<compile_context>
chip_gen: v5e
topology: v5e:2x2
jax: 0.10.0
libtpu: 0.0.40
codegen_flags: <defaults>
</compile_context>

<pallas_src>
import jax
import jax.numpy as jnp
import numpy as np
from jax import lax
from jax.experimental import pallas as pl
from jax.experimental.pallas import tpu as pltpu

# Shapes implied by the module: conv output reshaped to (1, 729) => H = W = 27.
N, C, H, W = 2, 4, 27, 27
K = 7
PAD = (K - 1) // 2
HP, WP = H + 2 * PAD, W + 2 * PAD          # 33, 33 (zero-padded spatial)
FLAT_IN = HP * WP                          # 1089  flattened padded spatial length
FEAT = H * W                               # 729
L_OUT = WP * (H - 1) + W                   # 885   stride-WP flat conv-output length
L_PAD = 896                                # 7*128 lane-aligned pad of L_OUT
HID = 512
NQ = 12
NGATES = 4                                 # i, f, g, o (PyTorch LSTMCell gate order)
XH = L_PAD + HID                           # 1408  combined [conv_out | h] row length


# ----------------------------------------------------------------------------- #
# Fused kernel.
#   grid = (NGATES,): step j computes gate block j's pre-activation; step 0 also runs
#   the conv path; step NGATES-1 runs the LSTM cell update + Q projection epilogue.
# ----------------------------------------------------------------------------- #
def spatial_gate_lstm_kernel(x_ref, cw_ref, h_ref, c_ref, w_ref, b_ref,
                             wq_ref, bq_ref,
                             q_ref, h_out_ref, c_out_ref,
                             xh_scr, gates_scr):
    # x_ref : (N, C, FLAT_IN) f32 VMEM   flattened zero-padded NCHW input
    # cw_ref: (2*K*K + 1,)    f32 SMEM   [conv_w * bn_scale (98), bn_shift]
    # h_ref : (1, HID)        f32 VMEM   previous hidden state
    # c_ref : (1, HID)        f32 VMEM   previous cell state
    # w_ref : (XH, HID)       bf16 VMEM  gate block j of stacked [w_ih_perm; w_hh]^T
    # b_ref : (1, HID)        f32 VMEM   gate block j of (b_ih + b_hh)
    # wq_ref: (HID, NQ) f32, bq_ref: (1, NQ) f32
    # q_ref : (1, NQ), h_out_ref/c_out_ref: (1, HID)  -- written in last-step epilogue
    # xh_scr: (1, XH) f32 VMEM scratch, gates_scr: (NGATES, HID) f32 VMEM scratch
    j = pl.program_id(0)

    # ---- step 0: channel pool + 7x7 conv (stride-WP flat) + BN + gate + batch sum ----
    # This whole block hides under the pipelined DMA of gate block 1's weights.
    @pl.when(j == 0)
    def _():
        # Channel pool with per-channel reads (keeps live vregs low).
        mx = x_ref[:, 0, :]
        sm = x_ref[:, 0, :]
        for c in range(1, C):
            xc = x_ref[:, c, :]
            mx = jnp.maximum(mx, xc)
            sm = sm + xc
        mn = sm * (1.0 / C)                                   # (N, FLAT_IN)

        # 7x7 conv as shifted MACs in the flat domain: output q = WP*h + w reads
        # input q + WP*kh + kw.  The unaligned lane slices are XLU work that rides
        # under the next weight-block DMA (conv path is not on the DMA roofline).
        acc = jnp.zeros((N, L_OUT), jnp.float32)
        for kh in range(K):
            base = WP * kh
            for kw in range(K):
                s = base + kw
                acc = acc + mx[:, s:s + L_OUT] * cw_ref[kh * K + kw]
                acc = acc + mn[:, s:s + L_OUT] * cw_ref[K * K + kh * K + kw]

        conv = acc + cw_ref[2 * K * K]            # BN scale folded into weights offline
        gated = conv * jax.nn.sigmoid(conv)       # x_out * sigmoid(x_out)
        lstm_in = jnp.sum(gated, axis=0, keepdims=True)       # (1, L_OUT), batch sum

        # Build the lane-dense combined row [lstm_in | 0 pad | h] (no reshape needed:
        # the w_ih rows were permuted offline to this stride-WP flat layout).
        xh_scr[...] = jnp.zeros((1, XH), jnp.float32)
        xh_scr[:, :L_OUT] = lstm_in
        xh_scr[:, L_PAD:] = h_ref[...]

    # ---- every step: one gate block's (1, XH) @ (XH, HID) MXU matmul (bf16 in, f32 acc)
    xh = xh_scr[...].astype(jnp.bfloat16)
    pre = jnp.dot(xh, w_ref[...], preferred_element_type=jnp.float32) + b_ref[...]
    gates_scr[pl.ds(j, 1), :] = pre

    # ---- last step: LSTM cell update + Q projection ----
    @pl.when(j == NGATES - 1)
    def _():
        i_g = jax.nn.sigmoid(gates_scr[0:1, :])
        f_g = jax.nn.sigmoid(gates_scr[1:2, :])
        g_g = jnp.tanh(gates_scr[2:3, :])
        o_g = jax.nn.sigmoid(gates_scr[3:4, :])
        c_new = f_g * c_ref[...] + i_g * g_g
        h_new = o_g * jnp.tanh(c_new)
        c_out_ref[...] = c_new
        h_out_ref[...] = h_new
        q_ref[...] = (jnp.dot(h_new, wq_ref[...], preferred_element_type=jnp.float32)
                      + bq_ref[...])


# ----------------------------------------------------------------------------- #
# One-time parameter preparation (outside the per-step hot path).
# ----------------------------------------------------------------------------- #
def prepare_params(p):
    # Fold eval-mode BN scale into the conv weights; keep the shift as the tail scalar.
    cw = jnp.concatenate([
        (p["conv_w"] * p["bn_scale"]).reshape(-1).astype(jnp.float32),
        jnp.reshape(p["bn_shift"], (1,)).astype(jnp.float32),
    ])                                                         # (2*K*K + 1,)

    # Permute w_ih rows from torch-flat index (W*h + w) to the kernel's stride-WP flat
    # index (WP*h + w); pad to L_PAD; stack with w_hh^T; store bf16 (halves HBM bytes).
    f = np.arange(FEAT)
    rows = (WP * (f // W) + (f % W)).astype(np.int32)
    w_x = jnp.zeros((L_PAD, 4 * HID), jnp.float32).at[rows].set(
        jnp.transpose(p["w_ih"]).astype(jnp.float32))
    w_comb = jnp.concatenate(
        [w_x, jnp.transpose(p["w_hh"]).astype(jnp.float32)], axis=0
    ).astype(jnp.bfloat16)                                     # (XH, 4*HID)

    b_comb = (p["b_ih"] + p["b_hh"]).reshape(1, -1).astype(jnp.float32)   # (1, 4*HID)
    return dict(
        conv_w=cw,
        w_comb=w_comb,
        b_comb=b_comb,
        w_q_t=jnp.transpose(p["w_q"]).astype(jnp.float32),     # (HID, NQ)
        b_q=p["b_q"].reshape(1, -1).astype(jnp.float32),       # (1, NQ)
    )


# ----------------------------------------------------------------------------- #
# Forward (single fused pallas_call).
# ----------------------------------------------------------------------------- #
@jax.jit
def spatial_gate_forward(x, hidden, prep):
    h0, c0 = hidden
    x_pad = jnp.pad(x, ((0, 0), (0, 0), (PAD, PAD), (PAD, PAD)))
    x_flat = x_pad.reshape(N, C, FLAT_IN)

    q, h, c = pl.pallas_call(
        spatial_gate_lstm_kernel,
        out_shape=(
            jax.ShapeDtypeStruct((1, NQ), jnp.float32),
            jax.ShapeDtypeStruct((1, HID), jnp.float32),
            jax.ShapeDtypeStruct((1, HID), jnp.float32),
        ),
        grid_spec=pltpu.PrefetchScalarGridSpec(
            num_scalar_prefetch=0,
            grid=(NGATES,),
            in_specs=[
                pl.BlockSpec((N, C, FLAT_IN), lambda j: (0, 0, 0)),          # x (resident)
                pl.BlockSpec(memory_space=pltpu.MemorySpace.SMEM),           # conv w + shift
                pl.BlockSpec((1, HID), lambda j: (0, 0)),                    # h0
                pl.BlockSpec((1, HID), lambda j: (0, 0)),                    # c0
                pl.BlockSpec((XH, HID), lambda j: (0, j)),                   # weight block j
                pl.BlockSpec((1, HID), lambda j: (0, j)),                    # bias block j
                pl.BlockSpec((HID, NQ), lambda j: (0, 0)),                   # w_q^T
                pl.BlockSpec((1, NQ), lambda j: (0, 0)),                     # b_q
            ],
            out_specs=(
                pl.BlockSpec((1, NQ), lambda j: (0, 0)),
                pl.BlockSpec((1, HID), lambda j: (0, 0)),
                pl.BlockSpec((1, HID), lambda j: (0, 0)),
            ),
            scratch_shapes=[
                pltpu.VMEM((1, XH), jnp.float32),          # combined [conv_out | h] row
                pltpu.VMEM((NGATES, HID), jnp.float32),    # staged gate pre-activations
            ],
        ),
        compiler_params=pltpu.CompilerParams(
            dimension_semantics=("arbitrary",),
            vmem_limit_bytes=32 * 1024 * 1024,
        ),
    )(x_flat, prep["conv_w"], h0, c0, prep["w_comb"], prep["b_comb"],
      prep["w_q_t"], prep["b_q"])
    return q, (h, c)


# ----------------------------------------------------------------------------- #
# Pure-JAX f32 reference (mirrors the PyTorch module) for validation.
# ----------------------------------------------------------------------------- #
def reference_forward(x, hidden, p):
    mx = jnp.max(x, axis=1, keepdims=True)
    mn = jnp.mean(x, axis=1, keepdims=True)
    pooled = jnp.concatenate([mx, mn], axis=1)
    conv = lax.conv_general_dilated(
        pooled, p["conv_w"], (1, 1), [(PAD, PAD), (PAD, PAD)],
        dimension_numbers=("NCHW", "OIHW", "NCHW"),
        precision=lax.Precision.HIGHEST)
    x_out = conv * p["bn_scale"] + p["bn_shift"]
    out = x_out * jax.nn.sigmoid(x_out)
    lstm_in = jnp.sum(out, axis=0).reshape(1, FEAT)
    gates = (jnp.dot(lstm_in, p["w_ih"].T, precision=lax.Precision.HIGHEST)
             + jnp.dot(hidden[0], p["w_hh"].T, precision=lax.Precision.HIGHEST)
             + p["b_ih"] + p["b_hh"])
    i_g = jax.nn.sigmoid(gates[:, 0 * HID:1 * HID])
    f_g = jax.nn.sigmoid(gates[:, 1 * HID:2 * HID])
    g_g = jnp.tanh(gates[:, 2 * HID:3 * HID])
    o_g = jax.nn.sigmoid(gates[:, 3 * HID:4 * HID])
    c = f_g * hidden[1] + i_g * g_g
    h = o_g * jnp.tanh(c)
    q = jnp.dot(h, p["w_q"].T, precision=lax.Precision.HIGHEST) + p["b_q"]
    return q, (h, c)


if __name__ == "__main__":
    key = jax.random.PRNGKey(0)
    ks = jax.random.split(key, 10)

    x = jax.random.normal(ks[0], (N, C, H, W), jnp.float32)
    h0 = jax.random.normal(ks[1], (1, HID), jnp.float32) * 0.1
    c0 = jax.random.normal(ks[2], (1, HID), jnp.float32) * 0.1

    # Deterministic synthetic parameters (shapes from the module's __init__).
    # BatchNorm uses eval-mode running stats at default init: mean=0, var=1, gamma=1, beta=0.
    # TODO(synk): PyTorch default training-mode BN (batch statistics) not reproduced here.
    params = dict(
        conv_w=jax.random.normal(ks[3], (1, 2, K, K), jnp.float32) * 0.1,    # Conv2d(2,1,7)
        bn_scale=jnp.float32(1.0 / np.sqrt(1.0 + 1e-5)),
        bn_shift=jnp.float32(0.0),
        w_ih=jax.random.normal(ks[4], (4 * HID, FEAT), jnp.float32) * 0.02,  # LSTMCell
        w_hh=jax.random.normal(ks[5], (4 * HID, HID), jnp.float32) * 0.02,
        b_ih=jax.random.normal(ks[6], (4 * HID,), jnp.float32) * 0.02,
        b_hh=jax.random.normal(ks[7], (4 * HID,), jnp.float32) * 0.02,
        w_q=jax.random.normal(ks[8], (NQ, HID), jnp.float32) * 0.05,         # Linear(512,12)
        b_q=jax.random.normal(ks[9], (NQ,), jnp.float32) * 0.05,
    )

    prep = prepare_params(params)            # one-time: transpose/stack/permute + bf16

    q, (h, c) = spatial_gate_forward(x, (h0, c0), prep)
    jax.block_until_ready((q, h, c))

    q_ref, (h_ref, c_ref) = reference_forward(x, (h0, c0), params)
    # Tolerance reflects bf16 storage of the LSTM weight matrix (f32 MXU accumulation);
    # with f32 weights the same kernel matches the reference at 2e-3.
    np.testing.assert_allclose(np.asarray(q), np.asarray(q_ref), rtol=5e-3, atol=5e-3)
    np.testing.assert_allclose(np.asarray(h), np.asarray(h_ref), rtol=5e-3, atol=5e-3)
    np.testing.assert_allclose(np.asarray(c), np.asarray(c_ref), rtol=5e-3, atol=5e-3)

    print("KERNEL_OK")
</pallas_src>

<mosaic_0001>
module attributes {stable_mosaic.version = 11 : i64} {
  func.func @spatial_gate_lstm_kernel(%arg0: i32, %arg1: memref<2x4x1089xf32, #tpu.memory_space<vmem>>, %arg2: memref<99xf32, #tpu.memory_space<smem>>, %arg3: memref<1x512xf32, #tpu.memory_space<vmem>>, %arg4: memref<1x512xf32, #tpu.memory_space<vmem>>, %arg5: memref<1408x512xbf16, #tpu.memory_space<vmem>>, %arg6: memref<1x512xf32, #tpu.memory_space<vmem>>, %arg7: memref<512x12xf32, #tpu.memory_space<vmem>>, %arg8: memref<1x12xf32, #tpu.memory_space<vmem>>, %arg9: memref<1x12xf32, #tpu.memory_space<vmem>>, %arg10: memref<1x512xf32, #tpu.memory_space<vmem>>, %arg11: memref<1x512xf32, #tpu.memory_space<vmem>>, %arg12: memref<1x1408xf32, #tpu.memory_space<vmem>>, %arg13: memref<4x512xf32, #tpu.memory_space<vmem>>) attributes {dimension_semantics = [#tpu.dimension_semantics<arbitrary>], iteration_bounds = array<i64: 4>, scalar_prefetch = 0 : i64, scratch_operands = 2 : i64, tpu.core_type = #tpu.core_type<tc>, window_params = [{pipeline_mode = #tpu.pipeline_mode<synchronous>, transform_indices = @transform_0, window_bounds = array<i64: 2, 4, 1089>}, {transform_indices = @transform_1, window_bounds = array<i64: 99>}, {pipeline_mode = #tpu.pipeline_mode<synchronous>, transform_indices = @transform_2, window_bounds = array<i64: 1, 512>}, {pipeline_mode = #tpu.pipeline_mode<synchronous>, transform_indices = @transform_3, window_bounds = array<i64: 1, 512>}, {transform_indices = @transform_4, window_bounds = array<i64: 1408, 512>}, {transform_indices = @transform_5, window_bounds = array<i64: 1, 512>}, {pipeline_mode = #tpu.pipeline_mode<synchronous>, transform_indices = @transform_6, window_bounds = array<i64: 512, 12>}, {pipeline_mode = #tpu.pipeline_mode<synchronous>, transform_indices = @transform_7, window_bounds = array<i64: 1, 12>}, {pipeline_mode = #tpu.pipeline_mode<synchronous>, transform_indices = @transform_8, window_bounds = array<i64: 1, 12>}, {pipeline_mode = #tpu.pipeline_mode<synchronous>, transform_indices = @transform_9, window_bounds = array<i64: 1, 512>}, {pipeline_mode = #tpu.pipeline_mode<synchronous>, transform_indices = @transform_10, window_bounds = array<i64: 1, 512>}]} {
    %c0_i32 = arith.constant 0 : i32
    %0 = arith.cmpi eq, %arg0, %c0_i32 : i32
    %1 = arith.extui %0 : i1 to i32
    %c0_i32_0 = arith.constant 0 : i32
    %2 = arith.cmpi ne, %1, %c0_i32_0 : i32
    scf.if %2 {
      %c0_8 = arith.constant 0 : index
      %c0_9 = arith.constant 0 : index
      %c0_10 = arith.constant 0 : index
      %14 = vector.load %arg1[%c0_8, %c0_9, %c0_10] : memref<2x4x1089xf32, #tpu.memory_space<vmem>>, vector<2x1x1089xf32>
      %15 = vector.shape_cast %14 : vector<2x1x1089xf32> to vector<2x1089xf32>
      %c0_11 = arith.constant 0 : index
      %c0_12 = arith.constant 0 : index
      %c0_13 = arith.constant 0 : index
      %16 = vector.load %arg1[%c0_11, %c0_12, %c0_13] : memref<2x4x1089xf32, #tpu.memory_space<vmem>>, vector<2x1x1089xf32>
      %17 = vector.shape_cast %16 : vector<2x1x1089xf32> to vector<2x1089xf32>
      %c0_14 = arith.constant 0 : index
      %c1 = arith.constant 1 : index
      %c0_15 = arith.constant 0 : index
      %18 = vector.load %arg1[%c0_14, %c1, %c0_15] : memref<2x4x1089xf32, #tpu.memory_space<vmem>>, vector<2x1x1089xf32>
      %19 = vector.shape_cast %18 : vector<2x1x1089xf32> to vector<2x1089xf32>
      %20 = arith.maximumf %15, %19 : vector<2x1089xf32>
      %21 = arith.addf %17, %19 : vector<2x1089xf32>
      %c0_16 = arith.constant 0 : index
      %c2 = arith.constant 2 : index
      %c0_17 = arith.constant 0 : index
      %22 = vector.load %arg1[%c0_16, %c2, %c0_17] : memref<2x4x1089xf32, #tpu.memory_space<vmem>>, vector<2x1x1089xf32>
      %23 = vector.shape_cast %22 : vector<2x1x1089xf32> to vector<2x1089xf32>
      %24 = arith.maximumf %20, %23 : vector<2x1089xf32>
      %25 = arith.addf %21, %23 : vector<2x1089xf32>
      %c0_18 = arith.constant 0 : index
      %c3 = arith.constant 3 : index
      %c0_19 = arith.constant 0 : index
      %26 = vector.load %arg1[%c0_18, %c3, %c0_19] : memref<2x4x1089xf32, #tpu.memory_space<vmem>>, vector<2x1x1089xf32>
      %27 = vector.shape_cast %26 : vector<2x1x1089xf32> to vector<2x1089xf32>
      %28 = arith.maximumf %24, %27 : vector<2x1089xf32>
      %29 = arith.addf %25, %27 : vector<2x1089xf32>
      %cst_20 = arith.constant 2.500000e-01 : f32
      %30 = vector.broadcast %cst_20 : f32 to vector<2x1089xf32>
      %31 = arith.mulf %29, %30 : vector<2x1089xf32>
      %cst_21 = arith.constant 0.000000e+00 : f32
      %32 = vector.broadcast %cst_21 : f32 to vector<2x885xf32>
      %33 = vector.extract_strided_slice %28 {offsets = [0, 0], sizes = [2, 885], strides = [1, 1]} : vector<2x1089xf32> to vector<2x885xf32>
      %c0_22 = arith.constant 0 : index
      %34 = memref.load %arg2[%c0_22] : memref<99xf32, #tpu.memory_space<smem>>
      %35 = vector.broadcast %34 : f32 to vector<2x885xf32>
      %36 = arith.mulf %33, %35 : vector<2x885xf32>
      %37 = arith.addf %32, %36 : vector<2x885xf32>
      %38 = vector.extract_strided_slice %31 {offsets = [0, 0], sizes = [2, 885], strides = [1, 1]} : vector<2x1089xf32> to vector<2x885xf32>
      %c49 = arith.constant 49 : index
      %39 = memref.load %arg2[%c49] : memref<99xf32, #tpu.memory_space<smem>>
      %40 = vector.broadcast %39 : f32 to vector<2x885xf32>
      %41 = arith.mulf %38, %40 : vector<2x885xf32>
      %42 = arith.addf %37, %41 : vector<2x885xf32>
      %43 = vector.extract_strided_slice %28 {offsets = [0, 1], sizes = [2, 885], strides = [1, 1]} : vector<2x1089xf32> to vector<2x885xf32>
      %c1_23 = arith.constant 1 : index
      %44 = memref.load %arg2[%c1_23] : memref<99xf32, #tpu.memory_space<smem>>
      %45 = vector.broadcast %44 : f32 to vector<2x885xf32>
      %46 = arith.mulf %43, %45 : vector<2x885xf32>
      %47 = arith.addf %42, %46 : vector<2x885xf32>
      %48 = vector.extract_strided_slice %31 {offsets = [0, 1], sizes = [2, 885], strides = [1, 1]} : vector<2x1089xf32> to vector<2x885xf32>
      %c50 = arith.constant 50 : index
      %49 = memref.load %arg2[%c50] : memref<99xf32, #tpu.memory_space<smem>>
      %50 = vector.broadcast %49 : f32 to vector<2x885xf32>
      %51 = arith.mulf %48, %50 : vector<2x885xf32>
      %52 = arith.addf %47, %51 : vector<2x885xf32>
      %53 = vector.extract_strided_slice %28 {offsets = [0, 2], sizes = [2, 885], strides = [1, 1]} : vector<2x1089xf32> to vector<2x885xf32>
      %c2_24 = arith.constant 2 : index
      %54 = memref.load %arg2[%c2_24] : memref<99xf32, #tpu.memory_space<smem>>
      %55 = vector.broadcast %54 : f32 to vector<2x885xf32>
      %56 = arith.mulf %53, %55 : vector<2x885xf32>
      %57 = arith.addf %52, %56 : vector<2x885xf32>
      %58 = vector.extract_strided_slice %31 {offsets = [0, 2], sizes = [2, 885], strides = [1, 1]} : vector<2x1089xf32> to vector<2x885xf32>
      %c51 = arith.constant 51 : index
      %59 = memref.load %arg2[%c51] : memref<99xf32, #tpu.memory_space<smem>>
      %60 = vector.broadcast %59 : f32 to vector<2x885xf32>
      %61 = arith.mulf %58, %60 : vector<2x885xf32>
      %62 = arith.addf %57, %61 : vector<2x885xf32>
      %63 = vector.extract_strided_slice %28 {offsets = [0, 3], sizes = [2, 885], strides = [1, 1]} : vector<2x1089xf32> to vector<2x885xf32>
      %c3_25 = arith.constant 3 : index
      %64 = memref.load %arg2[%c3_25] : memref<99xf32, #tpu.memory_space<smem>>
      %65 = vector.broadcast %64 : f32 to vector<2x885xf32>
      %66 = arith.mulf %63, %65 : vector<2x885xf32>
      %67 = arith.addf %62, %66 : vector<2x885xf32>
      %68 = vector.extract_strided_slice %31 {offsets = [0, 3], sizes = [2, 885], strides = [1, 1]} : vector<2x1089xf32> to vector<2x885xf32>
      %c52 = arith.constant 52 : index
      %69 = memref.load %arg2[%c52] : memref<99xf32, #tpu.memory_space<smem>>
      %70 = vector.broadcast %69 : f32 to vector<2x885xf32>
      %71 = arith.mulf %68, %70 : vector<2x885xf32>
      %72 = arith.addf %67, %71 : vector<2x885xf32>
      %73 = vector.extract_strided_slice %28 {offsets = [0, 4], sizes = [2, 885], strides = [1, 1]} : vector<2x1089xf32> to vector<2x885xf32>
      %c4 = arith.constant 4 : index
      %74 = memref.load %arg2[%c4] : memref<99xf32, #tpu.memory_space<smem>>
      %75 = vector.broadcast %74 : f32 to vector<2x885xf32>
      %76 = arith.mulf %73, %75 : vector<2x885xf32>
      %77 = arith.addf %72, %76 : vector<2x885xf32>
      %78 = vector.extract_strided_slice %31 {offsets = [0, 4], sizes = [2, 885], strides = [1, 1]} : vector<2x1089xf32> to vector<2x885xf32>
      %c53 = arith.constant 53 : index
      %79 = memref.load %arg2[%c53] : memref<99xf32, #tpu.memory_space<smem>>
      %80 = vector.broadcast %79 : f32 to vector<2x885xf32>
      %81 = arith.mulf %78, %80 : vector<2x885xf32>
      %82 = arith.addf %77, %81 : vector<2x885xf32>
      %83 = vector.extract_strided_slice %28 {offsets = [0, 5], sizes = [2, 885], strides = [1, 1]} : vector<2x1089xf32> to vector<2x885xf32>
      %c5 = arith.constant 5 : index
      %84 = memref.load %arg2[%c5] : memref<99xf32, #tpu.memory_space<smem>>
      %85 = vector.broadcast %84 : f32 to vector<2x885xf32>
      %86 = arith.mulf %83, %85 : vector<2x885xf32>
      %87 = arith.addf %82, %86 : vector<2x885xf32>
      %88 = vector.extract_strided_slice %31 {offsets = [0, 5], sizes = [2, 885], strides = [1, 1]} : vector<2x1089xf32> to vector<2x885xf32>
      %c54 = arith.constant 54 : index
      %89 = memref.load %arg2[%c54] : memref<99xf32, #tpu.memory_space<smem>>
      %90 = vector.broadcast %89 : f32 to vector<2x885xf32>
      %91 = arith.mulf %88, %90 : vector<2x885xf32>
      %92 = arith.addf %87, %91 : vector<2x885xf32>
      %93 = vector.extract_strided_slice %28 {offsets = [0, 6], sizes = [2, 885], strides = [1, 1]} : vector<2x1089xf32> to vector<2x885xf32>
      %c6 = arith.constant 6 : index
      %94 = memref.load %arg2[%c6] : memref<99xf32, #tpu.memory_space<smem>>
      %95 = vector.broadcast %94 : f32 to vector<2x885xf32>
      %96 = arith.mulf %93, %95 : vector<2x885xf32>
      %97 = arith.addf %92, %96 : vector<2x885xf32>
      %98 = vector.extract_strided_slice %31 {offsets = [0, 6], sizes = [2, 885], strides = [1, 1]} : vector<2x1089xf32> to vector<2x885xf32>
      %c55 = arith.constant 55 : index
      %99 = memref.load %arg2[%c55] : memref<99xf32, #tpu.memory_space<smem>>
      %100 = vector.broadcast %99 : f32 to vector<2x885xf32>
      %101 = arith.mulf %98, %100 : vector<2x885xf32>
      %102 = arith.addf %97, %101 : vector<2x885xf32>
      %103 = vector.extract_strided_slice %28 {offsets = [0, 33], sizes = [2, 885], strides = [1, 1]} : vector<2x1089xf32> to vector<2x885xf32>
      %c7 = arith.constant 7 : index
      %104 = memref.load %arg2[%c7] : memref<99xf32, #tpu.memory_space<smem>>
      %105 = vector.broadcast %104 : f32 to vector<2x885xf32>
      %106 = arith.mulf %103, %105 : vector<2x885xf32>
      %107 = arith.addf %102, %106 : vector<2x885xf32>
      %108 = vector.extract_strided_slice %31 {offsets = [0, 33], sizes = [2, 885], strides = [1, 1]} : vector<2x1089xf32> to vector<2x885xf32>
      %c56 = arith.constant 56 : index
      %109 = memref.load %arg2[%c56] : memref<99xf32, #tpu.memory_space<smem>>
      %110 = vector.broadcast %109 : f32 to vector<2x885xf32>
      %111 = arith.mulf %108, %110 : vector<2x885xf32>
      %112 = arith.addf %107, %111 : vector<2x885xf32>
      %113 = vector.extract_strided_slice %28 {offsets = [0, 34], sizes = [2, 885], strides = [1, 1]} : vector<2x1089xf32> to vector<2x885xf32>
      %c8 = arith.constant 8 : index
      %114 = memref.load %arg2[%c8] : memref<99xf32, #tpu.memory_space<smem>>
      %115 = vector.broadcast %114 : f32 to vector<2x885xf32>
      %116 = arith.mulf %113, %115 : vector<2x885xf32>
      %117 = arith.addf %112, %116 : vector<2x885xf32>
      %118 = vector.extract_strided_slice %31 {offsets = [0, 34], sizes = [2, 885], strides = [1, 1]} : vector<2x1089xf32> to vector<2x885xf32>
      %c57 = arith.constant 57 : index
      %119 = memref.load %arg2[%c57] : memref<99xf32, #tpu.memory_space<smem>>
      %120 = vector.broadcast %119 : f32 to vector<2x885xf32>
      %121 = arith.mulf %118, %120 : vector<2x885xf32>
      %122 = arith.addf %117, %121 : vector<2x885xf32>
      %123 = vector.extract_strided_slice %28 {offsets = [0, 35], sizes = [2, 885], strides = [1, 1]} : vector<2x1089xf32> to vector<2x885xf32>
      %c9 = arith.constant 9 : index
      %124 = memref.load %arg2[%c9] : memref<99xf32, #tpu.memory_space<smem>>
      %125 = vector.broadcast %124 : f32 to vector<2x885xf32>
      %126 = arith.mulf %123, %125 : vector<2x885xf32>
      %127 = arith.addf %122, %126 : vector<2x885xf32>
      %128 = vector.extract_strided_slice %31 {offsets = [0, 35], sizes = [2, 885], strides = [1, 1]} : vector<2x1089xf32> to vector<2x885xf32>
      %c58 = arith.constant 58 : index
      %129 = memref.load %arg2[%c58] : memref<99xf32, #tpu.memory_space<smem>>
      %130 = vector.broadcast %129 : f32 to vector<2x885xf32>
      %131 = arith.mulf %128, %130 : vector<2x885xf32>
      %132 = arith.addf %127, %131 : vector<2x885xf32>
      %133 = vector.extract_strided_slice %28 {offsets = [0, 36], sizes = [2, 885], strides = [1, 1]} : vector<2x1089xf32> to vector<2x885xf32>
      %c10 = arith.constant 10 : index
      %134 = memref.load %arg2[%c10] : memref<99xf32, #tpu.memory_space<smem>>
      %135 = vector.broadcast %134 : f32 to vector<2x885xf32>
      %136 = arith.mulf %133, %135 : vector<2x885xf32>
      %137 = arith.addf %132, %136 : vector<2x885xf32>
      %138 = vector.extract_strided_slice %31 {offsets = [0, 36], sizes = [2, 885], strides = [1, 1]} : vector<2x1089xf32> to vector<2x885xf32>
      %c59 = arith.constant 59 : index
      %139 = memref.load %arg2[%c59] : memref<99xf32, #tpu.memory_space<smem>>
      %140 = vector.broadcast %139 : f32 to vector<2x885xf32>
      %141 = arith.mulf %138, %140 : vector<2x885xf32>
      %142 = arith.addf %137, %141 : vector<2x885xf32>
      %143 = vector.extract_strided_slice %28 {offsets = [0, 37], sizes = [2, 885], strides = [1, 1]} : vector<2x1089xf32> to vector<2x885xf32>
      %c11 = arith.constant 11 : index
      %144 = memref.load %arg2[%c11] : memref<99xf32, #tpu.memory_space<smem>>
      %145 = vector.broadcast %144 : f32 to vector<2x885xf32>
      %146 = arith.mulf %143, %145 : vector<2x885xf32>
      %147 = arith.addf %142, %146 : vector<2x885xf32>
      %148 = vector.extract_strided_slice %31 {offsets = [0, 37], sizes = [2, 885], strides = [1, 1]} : vector<2x1089xf32> to vector<2x885xf32>
      %c60 = arith.constant 60 : index
      %149 = memref.load %arg2[%c60] : memref<99xf32, #tpu.memory_space<smem>>
      %150 = vector.broadcast %149 : f32 to vector<2x885xf32>
      %151 = arith.mulf %148, %150 : vector<2x885xf32>
      %152 = arith.addf %147, %151 : vector<2x885xf32>
      %153 = vector.extract_strided_slice %28 {offsets = [0, 38], sizes = [2, 885], strides = [1, 1]} : vector<2x1089xf32> to vector<2x885xf32>
      %c12 = arith.constant 12 : index
      %154 = memref.load %arg2[%c12] : memref<99xf32, #tpu.memory_space<smem>>
      %155 = vector.broadcast %154 : f32 to vector<2x885xf32>
      %156 = arith.mulf %153, %155 : vector<2x885xf32>
      %157 = arith.addf %152, %156 : vector<2x885xf32>
      %158 = vector.extract_strided_slice %31 {offsets = [0, 38], sizes = [2, 885], strides = [1, 1]} : vector<2x1089xf32> to vector<2x885xf32>
      %c61 = arith.constant 61 : index
      %159 = memref.load %arg2[%c61] : memref<99xf32, #tpu.memory_space<smem>>
      %160 = vector.broadcast %159 : f32 to vector<2x885xf32>
      %161 = arith.mulf %158, %160 : vector<2x885xf32>
      %162 = arith.addf %157, %161 : vector<2x885xf32>
      %163 = vector.extract_strided_slice %28 {offsets = [0, 39], sizes = [2, 885], strides = [1, 1]} : vector<2x1089xf32> to vector<2x885xf32>
      %c13 = arith.constant 13 : index
      %164 = memref.load %arg2[%c13] : memref<99xf32, #tpu.memory_space<smem>>
      %165 = vector.broadcast %164 : f32 to vector<2x885xf32>
      %166 = arith.mulf %163, %165 : vector<2x885xf32>
      %167 = arith.addf %162, %166 : vector<2x885xf32>
      %168 = vector.extract_strided_slice %31 {offsets = [0, 39], sizes = [2, 885], strides = [1, 1]} : vector<2x1089xf32> to vector<2x885xf32>
      %c62 = arith.constant 62 : index
      %169 = memref.load %arg2[%c62] : memref<99xf32, #tpu.memory_space<smem>>
      %170 = vector.broadcast %169 : f32 to vector<2x885xf32>
      %171 = arith.mulf %168, %170 : vector<2x885xf32>
      %172 = arith.addf %167, %171 : vector<2x885xf32>
      %173 = vector.extract_strided_slice %28 {offsets = [0, 66], sizes = [2, 885], strides = [1, 1]} : vector<2x1089xf32> to vector<2x885xf32>
      %c14 = arith.constant 14 : index
      %174 = memref.load %arg2[%c14] : memref<99xf32, #tpu.memory_space<smem>>
      %175 = vector.broadcast %174 : f32 to vector<2x885xf32>
      %176 = arith.mulf %173, %175 : vector<2x885xf32>
      %177 = arith.addf %172, %176 : vector<2x885xf32>
      %178 = vector.extract_strided_slice %31 {offsets = [0, 66], sizes = [2, 885], strides = [1, 1]} : vector<2x1089xf32> to vector<2x885xf32>
      %c63 = arith.constant 63 : index
      %179 = memref.load %arg2[%c63] : memref<99xf32, #tpu.memory_space<smem>>
      %180 = vector.broadcast %179 : f32 to vector<2x885xf32>
      %181 = arith.mulf %178, %180 : vector<2x885xf32>
      %182 = arith.addf %177, %181 : vector<2x885xf32>
      %183 = vector.extract_strided_slice %28 {offsets = [0, 67], sizes = [2, 885], strides = [1, 1]} : vector<2x1089xf32> to vector<2x885xf32>
      %c15 = arith.constant 15 : index
      %184 = memref.load %arg2[%c15] : memref<99xf32, #tpu.memory_space<smem>>
      %185 = vector.broadcast %184 : f32 to vector<2x885xf32>
      %186 = arith.mulf %183, %185 : vector<2x885xf32>
      %187 = arith.addf %182, %186 : vector<2x885xf32>
      %188 = vector.extract_strided_slice %31 {offsets = [0, 67], sizes = [2, 885], strides = [1, 1]} : vector<2x1089xf32> to vector<2x885xf32>
      %c64 = arith.constant 64 : index
      %189 = memref.load %arg2[%c64] : memref<99xf32, #tpu.memory_space<smem>>
      %190 = vector.broadcast %189 : f32 to vector<2x885xf32>
      %191 = arith.mulf %188, %190 : vector<2x885xf32>
      %192 = arith.addf %187, %191 : vector<2x885xf32>
      %193 = vector.extract_strided_slice %28 {offsets = [0, 68], sizes = [2, 885], strides = [1, 1]} : vector<2x1089xf32> to vector<2x885xf32>
      %c16 = arith.constant 16 : index
      %194 = memref.load %arg2[%c16] : memref<99xf32, #tpu.memory_space<smem>>
      %195 = vector.broadcast %194 : f32 to vector<2x885xf32>
      %196 = arith.mulf %193, %195 : vector<2x885xf32>
      %197 = arith.addf %192, %196 : vector<2x885xf32>
      %198 = vector.extract_strided_slice %31 {offsets = [0, 68], sizes = [2, 885], strides = [1, 1]} : vector<2x1089xf32> to vector<2x885xf32>
      %c65 = arith.constant 65 : index
      %199 = memref.load %arg2[%c65] : memref<99xf32, #tpu.memory_space<smem>>
      %200 = vector.broadcast %199 : f32 to vector<2x885xf32>
      %201 = arith.mulf %198, %200 : vector<2x885xf32>
      %202 = arith.addf %197, %201 : vector<2x885xf32>
      %203 = vector.extract_strided_slice %28 {offsets = [0, 69], sizes = [2, 885], strides = [1, 1]} : vector<2x1089xf32> to vector<2x885xf32>
      %c17 = arith.constant 17 : index
      %204 = memref.load %arg2[%c17] : memref<99xf32, #tpu.memory_space<smem>>
      %205 = vector.broadcast %204 : f32 to vector<2x885xf32>
      %206 = arith.mulf %203, %205 : vector<2x885xf32>
      %207 = arith.addf %202, %206 : vector<2x885xf32>
      %208 = vector.extract_strided_slice %31 {offsets = [0, 69], sizes = [2, 885], strides = [1, 1]} : vector<2x1089xf32> to vector<2x885xf32>
      %c66 = arith.constant 66 : index
      %209 = memref.load %arg2[%c66] : memref<99xf32, #tpu.memory_space<smem>>
      %210 = vector.broadcast %209 : f32 to vector<2x885xf32>
      %211 = arith.mulf %208, %210 : vector<2x885xf32>
      %212 = arith.addf %207, %211 : vector<2x885xf32>
      %213 = vector.extract_strided_slice %28 {offsets = [0, 70], sizes = [2, 885], strides = [1, 1]} : vector<2x1089xf32> to vector<2x885xf32>
      %c18 = arith.constant 18 : index
      %214 = memref.load %arg2[%c18] : memref<99xf32, #tpu.memory_space<smem>>
      %215 = vector.broadcast %214 : f32 to vector<2x885xf32>
      %216 = arith.mulf %213, %215 : vector<2x885xf32>
      %217 = arith.addf %212, %216 : vector<2x885xf32>
      %218 = vector.extract_strided_slice %31 {offsets = [0, 70], sizes = [2, 885], strides = [1, 1]} : vector<2x1089xf32> to vector<2x885xf32>
      %c67 = arith.constant 67 : index
      %219 = memref.load %arg2[%c67] : memref<99xf32, #tpu.memory_space<smem>>
      %220 = vector.broadcast %219 : f32 to vector<2x885xf32>
      %221 = arith.mulf %218, %220 : vector<2x885xf32>
      %222 = arith.addf %217, %221 : vector<2x885xf32>
      %223 = vector.extract_strided_slice %28 {offsets = [0, 71], sizes = [2, 885], strides = [1, 1]} : vector<2x1089xf32> to vector<2x885xf32>
      %c19 = arith.constant 19 : index
      %224 = memref.load %arg2[%c19] : memref<99xf32, #tpu.memory_space<smem>>
      %225 = vector.broadcast %224 : f32 to vector<2x885xf32>
      %226 = arith.mulf %223, %225 : vector<2x885xf32>
      %227 = arith.addf %222, %226 : vector<2x885xf32>
      %228 = vector.extract_strided_slice %31 {offsets = [0, 71], sizes = [2, 885], strides = [1, 1]} : vector<2x1089xf32> to vector<2x885xf32>
      %c68 = arith.constant 68 : index
      %229 = memref.load %arg2[%c68] : memref<99xf32, #tpu.memory_space<smem>>
      %230 = vector.broadcast %229 : f32 to vector<2x885xf32>
      %231 = arith.mulf %228, %230 : vector<2x885xf32>
      %232 = arith.addf %227, %231 : vector<2x885xf32>
      %233 = vector.extract_strided_slice %28 {offsets = [0, 72], sizes = [2, 885], strides = [1, 1]} : vector<2x1089xf32> to vector<2x885xf32>
      %c20 = arith.constant 20 : index
      %234 = memref.load %arg2[%c20] : memref<99xf32, #tpu.memory_space<smem>>
      %235 = vector.broadcast %234 : f32 to vector<2x885xf32>
      %236 = arith.mulf %233, %235 : vector<2x885xf32>
      %237 = arith.addf %232, %236 : vector<2x885xf32>
      %238 = vector.extract_strided_slice %31 {offsets = [0, 72], sizes = [2, 885], strides = [1, 1]} : vector<2x1089xf32> to vector<2x885xf32>
      %c69 = arith.constant 69 : index
      %239 = memref.load %arg2[%c69] : memref<99xf32, #tpu.memory_space<smem>>
      %240 = vector.broadcast %239 : f32 to vector<2x885xf32>
      %241 = arith.mulf %238, %240 : vector<2x885xf32>
      %242 = arith.addf %237, %241 : vector<2x885xf32>
      %243 = vector.extract_strided_slice %28 {offsets = [0, 99], sizes = [2, 885], strides = [1, 1]} : vector<2x1089xf32> to vector<2x885xf32>
      %c21 = arith.constant 21 : index
      %244 = memref.load %arg2[%c21] : memref<99xf32, #tpu.memory_space<smem>>
      %245 = vector.broadcast %244 : f32 to vector<2x885xf32>
      %246 = arith.mulf %243, %245 : vector<2x885xf32>
      %247 = arith.addf %242, %246 : vector<2x885xf32>
      %248 = vector.extract_strided_slice %31 {offsets = [0, 99], sizes = [2, 885], strides = [1, 1]} : vector<2x1089xf32> to vector<2x885xf32>
      %c70 = arith.constant 70 : index
      %249 = memref.load %arg2[%c70] : memref<99xf32, #tpu.memory_space<smem>>
      %250 = vector.broadcast %249 : f32 to vector<2x885xf32>
      %251 = arith.mulf %248, %250 : vector<2x885xf32>
      %252 = arith.addf %247, %251 : vector<2x885xf32>
      %253 = vector.extract_strided_slice %28 {offsets = [0, 100], sizes = [2, 885], strides = [1, 1]} : vector<2x1089xf32> to vector<2x885xf32>
      %c22 = arith.constant 22 : index
      %254 = memref.load %arg2[%c22] : memref<99xf32, #tpu.memory_space<smem>>
      %255 = vector.broadcast %254 : f32 to vector<2x885xf32>
      %256 = arith.mulf %253, %255 : vector<2x885xf32>
      %257 = arith.addf %252, %256 : vector<2x885xf32>
      %258 = vector.extract_strided_slice %31 {offsets = [0, 100], sizes = [2, 885], strides = [1, 1]} : vector<2x1089xf32> to vector<2x885xf32>
      %c71 = arith.constant 71 : index
      %259 = memref.load %arg2[%c71] : memref<99xf32, #tpu.memory_space<smem>>
      %260 = vector.broadcast %259 : f32 to vector<2x885xf32>
      %261 = arith.mulf %258, %260 : vector<2x885xf32>
      %262 = arith.addf %257, %261 : vector<2x885xf32>
      %263 = vector.extract_strided_slice %28 {offsets = [0, 101], sizes = [2, 885], strides = [1, 1]} : vector<2x1089xf32> to vector<2x885xf32>
      %c23 = arith.constant 23 : index
      %264 = memref.load %arg2[%c23] : memref<99xf32, #tpu.memory_space<smem>>
      %265 = vector.broadcast %264 : f32 to vector<2x885xf32>
      %266 = arith.mulf %263, %265 : vector<2x885xf32>
      %267 = arith.addf %262, %266 : vector<2x885xf32>
      %268 = vector.extract_strided_slice %31 {offsets = [0, 101], sizes = [2, 885], strides = [1, 1]} : vector<2x1089xf32> to vector<2x885xf32>
      %c72 = arith.constant 72 : index
      %269 = memref.load %arg2[%c72] : memref<99xf32, #tpu.memory_space<smem>>
      %270 = vector.broadcast %269 : f32 to vector<2x885xf32>
      %271 = arith.mulf %268, %270 : vector<2x885xf32>
      %272 = arith.addf %267, %271 : vector<2x885xf32>
      %273 = vector.extract_strided_slice %28 {offsets = [0, 102], sizes = [2, 885], strides = [1, 1]} : vector<2x1089xf32> to vector<2x885xf32>
      %c24 = arith.constant 24 : index
      %274 = memref.load %arg2[%c24] : memref<99xf32, #tpu.memory_space<smem>>
      %275 = vector.broadcast %274 : f32 to vector<2x885xf32>
      %276 = arith.mulf %273, %275 : vector<2x885xf32>
      %277 = arith.addf %272, %276 : vector<2x885xf32>
      %278 = vector.extract_strided_slice %31 {offsets = [0, 102], sizes = [2, 885], strides = [1, 1]} : vector<2x1089xf32> to vector<2x885xf32>
      %c73 = arith.constant 73 : index
      %279 = memref.load %arg2[%c73] : memref<99xf32, #tpu.memory_space<smem>>
      %280 = vector.broadcast %279 : f32 to vector<2x885xf32>
      %281 = arith.mulf %278, %280 : vector<2x885xf32>
      %282 = arith.addf %277, %281 : vector<2x885xf32>
      %283 = vector.extract_strided_slice %28 {offsets = [0, 103], sizes = [2, 885], strides = [1, 1]} : vector<2x1089xf32> to vector<2x885xf32>
      %c25 = arith.constant 25 : index
      %284 = memref.load %arg2[%c25] : memref<99xf32, #tpu.memory_space<smem>>
      %285 = vector.broadcast %284 : f32 to vector<2x885xf32>
      %286 = arith.mulf %283, %285 : vector<2x885xf32>
      %287 = arith.addf %282, %286 : vector<2x885xf32>
      %288 = vector.extract_strided_slice %31 {offsets = [0, 103], sizes = [2, 885], strides = [1, 1]} : vector<2x1089xf32> to vector<2x885xf32>
      %c74 = arith.constant 74 : index
      %289 = memref.load %arg2[%c74] : memref<99xf32, #tpu.memory_space<smem>>
      %290 = vector.broadcast %289 : f32 to vector<2x885xf32>
      %291 = arith.mulf %288, %290 : vector<2x885xf32>
      %292 = arith.addf %287, %291 : vector<2x885xf32>
      %293 = vector.extract_strided_slice %28 {offsets = [0, 104], sizes = [2, 885], strides = [1, 1]} : vector<2x1089xf32> to vector<2x885xf32>
      %c26 = arith.constant 26 : index
      %294 = memref.load %arg2[%c26] : memref<99xf32, #tpu.memory_space<smem>>
      %295 = vector.broadcast %294 : f32 to vector<2x885xf32>
      %296 = arith.mulf %293, %295 : vector<2x885xf32>
      %297 = arith.addf %292, %296 : vector<2x885xf32>
      %298 = vector.extract_strided_slice %31 {offsets = [0, 104], sizes = [2, 885], strides = [1, 1]} : vector<2x1089xf32> to vector<2x885xf32>
      %c75 = arith.constant 75 : index
      %299 = memref.load %arg2[%c75] : memref<99xf32, #tpu.memory_space<smem>>
      %300 = vector.broadcast %299 : f32 to vector<2x885xf32>
      %301 = arith.mulf %298, %300 : vector<2x885xf32>
      %302 = arith.addf %297, %301 : vector<2x885xf32>
      %303 = vector.extract_strided_slice %28 {offsets = [0, 105], sizes = [2, 885], strides = [1, 1]} : vector<2x1089xf32> to vector<2x885xf32>
      %c27 = arith.constant 27 : index
      %304 = memref.load %arg2[%c27] : memref<99xf32, #tpu.memory_space<smem>>
      %305 = vector.broadcast %304 : f32 to vector<2x885xf32>
      %306 = arith.mulf %303, %305 : vector<2x885xf32>
      %307 = arith.addf %302, %306 : vector<2x885xf32>
      %308 = vector.extract_strided_slice %31 {offsets = [0, 105], sizes = [2, 885], strides = [1, 1]} : vector<2x1089xf32> to vector<2x885xf32>
      %c76 = arith.constant 76 : index
      %309 = memref.load %arg2[%c76] : memref<99xf32, #tpu.memory_space<smem>>
      %310 = vector.broadcast %309 : f32 to vector<2x885xf32>
      %311 = arith.mulf %308, %310 : vector<2x885xf32>
      %312 = arith.addf %307, %311 : vector<2x885xf32>
      %313 = vector.extract_strided_slice %28 {offsets = [0, 132], sizes = [2, 885], strides = [1, 1]} : vector<2x1089xf32> to vector<2x885xf32>
      %c28 = arith.constant 28 : index
      %314 = memref.load %arg2[%c28] : memref<99xf32, #tpu.memory_space<smem>>
      %315 = vector.broadcast %314 : f32 to vector<2x885xf32>
      %316 = arith.mulf %313, %315 : vector<2x885xf32>
      %317 = arith.addf %312, %316 : vector<2x885xf32>
      %318 = vector.extract_strided_slice %31 {offsets = [0, 132], sizes = [2, 885], strides = [1, 1]} : vector<2x1089xf32> to vector<2x885xf32>
      %c77 = arith.constant 77 : index
      %319 = memref.load %arg2[%c77] : memref<99xf32, #tpu.memory_space<smem>>
      %320 = vector.broadcast %319 : f32 to vector<2x885xf32>
      %321 = arith.mulf %318, %320 : vector<2x885xf32>
      %322 = arith.addf %317, %321 : vector<2x885xf32>
      %323 = vector.extract_strided_slice %28 {offsets = [0, 133], sizes = [2, 885], strides = [1, 1]} : vector<2x1089xf32> to vector<2x885xf32>
      %c29 = arith.constant 29 : index
      %324 = memref.load %arg2[%c29] : memref<99xf32, #tpu.memory_space<smem>>
      %325 = vector.broadcast %324 : f32 to vector<2x885xf32>
      %326 = arith.mulf %323, %325 : vector<2x885xf32>
      %327 = arith.addf %322, %326 : vector<2x885xf32>
      %328 = vector.extract_strided_slice %31 {offsets = [0, 133], sizes = [2, 885], strides = [1, 1]} : vector<2x1089xf32> to vector<2x885xf32>
      %c78 = arith.constant 78 : index
      %329 = memref.load %arg2[%c78] : memref<99xf32, #tpu.memory_space<smem>>
      %330 = vector.broadcast %329 : f32 to vector<2x885xf32>
      %331 = arith.mulf %328, %330 : vector<2x885xf32>
      %332 = arith.addf %327, %331 : vector<2x885xf32>
      %333 = vector.extract_strided_slice %28 {offsets = [0, 134], sizes = [2, 885], strides = [1, 1]} : vector<2x1089xf32> to vector<2x885xf32>
      %c30 = arith.constant 30 : index
      %334 = memref.load %arg2[%c30] : memref<99xf32, #tpu.memory_space<smem>>
      %335 = vector.broadcast %334 : f32 to vector<2x885xf32>
      %336 = arith.mulf %333, %335 : vector<2x885xf32>
      %337 = arith.addf %332, %336 : vector<2x885xf32>
      %338 = vector.extract_strided_slice %31 {offsets = [0, 134], sizes = [2, 885], strides = [1, 1]} : vector<2x1089xf32> to vector<2x885xf32>
      %c79 = arith.constant 79 : index
      %339 = memref.load %arg2[%c79] : memref<99xf32, #tpu.memory_space<smem>>
      %340 = vector.broadcast %339 : f32 to vector<2x885xf32>
      %341 = arith.mulf %338, %340 : vector<2x885xf32>
      %342 = arith.addf %337, %341 : vector<2x885xf32>
      %343 = vector.extract_strided_slice %28 {offsets = [0, 135], sizes = [2, 885], strides = [1, 1]} : vector<2x1089xf32> to vector<2x885xf32>
      %c31 = arith.constant 31 : index
      %344 = memref.load %arg2[%c31] : memref<99xf32, #tpu.memory_space<smem>>
      %345 = vector.broadcast %344 : f32 to vector<2x885xf32>
      %346 = arith.mulf %343, %345 : vector<2x885xf32>
      %347 = arith.addf %342, %346 : vector<2x885xf32>
      %348 = vector.extract_strided_slice %31 {offsets = [0, 135], sizes = [2, 885], strides = [1, 1]} : vector<2x1089xf32> to vector<2x885xf32>
      %c80 = arith.constant 80 : index
      %349 = memref.load %arg2[%c80] : memref<99xf32, #tpu.memory_space<smem>>
      %350 = vector.broadcast %349 : f32 to vector<2x885xf32>
      %351 = arith.mulf %348, %350 : vector<2x885xf32>
      %352 = arith.addf %347, %351 : vector<2x885xf32>
      %353 = vector.extract_strided_slice %28 {offsets = [0, 136], sizes = [2, 885], strides = [1, 1]} : vector<2x1089xf32> to vector<2x885xf32>
      %c32 = arith.constant 32 : index
      %354 = memref.load %arg2[%c32] : memref<99xf32, #tpu.memory_space<smem>>
      %355 = vector.broadcast %354 : f32 to vector<2x885xf32>
      %356 = arith.mulf %353, %355 : vector<2x885xf32>
      %357 = arith.addf %352, %356 : vector<2x885xf32>
      %358 = vector.extract_strided_slice %31 {offsets = [0, 136], sizes = [2, 885], strides = [1, 1]} : vector<2x1089xf32> to vector<2x885xf32>
      %c81 = arith.constant 81 : index
      %359 = memref.load %arg2[%c81] : memref<99xf32, #tpu.memory_space<smem>>
      %360 = vector.broadcast %359 : f32 to vector<2x885xf32>
      %361 = arith.mulf %358, %360 : vector<2x885xf32>
      %362 = arith.addf %357, %361 : vector<2x885xf32>
      %363 = vector.extract_strided_slice %28 {offsets = [0, 137], sizes = [2, 885], strides = [1, 1]} : vector<2x1089xf32> to vector<2x885xf32>
      %c33 = arith.constant 33 : index
      %364 = memref.load %arg2[%c33] : memref<99xf32, #tpu.memory_space<smem>>
      %365 = vector.broadcast %364 : f32 to vector<2x885xf32>
      %366 = arith.mulf %363, %365 : vector<2x885xf32>
      %367 = arith.addf %362, %366 : vector<2x885xf32>
      %368 = vector.extract_strided_slice %31 {offsets = [0, 137], sizes = [2, 885], strides = [1, 1]} : vector<2x1089xf32> to vector<2x885xf32>
      %c82 = arith.constant 82 : index
      %369 = memref.load %arg2[%c82] : memref<99xf32, #tpu.memory_space<smem>>
      %370 = vector.broadcast %369 : f32 to vector<2x885xf32>
      %371 = arith.mulf %368, %370 : vector<2x885xf32>
      %372 = arith.addf %367, %371 : vector<2x885xf32>
      %373 = vector.extract_strided_slice %28 {offsets = [0, 138], sizes = [2, 885], strides = [1, 1]} : vector<2x1089xf32> to vector<2x885xf32>
      %c34 = arith.constant 34 : index
      %374 = memref.load %arg2[%c34] : memref<99xf32, #tpu.memory_space<smem>>
      %375 = vector.broadcast %374 : f32 to vector<2x885xf32>
      %376 = arith.mulf %373, %375 : vector<2x885xf32>
      %377 = arith.addf %372, %376 : vector<2x885xf32>
      %378 = vector.extract_strided_slice %31 {offsets = [0, 138], sizes = [2, 885], strides = [1, 1]} : vector<2x1089xf32> to vector<2x885xf32>
      %c83 = arith.constant 83 : index
      %379 = memref.load %arg2[%c83] : memref<99xf32, #tpu.memory_space<smem>>
      %380 = vector.broadcast %379 : f32 to vector<2x885xf32>
      %381 = arith.mulf %378, %380 : vector<2x885xf32>
      %382 = arith.addf %377, %381 : vector<2x885xf32>
      %383 = vector.extract_strided_slice %28 {offsets = [0, 165], sizes = [2, 885], strides = [1, 1]} : vector<2x1089xf32> to vector<2x885xf32>
      %c35 = arith.constant 35 : index
      %384 = memref.load %arg2[%c35] : memref<99xf32, #tpu.memory_space<smem>>
      %385 = vector.broadcast %384 : f32 to vector<2x885xf32>
      %386 = arith.mulf %383, %385 : vector<2x885xf32>
      %387 = arith.addf %382, %386 : vector<2x885xf32>
      %388 = vector.extract_strided_slice %31 {offsets = [0, 165], sizes = [2, 885], strides = [1, 1]} : vector<2x1089xf32> to vector<2x885xf32>
      %c84 = arith.constant 84 : index
      %389 = memref.load %arg2[%c84] : memref<99xf32, #tpu.memory_space<smem>>
      %390 = vector.broadcast %389 : f32 to vector<2x885xf32>
      %391 = arith.mulf %388, %390 : vector<2x885xf32>
      %392 = arith.addf %387, %391 : vector<2x885xf32>
      %393 = vector.extract_strided_slice %28 {offsets = [0, 166], sizes = [2, 885], strides = [1, 1]} : vector<2x1089xf32> to vector<2x885xf32>
      %c36 = arith.constant 36 : index
      %394 = memref.load %arg2[%c36] : memref<99xf32, #tpu.memory_space<smem>>
      %395 = vector.broadcast %394 : f32 to vector<2x885xf32>
      %396 = arith.mulf %393, %395 : vector<2x885xf32>
      %397 = arith.addf %392, %396 : vector<2x885xf32>
      %398 = vector.extract_strided_slice %31 {offsets = [0, 166], sizes = [2, 885], strides = [1, 1]} : vector<2x1089xf32> to vector<2x885xf32>
      %c85 = arith.constant 85 : index
      %399 = memref.load %arg2[%c85] : memref<99xf32, #tpu.memory_space<smem>>
      %400 = vector.broadcast %399 : f32 to vector<2x885xf32>
      %401 = arith.mulf %398, %400 : vector<2x885xf32>
      %402 = arith.addf %397, %401 : vector<2x885xf32>
      %403 = vector.extract_strided_slice %28 {offsets = [0, 167], sizes = [2, 885], strides = [1, 1]} : vector<2x1089xf32> to vector<2x885xf32>
      %c37 = arith.constant 37 : index
      %404 = memref.load %arg2[%c37] : memref<99xf32, #tpu.memory_space<smem>>
      %405 = vector.broadcast %404 : f32 to vector<2x885xf32>
      %406 = arith.mulf %403, %405 : vector<2x885xf32>
      %407 = arith.addf %402, %406 : vector<2x885xf32>
      %408 = vector.extract_strided_slice %31 {offsets = [0, 167], sizes = [2, 885], strides = [1, 1]} : vector<2x1089xf32> to vector<2x885xf32>
      %c86 = arith.constant 86 : index
      %409 = memref.load %arg2[%c86] : memref<99xf32, #tpu.memory_space<smem>>
      %410 = vector.broadcast %409 : f32 to vector<2x885xf32>
      %411 = arith.mulf %408, %410 : vector<2x885xf32>
      %412 = arith.addf %407, %411 : vector<2x885xf32>
      %413 = vector.extract_strided_slice %28 {offsets = [0, 168], sizes = [2, 885], strides = [1, 1]} : vector<2x1089xf32> to vector<2x885xf32>
      %c38 = arith.constant 38 : index
      %414 = memref.load %arg2[%c38] : memref<99xf32, #tpu.memory_space<smem>>
      %415 = vector.broadcast %414 : f32 to vector<2x885xf32>
      %416 = arith.mulf %413, %415 : vector<2x885xf32>
      %417 = arith.addf %412, %416 : vector<2x885xf32>
      %418 = vector.extract_strided_slice %31 {offsets = [0, 168], sizes = [2, 885], strides = [1, 1]} : vector<2x1089xf32> to vector<2x885xf32>
      %c87 = arith.constant 87 : index
      %419 = memref.load %arg2[%c87] : memref<99xf32, #tpu.memory_space<smem>>
      %420 = vector.broadcast %419 : f32 to vector<2x885xf32>
      %421 = arith.mulf %418, %420 : vector<2x885xf32>
      %422 = arith.addf %417, %421 : vector<2x885xf32>
      %423 = vector.extract_strided_slice %28 {offsets = [0, 169], sizes = [2, 885], strides = [1, 1]} : vector<2x1089xf32> to vector<2x885xf32>
      %c39 = arith.constant 39 : index
      %424 = memref.load %arg2[%c39] : memref<99xf32, #tpu.memory_space<smem>>
      %425 = vector.broadcast %424 : f32 to vector<2x885xf32>
      %426 = arith.mulf %423, %425 : vector<2x885xf32>
      %427 = arith.addf %422, %426 : vector<2x885xf32>
      %428 = vector.extract_strided_slice %31 {offsets = [0, 169], sizes = [2, 885], strides = [1, 1]} : vector<2x1089xf32> to vector<2x885xf32>
      %c88 = arith.constant 88 : index
      %429 = memref.load %arg2[%c88] : memref<99xf32, #tpu.memory_space<smem>>
      %430 = vector.broadcast %429 : f32 to vector<2x885xf32>
      %431 = arith.mulf %428, %430 : vector<2x885xf32>
      %432 = arith.addf %427, %431 : vector<2x885xf32>
      %433 = vector.extract_strided_slice %28 {offsets = [0, 170], sizes = [2, 885], strides = [1, 1]} : vector<2x1089xf32> to vector<2x885xf32>
      %c40 = arith.constant 40 : index
      %434 = memref.load %arg2[%c40] : memref<99xf32, #tpu.memory_space<smem>>
      %435 = vector.broadcast %434 : f32 to vector<2x885xf32>
      %436 = arith.mulf %433, %435 : vector<2x885xf32>
      %437 = arith.addf %432, %436 : vector<2x885xf32>
      %438 = vector.extract_strided_slice %31 {offsets = [0, 170], sizes = [2, 885], strides = [1, 1]} : vector<2x1089xf32> to vector<2x885xf32>
      %c89 = arith.constant 89 : index
      %439 = memref.load %arg2[%c89] : memref<99xf32, #tpu.memory_space<smem>>
      %440 = vector.broadcast %439 : f32 to vector<2x885xf32>
      %441 = arith.mulf %438, %440 : vector<2x885xf32>
      %442 = arith.addf %437, %441 : vector<2x885xf32>
      %443 = vector.extract_strided_slice %28 {offsets = [0, 171], sizes = [2, 885], strides = [1, 1]} : vector<2x1089xf32> to vector<2x885xf32>
      %c41 = arith.constant 41 : index
      %444 = memref.load %arg2[%c41] : memref<99xf32, #tpu.memory_space<smem>>
      %445 = vector.broadcast %444 : f32 to vector<2x885xf32>
      %446 = arith.mulf %443, %445 : vector<2x885xf32>
      %447 = arith.addf %442, %446 : vector<2x885xf32>
      %448 = vector.extract_strided_slice %31 {offsets = [0, 171], sizes = [2, 885], strides = [1, 1]} : vector<2x1089xf32> to vector<2x885xf32>
      %c90 = arith.constant 90 : index
      %449 = memref.load %arg2[%c90] : memref<99xf32, #tpu.memory_space<smem>>
      %450 = vector.broadcast %449 : f32 to vector<2x885xf32>
      %451 = arith.mulf %448, %450 : vector<2x885xf32>
      %452 = arith.addf %447, %451 : vector<2x885xf32>
      %453 = vector.extract_strided_slice %28 {offsets = [0, 198], sizes = [2, 885], strides = [1, 1]} : vector<2x1089xf32> to vector<2x885xf32>
      %c42 = arith.constant 42 : index
      %454 = memref.load %arg2[%c42] : memref<99xf32, #tpu.memory_space<smem>>
      %455 = vector.broadcast %454 : f32 to vector<2x885xf32>
      %456 = arith.mulf %453, %455 : vector<2x885xf32>
      %457 = arith.addf %452, %456 : vector<2x885xf32>
      %458 = vector.extract_strided_slice %31 {offsets = [0, 198], sizes = [2, 885], strides = [1, 1]} : vector<2x1089xf32> to vector<2x885xf32>
      %c91 = arith.constant 91 : index
      %459 = memref.load %arg2[%c91] : memref<99xf32, #tpu.memory_space<smem>>
      %460 = vector.broadcast %459 : f32 to vector<2x885xf32>
      %461 = arith.mulf %458, %460 : vector<2x885xf32>
      %462 = arith.addf %457, %461 : vector<2x885xf32>
      %463 = vector.extract_strided_slice %28 {offsets = [0, 199], sizes = [2, 885], strides = [1, 1]} : vector<2x1089xf32> to vector<2x885xf32>
      %c43 = arith.constant 43 : index
      %464 = memref.load %arg2[%c43] : memref<99xf32, #tpu.memory_space<smem>>
      %465 = vector.broadcast %464 : f32 to vector<2x885xf32>
      %466 = arith.mulf %463, %465 : vector<2x885xf32>
      %467 = arith.addf %462, %466 : vector<2x885xf32>
      %468 = vector.extract_strided_slice %31 {offsets = [0, 199], sizes = [2, 885], strides = [1, 1]} : vector<2x1089xf32> to vector<2x885xf32>
      %c92 = arith.constant 92 : index
      %469 = memref.load %arg2[%c92] : memref<99xf32, #tpu.memory_space<smem>>
      %470 = vector.broadcast %469 : f32 to vector<2x885xf32>
      %471 = arith.mulf %468, %470 : vector<2x885xf32>
      %472 = arith.addf %467, %471 : vector<2x885xf32>
      %473 = vector.extract_strided_slice %28 {offsets = [0, 200], sizes = [2, 885], strides = [1, 1]} : vector<2x1089xf32> to vector<2x885xf32>
      %c44 = arith.constant 44 : index
      %474 = memref.load %arg2[%c44] : memref<99xf32, #tpu.memory_space<smem>>
      %475 = vector.broadcast %474 : f32 to vector<2x885xf32>
      %476 = arith.mulf %473, %475 : vector<2x885xf32>
      %477 = arith.addf %472, %476 : vector<2x885xf32>
      %478 = vector.extract_strided_slice %31 {offsets = [0, 200], sizes = [2, 885], strides = [1, 1]} : vector<2x1089xf32> to vector<2x885xf32>
      %c93 = arith.constant 93 : index
      %479 = memref.load %arg2[%c93] : memref<99xf32, #tpu.memory_space<smem>>
      %480 = vector.broadcast %479 : f32 to vector<2x885xf32>
      %481 = arith.mulf %478, %480 : vector<2x885xf32>
      %482 = arith.addf %477, %481 : vector<2x885xf32>
      %483 = vector.extract_strided_slice %28 {offsets = [0, 201], sizes = [2, 885], strides = [1, 1]} : vector<2x1089xf32> to vector<2x885xf32>
      %c45 = arith.constant 45 : index
      %484 = memref.load %arg2[%c45] : memref<99xf32, #tpu.memory_space<smem>>
      %485 = vector.broadcast %484 : f32 to vector<2x885xf32>
      %486 = arith.mulf %483, %485 : vector<2x885xf32>
      %487 = arith.addf %482, %486 : vector<2x885xf32>
      %488 = vector.extract_strided_slice %31 {offsets = [0, 201], sizes = [2, 885], strides = [1, 1]} : vector<2x1089xf32> to vector<2x885xf32>
      %c94 = arith.constant 94 : index
      %489 = memref.load %arg2[%c94] : memref<99xf32, #tpu.memory_space<smem>>
      %490 = vector.broadcast %489 : f32 to vector<2x885xf32>
      %491 = arith.mulf %488, %490 : vector<2x885xf32>
      %492 = arith.addf %487, %491 : vector<2x885xf32>
      %493 = vector.extract_strided_slice %28 {offsets = [0, 202], sizes = [2, 885], strides = [1, 1]} : vector<2x1089xf32> to vector<2x885xf32>
      %c46 = arith.constant 46 : index
      %494 = memref.load %arg2[%c46] : memref<99xf32, #tpu.memory_space<smem>>
      %495 = vector.broadcast %494 : f32 to vector<2x885xf32>
      %496 = arith.mulf %493, %495 : vector<2x885xf32>
      %497 = arith.addf %492, %496 : vector<2x885xf32>
      %498 = vector.extract_strided_slice %31 {offsets = [0, 202], sizes = [2, 885], strides = [1, 1]} : vector<2x1089xf32> to vector<2x885xf32>
      %c95 = arith.constant 95 : index
      %499 = memref.load %arg2[%c95] : memref<99xf32, #tpu.memory_space<smem>>
      %500 = vector.broadcast %499 : f32 to vector<2x885xf32>
      %501 = arith.mulf %498, %500 : vector<2x885xf32>
      %502 = arith.addf %497, %501 : vector<2x885xf32>
      %503 = vector.extract_strided_slice %28 {offsets = [0, 203], sizes = [2, 885], strides = [1, 1]} : vector<2x1089xf32> to vector<2x885xf32>
      %c47 = arith.constant 47 : index
      %504 = memref.load %arg2[%c47] : memref<99xf32, #tpu.memory_space<smem>>
      %505 = vector.broadcast %504 : f32 to vector<2x885xf32>
      %506 = arith.mulf %503, %505 : vector<2x885xf32>
      %507 = arith.addf %502, %506 : vector<2x885xf32>
      %508 = vector.extract_strided_slice %31 {offsets = [0, 203], sizes = [2, 885], strides = [1, 1]} : vector<2x1089xf32> to vector<2x885xf32>
      %c96 = arith.constant 96 : index
      %509 = memref.load %arg2[%c96] : memref<99xf32, #tpu.memory_space<smem>>
      %510 = vector.broadcast %509 : f32 to vector<2x885xf32>
      %511 = arith.mulf %508, %510 : vector<2x885xf32>
      %512 = arith.addf %507, %511 : vector<2x885xf32>
      %513 = vector.extract_strided_slice %28 {offsets = [0, 204], sizes = [2, 885], strides = [1, 1]} : vector<2x1089xf32> to vector<2x885xf32>
      %c48 = arith.constant 48 : index
      %514 = memref.load %arg2[%c48] : memref<99xf32, #tpu.memory_space<smem>>
      %515 = vector.broadcast %514 : f32 to vector<2x885xf32>
      %516 = arith.mulf %513, %515 : vector<2x885xf32>
      %517 = arith.addf %512, %516 : vector<2x885xf32>
      %518 = vector.extract_strided_slice %31 {offsets = [0, 204], sizes = [2, 885], strides = [1, 1]} : vector<2x1089xf32> to vector<2x885xf32>
      %c97 = arith.constant 97 : index
      %519 = memref.load %arg2[%c97] : memref<99xf32, #tpu.memory_space<smem>>
      %520 = vector.broadcast %519 : f32 to vector<2x885xf32>
      %521 = arith.mulf %518, %520 : vector<2x885xf32>
      %522 = arith.addf %517, %521 : vector<2x885xf32>
      %c98 = arith.constant 98 : index
      %523 = memref.load %arg2[%c98] : memref<99xf32, #tpu.memory_space<smem>>
      %524 = vector.broadcast %523 : f32 to vector<2x885xf32>
      %525 = arith.addf %522, %524 : vector<2x885xf32>
      %526 = arith.negf %525 : vector<2x885xf32>
      %527 = math.exp %526 : vector<2x885xf32>
      %cst_26 = arith.constant 1.000000e+00 : f32
      %528 = vector.broadcast %cst_26 : f32 to vector<2x885xf32>
      %529 = arith.addf %528, %527 : vector<2x885xf32>
      %530 = arith.divf %528, %529 : vector<2x885xf32>
      %531 = arith.mulf %525, %530 : vector<2x885xf32>
      %cst_27 = arith.constant dense<0.000000e+00> : vector<885xf32>
      %532 = vector.multi_reduction <add>, %531, %cst_27 [0] : vector<2x885xf32> to vector<885xf32>
      %533 = vector.shape_cast %532 : vector<885xf32> to vector<1x885xf32>
      %cst_28 = arith.constant 0.000000e+00 : f32
      %534 = vector.broadcast %cst_28 : f32 to vector<1x1408xf32>
      %c0_29 = arith.constant 0 : index
      %c0_30 = arith.constant 0 : index
      %535 = vector.load %arg12[%c0_29, %c0_30] : memref<1x1408xf32, #tpu.memory_space<vmem>>, vector<1x1408xf32>
      tpu.vector_store %arg12[%c0_29, %c0_30], %534 {strides = array<i32>} : memref<1x1408xf32, #tpu.memory_space<vmem>>, vector<1x1408xf32>,
      %c0_31 = arith.constant 0 : index
      %c0_32 = arith.constant 0 : index
      %536 = vector.load %arg12[%c0_31, %c0_32] : memref<1x1408xf32, #tpu.memory_space<vmem>>, vector<1x885xf32>
      tpu.vector_store %arg12[%c0_31, %c0_32], %533 {strides = array<i32>} : memref<1x1408xf32, #tpu.memory_space<vmem>>, vector<1x885xf32>,
      %c0_33 = arith.constant 0 : index
      %c0_34 = arith.constant 0 : index
      %537 = vector.load %arg3[%c0_33, %c0_34] : memref<1x512xf32, #tpu.memory_space<vmem>>, vector<1x512xf32>
      %c0_35 = arith.constant 0 : index
      %c896 = arith.constant 896 : index
      %538 = vector.load %arg12[%c0_35, %c896] : memref<1x1408xf32, #tpu.memory_space<vmem>>, vector<1x512xf32>
      tpu.vector_store %arg12[%c0_35, %c896], %537 {strides = array<i32>} : memref<1x1408xf32, #tpu.memory_space<vmem>>, vector<1x512xf32>,
    } else {
    }
    %c0 = arith.constant 0 : index
    %c0_1 = arith.constant 0 : index
    %3 = vector.load %arg12[%c0, %c0_1] : memref<1x1408xf32, #tpu.memory_space<vmem>>, vector<1x1408xf32>
    %4 = arith.truncf %3 : vector<1x1408xf32> to vector<1x1408xbf16>
    %c0_2 = arith.constant 0 : index
    %c0_3 = arith.constant 0 : index
    %5 = vector.load %arg5[%c0_2, %c0_3] : memref<1408x512xbf16, #tpu.memory_space<vmem>>, vector<1408x512xbf16>
    %cst = arith.constant dense<0.000000e+00> : vector<1x512xf32>
    %6 = tpu.matmul %4, %5, %cst {dimension_numbers = #tpu.dot_dimension_numbers<[1], [0], [0], [1], [0, 0, 1, 1], [], []>} : vector<1x1408xbf16>, vector<1408x512xbf16>, vector<1x512xf32> -> vector<1x512xf32>
    %c0_4 = arith.constant 0 : index
    %c0_5 = arith.constant 0 : index
    %7 = vector.load %arg6[%c0_4, %c0_5] : memref<1x512xf32, #tpu.memory_space<vmem>>, vector<1x512xf32>
    %8 = arith.addf %6, %7 : vector<1x512xf32>
    %9 = arith.index_cast %arg0 : i32 to index
    %c0_6 = arith.constant 0 : index
    %10 = vector.load %arg13[%9, %c0_6] : memref<4x512xf32, #tpu.memory_space<vmem>>, vector<1x512xf32>
    tpu.vector_store %arg13[%9, %c0_6], %8 {strides = array<i32>} : memref<4x512xf32, #tpu.memory_space<vmem>>, vector<1x512xf32>,
    %c3_i32 = arith.constant 3 : i32
    %11 = arith.cmpi eq, %arg0, %c3_i32 : i32
    %12 = arith.extui %11 : i1 to i32
    %c0_i32_7 = arith.constant 0 : i32
    %13 = arith.cmpi ne, %12, %c0_i32_7 : i32
    scf.if %13 {
      %c0_8 = arith.constant 0 : index
      %c0_9 = arith.constant 0 : index
      %14 = vector.load %arg13[%c0_8, %c0_9] : memref<4x512xf32, #tpu.memory_space<vmem>>, vector<1x512xf32>
      %15 = arith.negf %14 : vector<1x512xf32>
      %16 = math.exp %15 : vector<1x512xf32>
      %cst_10 = arith.constant 1.000000e+00 : f32
      %17 = vector.broadcast %cst_10 : f32 to vector<1x512xf32>
      %18 = arith.addf %17, %16 : vector<1x512xf32>
      %19 = arith.divf %17, %18 : vector<1x512xf32>
      %c1 = arith.constant 1 : index
      %c0_11 = arith.constant 0 : index
      %20 = vector.load %arg13[%c1, %c0_11] : memref<4x512xf32, #tpu.memory_space<vmem>>, vector<1x512xf32>
      %21 = arith.negf %20 : vector<1x512xf32>
      %22 = math.exp %21 : vector<1x512xf32>
      %cst_12 = arith.constant 1.000000e+00 : f32
      %23 = vector.broadcast %cst_12 : f32 to vector<1x512xf32>
      %24 = arith.addf %23, %22 : vector<1x512xf32>
      %25 = arith.divf %23, %24 : vector<1x512xf32>
      %c2 = arith.constant 2 : index
      %c0_13 = arith.constant 0 : index
      %26 = vector.load %arg13[%c2, %c0_13] : memref<4x512xf32, #tpu.memory_space<vmem>>, vector<1x512xf32>
      %27 = math.tanh %26 : vector<1x512xf32>
      %c3 = arith.constant 3 : index
      %c0_14 = arith.constant 0 : index
      %28 = vector.load %arg13[%c3, %c0_14] : memref<4x512xf32, #tpu.memory_space<vmem>>, vector<1x512xf32>
      %29 = arith.negf %28 : vector<1x512xf32>
      %30 = math.exp %29 : vector<1x512xf32>
      %cst_15 = arith.constant 1.000000e+00 : f32
      %31 = vector.broadcast %cst_15 : f32 to vector<1x512xf32>
      %32 = arith.addf %31, %30 : vector<1x512xf32>
      %33 = arith.divf %31, %32 : vector<1x512xf32>
      %c0_16 = arith.constant 0 : index
      %c0_17 = arith.constant 0 : index
      %34 = vector.load %arg4[%c0_16, %c0_17] : memref<1x512xf32, #tpu.memory_space<vmem>>, vector<1x512xf32>
      %35 = arith.mulf %25, %34 : vector<1x512xf32>
      %36 = arith.mulf %19, %27 : vector<1x512xf32>
      %37 = arith.addf %35, %36 : vector<1x512xf32>
      %38 = math.tanh %37 : vector<1x512xf32>
      %39 = arith.mulf %33, %38 : vector<1x512xf32>
      %c0_18 = arith.constant 0 : index
      %c0_19 = arith.constant 0 : index
      %40 = vector.load %arg11[%c0_18, %c0_19] : memref<1x512xf32, #tpu.memory_space<vmem>>, vector<1x512xf32>
      tpu.vector_store %arg11[%c0_18, %c0_19], %37 {strides = array<i32>} : memref<1x512xf32, #tpu.memory_space<vmem>>, vector<1x512xf32>,
      %c0_20 = arith.constant 0 : index
      %c0_21 = arith.constant 0 : index
      %41 = vector.load %arg10[%c0_20, %c0_21] : memref<1x512xf32, #tpu.memory_space<vmem>>, vector<1x512xf32>
      tpu.vector_store %arg10[%c0_20, %c0_21], %39 {strides = array<i32>} : memref<1x512xf32, #tpu.memory_space<vmem>>, vector<1x512xf32>,
      %c0_22 = arith.constant 0 : index
      %c0_23 = arith.constant 0 : index
      %42 = vector.load %arg7[%c0_22, %c0_23] : memref<512x12xf32, #tpu.memory_space<vmem>>, vector<512x12xf32>
      %cst_24 = arith.constant dense<0.000000e+00> : vector<1x12xf32>
      %43 = tpu.matmul %39, %42, %cst_24 {dimension_numbers = #tpu.dot_dimension_numbers<[1], [0], [0], [1], [0, 0, 1, 1], [], []>} : vector<1x512xf32>, vector<512x12xf32>, vector<1x12xf32> -> vector<1x12xf32>
      %c0_25 = arith.constant 0 : index
      %c0_26 = arith.constant 0 : index
      %44 = vector.load %arg8[%c0_25, %c0_26] : memref<1x12xf32, #tpu.memory_space<vmem>>, vector<1x12xf32>
      %45 = arith.addf %43, %44 : vector<1x12xf32>
      %c0_27 = arith.constant 0 : index
      %c0_28 = arith.constant 0 : index
      %46 = vector.load %arg9[%c0_27, %c0_28] : memref<1x12xf32, #tpu.memory_space<vmem>>, vector<1x12xf32>
      tpu.vector_store %arg9[%c0_27, %c0_28], %45 {strides = array<i32>} : memref<1x12xf32, #tpu.memory_space<vmem>>, vector<1x12xf32>,
    } else {
    }
    return
  }
  func.func @transform_0(%arg0: i32) -> (i32, i32, i32) {
    %c0_i32 = arith.constant 0 : i32
    %c0_i32_0 = arith.constant 0 : i32
    %c0_i32_1 = arith.constant 0 : i32
    %c0_i32_2 = arith.constant 0 : i32
    return %c0_i32, %c0_i32_0, %c0_i32_1 : i32, i32, i32
  }
  func.func @transform_1(%arg0: i32) -> i32 {
    %c0_i32 = arith.constant 0 : i32
    %c0_i32_0 = arith.constant 0 : i32
    return %c0_i32 : i32
  }
  func.func @transform_2(%arg0: i32) -> (i32, i32) {
    %c0_i32 = arith.constant 0 : i32
    %c0_i32_0 = arith.constant 0 : i32
    %c0_i32_1 = arith.constant 0 : i32
    return %c0_i32, %c0_i32_0 : i32, i32
  }
  func.func @transform_3(%arg0: i32) -> (i32, i32) {
    %c0_i32 = arith.constant 0 : i32
    %c0_i32_0 = arith.constant 0 : i32
    %c0_i32_1 = arith.constant 0 : i32
    return %c0_i32, %c0_i32_0 : i32, i32
  }
  func.func @transform_4(%arg0: i32) -> (i32, i32) {
    %c0_i32 = arith.constant 0 : i32
    %c0_i32_0 = arith.constant 0 : i32
    return %c0_i32, %arg0 : i32, i32
  }
  func.func @transform_5(%arg0: i32) -> (i32, i32) {
    %c0_i32 = arith.constant 0 : i32
    %c0_i32_0 = arith.constant 0 : i32
    return %c0_i32, %arg0 : i32, i32
  }
  func.func @transform_6(%arg0: i32) -> (i32, i32) {
    %c0_i32 = arith.constant 0 : i32
    %c0_i32_0 = arith.constant 0 : i32
    %c0_i32_1 = arith.constant 0 : i32
    return %c0_i32, %c0_i32_0 : i32, i32
  }
  func.func @transform_7(%arg0: i32) -> (i32, i32) {
    %c0_i32 = arith.constant 0 : i32
    %c0_i32_0 = arith.constant 0 : i32
    %c0_i32_1 = arith.constant 0 : i32
    return %c0_i32, %c0_i32_0 : i32, i32
  }
  func.func @transform_8(%arg0: i32) -> (i32, i32) {
    %c0_i32 = arith.constant 0 : i32
    %c0_i32_0 = arith.constant 0 : i32
    %c0_i32_1 = arith.constant 0 : i32
    return %c0_i32, %c0_i32_0 : i32, i32
  }
  func.func @transform_9(%arg0: i32) -> (i32, i32) {
    %c0_i32 = arith.constant 0 : i32
    %c0_i32_0 = arith.constant 0 : i32
    %c0_i32_1 = arith.constant 0 : i32
    return %c0_i32, %c0_i32_0 : i32, i32
  }
  func.func @transform_10(%arg0: i32) -> (i32, i32) {
    %c0_i32 = arith.constant 0 : i32
    %c0_i32_0 = arith.constant 0 : i32
    %c0_i32_1 = arith.constant 0 : i32
    return %c0_i32, %c0_i32_0 : i32, i32
  }
}

</mosaic_0001>

<bundles_post_ra>
// kernel: spatial_gate_forward.1
= control target key start
LH: loop header
LB: loop body
LE: loop exit
PB: predicated region body
PF: predicated region fallthrough
CT: control target
= control target key end

     0   :  { %s10973_s0 = inlined_call_operand.vmem [shape: f32[2,4,1089], index: 0, kind: input, shape index: {}]   ;;  %s10974_s1 = inlined_call_operand.hbm [shape: f32[99], index: 1, kind: input, shape index: {}]   ;;  %s10975_s2 = inlined_call_operand.hbm [shape: f32[1,512], index: 2, kind: input, shape index: {}]   ;;  %s10976_s3 = inlined_call_operand.hbm [shape: f32[1,512], index: 3, kind: input, shape index: {}]   ;;  %s10977_s4 = inlined_call_operand.hbm [shape: bf16[1408,2048], index: 4, kind: input, shape index: {}]   ;;  %s10978_s5 = inlined_call_operand.hbm [shape: f32[1,2048], index: 5, kind: input, shape index: {}]   ;;  %s10979_s6 = inlined_call_operand.vmem [shape: f32[512,12], index: 6, kind: input, shape index: {}]   ;;  %s10980_s7 = inlined_call_operand.hbm [shape: f32[1,12], index: 7, kind: input, shape index: {}]   ;;  %s10981_s8 = inlined_call_operand.hbm [shape: f32[1,12], index: 8, kind: output, shape index: {0}]   ;;  %s10982_s9 = inlined_call_operand.hbm [shape: f32[1,512], index: 9, kind: output, shape index: {1}]   ;;  %s10983_s10 = inlined_call_operand.hbm [shape: f32[1,512], index: 10, kind: output, shape index: {2}]  }
   0x1   :  { %10999 = sst [smem:[#allocation39_spill]] %s10975_s2 }
   0x2   :  { %11000 = sst [smem:[#allocation40_spill]] %s10976_s3 }
   0x3   :  { %11001 = sst [smem:[#allocation41_spill]] %s10977_s4 }
   0x4   :  { %11002 = sst [smem:[#allocation42_spill]] %s10981_s8 }
   0x5   :  { %11003 = sst [smem:[#allocation43_spill]] %s10983_s10 }
   0x6   :  { %16 = vsyncpa [#allocation7], 0 }
   0x7   :  { %17 = vsyncpa [#allocation5], 0 }
   0x8   :  { %18 = vsyncpa [#allocation10], 0 }
   0x9   :  { %19 = vsyncpa [#allocation6], 0 }
   0xa   :  { %20 = vsyncpa [#allocation16], 0  ;;  %s8343_s13 = smov 0   ;;  %s8345_s14 = smov 0  }
   0xb   :  { %s8347_s15 = smov 0   ;;  %s8349_s16 = smov 0  }
   0xc LB: > { %s8362_s17 = sadd.s32 4294967295, %s8236_s16   ;;  %s8365_s18 = sadd.s32 1, %s8236_s16   ;;  %s8236_s16 = sphi %s8349_s16, %s11043_s16   ;;  %s8232_s15 = sphi %s8347_s15, %s11047_s15   ;;  %s8228_s14 = sphi %s8345_s14, %s11046_s14   ;;  %s8224_s13 = sphi %s8343_s13, %s11045_s13  }
   0xd   : > { %11004 = sst [smem:[#allocation25_spill]] %s8365_s18  ;;  %s114_s19 = ssub.s32 %s8236_s16, %s8365_s18 }
   0xe   : > { %s117_s20 = sadd.s32 1, %s8232_s15  ;;  %p115_p0 = scmp.eq.s32.totalorder %s114_s19, 0 }
   0xf   : > { %p124_p1 = scmp.ne.s32.totalorder %s8232_s15, %s8228_s14  ;;  %p125_p2 = scmp.eq.s32.totalorder %s8236_s16, 0 }
  0x10   : > { %p130_p3 = scmp.ne.s32.totalorder %s8228_s14, %s8224_s13  ;;  %p131_p5 = scmp.eq.s32.totalorder %s8362_s17, 0 }
  0x11   : > { %s8375_s21 = scalar_select %p115_p0, %s8232_s15, %s117_s20  }
  0x12   : > { %p8377_p4 = por %p125_p2, %p124_p1  ;;  %p5845_p6 = scmp.ge.s32.totalorder %s8236_s16, 1 }
  0x13   : > { %11005 = sst [smem:[#allocation26_spill]] %s8375_s21  ;;  %p272_p7 = scmp.lt.s32.totalorder %s8236_s16, 5 }
  0x14   : > { %p8386_p8 = por %p131_p5, %p130_p3  ;;  %p5846_p9 = scmp.ne.s32.totalorder %s8362_s17, 0 }
  0x15   : > { %p8391_p10 = pnand %p5845_p6, %p272_p7  ;;  %s11009_s2 = sld [smem:[#allocation39_spill]] }
  0x16   : > { %s8238_s28 = smov [#allocation8]   ;;  %p7811_p13 = scmp.lt.s32.totalorder %s8236_s16, 4 }
  0x17   : > { %p7787_p11 = pneg %p8391_p10  ;;  %s299_s29 = sshll.u32 %s8238_s28, 4  ;;  %s300_s29 = int_to_ptr.vmem [resolvable:$true] %s299_s29 }
  0x18   : > { %s11011_s3 = sld [smem:[#allocation40_spill]]  ;;  %p8412_p0 = pnand %p7811_p13, %p8377_p4 }
  0x19   : > { %p8402_p12 = pnand %p7787_p11, %p131_p5  ;;  %s8239_s20 = smov [#allocation9]  }
  0x1a   : > { %s311_s25 = sshll.u32 %s8239_s20, 4  ;;  %s337_s26 = sand.u32 1, %s8236_s16   ;;  %s312_s25 = int_to_ptr.vmem [resolvable:$true] %s311_s25 }
  0x1b   : > { %s297_s27 = sshll.u32 %s11009_s2, 4  ;;  %s10986_s28 = sand.u32 1, %s8232_s15   ;;  %s298_s27 = int_to_ptr.hbm [resolvable:$true] %s297_s27 }
  0x1c   : > { %7793 = dma.hbm_to_vmem [thread:$0]  (!%p8402_p12), %s298_s27, 64, %s300_s29, [#allocation5]  }
  0x1d   : > { %s7399_s2 = sshll.u32 %s8236_s16, 4  ;;  %s7753_s11 = smul.u32 2816, %s10986_s28 }
  0x1e   : > { %s309_s13 = sshll.u32 %s11011_s3, 4  ;;  %s11013_s4 = sld [smem:[#allocation41_spill]]  ;;  %s310_s13 = int_to_ptr.hbm [resolvable:$true] %s309_s13 }
  0x1f   : > { %7796 = dma.hbm_to_vmem [thread:$0]  (!%p8402_p12), %s310_s13, 64, %s312_s25, [#allocation10]  }
  0x20   : > { %s341_s27 = scalar_lea.vmem [#allocation11], %s7753_s11  ;;  %s8428_s20 = scalar_lea.sflag [#allocation5], %s337_s26 }
  0x21   : > { %s349_s29 = sshll.u32 %s341_s27, 4  ;;  %p7993_p2 = pneg %p8412_p0  ;;  %s350_s29 = int_to_ptr.vmem [resolvable:$true] %s349_s29 }
  0x24   : > { %s346_s3 = scalar_lea.hbm %s11013_s4, %s7399_s2  ;;  %s7996_s2 = scalar_lea.hbm %s11013_s4, 11264 }
  0x25   : > { %s347_s21 = sshll.u32 %s346_s3, 4  ;;  %s348_s21 = int_to_ptr.hbm [resolvable:$true] %s347_s21 }
  0x26   : > { %s7989_s18 = sshra.s32 %s348_s21, 4  ;;  %s7990_s18 = int_to_ptr.hbm [resolvable:$true] %s7989_s18 }
  0x27   : > { %s7991_s10 = scalar_lea.hbm %s7990_s18, 2816  ;;  %p7997_p6 = scmp.lt.s32.totalorder %s7990_s18, %s11013_s4 }
  0x28   : > { %p7992_p1 = scmp.ne.s32.totalorder %s7990_s18, %s7991_s10  ;;  %p7998_p7 = scmp.lt.s32.totalorder %s7996_s2, %s7991_s10 }
  0x2a   : > { %p7994_p3 = pnand %p7993_p2, %p7992_p1  ;;  %p7999_p11 = por %p7998_p7, %p7997_p6 }
  0x2c   : > { %p7995_p4 = pneg %p7994_p3 }
  0x2e   : > { %p8000_p13 = pnand %p7999_p11, %p7995_p4 }
  0x30   : > { %8003 = shalt.err (!%p8000_p13)
}
  0x31   : > { %s8240_s26 = smov 1024   ;;  %s8241_s22 = smov 256  }
  0x32   : > { %s8242_s12 = smov 16   ;;  %s287_s25 = sshll.u32 %s10974_s1, 4  ;;  %s288_s25 = int_to_ptr.hbm [resolvable:$true] %s287_s25 }
  0x33   : > { %7803 = dma.hbm_to_vmem [thread:$0]  (!%p8412_p0), %s348_s21, 45056, %s350_s29, %s8428_s20, %s8240_s26, %s8241_s22, %s8242_s12  }
  0x34   : > { %s324_s2 = sshll.u32 %s10980_s7, 4  ;;  %s8243_s3 = smov [#allocation4]   ;;  %s325_s2 = int_to_ptr.hbm [resolvable:$true] %s324_s2 }
  0x35   : > { %7790 = dma.hbm_to_smem (!%p8402_p12), %s288_s25, 16, %s8243_s3, [#allocation7]  }
  0x36   : > { %s8244_s11 = smov [#allocation13]   ;;  %s11014_s4 = sand.u32 1, %s8232_s15  }
  0x37   : > { %s326_s28 = sshll.u32 %s8244_s11, 4  ;;  %s5853_s8 = sshll.u32 %s11014_s4, 2  ;;  %s327_s28 = int_to_ptr.vmem [resolvable:$true] %s326_s28 }
  0x38   : > { %7799 = dma.hbm_to_vmem [thread:$0]  (!%p8402_p12), %s325_s2, 16, %s327_s28, [#allocation10]  }
  0x39   : > { %s5854_s21 = sshll.u32 %s8236_s16, 2  ;;  %s363_s29 = scalar_lea.vmem [#allocation12], %s5853_s8 }
  0x3a   : > { %s371_s26 = sshll.u32 %s363_s29, 4  ;;  %s367_s27 = scalar_lea.hbm %s10978_s5, %s5854_s21  ;;  %s372_s26 = int_to_ptr.vmem [resolvable:$true] %s371_s26 }
  0x3b   : > { %s369_s13 = sshll.u32 %s367_s27, 4  ;;  %s8071_s8 = scalar_lea.hbm %s10978_s5, 16  ;;  %s370_s13 = int_to_ptr.hbm [resolvable:$true] %s369_s13 }
  0x3c   : > { %s8064_s25 = sshra.s32 %s370_s13, 4  ;;  %s8065_s25 = int_to_ptr.hbm [resolvable:$true] %s8064_s25 }
  0x3d   : > { %s8066_s10 = scalar_lea.hbm %s8065_s25, 4  ;;  %p8072_p12 = scmp.lt.s32.totalorder %s8065_s25, %s10978_s5 }
  0x3e   : > { %p8067_p1 = scmp.ne.s32.totalorder %s8065_s25, %s8066_s10  ;;  %p8073_p6 = scmp.lt.s32.totalorder %s8071_s8, %s8066_s10 }
  0x40   : > { %p8069_p3 = pnand %p8067_p1, %p7993_p2  ;;  %p8074_p7 = por %p8073_p6, %p8072_p12 }
  0x42   : > { %p8070_p4 = pneg %p8069_p3 }
  0x44   : > { %p8075_p11 = pnand %p8074_p7, %p8070_p4 }
  0x46   : > { %8078 = shalt.err (!%p8075_p11)
}
  0x47   : > { %7806 = dma.hbm_to_vmem [thread:$0]  (!%p8412_p0), %s370_s13, 64, %s372_s26, %s8428_s20  }
  0x48   : > { %380 = sbr.rel (%p8391_p10) target bundleno = 1663 (0x67f), region = 52 }
  0x4d   : > { %8195 = dma.done.wait (%p131_p5), [#allocation7], 16  }
  0x4e   : > { %8197 = vsyncadd (%p131_p5), [#allocation7], 4294967280 }
  0x4f   : > { %8199 = dma.done.wait (%p131_p5), [#allocation5], 64  }
  0x50   : > { %8201 = vsyncadd (%p131_p5), [#allocation5], 4294967232 }
  0x51   : > { %8203 = dma.done.wait (%p131_p5), [#allocation10], 64  }
  0x52   : > { %8205 = vsyncadd (%p131_p5), [#allocation10], 4294967232  ;;  %s397_s24 = sand.u32 1, %s8362_s17   ;;  %s399_s19 = sand.u32 1, %s8228_s14  }
  0x53   : > { %s7754_s20 = smul.u32 2816, %s399_s19  ;;  %s398_s18 = scalar_lea.sflag [#allocation5], %s397_s24 }
  0x55   : > { %s8488_s2 = scalar_lea.vmem [#allocation11], %s7754_s20 }
  0x56   : > { %8207 = dma.done.wait (%p8386_p8), %s398_s18, 45120  }
  0x57   : > { %8209 = vsyncadd (%p8386_p8), %s398_s18, 4294922176  ;;  %s8494_s3 = sshll.u32 %s399_s19, 2 }
  0x58   : > { %s411_s11 = scalar_lea.vmem [#allocation12], %s8494_s3 }
  0x59   : > { %8211 = dma.done.wait (%p131_p5), [#allocation10], 16  }
  0x5a   : > { %8213 = vsyncadd (%p131_p5), [#allocation10], 4294967280 }
  0x5b   : > { %422 = sfence }
  0x5c   : > { %460 = sbr.rel (%p5846_p9) target bundleno = 950 (0x3b6), region = 80 }
  0x61   : > { %v461_v0 = vld [vmem:[%s10973_s0] ss:$4 sm:$0xff]  ;;  %v5865_v2 = vld [vmem:[%s10973_s0 + $0x1] ss:$4 sm:$0xff]  ;;  %v5869_v5 = vld [vmem:[%s10973_s0 + $0x2] ss:$4 sm:$0xff] }
  0x62   : > { %v5863_v1 = vld [vmem:[%s10973_s0 + $0x24] ss:$4 sm:$0xff]  ;;  %v5867_v3 = vld [vmem:[%s10973_s0 + $0x25] ss:$4 sm:$0xff]  ;;  %v476_v4 = vmax.f32 %v461_v0, %v5865_v2  ;;  %v5871_v6 = vld [vmem:[%s10973_s0 + $0x26] ss:$4 sm:$0xff]  ;;  %v480_v7 = vadd.f32 %v5865_v2, %v461_v0 }
  0x63   : > { %v5873_v8 = vld [vmem:[%s10973_s0 + $0x3] ss:$4 sm:$0xff]  ;;  %s5878_s28 = sld [smem:[#allocation4 + $0x1]]  ;;  %v482_v9 = vadd.f32 %v5867_v3, %v5863_v1  ;;  %v478_v10 = vmax.f32 %v5863_v1, %v5867_v3  ;;  %s8245_s21 = smov 127   ;;  %vm544_vm0 = vcmask 1039360   ;;  %vm581_vm1 = vcmask 1031168  }
  0x64   : > { %v492_v11 = vmax.f32 %v476_v4, %v5869_v5  ;;  %v496_v12 = vadd.f32 %v5869_v5, %v480_v7  ;;  %s5879_s24 = sld [smem:[#allocation4 + $0x32]]  ;;  %v5875_v14 = vld [vmem:[%s10973_s0 + $0x27] ss:$4 sm:$0xff]  ;;  %s8246_s23 = smov 126   ;;  %vm618_vm2 = vcmask 1022976   ;;  %vm655_vm3 = vcmask 1014784  }
  0x65   : > { %v498_v13 = vadd.f32 %v5871_v6, %v482_v9  ;;  %v494_v17 = vmax.f32 %v478_v10, %v5871_v6  ;;  %s5880_s18 = sld [smem:[#allocation4 + $0x2]]  ;;  %s8247_s27 = smov 125   ;;  %vm692_vm4 = vcmask 1006592   ;;  %vm729_vm5 = vcmask 998400  }
  0x66   : > { %v8527_v15 = vmax.f32 %v492_v11, %v5873_v8  ;;  %v512_v16 = vadd.f32 %v5873_v8, %v496_v12  ;;  %s5881_s29 = sld [smem:[#allocation4 + $0x33]]  ;;  %s8248_s10 = smov 124   ;;  %vm766_vm6 = vcmask 777216   ;;  %vm803_vm7 = vcmask 769024  }
  0x67   : > { %v514_v20 = vadd.f32 %v5875_v14, %v498_v13  ;;  %v8533_v24 = vmax.f32 %v494_v17, %v5875_v14  ;;  %s5882_s26 = sld [smem:[#allocation4 + $0x3]]  ;;  %s8249_s8 = smov 123   ;;  %vm840_vm8 = vcmask 760832   ;;  %vm877_vm9 = vcmask 752640  }
  0x68   : > { %v8529_v18 = vmul.f32 0.25, %v512_v16  ;;  %s5883_s22 = sld [smem:[#allocation4 + $0x34]]  ;;  %vm914_vm10 = vcmask 744448   ;;  %vm951_vm11 = vcmask 736256   ;;  %vm988_vm12 = vcmask 728064  }
  0x69   : > { %v533_v19 = vstv %s5878_s28  ;;  %v8535_v25 = vmul.f32 0.25, %v514_v20  ;;  %s5884_s12 = sld [smem:[#allocation4 + $0x4]]  ;;  %vm1025_vm13 = vcmask 506880   ;;  %vm1062_vm14 = vcmask 498688  }
  0x6a   : > { %v534_v21 = vmul.f32 %v533_v19, %v8527_v15  ;;  %v552_v22 = vstv %s5879_s24  ;;  %v535_v28 = vmul.f32 %v533_v19, %v8533_v24  ;;  %s5885_s13 = sld [smem:[#allocation4 + $0x35]]  ;;  %s8250_s24 = smov 122   ;;  %vm1099_vm15 = vcmask 490496  }
  0x6b   : > { %v553_v23 = vmul.f32 %v552_v22, %v8529_v18  ;;  %v570_v26 = vstv %s5880_s18  ;;  %v554_v29 = vmul.f32 %v552_v22, %v8535_v25  ;;  %s5886_s25 = sld [smem:[#allocation4 + $0x5]]  ;;  %s8251_s18 = smov 95  }
  0x6c   : > { %538 = vrot.lane.b32.xlu0 %v534_v21, %s8245_s21  ;;  %v571_v27 = vmul.f32 %v570_v26, %v8527_v15  ;;  %v589_v30 = vstv %s5881_s29  ;;  %v572_v31 = vmul.f32 %v570_v26, %v8533_v24  ;;  %s5887_s4 = sld [smem:[#allocation4 + $0x36]] }
  0x6d   : > { %557 = vrot.lane.b32.xlu1 %v553_v23, %s8245_s21  ;;  %v590_v32 = vmul.f32 %v589_v30, %v8529_v18  ;;  %v591_v33 = vmul.f32 %v589_v30, %v8535_v25  ;;  %v607_v34 = vstv %s5882_s26  ;;  %s5888_s30 = sld [smem:[#allocation4 + $0x6]] }
  0x6e   : > { %575 = vrot.lane.b32.xlu2 %v571_v27, %s8246_s23  ;;  %v608_v35 = vmul.f32 %v607_v34, %v8527_v15  ;;  %v626_v36 = vstv %s5883_s22  ;;  %v609_v37 = vmul.f32 %v607_v34, %v8533_v24  ;;  %s5889_s16 = sld [smem:[#allocation4 + $0x37]] }
  0x6f   : > { %v627_v38 = vmul.f32 %v626_v36, %v8529_v18  ;;  %v644_v39 = vstv %s5884_s12  ;;  %v628_v40 = vmul.f32 %v626_v36, %v8535_v25  ;;  %s5890_s28 = sld [smem:[#allocation4 + $0x7]]  ;;  %s8253_s12 = smov 93  }
  0x70   : > { %v645_v41 = vmul.f32 %v644_v39, %v8527_v15  ;;  %v646_v42 = vmul.f32 %v644_v39, %v8533_v24  ;;  %v663_v43 = vstv %s5885_s13  ;;  %s5891_s19 = sld [smem:[#allocation4 + $0x38]] }
  0x71   : > { %v664_v44 = vmul.f32 %v663_v43, %v8529_v18  ;;  %v681_v45 = vstv %s5886_s25  ;;  %v665_v46 = vmul.f32 %v663_v43, %v8535_v25  ;;  %s5892_s20 = sld [smem:[#allocation4 + $0x8]]  ;;  %s8254_s25 = smov 92  }
  0x72   : > { %v682_v47 = vmul.f32 %v681_v45, %v8527_v15  ;;  %v700_v48 = vstv %s5887_s4  ;;  %v683_v49 = vmul.f32 %v681_v45, %v8533_v24  ;;  %s5894_s29 = sld [smem:[#allocation4 + $0x9]] }
  0x73   : > { %v701_v50 = vmul.f32 %v700_v48, %v8529_v18  ;;  %v702_v51 = vmul.f32 %v700_v48, %v8535_v25  ;;  %v718_v52 = vstv %s5888_s30  ;;  %s5895_s26 = sld [smem:[#allocation4 + $0x3a]] }
  0x74   : > { %540 = vrot.lane.b32.xlu0 %v535_v28, %s8245_s21  ;;  %v719_v53 = vmul.f32 %v718_v52, %v8527_v15  ;;  %v737_v54 = vstv %s5889_s16  ;;  %v720_v55 = vmul.f32 %v718_v52, %v8533_v24  ;;  %s5896_s22 = sld [smem:[#allocation4 + $0xa]]  ;;  %s8255_s16 = smov 91  }
  0x75   : > { %559 = vrot.lane.b32.xlu1 %v554_v29, %s8245_s21  ;;  %v738_v56 = vmul.f32 %v737_v54, %v8529_v18  ;;  %v755_v57 = vstv %s5890_s28  ;;  %v739_v58 = vmul.f32 %v737_v54, %v8535_v25  ;;  %s5893_s21 = sld [smem:[#allocation4 + $0x39]] }
  0x76   : > { %577 = vrot.lane.b32.xlu2 %v572_v31, %s8246_s23  ;;  %v756_v59 = vmul.f32 %v755_v57, %v8527_v15  ;;  %v757_v60 = vmul.f32 %v755_v57, %v8533_v24  ;;  %v774_v61 = vstv %s5891_s19  ;;  %s5898_s13 = sld [smem:[#allocation4 + $0xb]] }
  0x77   : > { %v775_v62 = vmul.f32 %v774_v61, %v8529_v18  ;;  %v792_v63 = vstv %s5892_s20  ;;  %v776_v0 = vmul.f32 %v774_v61, %v8535_v25  ;;  %s5899_s4 = sld [smem:[#allocation4 + $0x3c]]  ;;  %s8256_s20 = smov 90  }
  0x78   : > { %v793_v1 = vmul.f32 %v792_v63, %v8527_v15  ;;  %v794_v3 = vmul.f32 %v792_v63, %v8533_v24  ;;  %v829_v6 = vstv %s5894_s29  ;;  %s5900_s30 = sld [smem:[#allocation4 + $0xc]]  ;;  %s8257_s29 = smov 89  }
  0x79   : > { %v830_v7 = vmul.f32 %v829_v6, %v8527_v15  ;;  %v848_v8 = vstv %s5895_s26  ;;  %v831_v9 = vmul.f32 %v829_v6, %v8533_v24  ;;  %s5901_s28 = sld [smem:[#allocation4 + $0x3d]] }
  0x7a   : > { %v849_v10 = vmul.f32 %v848_v8, %v8529_v18  ;;  %v866_v11 = vstv %s5896_s22  ;;  %v850_v12 = vmul.f32 %v848_v8, %v8535_v25  ;;  %s5902_s19 = sld [smem:[#allocation4 + $0xd]]  ;;  %s8258_s22 = smov 62  }
  0x7b   : > { %v811_v2 = vstv %s5893_s21  ;;  %v867_v13 = vmul.f32 %v866_v11, %v8527_v15  ;;  %v868_v14 = vmul.f32 %v866_v11, %v8533_v24  ;;  %s5904_s21 = sld [smem:[#allocation4 + $0xe]] }
  0x7c   : > { %594 = vrot.lane.b32.xlu0 %v590_v32, %s8246_s23  ;;  %v812_v4 = vmul.f32 %v811_v2, %v8529_v18  ;;  %v813_v5 = vmul.f32 %v811_v2, %v8535_v25  ;;  %v903_v20 = vstv %s5898_s13  ;;  %s5906_s26 = sld [smem:[#allocation4 + $0xf]]  ;;  %s8259_s13 = smov 61  }
  0x7d   : > { %596 = vrot.lane.b32.xlu1 %v591_v33, %s8246_s23  ;;  %s8252_s23 = smov 94   ;;  %v904_v22 = vmul.f32 %v903_v20, %v8527_v15  ;;  %v922_v26 = vstv %s5899_s4  ;;  %v905_v27 = vmul.f32 %v903_v20, %v8533_v24  ;;  %s5910_s4 = sld [smem:[#allocation4 + $0x11]] }
  0x7e   : > { %612 = vrot.lane.b32.xlu2 %v608_v35, %s8247_s27  ;;  %v923_v28 = vmul.f32 %v922_v26, %v8529_v18  ;;  %v924_v29 = vmul.f32 %v922_v26, %v8535_v25  ;;  %v940_v31 = vstv %s5900_s30  ;;  %s8260_s30 = smov 60  }
  0x7f   : > { %v941_v32 = vmul.f32 %v940_v31, %v8527_v15  ;;  %v959_v34 = vstv %s5901_s28  ;;  %v942_v36 = vmul.f32 %v940_v31, %v8533_v24  ;;  %s5911_s28 = sld [smem:[#allocation4 + $0x42]] }
  0x80   : > { %v977_v39 = vstv %s5902_s19  ;;  %s5912_s19 = sld [smem:[#allocation4 + $0x12]] }
  0x81   : > { %v978_v43 = vmul.f32 %v977_v39, %v8527_v15 }
  0x82   : > { %v1051_v61 = vstv %s5906_s26  ;;  %s8262_s26 = smov 58  }
  0x83   : > { %v1053_v2 = vmul.f32 %v1051_v61, %v8533_v24 }
  0x84   : > { %614 = vrot.lane.b32.xlu0 %v609_v37, %s8247_s27  ;;  %v960_v37 = vmul.f32 %v959_v34, %v8529_v18 }
  0x85   : > { %631 = vrot.lane.b32.xlu1 %v627_v38, %s8247_s27  ;;  %v1144_v26 = vstv %s5911_s28  ;;  %s5920_s28 = sld [smem:[#allocation4 + $0x16]] }
  0x86   : > { %633 = vrot.lane.b32.xlu2 %v628_v40, %s8247_s27  ;;  %s5897_s27 = sld [smem:[#allocation4 + $0x3b]]  ;;  %v961_v40 = vmul.f32 %v959_v34, %v8535_v25  ;;  %v1145_v31 = vmul.f32 %v1144_v26, %v8529_v18 }
  0x8c   : > { %649 = vrot.lane.b32.xlu0 %v645_v41, %s8248_s10  ;;  %v885_v17 = vstv %s5897_s27  ;;  %s5908_s27 = sld [smem:[#allocation4 + $0x10]] }
  0x8d   : > { %651 = vrot.lane.b32.xlu1 %v646_v42, %s8248_s10  ;;  %v886_v19 = vmul.f32 %v885_v17, %v8529_v18  ;;  %v887_v21 = vmul.f32 %v885_v17, %v8535_v25  ;;  %v1125_v17 = vstv %s5910_s4  ;;  %s8264_s4 = smov 56  }
  0x8e   : > { %668 = vrot.lane.b32.xlu2 %v664_v44, %s8248_s10  ;;  %v979_v44 = vmul.f32 %v977_v39, %v8533_v24 }
  0x94   : > { %670 = vrot.lane.b32.xlu0 %v665_v46, %s8248_s10 }
  0x95   : > { %686 = vrot.lane.b32.xlu1 %v682_v47, %s8249_s8 }
  0x96   : > { %688 = vrot.lane.b32.xlu2 %v683_v49, %s8249_s8  ;;  %v1014_v49 = vstv %s5904_s21  ;;  %s5913_s21 = sld [smem:[#allocation4 + $0x43]] }
  0x97   : > { %v1015_v52 = vmul.f32 %v1014_v49, %v8527_v15 }
  0x9c   : > { %705 = vrot.lane.b32.xlu0 %v701_v50, %s8249_s8 }
  0x9d   : > { %707 = vrot.lane.b32.xlu1 %v702_v51, %s8249_s8 }
  0x9e   : > { %723 = vrot.lane.b32.xlu2 %v719_v53, %s8250_s24 }
  0xa4   : > { %725 = vrot.lane.b32.xlu0 %v720_v55, %s8250_s24  ;;  %v1016_v55 = vmul.f32 %v1014_v49, %v8533_v24 }
  0xa5   : > { %742 = vrot.lane.b32.xlu1 %v738_v56, %s8250_s24 }
  0xa6   : > { %744 = vrot.lane.b32.xlu2 %v739_v58, %s8250_s24 }
  0xac   : > { %760 = vrot.lane.b32.xlu0 %v756_v59, %s8251_s18 }
  0xad   : > { %762 = vrot.lane.b32.xlu1 %v757_v60, %s8251_s18 }
  0xae   : > { %779 = vrot.lane.b32.xlu2 %v775_v62, %s8251_s18  ;;  %v1052_v62 = vmul.f32 %v1051_v61, %v8527_v15 }
  0xb4   : > { %781 = vrot.lane.b32.xlu0 %v776_v0, %s8251_s18  ;;  %s5903_s18 = sld [smem:[#allocation4 + $0x3e]] }
  0xb5   : > { %797 = vrot.lane.b32.xlu1 %v793_v1, %s8252_s23 }
  0xb6   : > { %799 = vrot.lane.b32.xlu2 %v794_v3, %s8252_s23 }
  0xba   : > { %v996_v46 = vstv %s5903_s18  ;;  %s8261_s18 = smov 59  }
  0xbb   : > { %v997_v47 = vmul.f32 %v996_v46, %v8529_v18  ;;  %v998_v51 = vmul.f32 %v996_v46, %v8535_v25 }
  0xbc   : > { %816 = vrot.lane.b32.xlu0 %v812_v4, %s8252_s23 }
  0xbd   : > { %818 = vrot.lane.b32.xlu1 %v813_v5, %s8252_s23  ;;  %s5905_s23 = sld [smem:[#allocation4 + $0x3f]]  ;;  %v1088_v5 = vstv %s5908_s27  ;;  %s8263_s27 = smov 57  }
  0xbe   : > { %834 = vrot.lane.b32.xlu2 %v830_v7, %s8253_s12 }
  0xc3   : > { %v1033_v54 = vstv %s5905_s23  ;;  %s5914_s23 = sld [smem:[#allocation4 + $0x13]] }
  0xc4   : > { %836 = vrot.lane.b32.xlu0 %v831_v9, %s8253_s12  ;;  %v1034_v58 = vmul.f32 %v1033_v54, %v8529_v18  ;;  %v1035_v59 = vmul.f32 %v1033_v54, %v8535_v25  ;;  %v1089_v9 = vmul.f32 %v1088_v5, %v8527_v15 }
  0xc5   : > { %853 = vrot.lane.b32.xlu1 %v849_v10, %s8253_s12  ;;  %v1090_v10 = vmul.f32 %v1088_v5, %v8533_v24 }
  0xc6   : > { %855 = vrot.lane.b32.xlu2 %v850_v12, %s8253_s12  ;;  %s5907_s12 = sld [smem:[#allocation4 + $0x40]] }
  0xc8   : > { %v8585_v16 = vpop.permute.xlu2 %575 }
  0xc9   : > { %v1199_v49 = vstv %s5914_s23  ;;  %s8266_s23 = smov 28  }
  0xcc   : > { %871 = vrot.lane.b32.xlu0 %v867_v13, %s8254_s25  ;;  %v1070_v0 = vstv %s5907_s12  ;;  %s5916_s12 = sld [smem:[#allocation4 + $0x14]] }
  0xcd   : > { %873 = vrot.lane.b32.xlu1 %v868_v14, %s8254_s25  ;;  %v1071_v3 = vmul.f32 %v1070_v0, %v8529_v18  ;;  %v1072_v6 = vmul.f32 %v1070_v0, %v8535_v25 }
  0xce   : > { %890 = vrot.lane.b32.xlu2 %v886_v19, %s8254_s25 }
  0xd0   : > { %v8590_v23 = vpop.permute.xlu2 %577 }
  0xd4   : > { %892 = vrot.lane.b32.xlu0 %v887_v21, %s8254_s25  ;;  %s5909_s25 = sld [smem:[#allocation4 + $0x41]]  ;;  %v1126_v21 = vmul.f32 %v1125_v17, %v8527_v15 }
  0xd5   : > { %908 = vrot.lane.b32.xlu1 %v904_v22, %s8255_s16 }
  0xd6   : > { %910 = vrot.lane.b32.xlu2 %v905_v27, %s8255_s16  ;;  %v1127_v27 = vmul.f32 %v1125_v17, %v8533_v24 }
  0xd8   : > { %v8597_v30 = vpop.permute.xlu2 %612 }
  0xda   : > { %v1107_v12 = vstv %s5909_s25  ;;  %s5918_s25 = sld [smem:[#allocation4 + $0x15]] }
  0xdb   : > { %v1108_v13 = vmul.f32 %v1107_v12, %v8529_v18  ;;  %v1109_v20 = vmul.f32 %v1107_v12, %v8535_v25 }
  0xdc   : > { %927 = vrot.lane.b32.xlu0 %v923_v28, %s8255_s16 }
  0xdd   : > { %929 = vrot.lane.b32.xlu1 %v924_v29, %s8255_s16 }
  0xde   : > { %v8602_v33 = vpop.permute.xlu0 %538  ;;  %945 = vrot.lane.b32.xlu2 %v941_v32, %s8256_s20  ;;  %v1146_v32 = vmul.f32 %v1144_v26, %v8535_v25 }
  0xdf   : > { %v8604_v35 = vpop.permute.xlu1 %557 }
  0xe0   : > { %v8609_v38 = vpop.permute.xlu2 %633 }
  0xe4   : > { %947 = vrot.lane.b32.xlu0 %v942_v36, %s8256_s20  ;;  %v1162_v36 = vstv %s5912_s19  ;;  %s8265_s19 = smov 29  }
  0xe5   : > { %964 = vrot.lane.b32.xlu1 %v960_v37, %s8256_s20  ;;  %v1163_v37 = vmul.f32 %v1162_v36, %v8527_v15 }
  0xe6   : > { %v8614_v41 = vpop.permute.xlu0 %540  ;;  %966 = vrot.lane.b32.xlu2 %v961_v40, %s8256_s20  ;;  %v1181_v40 = vstv %s5913_s21  ;;  %s5922_s21 = sld [smem:[#allocation4 + $0x17]] }
  0xe7   : > { %v8616_v42 = vpop.permute.xlu1 %559  ;;  %v1182_v46 = vmul.f32 %v1181_v40, %v8529_v18 }
  0xe8   : > { %v8621_v45 = vpop.permute.xlu2 %668 }
  0xec   : > { %982 = vrot.lane.b32.xlu0 %v978_v43, %s8257_s29 }
  0xed   : > { %984 = vrot.lane.b32.xlu1 %v979_v44, %s8257_s29  ;;  %v1164_v44 = vmul.f32 %v1162_v36, %v8533_v24 }
  0xee   : > { %v8626_v48 = vpop.permute.xlu0 %594  ;;  %1001 = vrot.lane.b32.xlu2 %v997_v47, %s8257_s29 }
  0xef   : > { %v8628_v50 = vpop.permute.xlu1 %596 }
  0xf0   : > { %v8633_v53 = vpop.permute.xlu2 %688 }
  0xf4   : > { %1003 = vrot.lane.b32.xlu0 %v998_v51, %s8257_s29  ;;  %v1183_v51 = vmul.f32 %v1181_v40, %v8535_v25 }
  0xf5   : > { %1019 = vrot.lane.b32.xlu1 %v1015_v52, %s8258_s22 }
  0xf6   : > { %v8637_v56 = vpop.permute.xlu0 %614  ;;  %1021 = vrot.lane.b32.xlu2 %v1016_v55, %s8258_s22  ;;  %v1200_v55 = vmul.f32 %v1199_v49, %v8527_v15 }
  0xf7   : > { %v8639_v57 = vpop.permute.xlu1 %631 }
  0xf8   : > { %v8643_v60 = vpop.permute.xlu2 %723 }
  0xfc   : > { %1038 = vrot.lane.b32.xlu0 %v1034_v58, %s8258_s22  ;;  %v1201_v58 = vmul.f32 %v1199_v49, %v8533_v24  ;;  %v1310_v49 = vstv %s5920_s28  ;;  %s8759_s28 = sld [smem:[#allocation4 + $0x49]] }
  0xfd   : > { %1040 = vrot.lane.b32.xlu1 %v1035_v59, %s8258_s22  ;;  %s5915_s22 = sld [smem:[#allocation4 + $0x44]] }
  0xfe   : > { %v8646_v63 = vpop.permute.xlu0 %649  ;;  %1056 = vrot.lane.b32.xlu2 %v1052_v62, %s8259_s13 }
  0xff   : > { %v8648_v1 = vpop.permute.xlu1 %651 }
 0x100   : > { %v8652_v4 = vpop.permute.xlu2 %744 }
 0x103   : > { %v1218_v61 = vstv %s5915_s22  ;;  %s5923_s22 = sld [smem:[#allocation4 + $0x48]] }
 0x104   : > { %1058 = vrot.lane.b32.xlu0 %v1053_v2, %s8259_s13  ;;  %v1219_v62 = vmul.f32 %v1218_v61, %v8529_v18  ;;  %v1236_v2 = vstv %s5916_s12  ;;  %v1220_v5 = vmul.f32 %v1218_v61, %v8535_v25  ;;  %v1311_v61 = vmul.f32 %v1310_v49, %v8527_v15  ;;  %s5877_s12 = sld [smem:[#allocation4 + $0x31]] }
 0x105   : > { %1075 = vrot.lane.b32.xlu1 %v1071_v3, %s8259_s13  ;;  %v1238_v12 = vmul.f32 %v1236_v2, %v8533_v24 }
 0x106   : > { %v8655_v7 = vpop.permute.xlu0 %670  ;;  %1077 = vrot.lane.b32.xlu2 %v1072_v6, %s8259_s13  ;;  %s5917_s13 = sld [smem:[#allocation4 + $0x45]]  ;;  %v1237_v6 = vmul.f32 %v1236_v2, %v8527_v15 }
 0x107   : > { %v8657_v8 = vpop.permute.xlu1 %686 }
 0x108   : > { %v8661_v11 = vpop.permute.xlu2 %779 }
 0x10c   : > { %1093 = vrot.lane.b32.xlu0 %v1089_v9, %s8260_s30 }
 0x10d   : > { %1095 = vrot.lane.b32.xlu1 %v1090_v10, %s8260_s30  ;;  %v1255_v10 = vstv %s5917_s13  ;;  %s5924_s13 = sld [smem:[#allocation4 + $0x18]] }
 0x10e   : > { %v8664_v14 = vpop.permute.xlu0 %705  ;;  %1112 = vrot.lane.b32.xlu2 %v1108_v13, %s8260_s30 }
 0x10f   : > { %v8666_v19 = vpop.permute.xlu1 %707 }
 0x110   : > { %v8670_v22 = vpop.permute.xlu2 %799 }
 0x114   : > { %1114 = vrot.lane.b32.xlu0 %v1109_v20, %s8260_s30  ;;  %s5919_s30 = sld [smem:[#allocation4 + $0x46]]  ;;  %v1256_v20 = vmul.f32 %v1255_v10, %v8529_v18 }
 0x115   : > { %1130 = vrot.lane.b32.xlu1 %v1126_v21, %s8261_s18  ;;  %v1257_v21 = vmul.f32 %v1255_v10, %v8535_v25 }
 0x116   : > { %v8673_v28 = vpop.permute.xlu0 %725  ;;  %1132 = vrot.lane.b32.xlu2 %v1127_v27, %s8261_s18  ;;  %v1273_v27 = vstv %s5918_s25  ;;  %s520_s25 = sld [smem:[#allocation4]] }
 0x117   : > { %v8675_v29 = vpop.permute.xlu1 %742  ;;  %v1275_v40 = vmul.f32 %v1273_v27, %v8533_v24 }
 0x118   : > { %v8679_v34 = vpop.permute.xlu2 %834 }
 0x11a   : > { %v1292_v36 = vstv %s5919_s30  ;;  %s8267_s30 = smov 27  }
 0x11c   : > { %1149 = vrot.lane.b32.xlu0 %v1145_v31, %s8261_s18  ;;  %v1274_v31 = vmul.f32 %v1273_v27, %v8527_v15 }
 0x11d   : > { %1151 = vrot.lane.b32.xlu1 %v1146_v32, %s8261_s18  ;;  %s5921_s18 = sld [smem:[#allocation4 + $0x47]] }
 0x11e   : > { %v8682_v39 = vpop.permute.xlu0 %760  ;;  %1167 = vrot.lane.b32.xlu2 %v1163_v37, %s8262_s26 }
 0x11f   : > { %v8684_v43 = vpop.permute.xlu1 %762 }
 0x120   : > { %v8689_v47 = vpop.permute.xlu2 %855 }
 0x124   : > { %1169 = vrot.lane.b32.xlu0 %v1164_v44, %s8262_s26  ;;  %v1293_v44 = vmul.f32 %v1292_v36, %v8529_v18 }
 0x125   : > { %1186 = vrot.lane.b32.xlu1 %v1182_v46, %s8262_s26 }
 0x126   : > { %v8694_v52 = vpop.permute.xlu0 %781  ;;  %1188 = vrot.lane.b32.xlu2 %v1183_v51, %s8262_s26  ;;  %v1294_v51 = vmul.f32 %v1292_v36, %v8535_v25  ;;  %v1366_v36 = vstv %s5923_s22  ;;  %s8269_s22 = smov 25  }
 0x127   : > { %v8696_v54 = vpop.permute.xlu1 %797 }
 0x128   : > { %v8701_v59 = vpop.permute.xlu2 %890 }
 0x12c   : > { %1204 = vrot.lane.b32.xlu0 %v1200_v55, %s8263_s27 }
 0x12d   : > { %1206 = vrot.lane.b32.xlu1 %v1201_v58, %s8263_s27 }
 0x12e   : > { %v8706_v0 = vpop.permute.xlu0 %816  ;;  %1223 = vrot.lane.b32.xlu2 %v1219_v62, %s8263_s27  ;;  %v1312_v62 = vmul.f32 %v1310_v49, %v8533_v24 }
 0x12f   : > { %v8708_v3 = vpop.permute.xlu1 %818 }
 0x130   : > { %v8713_v9 = vpop.permute.xlu2 %910 }
 0x134   : > { %1225 = vrot.lane.b32.xlu0 %v1220_v5, %s8263_s27  ;;  %v1329_v5 = vstv %s5921_s18  ;;  %s8268_s18 = smov 26  }
 0x135   : > { %1241 = vrot.lane.b32.xlu1 %v1237_v6, %s8264_s4  ;;  %v1330_v6 = vmul.f32 %v1329_v5, %v8529_v18 }
 0x136   : > { %v8718_v13 = vpop.permute.xlu0 %836  ;;  %1243 = vrot.lane.b32.xlu2 %v1238_v12, %s8264_s4  ;;  %v1347_v12 = vstv %s5922_s21  ;;  %s8785_s21 = sld [smem:[#allocation4 + $0x4a]] }
 0x137   : > { %v8720_v17 = vpop.permute.xlu1 %853  ;;  %v1348_v27 = vmul.f32 %v1347_v12, %v8527_v15 }
 0x138   : > { %v8725_v26 = vpop.permute.xlu2 %945 }
 0x139   : > { %11015 = vst [vmem:[#allocation27_spill] sm:$0xff] %v8725_v26 }
 0x13c   : > { %1260 = vrot.lane.b32.xlu0 %v1256_v20, %s8264_s4 }
 0x13d   : > { %1262 = vrot.lane.b32.xlu1 %v1257_v21, %s8264_s4  ;;  %v1331_v21 = vmul.f32 %v1329_v5, %v8535_v25  ;;  %v527_v5 = vstv %s5877_s12  ;;  %s8818_s12 = sld [smem:[#allocation4 + $0x4b]] }
 0x13e   : > { %v8730_v32 = vpop.permute.xlu0 %871  ;;  %1278 = vrot.lane.b32.xlu2 %v1274_v31, %s8265_s19 }
 0x13f   : > { %v8732_v37 = vpop.permute.xlu1 %873 }
 0x140   : > { %v8736_v46 = vpop.permute.xlu2 %966 }
 0x141   : > { %11016 = vst [vmem:[#allocation28_spill] sm:$0xff] %v8736_v46 }
 0x144   : > { %1280 = vrot.lane.b32.xlu0 %v1275_v40, %s8265_s19  ;;  %v1349_v40 = vmul.f32 %v1347_v12, %v8533_v24 }
 0x145   : > { %1297 = vrot.lane.b32.xlu1 %v1293_v44, %s8265_s19 }
 0x146   : > { %v8739_v55 = vpop.permute.xlu0 %892  ;;  %1299 = vrot.lane.b32.xlu2 %v1294_v51, %s8265_s19  ;;  %v1367_v51 = vmul.f32 %v1366_v36, %v8529_v18  ;;  %s8767_s19 = sld [smem:[#allocation4 + $0x19]] }
 0x147   : > { %v8741_v58 = vpop.permute.xlu1 %908 }
 0x148   : > { %v8745_v2 = vpop.permute.xlu2 %1001 }
 0x149   : > { %11017 = vst [vmem:[#allocation29_spill] sm:$0xff] %v8745_v2  ;;  %v528_v2 = vmul.f32 %v527_v5, %v8529_v18 }
 0x14c   : > { %1315 = vrot.lane.b32.xlu0 %v1311_v61, %s8266_s23  ;;  %v1368_v61 = vmul.f32 %v1366_v36, %v8535_v25 }
 0x14d   : > { %1317 = vrot.lane.b32.xlu1 %v1312_v62, %s8266_s23 }
 0x14e   : > { %v8748_v10 = vpop.permute.xlu0 %927  ;;  %1334 = vrot.lane.b32.xlu2 %v1330_v6, %s8266_s23  ;;  %v1384_v6 = vstv %s5924_s13  ;;  %s8848_s13 = sld [smem:[#allocation4 + $0x1b]] }
 0x14f   : > { %11018 = vst [vmem:[#allocation30_spill] sm:$0xff] %v8748_v10  ;;  %v8750_v20 = vpop.permute.xlu1 %929  ;;  %v1385_v12 = vmul.f32 %v1384_v6, %v8527_v15  ;;  %v562_v10 = vrot.slane %v8616_v42, 1 }
 0x150   : > { %11019 = vst [vmem:[#allocation31_spill] sm:$0xff] %v8750_v20  ;;  %v8754_v31 = vpop.permute.xlu2 %1021 }
 0x151   : > { %11020 = vst [vmem:[#allocation32_spill] sm:$0xff] %v8754_v31  ;;  %v1403_v31 = vstv %s8759_s28  ;;  %s8271_s28 = smov 23  }
 0x152   : > { %v1405_v20 = vmul.f32 %v1403_v31, %v8535_v25 }
 0x154   : > { %1336 = vrot.lane.b32.xlu0 %v1331_v21, %s8266_s23  ;;  %v521_v21 = vstv %s520_s25  ;;  %s8797_s23 = sld [smem:[#allocation4 + $0x1a]]  ;;  %s8270_s25 = smov 24  }
 0x155   : > { %1352 = vrot.lane.b32.xlu1 %v1348_v27, %s8267_s30  ;;  %v522_v36 = vmul.f32 %v521_v21, %v8527_v15 }
 0x156   : > { %v8757_v44 = vpop.permute.xlu0 %947  ;;  %1354 = vrot.lane.b32.xlu2 %v1349_v40, %s8267_s30  ;;  %v523_v40 = vmul.f32 %v521_v21, %v8533_v24  ;;  %v1421_v21 = vstv %s8767_s19  ;;  %s8275_s19 = smov 118  }
 0x157   : > { %11021 = vst [vmem:[#allocation33_spill] sm:$0xff] %v8757_v44  ;;  %v8761_v49 = vpop.permute.xlu1 %964 }
 0x158   : > { %11022 = vst [vmem:[#allocation34_spill] sm:$0xff] %v8761_v49  ;;  %v8765_v62 = vpop.permute.xlu2 %1056  ;;  %v1404_v49 = vmul.f32 %v1403_v31, %v8529_v18  ;;  %v579_v31 = vrot.slane %v8585_v16, 1 }
 0x159   : > { %11023 = vst [vmem:[#allocation35_spill] sm:$0xff] %v8765_v62  ;;  %v542_v62 = vrot.slane %v8602_v33, 1 }
 0x15c   : > { %1371 = vrot.lane.b32.xlu0 %v1367_v51, %s8267_s30  ;;  %v529_v51 = vmul.f32 %v527_v5, %v8535_v25  ;;  %v545_v5 = vsel %vm544_vm0, %v8602_v33, %v542_v62  ;;  %v1422_v33 = vmul.f32 %v1421_v21, %v8527_v15 }
 0x15d   : > { %1373 = vrot.lane.b32.xlu1 %v1368_v61, %s8267_s30  ;;  %v1386_v61 = vmul.f32 %v1384_v6, %v8533_v24  ;;  %v561_v6 = vrot.slane %v8604_v35, 1  ;;  %s8860_s30 = sld [smem:[#allocation4 + $0x4c]] }
 0x15e   : > { %v8770_v27 = vpop.permute.xlu0 %982  ;;  %1389 = vrot.lane.b32.xlu2 %v1385_v12, %s8268_s18  ;;  %v531_v44 = vadd.f32 %v529_v51, %v523_v40  ;;  %v580_v40 = vrot.slane %v8590_v23, 1 }
 0x15f   : > { %11024 = vst [vmem:[#allocation36_spill] sm:$0xff] %v8770_v27  ;;  %v8774_v46 = vpop.permute.xlu1 %984  ;;  %v543_v27 = vrot.slane %v8614_v41, 1 }
 0x160   : > { %11025 = vst [vmem:[#allocation37_spill] sm:$0xff] %v8774_v46  ;;  %v8783_v26 = vpop.permute.xlu2 %1077  ;;  %v530_v46 = vadd.f32 %v528_v2, %v522_v36 }
 0x161   : > { %11026 = vst [vmem:[#allocation38_spill] sm:$0xff] %v8783_v26  ;;  %v546_v12 = vsel %vm544_vm0, %v8614_v41, %v543_v27  ;;  %v1423_v41 = vmul.f32 %v1421_v21, %v8533_v24  ;;  %v564_v27 = vsel %vm544_vm0, %v8616_v42, %v562_v10  ;;  %v583_v10 = vsel %vm581_vm1, %v8590_v23, %v580_v40 }
 0x162   : > { %v549_v36 = vadd.f32 %v545_v5, %v530_v46  ;;  %v550_v62 = vadd.f32 %v546_v12, %v531_v44  ;;  %v598_v46 = vrot.slane %v8626_v48, 1  ;;  %v1440_v44 = vstv %s8785_s21  ;;  %s9424_s21 = sld [smem:[#allocation4 + $0x52]] }
 0x163   : > { %v1441_v42 = vmul.f32 %v1440_v44, %v8529_v18  ;;  %v1458_v12 = vstv %s8797_s23  ;;  %s9442_s23 = sld [smem:[#allocation4 + $0x53]] }
 0x164   : > { %1391 = vrot.lane.b32.xlu0 %v1386_v61, %s8268_s18  ;;  %v568_v5 = vadd.f32 %v564_v27, %v550_v62  ;;  %v1442_v62 = vmul.f32 %v1440_v44, %v8535_v25  ;;  %v1459_v27 = vmul.f32 %v1458_v12, %v8527_v15 }
 0x165   : > { %1408 = vrot.lane.b32.xlu1 %v1404_v49, %s8268_s18  ;;  %v563_v49 = vsel %vm544_vm0, %v8604_v35, %v561_v6  ;;  %v599_v35 = vrot.slane %v8628_v50, 1  ;;  %v617_v6 = vrot.slane %v8637_v56, 1  ;;  %vm1136_vm0 = vcmask 482304  }
 0x166   : > { %v8795_v26 = vpop.permute.xlu0 %1003  ;;  %1410 = vrot.lane.b32.xlu2 %v1405_v20, %s8268_s18  ;;  %v567_v61 = vadd.f32 %v563_v49, %v549_v36  ;;  %v582_v20 = vsel %vm581_vm1, %v8585_v16, %v579_v31  ;;  %v600_v36 = vsel %vm581_vm1, %v8626_v48, %v598_v46  ;;  %v616_v16 = vrot.slane %v8597_v30, 1  ;;  %s8277_s18 = smov 87  }
 0x167   : > { %v8799_v2 = vpop.permute.xlu1 %1019  ;;  %v601_v31 = vsel %vm581_vm1, %v8628_v50, %v599_v35  ;;  %v587_v23 = vadd.f32 %v583_v10, %v568_v5  ;;  %v620_v40 = vsel %vm618_vm2, %v8637_v56, %v617_v6  ;;  %v636_v46 = vrot.slane %v8609_v38, 1 }
 0x168   : > { %v8810_v51 = vpop.permute.xlu2 %1112  ;;  %v586_v49 = vadd.f32 %v582_v20, %v567_v61  ;;  %v619_v50 = vsel %vm618_vm2, %v8597_v30, %v616_v16  ;;  %v653_v35 = vrot.slane %v8646_v63, 1  ;;  %v654_v20 = vrot.slane %v8648_v1, 1 }
 0x169   : > { %v605_v61 = vadd.f32 %v601_v31, %v587_v23  ;;  %v1460_v30 = vmul.f32 %v1458_v12, %v8533_v24  ;;  %v638_v6 = vsel %vm618_vm2, %v8609_v38, %v636_v46  ;;  %vm1173_vm1 = vcmask 474112  }
 0x16a   : > { %v604_v48 = vadd.f32 %v600_v36, %v586_v49  ;;  %v673_v36 = vrot.slane %v8655_v7, 1  ;;  %v656_v49 = vsel %vm655_vm3, %v8646_v63, %v653_v35  ;;  %v657_v12 = vsel %vm655_vm3, %v8648_v1, %v654_v20 }
 0x16b   : > { %v624_v5 = vadd.f32 %v620_v40, %v605_v61  ;;  %v691_v40 = vrot.slane %v8633_v53, 1  ;;  %v709_v61 = vrot.slane %v8664_v14, 1  ;;  %v710_v35 = vrot.slane %v8666_v19, 1 }
 0x16c   : > { %1426 = vrot.lane.b32.xlu0 %v1422_v33, %s8269_s22  ;;  %v623_v10 = vadd.f32 %v619_v50, %v604_v48  ;;  %v675_v63 = vsel %vm655_vm3, %v8655_v7, %v673_v36  ;;  %v1495_v20 = vstv %s8848_s13  ;;  %s9339_s13 = sld [smem:[#allocation4 + $0x1e]] }
 0x16d   : > { %1428 = vrot.lane.b32.xlu1 %v1423_v41, %s8269_s22  ;;  %v635_v41 = vrot.slane %v8639_v57, 1  ;;  %v642_v23 = vadd.f32 %v638_v6, %v624_v5  ;;  %v1514_v6 = vstv %s8860_s30  ;;  %v711_v36 = vsel %vm692_vm4, %v8664_v14, %v709_v61  ;;  %s8276_s30 = smov 88  }
 0x16e   : > { %v8824_v21 = vpop.permute.xlu0 %1038  ;;  %1445 = vrot.lane.b32.xlu2 %v1441_v42, %s8269_s22  ;;  %v1477_v42 = vstv %s8818_s12  ;;  %s9323_s12 = sld [smem:[#allocation4 + $0x1d]] }
 0x16f   : > { %v8830_v33 = vpop.permute.xlu1 %1040  ;;  %v637_v56 = vsel %vm618_vm2, %v8639_v57, %v635_v41  ;;  %v672_v57 = vrot.slane %v8621_v45, 1  ;;  %v1478_v38 = vmul.f32 %v1477_v42, %v8529_v18  ;;  %v690_v41 = vrot.slane %v8657_v8, 1 }
 0x170   : > { %v8844_v44 = vpop.permute.xlu2 %1132  ;;  %v661_v46 = vadd.f32 %v657_v12, %v642_v23  ;;  %v1497_v12 = vmul.f32 %v1495_v20, %v8533_v24  ;;  %v1515_v23 = vmul.f32 %v1514_v6, %v8529_v18  ;;  %vm1210_vm2 = vcmask 465920  }
 0x171   : > { %v674_v1 = vsel %vm655_vm3, %v8621_v45, %v672_v57  ;;  %v693_v7 = vsel %vm692_vm4, %v8657_v8, %v690_v41  ;;  %v694_v45 = vsel %vm692_vm4, %v8633_v53, %v691_v40 }
 0x172   : > { %v679_v5 = vadd.f32 %v675_v63, %v661_v46  ;;  %v764_v63 = vrot.slane %v8682_v39, 1  ;;  %v765_v46 = vrot.slane %v8684_v43, 1 }
 0x174   : > { %1447 = vrot.lane.b32.xlu0 %v1442_v62, %s8269_s22  ;;  %v641_v62 = vadd.f32 %v637_v56, %v623_v10  ;;  %v1496_v56 = vmul.f32 %v1495_v20, %v8527_v15  ;;  %v698_v53 = vadd.f32 %v694_v45, %v679_v5  ;;  %s9309_s22 = sld [smem:[#allocation4 + $0x4d]] }
 0x175   : > { %1463 = vrot.lane.b32.xlu1 %v1459_v27, %s8270_s25  ;;  %v1479_v27 = vmul.f32 %v1477_v42, %v8535_v25 }
 0x176   : > { %v8858_v16 = vpop.permute.xlu0 %1058  ;;  %1465 = vrot.lane.b32.xlu2 %v1460_v30, %s8270_s25  ;;  %v660_v48 = vadd.f32 %v656_v49, %v641_v62  ;;  %v728_v30 = vrot.slane %v8673_v28, 1  ;;  %v727_v49 = vrot.slane %v8643_v60, 1  ;;  %v712_v62 = vsel %vm692_vm4, %v8666_v19, %v710_v35 }
 0x177   : > { %v8865_v31 = vpop.permute.xlu1 %1075 }
 0x178   : > { %v8879_v50 = vpop.permute.xlu2 %1167  ;;  %v678_v42 = vadd.f32 %v674_v1, %v660_v48  ;;  %v731_v14 = vsel %vm729_vm5, %v8673_v28, %v728_v30  ;;  %v716_v48 = vadd.f32 %v712_v62, %v698_v53  ;;  %v730_v19 = vsel %vm729_vm5, %v8643_v60, %v727_v49 }
 0x179   : > { %v1516_v28 = vmul.f32 %v1514_v6, %v8535_v25  ;;  %v784_v60 = vrot.slane %v8694_v52, 1  ;;  %v801_v6 = vrot.slane %v8696_v54, 1  ;;  %v802_v49 = vrot.slane %v8670_v22, 1 }
 0x17a   : > { %v697_v8 = vadd.f32 %v693_v7, %v678_v42  ;;  %v735_v1 = vadd.f32 %v731_v14, %v716_v48  ;;  %v767_v7 = vsel %vm766_vm6, %v8682_v39, %v764_v63  ;;  %v820_v62 = vrot.slane %v8706_v0, 1 }
 0x17c   : > { %1482 = vrot.lane.b32.xlu0 %v1478_v38, %s8270_s25  ;;  %v746_v38 = vrot.slane %v8675_v29, 1  ;;  %v715_v41 = vadd.f32 %v711_v36, %v697_v8  ;;  %v786_v36 = vsel %vm766_vm6, %v8694_v52, %v784_v60  ;;  %v804_v52 = vsel %vm803_vm7, %v8696_v54, %v801_v6 }
 0x17d   : > { %1484 = vrot.lane.b32.xlu1 %v1479_v27, %s8270_s25  ;;  %v747_v27 = vrot.slane %v8652_v4, 1  ;;  %v822_v14 = vsel %vm803_vm7, %v8706_v0, %v820_v62  ;;  %v858_v0 = vrot.slane %v8689_v47, 1  ;;  %s9354_s25 = sld [smem:[#allocation4 + $0x4f]] }
 0x17e   : > { %v8891_v10 = vpop.permute.xlu0 %1093  ;;  %1500 = vrot.lane.b32.xlu2 %v1496_v56, %s8271_s28  ;;  %v748_v61 = vsel %vm729_vm5, %v8675_v29, %v746_v38  ;;  %v734_v35 = vadd.f32 %v730_v19, %v715_v41  ;;  %v783_v56 = vrot.slane %v8661_v11, 1  ;;  %v768_v29 = vsel %vm766_vm6, %v8684_v43, %v765_v46 }
 0x17f   : > { %v8897_v57 = vpop.permute.xlu1 %1095  ;;  %v749_v20 = vsel %vm729_vm5, %v8652_v4, %v747_v27  ;;  %v821_v43 = vrot.slane %v8708_v3, 1  ;;  %v838_v27 = vrot.slane %v8679_v34, 1  ;;  %v857_v46 = vrot.slane %v8720_v17, 1 }
 0x180   : > { %v8910_v40 = vpop.permute.xlu2 %1188  ;;  %v752_v45 = vadd.f32 %v748_v61, %v734_v35  ;;  %v753_v30 = vadd.f32 %v749_v20, %v735_v1  ;;  %v785_v8 = vsel %vm766_vm6, %v8661_v11, %v783_v56  ;;  %v805_v11 = vsel %vm803_vm7, %v8670_v22, %v802_v49 }
 0x181   : > { %v823_v54 = vsel %vm803_vm7, %v8708_v3, %v821_v43  ;;  %v875_v35 = vrot.slane %v8730_v32, 1  ;;  %v876_v20 = vrot.slane %v8732_v37, 1  ;;  %v895_v56 = vrot.slane %v8739_v55, 1  ;;  %v11027_v43 = vld [vmem:[#allocation30_spill] sm:$0xff] }
 0x182   : > { %v771_v4 = vadd.f32 %v767_v7, %v752_v45  ;;  %v772_v39 = vadd.f32 %v768_v29, %v753_v30  ;;  %v894_v30 = vrot.slane %v8701_v59, 1  ;;  %v912_v49 = vrot.slane %v8741_v58, 1 }
 0x183   : > { %v878_v29 = vsel %vm877_vm9, %v8730_v32, %v875_v35  ;;  %v913_v32 = vrot.slane %v8713_v9, 1  ;;  %vm1247_vm6 = vcmask 457728   ;;  %vm1284_vm7 = vcmask 236544  }
 0x184   : > { %1502 = vrot.lane.b32.xlu0 %v1497_v12, %s8271_s28  ;;  %v790_v53 = vadd.f32 %v786_v36, %v772_v39  ;;  %v789_v38 = vadd.f32 %v785_v8, %v771_v4  ;;  %v897_v39 = vsel %vm877_vm9, %v8739_v55, %v895_v56  ;;  %v896_v62 = vsel %vm877_vm9, %v8701_v59, %v894_v30  ;;  %v11034_v30 = vld [vmem:[#allocation37_spill] sm:$0xff] }
 0x185   : > { %1519 = vrot.lane.b32.xlu1 %v1515_v23, %s8271_s28  ;;  %v839_v23 = vrot.slane %v8718_v13, 1  ;;  %v915_v55 = vsel %vm914_vm10, %v8741_v58, %v912_v49  ;;  %v916_v59 = vsel %vm914_vm10, %v8713_v9, %v913_v32 }
 0x186   : > { %v8919_v5 = vpop.permute.xlu0 %1114  ;;  %1521 = vrot.lane.b32.xlu2 %v1516_v28, %s8271_s28  ;;  %v808_v19 = vadd.f32 %v804_v52, %v789_v38  ;;  %v809_v63 = vadd.f32 %v805_v11, %v790_v53  ;;  %v841_v28 = vsel %vm840_vm8, %v8679_v34, %v838_v27  ;;  %v860_v34 = vsel %vm840_vm8, %v8689_v47, %v858_v0  ;;  %v11028_v52 = vld [vmem:[#allocation31_spill] sm:$0xff]  ;;  %s9368_s28 = sld [smem:[#allocation4 + $0x1f]] }
 0x187   : > { %v8924_v42 = vpop.permute.xlu1 %1130  ;;  %v842_v1 = vsel %vm840_vm8, %v8718_v13, %v839_v23  ;;  %v859_v13 = vsel %vm840_vm8, %v8720_v17, %v857_v46  ;;  %v879_v17 = vsel %vm877_vm9, %v8732_v37, %v876_v20  ;;  %v931_v53 = vrot.slane %v11027_v43, 1  ;;  %v11032_v20 = vld [vmem:[#allocation28_spill] sm:$0xff] }
 0x188   : > { %v8935_v12 = vpop.permute.xlu2 %1223  ;;  %v826_v22 = vadd.f32 %v822_v14, %v808_v19  ;;  %v827_v61 = vadd.f32 %v823_v54, %v809_v63  ;;  %v932_v38 = vrot.slane %v11028_v52, 1  ;;  %v11029_v14 = vld [vmem:[#allocation33_spill] sm:$0xff]  ;;  %v11030_v63 = vld [vmem:[#allocation27_spill] sm:$0xff]  ;;  %vm1321_vm8 = vcmask 228352  }
 0x189   : > { %v950_v27 = vrot.slane %v11029_v14, 1  ;;  %v933_v54 = vsel %vm914_vm10, %v11027_v43, %v931_v53  ;;  %v949_v46 = vrot.slane %v11030_v63, 1  ;;  %vm1358_vm9 = vcmask 220160  }
 0x18a   : > { %v846_v60 = vadd.f32 %v842_v1, %v827_v61  ;;  %v845_v7 = vadd.f32 %v841_v28, %v826_v22  ;;  %v934_v58 = vsel %vm914_vm10, %v11028_v52, %v932_v38  ;;  %v11031_v61 = vld [vmem:[#allocation34_spill] sm:$0xff] }
 0x18b   : > { %v968_v28 = vrot.slane %v11031_v61, 1  ;;  %v953_v35 = vsel %vm951_vm11, %v11029_v14, %v950_v27  ;;  %v11036_v14 = vld [vmem:[#allocation32_spill] sm:$0xff] }
 0x18c   : > { %1535 = vrot.lane.b32.xlu0 %v8527_v15, %s8248_s10  ;;  %v863_v4 = vadd.f32 %v859_v13, %v845_v7  ;;  %v864_v36 = vadd.f32 %v860_v34, %v846_v60  ;;  %v969_v60 = vrot.slane %v11032_v20, 1  ;;  %v952_v7 = vsel %vm951_vm11, %v11030_v63, %v949_v46  ;;  %v11033_v34 = vld [vmem:[#allocation36_spill] sm:$0xff] }
 0x18d   : > { %1537 = vrot.lane.b32.xlu1 %v8533_v24, %s8248_s10  ;;  %v986_v56 = vrot.slane %v11033_v34, 1  ;;  %v1024_v27 = vrot.slane %v11036_v14, 1  ;;  %v1042_v46 = vrot.slane %v8824_v21, 1 }
 0x18e   : > { %v8947_v41 = vpop.permute.xlu0 %1149  ;;  %1555 = vrot.lane.b32.xlu2 %v8529_v18, %s8248_s10  ;;  %v882_v47 = vadd.f32 %v878_v29, %v863_v4  ;;  %v883_v8 = vadd.f32 %v879_v17, %v864_v36  ;;  %v987_v4 = vrot.slane %v11034_v30, 1  ;;  %v970_v36 = vsel %vm951_vm11, %v11031_v61, %v968_v28 }
 0x18f   : > { %v8952_v48 = vpop.permute.xlu1 %1151  ;;  %v1027_v28 = vsel %vm1025_vm13, %v11036_v14, %v1024_v27 }
 0x190   : > { %v8965_v3 = vpop.permute.xlu2 %1243  ;;  %v901_v11 = vadd.f32 %v897_v39, %v883_v8  ;;  %v900_v23 = vadd.f32 %v896_v62, %v882_v47  ;;  %v971_v47 = vsel %vm951_vm11, %v11032_v20, %v969_v60  ;;  %v1006_v39 = vrot.slane %v8795_v26, 1  ;;  %v11035_v62 = vld [vmem:[#allocation29_spill] sm:$0xff]  ;;  %v11037_v60 = vld [vmem:[#allocation35_spill] sm:$0xff] }
 0x191   : > { %v989_v8 = vsel %vm988_vm12, %v11033_v34, %v986_v56  ;;  %v1005_v43 = vrot.slane %v11035_v62, 1  ;;  %v990_v38 = vsel %vm988_vm12, %v11034_v30, %v987_v4  ;;  %v1044_v20 = vsel %vm1025_vm13, %v8824_v21, %v1042_v46 }
 0x192   : > { %v919_v1 = vadd.f32 %v915_v55, %v900_v23  ;;  %v920_v0 = vadd.f32 %v916_v59, %v901_v11  ;;  %v1023_v55 = vrot.slane %v8799_v2, 1  ;;  %v1008_v59 = vsel %vm988_vm12, %v8795_v26, %v1006_v39 }
 0x193   : > { %v1007_v63 = vsel %vm988_vm12, %v11035_v62, %v1005_v43  ;;  %v1079_v30 = vrot.slane %v8865_v31, 1  ;;  %v1097_v39 = vrot.slane %v8891_v10, 1 }
 0x194   : > { %1557 = vrot.lane.b32.xlu0 %v8535_v25, %s8248_s10  ;;  %v937_v9 = vadd.f32 %v933_v54, %v919_v1  ;;  %v938_v13 = vadd.f32 %v934_v58, %v920_v0  ;;  %v1043_v58 = vrot.slane %v8830_v33, 1  ;;  %s8272_s10 = smov 121   ;;  %v1026_v26 = vsel %vm1025_vm13, %v8799_v2, %v1023_v55 }
 0x195   : > { %1573 = vrot.lane.b32.xlu1 %v8527_v15, %s8249_s8  ;;  %v1081_v43 = vsel %vm1062_vm14, %v8865_v31, %v1079_v30  ;;  %v1100_v55 = vsel %vm1099_vm15, %v8891_v10, %v1097_v39  ;;  %v1135_v10 = vrot.slane %v8844_v44, 1 }
 0x196   : > { %v8977_v45 = vpop.permute.xlu0 %1169  ;;  %1575 = vrot.lane.b32.xlu2 %v8533_v24, %s8249_s8  ;;  %v957_v17 = vadd.f32 %v953_v35, %v938_v13  ;;  %v956_v49 = vadd.f32 %v952_v7, %v937_v9  ;;  %v1061_v9 = vrot.slane %v8858_v16, 1  ;;  %v1060_v13 = vrot.slane %v11037_v60, 1 }
 0x197   : > { %v8982_v6 = vpop.permute.xlu1 %1186  ;;  %v1045_v2 = vsel %vm1025_vm13, %v8830_v33, %v1043_v58  ;;  %v1098_v33 = vrot.slane %v8897_v57, 1  ;;  %vm1395_vm13 = vcmask 211968  }
 0x198   : > { %v8995_v37 = vpop.permute.xlu2 %1278  ;;  %v974_v52 = vadd.f32 %v970_v36, %v956_v49  ;;  %v975_v11 = vadd.f32 %v971_v47, %v957_v17  ;;  %v1064_v17 = vsel %vm1062_vm14, %v8858_v16, %v1061_v9  ;;  %v11038_v36 = vld [vmem:[#allocation38_spill] sm:$0xff]  ;;  %v1063_v47 = vsel %vm1062_vm14, %v11037_v60, %v1060_v13 }
 0x199   : > { %v1080_v21 = vrot.slane %v11038_v36, 1  ;;  %v1101_v31 = vsel %vm1099_vm15, %v8897_v57, %v1098_v33  ;;  %v1154_v57 = vrot.slane %v8952_v48, 1 }
 0x19a   : > { %v993_v23 = vadd.f32 %v989_v8, %v974_v52  ;;  %v994_v54 = vadd.f32 %v990_v38, %v975_v11  ;;  %v1117_v38 = vrot.slane %v8919_v5, 1 }
 0x19b   : > { %v1082_v52 = vsel %vm1062_vm14, %v11038_v36, %v1080_v21  ;;  %vm1432_vm14 = vcmask 203776  }
 0x19c   : > { %1591 = vrot.lane.b32.xlu0 %v8529_v18, %s8249_s8  ;;  %v1012_v0 = vadd.f32 %v1008_v59, %v994_v54  ;;  %v1011_v61 = vadd.f32 %v1007_v63, %v993_v23  ;;  %v1116_v23 = vrot.slane %v8810_v51, 1  ;;  %v1134_v54 = vrot.slane %v8924_v42, 1 }
 0x19d   : > { %1593 = vrot.lane.b32.xlu1 %v8535_v25, %s8249_s8  ;;  %s8273_s8 = smov 120   ;;  %v1119_v46 = vsel %vm1099_vm15, %v8919_v5, %v1117_v38 }
 0x19e   : > { %v9007_v19 = vpop.permute.xlu0 %1204  ;;  %1609 = vrot.lane.b32.xlu2 %v8527_v15, %s8250_s24  ;;  %v1030_v34 = vadd.f32 %v1026_v26, %v1011_v61  ;;  %v1031_v56 = vadd.f32 %v1027_v28, %v1012_v0  ;;  %v1118_v0 = vsel %vm1099_vm15, %v8810_v51, %v1116_v23  ;;  %v1153_v26 = vrot.slane %v8947_v41, 1 }
 0x19f   : > { %v9012_v22 = vpop.permute.xlu1 %1206  ;;  %v1137_v9 = vsel %vm1136_vm0, %v8924_v42, %v1134_v54  ;;  %v1172_v51 = vrot.slane %v8977_v45, 1  ;;  %v1156_v42 = vsel %vm1136_vm0, %v8952_v48, %v1154_v57  ;;  %vm1469_vm15 = vcmask 195584  }
 0x1a0   : > { %v9025_v29 = vpop.permute.xlu2 %1299  ;;  %v1048_v4 = vadd.f32 %v1044_v20, %v1030_v34  ;;  %v1049_v49 = vadd.f32 %v1045_v2, %v1031_v56  ;;  %v1138_v20 = vsel %vm1136_vm0, %v8844_v44, %v1135_v10  ;;  %v1155_v13 = vsel %vm1136_vm0, %v8947_v41, %v1153_v26  ;;  %v5866_v10 = vld [vmem:[%s10973_s0 + $0x21] ss:$4 sm:$0x1] }
 0x1a1   : > { %v1171_v34 = vrot.slane %v8879_v50, 1  ;;  %v1191_v41 = vrot.slane %v8910_v40, 1  ;;  %vm1506_vm0 = vcmask 187392  }
 0x1a2   : > { %v1068_v62 = vadd.f32 %v1064_v17, %v1049_v49  ;;  %v1067_v16 = vadd.f32 %v1063_v47, %v1048_v4  ;;  %v1190_v4 = vrot.slane %v8982_v6, 1  ;;  %v1175_v17 = vsel %vm1173_vm1, %v8977_v45, %v1172_v51 }
 0x1a3   : > { %v1174_v21 = vsel %vm1173_vm1, %v8879_v50, %v1171_v34  ;;  %v1208_v49 = vrot.slane %v9007_v19, 1  ;;  %v1209_v47 = vrot.slane %v9012_v22, 1  ;;  %v1282_v51 = vrot.slane %v8995_v37, 1 }
 0x1a4   : > { %1611 = vrot.lane.b32.xlu0 %v8533_v24, %s8250_s24  ;;  %v1085_v14 = vadd.f32 %v1081_v43, %v1067_v16  ;;  %v1086_v27 = vadd.f32 %v1082_v52, %v1068_v62  ;;  %v1192_v33 = vsel %vm1173_vm1, %v8982_v6, %v1190_v4  ;;  %v1193_v62 = vsel %vm1173_vm1, %v8910_v40, %v1191_v41 }
 0x1a5   : > { %1627 = vrot.lane.b32.xlu1 %v8529_v18, %s8250_s24  ;;  %v1211_v16 = vsel %vm1210_vm2, %v9007_v19, %v1208_v49  ;;  %v1227_v52 = vrot.slane %v8935_v12, 1  ;;  %v1212_v6 = vsel %vm1210_vm2, %v9012_v22, %v1209_v47  ;;  %v1246_v19 = vrot.slane %v8965_v3, 1 }
 0x1a6   : > { %v9037_v32 = vpop.permute.xlu0 %1225  ;;  %1629 = vrot.lane.b32.xlu2 %v8535_v25, %s8250_s24  ;;  %v1104_v63 = vadd.f32 %v1100_v55, %v1085_v14  ;;  %v1105_v58 = vadd.f32 %v1101_v31, %v1086_v27  ;;  %s8274_s24 = smov 119   ;;  %v1302_v41 = vrot.slane %v9025_v29, 1 }
 0x1a7   : > { %v9042_v53 = vpop.permute.xlu1 %1241  ;;  %v1228_v50 = vrot.slane %v9037_v32, 1  ;;  %v1229_v54 = vsel %vm1210_vm2, %v8935_v12, %v1227_v52 }
 0x1a8   : > { %v9055_v1 = vpop.permute.xlu2 %1334  ;;  %v1123_v28 = vadd.f32 %v1119_v46, %v1105_v58  ;;  %v1122_v5 = vadd.f32 %v1118_v0, %v1104_v63  ;;  %v1245_v14 = vrot.slane %v9042_v53, 1  ;;  %v1304_v52 = vsel %vm1284_vm7, %v9025_v29, %v1302_v41 }
 0x1a9   : > { %v1230_v31 = vsel %vm1210_vm2, %v9037_v32, %v1228_v50  ;;  %v5862_v32 = vld [vmem:[%s10973_s0 + $0x20] ss:$4 sm:$0x1] }
 0x1aa   : > { %v1141_v56 = vadd.f32 %v1137_v9, %v1122_v5  ;;  %v1142_v30 = vadd.f32 %v1138_v20, %v1123_v28  ;;  %v1248_v12 = vsel %vm1247_vm6, %v9042_v53, %v1245_v14  ;;  %v477_v26 = vmax.f32 %v5862_v32, %v5866_v10  ;;  %v5864_v5 = vld [vmem:[%s10973_s0 + $0x44] ss:$4 sm:$0x1]  ;;  %v5868_v53 = vld [vmem:[%s10973_s0 + $0x45] ss:$4 sm:$0x1] }
 0x1ab   : > { %v1249_v28 = vsel %vm1247_vm6, %v8965_v3, %v1246_v19  ;;  %v479_v4 = vmax.f32 %v5864_v5, %v5868_v53  ;;  %v1338_v14 = vrot.slane %v9055_v1, 1 }
 0x1ac   : > { %1645 = vrot.lane.b32.xlu0 %v8527_v15, %s8272_s10  ;;  %v1159_v44 = vadd.f32 %v1155_v13, %v1141_v56  ;;  %v1160_v36 = vadd.f32 %v1156_v42, %v1142_v30  ;;  %v5870_v56 = vld [vmem:[%s10973_s0 + $0x22] ss:$4 sm:$0x1] }
 0x1ad   : > { %1647 = vrot.lane.b32.xlu1 %v8533_v24, %s8272_s10 }
 0x1ae   : > { %v9065_v35 = vpop.permute.xlu0 %1260  ;;  %1664 = vrot.lane.b32.xlu2 %v8529_v18, %s8272_s10  ;;  %v1179_v39 = vadd.f32 %v1175_v17, %v1160_v36  ;;  %v1178_v45 = vadd.f32 %v1174_v21, %v1159_v44  ;;  %v1285_v21 = vsel %vm1284_vm7, %v8995_v37, %v1282_v51 }
 0x1af   : > { %v9070_v7 = vpop.permute.xlu1 %1262  ;;  %v1264_v63 = vrot.slane %v9065_v35, 1 }
 0x1b0   : > { %v9082_v8 = vpop.permute.xlu2 %1354  ;;  %v1196_v55 = vadd.f32 %v1192_v33, %v1178_v45  ;;  %v1197_v23 = vadd.f32 %v1193_v62, %v1179_v39  ;;  %v1265_v22 = vrot.slane %v9070_v7, 1  ;;  %v5874_v33 = vld [vmem:[%s10973_s0 + $0x23] ss:$4 sm:$0x1] }
 0x1b1   : > { %v1266_v20 = vsel %vm1247_vm6, %v9065_v35, %v1264_v63  ;;  %v493_v35 = vmax.f32 %v477_v26, %v5870_v56 }
 0x1b2   : > { %v1215_v40 = vadd.f32 %v1211_v16, %v1196_v55  ;;  %v1216_v27 = vadd.f32 %v1212_v6, %v1197_v23  ;;  %v1267_v3 = vsel %vm1247_vm6, %v9070_v7, %v1265_v22  ;;  %v5872_v7 = vld [vmem:[%s10973_s0 + $0x46] ss:$4 sm:$0x1]  ;;  %v5876_v23 = vld [vmem:[%s10973_s0 + $0x47] ss:$4 sm:$0x1]  ;;  %v483_v22 = vadd.f32 %v5868_v53, %v5864_v5 }
 0x1b3   : > { %v495_v37 = vmax.f32 %v479_v4, %v5872_v7  ;;  %v9223_v50 = vmax.f32 %v493_v35, %v5874_v33 }
 0x1b4   : > { %1666 = vrot.lane.b32.xlu0 %v8535_v25, %s8272_s10  ;;  %v1234_v58 = vadd.f32 %v1230_v31, %v1216_v27  ;;  %v1233_v57 = vadd.f32 %v1229_v54, %v1215_v40  ;;  %v499_v5 = vadd.f32 %v5872_v7, %v483_v22  ;;  %s9372_s10 = sld [smem:[#allocation4 + $0x50]] }
 0x1b5   : > { %1682 = vrot.lane.b32.xlu1 %v8527_v15, %s8273_s8  ;;  %v9237_v63 = vmax.f32 %v495_v37, %v5876_v23 }
 0x1b6   : > { %v9092_v11 = vpop.permute.xlu0 %1280  ;;  %1684 = vrot.lane.b32.xlu2 %v8533_v24, %s8273_s8  ;;  %v1252_v34 = vadd.f32 %v1248_v12, %v1233_v57  ;;  %v1253_v42 = vadd.f32 %v1249_v28, %v1234_v58 }
 0x1b7   : > { %v9097_v59 = vpop.permute.xlu1 %1297  ;;  %v1283_v0 = vrot.slane %v9092_v11, 1 }
 0x1b8   : > { %v9109_v61 = vpop.permute.xlu2 %1389  ;;  %v1301_v30 = vrot.slane %v9097_v59, 1  ;;  %v1270_v44 = vadd.f32 %v1266_v20, %v1252_v34  ;;  %v1271_v36 = vadd.f32 %v1267_v3, %v1253_v42 }
 0x1b9   : > { %v1286_v17 = vsel %vm1284_vm7, %v9092_v11, %v1283_v0  ;;  %v481_v11 = vadd.f32 %v5866_v10, %v5862_v32  ;;  %v1357_v10 = vrot.slane %v9082_v8, 1  ;;  %v1393_v3 = vrot.slane %v9109_v61, 1 }
 0x1ba   : > { %v1290_v45 = vadd.f32 %v1286_v17, %v1271_v36  ;;  %v1303_v62 = vsel %vm1284_vm7, %v9097_v59, %v1301_v30  ;;  %v1289_v16 = vadd.f32 %v1285_v21, %v1270_v44  ;;  %vm1764_vm7 = vcmask 965632  }
 0x1bb   : > { %v497_v27 = vadd.f32 %v5870_v56, %v481_v11  ;;  %v1396_v7 = vsel %vm1395_vm13, %v9109_v61, %v1393_v3 }
 0x1bc   : > { %1701 = vrot.lane.b32.xlu0 %v8529_v18, %s8273_s8  ;;  %v1307_v31 = vadd.f32 %v1303_v62, %v1289_v16  ;;  %v1308_v54 = vadd.f32 %v1304_v52, %v1290_v45 }
 0x1bd   : > { %1703 = vrot.lane.b32.xlu1 %v8535_v25, %s8273_s8  ;;  %v513_v57 = vadd.f32 %v5874_v33, %v497_v27  ;;  %s9403_s8 = sld [smem:[#allocation4 + $0x51]] }
 0x1be   : > { %v9119_v60 = vpop.permute.xlu0 %1315  ;;  %1719 = vrot.lane.b32.xlu2 %v8527_v15, %s8274_s24 }
 0x1bf   : > { %v9124_v2 = vpop.permute.xlu1 %1317  ;;  %v1319_v49 = vrot.slane %v9119_v60, 1  ;;  %v9263_v30 = vmul.f32 0.25, %v513_v57 }
 0x1c0   : > { %v9136_v48 = vpop.permute.xlu2 %1410  ;;  %v1320_v39 = vrot.slane %v9124_v2, 1 }
 0x1c1   : > { %v1322_v59 = vsel %vm1321_vm8, %v9119_v60, %v1319_v49 }
 0x1c2   : > { %v1323_v19 = vsel %vm1321_vm8, %v9124_v2, %v1320_v39  ;;  %v1326_v32 = vadd.f32 %v1322_v59, %v1307_v31  ;;  %v1340_v2 = vsel %vm1321_vm8, %v9055_v1, %v1338_v14  ;;  %v1360_v1 = vsel %vm1358_vm9, %v9082_v8, %v1357_v10 }
 0x1c3   : > { %v1327_v58 = vadd.f32 %v1323_v19, %v1308_v54  ;;  %v515_v8 = vadd.f32 %v5876_v23, %v499_v5 }
 0x1c4   : > { %1721 = vrot.lane.b32.xlu0 %v8533_v24, %s8274_s24  ;;  %v1344_v53 = vadd.f32 %v1340_v2, %v1326_v32 }
 0x1c5   : > { %1738 = vrot.lane.b32.xlu1 %v8529_v18, %s8274_s24  ;;  %v9276_v11 = vmul.f32 0.25, %v515_v8 }
 0x1c6   : > { %v9146_v43 = vpop.permute.xlu0 %1336  ;;  %1740 = vrot.lane.b32.xlu2 %v8535_v25, %s8274_s24  ;;  %s9407_s24 = sld [smem:[#allocation4 + $0x21]] }
 0x1c7   : > { %v9151_v38 = vpop.permute.xlu1 %1352  ;;  %v1339_v55 = vrot.slane %v9146_v43, 1 }
 0x1c8   : > { %v9164_v46 = vpop.permute.xlu2 %1445  ;;  %v1356_v29 = vrot.slane %v9151_v38, 1 }
 0x1c9   : > { %v1341_v60 = vsel %vm1321_vm8, %v9146_v43, %v1339_v55  ;;  %v1449_v37 = vrot.slane %v9164_v46, 1  ;;  %vm1809_vm8 = vcmask 1045504  }
 0x1ca   : > { %v1345_v28 = vadd.f32 %v1341_v60, %v1327_v58  ;;  %v1359_v43 = vsel %vm1358_vm9, %v9151_v38, %v1356_v29 }
 0x1cb   : > { %v1363_v42 = vadd.f32 %v1359_v43, %v1344_v53  ;;  %v1451_v19 = vsel %vm1432_vm14, %v9164_v46, %v1449_v37 }
 0x1cc   : > { %1756 = vrot.lane.b32.xlu0 %v8527_v15, %s8275_s19  ;;  %v1364_v4 = vadd.f32 %v1360_v1, %v1345_v28 }
 0x1cd   : > { %1758 = vrot.lane.b32.xlu1 %v8533_v24, %s8275_s19 }
 0x1ce   : > { %v9181_v9 = vpop.permute.xlu0 %1371  ;;  %1775 = vrot.lane.b32.xlu2 %v8529_v18, %s8275_s19 }
 0x1cf   : > { %v9192_v13 = vpop.permute.xlu1 %1373  ;;  %v1375_v12 = vrot.slane %v9181_v9, 1 }
 0x1d0   : > { %v9211_v47 = vpop.permute.xlu2 %1465  ;;  %v1376_v26 = vrot.slane %v9192_v13, 1 }
 0x1d1   : > { %v1377_v34 = vsel %vm1358_vm9, %v9181_v9, %v1375_v12  ;;  %v1413_v9 = vrot.slane %v9136_v48, 1 }
 0x1d2   : > { %v1378_v38 = vsel %vm1358_vm9, %v9192_v13, %v1376_v26  ;;  %v1381_v44 = vadd.f32 %v1377_v34, %v1363_v42  ;;  %vm2128_vm9 = vcmask 695296  }
 0x1d3   : > { %v1382_v41 = vadd.f32 %v1378_v38, %v1364_v4  ;;  %v1415_v45 = vsel %vm1395_vm13, %v9136_v48, %v1413_v9  ;;  %v1468_v48 = vrot.slane %v9211_v47, 1 }
 0x1d4   : > { %1777 = vrot.lane.b32.xlu0 %v8535_v25, %s8275_s19  ;;  %v1400_v33 = vadd.f32 %v1396_v7, %v1381_v44  ;;  %s9438_s19 = sld [smem:[#allocation4 + $0x22]] }
 0x1d5   : > { %1795 = vrot.lane.b32.xlu1 %v8527_v15, %s8255_s16  ;;  %v1471_v60 = vsel %vm1469_vm15, %v9211_v47, %v1468_v48 }
 0x1d6   : > { %v1392_v6 = vpop.permute.xlu0 %1391  ;;  %1797 = vrot.lane.b32.xlu2 %v9223_v50, %s8255_s16 }
 0x1d7   : > { %v1409_v40 = vpop.permute.xlu1 %1408  ;;  %v1394_v20 = vrot.slane %v1392_v6, 1 }
 0x1d8   : > { %v9247_v0 = vpop.permute.xlu2 %1500  ;;  %v1412_v35 = vrot.slane %v1409_v40, 1 }
 0x1d9   : > { %v1397_v17 = vsel %vm1395_vm13, %v1392_v6, %v1394_v20  ;;  %v1504_v22 = vrot.slane %v9247_v0, 1 }
 0x1da   : > { %v1401_v49 = vadd.f32 %v1397_v17, %v1382_v41  ;;  %v1414_v39 = vsel %vm1395_vm13, %v1409_v40, %v1412_v35  ;;  %vm2390_vm13 = vcmask 441344  }
 0x1db   : > { %v1418_v55 = vadd.f32 %v1414_v39, %v1400_v33  ;;  %v1507_v28 = vsel %vm1506_vm0, %v9247_v0, %v1504_v22 }
 0x1dc   : > { %1799 = vrot.lane.b32.xlu0 %v8533_v24, %s8255_s16  ;;  %v1419_v23 = vadd.f32 %v1415_v45, %v1401_v49  ;;  %v1552_v49 = vstv %s9309_s22  ;;  %s8278_s22 = smov 86  }
 0x1dd   : > { %1801 = vrot.lane.b32.xlu1 %v9237_v63, %s8255_s16 }
 0x1de   : > { %v1427_v51 = vpop.permute.xlu0 %1426  ;;  %1824 = vrot.lane.b32.xlu2 %v8529_v18, %s8255_s16 }
 0x1df   : > { %v1429_v56 = vpop.permute.xlu1 %1428  ;;  %v1430_v36 = vrot.slane %v1427_v51, 1 }
 0x1e0   : > { %v1522_v13 = vpop.permute.xlu2 %1521  ;;  %v1431_v21 = vrot.slane %v1429_v56, 1 }
 0x1e1   : > { %v1433_v62 = vsel %vm1432_vm14, %v1427_v51, %v1430_v36  ;;  %v1524_v20 = vrot.slane %v1522_v13, 1 }
 0x1e2   : > { %v1434_v6 = vsel %vm1432_vm14, %v1429_v56, %v1431_v21  ;;  %v1437_v14 = vadd.f32 %v1433_v62, %v1418_v55 }
 0x1e3   : > { %v1438_v31 = vadd.f32 %v1434_v6, %v1419_v23  ;;  %v1526_v42 = vsel %vm1506_vm0, %v1522_v13, %v1524_v20 }
 0x1e4   : > { %1826 = vrot.lane.b32.xlu0 %v9263_v30, %s8255_s16  ;;  %v1455_v32 = vadd.f32 %v1451_v19, %v1437_v14 }
 0x1e5   : > { %1828 = vrot.lane.b32.xlu1 %v8535_v25, %s8255_s16 }
 0x1e6   : > { %v1448_v61 = vpop.permute.xlu0 %1447  ;;  %1830 = vrot.lane.b32.xlu2 %v9276_v11, %s8255_s16  ;;  %s9307_s16 = sld [smem:[#allocation4 + $0x1c]] }
 0x1e7   : > { %v1450_v16 = vrot.slane %v1448_v61, 1  ;;  %v1464_v52 = vpop.permute.xlu1 %1463 }
 0x1e8   : > { %v1467_v59 = vrot.slane %v1464_v52, 1  ;;  %v1556_v27 = vpop.permute.xlu2 %1555 }
 0x1e9   : > { %v1452_v40 = vsel %vm1432_vm14, %v1448_v61, %v1450_v16  ;;  %v1559_v8 = vrot.slane %v1556_v27, 1  ;;  %v1561_v44 = vrot.slane %v1556_v27, 2  ;;  %v1572_v27 = vstv %s9323_s12  ;;  %s5947_s12 = sld [smem:[#allocation4 + $0x54]] }
 0x1ea   : > { %v1456_v54 = vadd.f32 %v1452_v40, %v1438_v31  ;;  %v1470_v29 = vsel %vm1469_vm15, %v1464_v52, %v1467_v59  ;;  %vm2443_vm14 = vcmask 433152  }
 0x1eb   : > { %v1474_v2 = vadd.f32 %v1470_v29, %v1455_v32  ;;  %v1563_v39 = vsel %vm655_vm3, %v1559_v8, %v1561_v44 }
 0x1ec   : > { %1850 = vrot.lane.b32.xlu0 %v8527_v15, %s8256_s20  ;;  %v1475_v26 = vadd.f32 %v1471_v60, %v1456_v54  ;;  %v1532_v41 = vstv %s9307_s16  ;;  %v1567_v16 = vmul.f32 %v1563_v39, %v1552_v49  ;;  %v1626_v39 = vstv %s9354_s25  ;;  %s9460_s16 = sld [smem:[#allocation4 + $0x23]] }
 0x1ed   : > { %1852 = vrot.lane.b32.xlu1 %v9223_v50, %s8256_s20  ;;  %s9507_s25 = sld [smem:[#allocation4 + $0x55]] }
 0x1ee   : > { %v1483_v10 = vpop.permute.xlu0 %1482  ;;  %1854 = vrot.lane.b32.xlu2 %v8533_v24, %s8256_s20 }
 0x1ef   : > { %v1486_v58 = vrot.slane %v1483_v10, 1  ;;  %v1485_v46 = vpop.permute.xlu1 %1484 }
 0x1f0   : > { %v1487_v12 = vrot.slane %v1485_v46, 1  ;;  %v1576_v47 = vpop.permute.xlu2 %1575 }
 0x1f1   : > { %v1488_v57 = vsel %vm1469_vm15, %v1483_v10, %v1486_v58  ;;  %v1578_v55 = vrot.slane %v1576_v47, 1  ;;  %v1580_v6 = vrot.slane %v1576_v47, 2 }
 0x1f2   : > { %v1492_v43 = vadd.f32 %v1488_v57, %v1474_v2  ;;  %v1489_v5 = vsel %vm1469_vm15, %v1485_v46, %v1487_v12  ;;  %vm2496_vm15 = vcmask 424960  }
 0x1f3   : > { %v1493_v53 = vadd.f32 %v1489_v5, %v1475_v26  ;;  %v1582_v29 = vsel %vm692_vm4, %v1578_v55, %v1580_v6 }
 0x1f4   : > { %v1511_v1 = vadd.f32 %v1507_v28, %v1492_v43  ;;  %1856 = vrot.lane.b32.xlu0 %v9237_v63, %s8256_s20  ;;  %v1586_v46 = vmul.f32 %v1582_v29, %v1572_v27 }
 0x1f5   : > { %1876 = vrot.lane.b32.xlu1 %v8529_v18, %s8256_s20 }
 0x1f6   : > { %v1503_v51 = vpop.permute.xlu0 %1502  ;;  %1878 = vrot.lane.b32.xlu2 %v9263_v30, %s8256_s20 }
 0x1f7   : > { %v1505_v0 = vrot.slane %v1503_v51, 1  ;;  %v1520_v34 = vpop.permute.xlu1 %1519 }
 0x1f8   : > { %v1523_v3 = vrot.slane %v1520_v34, 1  ;;  %v1610_v17 = vpop.permute.xlu2 %1609 }
 0x1f9   : > { %v1508_v56 = vsel %vm1506_vm0, %v1503_v51, %v1505_v0  ;;  %v1613_v12 = vrot.slane %v1610_v17, 1  ;;  %v1615_v26 = vrot.slane %v1610_v17, 2  ;;  %v1608_v0 = vstv %s9339_s13  ;;  %s9493_s13 = sld [smem:[#allocation4 + $0x24]] }
 0x1fa   : > { %v1512_v38 = vadd.f32 %v1508_v56, %v1493_v53  ;;  %v1525_v4 = vsel %vm1506_vm0, %v1520_v34, %v1523_v3 }
 0x1fb   : > { %v1529_v35 = vadd.f32 %v1525_v4, %v1511_v1  ;;  %v1617_v34 = vsel %vm729_vm5, %v1613_v12, %v1615_v26 }
 0x1fc   : > { %v1530_v9 = vadd.f32 %v1526_v42, %v1512_v38  ;;  %1880 = vrot.lane.b32.xlu0 %v8535_v25, %s8256_s20 }
 0x1fd   : > { %1882 = vrot.lane.b32.xlu1 %v9276_v11, %s8256_s20  ;;  %s9335_s20 = sld [smem:[#allocation4 + $0x4e]] }
 0x1fe   : > { %v1536_v7 = vpop.permute.xlu0 %1535  ;;  %1902 = vrot.lane.b32.xlu2 %v8527_v15, %s8257_s29 }
 0x1ff   : > { %v1539_v36 = vrot.slane %v1536_v7, 1  ;;  %v1541_v13 = vrot.slane %v1536_v7, 2  ;;  %v1538_v21 = vpop.permute.xlu1 %1537 }
 0x200   : > { %v1540_v33 = vrot.slane %v1538_v21, 1  ;;  %v1542_v45 = vrot.slane %v1538_v21, 2  ;;  %v9329_v23 = vpop.permute.xlu2 %1629 }
 0x201   : > { %v1543_v61 = vsel %vm655_vm3, %v1539_v36, %v1541_v13  ;;  %v1632_v44 = vrot.slane %v9329_v23, 1  ;;  %v1634_v17 = vrot.slane %v9329_v23, 2 }
 0x202   : > { %v1547_v62 = vmul.f32 %v1543_v61, %v1532_v41  ;;  %v1544_v37 = vsel %vm655_vm3, %v1540_v33, %v1542_v45 }
 0x203   : > { %v1548_v52 = vmul.f32 %v1544_v37, %v1532_v41  ;;  %v1590_v53 = vstv %s9335_s20  ;;  %v1636_v45 = vsel %vm729_vm5, %v1632_v44, %v1634_v17  ;;  %s8279_s20 = smov 85  }
 0x204   : > { %v1549_v59 = vadd.f32 %v1547_v62, %v1529_v35  ;;  %1904 = vrot.lane.b32.xlu0 %v9223_v50, %s8257_s29  ;;  %v1621_v35 = vmul.f32 %v1617_v34, %v1608_v0  ;;  %v1640_v55 = vmul.f32 %v1636_v45, %v1626_v39 }
 0x205   : > { %v1550_v14 = vadd.f32 %v1548_v52, %v1530_v9  ;;  %1906 = vrot.lane.b32.xlu1 %v8533_v24, %s8257_s29 }
 0x206   : > { %v1569_v40 = vadd.f32 %v1567_v16, %v1549_v59  ;;  %v1558_v48 = vpop.permute.xlu0 %1557  ;;  %1908 = vrot.lane.b32.xlu2 %v9237_v63, %s8257_s29 }
 0x207   : > { %v1560_v31 = vrot.slane %v1558_v48, 1  ;;  %v1562_v19 = vrot.slane %v1558_v48, 2  ;;  %v1574_v54 = vpop.permute.xlu1 %1573 }
 0x208   : > { %v1577_v22 = vrot.slane %v1574_v54, 1  ;;  %v1579_v32 = vrot.slane %v1574_v54, 2  ;;  %v9345_v57 = vpop.permute.xlu2 %1664 }
 0x209   : > { %v1564_v60 = vsel %vm655_vm3, %v1560_v31, %v1562_v19  ;;  %v1668_v23 = vrot.slane %v9345_v57, 1  ;;  %v1670_v59 = vrot.slane %v9345_v57, 2  ;;  %v1644_v19 = vstv %s9368_s28  ;;  %s9543_s28 = sld [smem:[#allocation4 + $0x56]] }
 0x20a   : > { %v1568_v10 = vmul.f32 %v1564_v60, %v1552_v49  ;;  %v1581_v58 = vsel %vm692_vm4, %v1577_v22, %v1579_v32  ;;  %vm1653_vm3 = vcmask 990208   ;;  %v1663_v32 = vstv %s9372_s10  ;;  %s9557_s10 = sld [smem:[#allocation4 + $0x26]] }
 0x20b   : > { %v1585_v2 = vmul.f32 %v1581_v58, %v1572_v27  ;;  %v1672_v60 = vsel %vm1653_vm3, %v1668_v23, %v1670_v59 }
 0x20c   : > { %v1570_v28 = vadd.f32 %v1568_v10, %v1550_v14  ;;  %1928 = vrot.lane.b32.xlu0 %v8529_v18, %s8257_s29  ;;  %v1676_v26 = vmul.f32 %v1672_v60, %v1663_v32  ;;  %v1737_v60 = vstv %s9424_s21  ;;  %s8281_s21 = smov 54  }
 0x20d   : > { %v1587_v43 = vadd.f32 %v1585_v2, %v1569_v40  ;;  %1930 = vrot.lane.b32.xlu1 %v9263_v30, %s8257_s29 }
 0x20e   : > { %v1588_v5 = vadd.f32 %v1586_v46, %v1570_v28  ;;  %v1592_v47 = vpop.permute.xlu0 %1591  ;;  %1932 = vrot.lane.b32.xlu2 %v8535_v25, %s8257_s29 }
 0x20f   : > { %v1595_v1 = vrot.slane %v1592_v47, 1  ;;  %v1597_v20 = vrot.slane %v1592_v47, 2  ;;  %v1594_v51 = vpop.permute.xlu1 %1593 }
 0x210   : > { %v1596_v3 = vrot.slane %v1594_v51, 1  ;;  %v1598_v56 = vrot.slane %v1594_v51, 2  ;;  %v9362_v9 = vpop.permute.xlu2 %1684 }
 0x211   : > { %v1599_v42 = vsel %vm692_vm4, %v1595_v1, %v1597_v20  ;;  %v1687_v28 = vrot.slane %v9362_v9, 1 }
 0x212   : > { %v1603_v38 = vmul.f32 %v1599_v42, %v1590_v53  ;;  %v1600_v4 = vsel %vm692_vm4, %v1596_v3, %v1598_v56  ;;  %vm1690_vm4 = vcmask 982016  }
 0x213   : > { %v1604_v8 = vmul.f32 %v1600_v4, %v1590_v53 }
 0x214   : > { %v1605_v41 = vadd.f32 %v1603_v38, %v1587_v43  ;;  %1934 = vrot.lane.b32.xlu0 %v9276_v11, %s8257_s29  ;;  %s9389_s29 = sld [smem:[#allocation4 + $0x20]]  ;;  %v1689_v43 = vrot.slane %v9362_v9, 2 }
 0x215   : > { %v1606_v7 = vadd.f32 %v1604_v8, %v1588_v5  ;;  %1954 = vrot.lane.b32.xlu1 %v8527_v15, %s8276_s30 }
 0x216   : > { %v1623_v36 = vadd.f32 %v1621_v35, %v1605_v41  ;;  %v1612_v13 = vpop.permute.xlu0 %1611  ;;  %1956 = vrot.lane.b32.xlu2 %v9223_v50, %s8276_s30  ;;  %v1692_v56 = vsel %vm1690_vm4, %v1687_v28, %v1689_v43 }
 0x217   : > { %v1614_v21 = vrot.slane %v1612_v13, 1  ;;  %v1616_v49 = vrot.slane %v1612_v13, 2  ;;  %v1628_v33 = vpop.permute.xlu1 %1627 }
 0x218   : > { %v1631_v61 = vrot.slane %v1628_v33, 1  ;;  %v1633_v62 = vrot.slane %v1628_v33, 2  ;;  %v9380_v14 = vpop.permute.xlu2 %1719 }
 0x219   : > { %v1618_v37 = vsel %vm729_vm5, %v1614_v21, %v1616_v49  ;;  %v1723_v9 = vrot.slane %v9380_v14, 1  ;;  %v1725_v41 = vrot.slane %v9380_v14, 2  ;;  %v1700_v49 = vstv %s9403_s8  ;;  %s8280_s8 = smov 55  }
 0x21a   : > { %v1622_v16 = vmul.f32 %v1618_v37, %v1608_v0  ;;  %v1635_v52 = vsel %vm729_vm5, %v1631_v61, %v1633_v62  ;;  %v1681_v34 = vstv %s9389_s29  ;;  %vm1727_vm5 = vcmask 973824   ;;  %s9593_s29 = sld [smem:[#allocation4 + $0x27]] }
 0x21b   : > { %v1639_v6 = vmul.f32 %v1635_v52, %v1626_v39  ;;  %v1696_v44 = vmul.f32 %v1692_v56, %v1681_v34  ;;  %v1718_v62 = vstv %s9407_s24  ;;  %v1728_v37 = vsel %vm1727_vm5, %v1723_v9, %v1725_v41  ;;  %s9643_s24 = sld [smem:[#allocation4 + $0x59]] }
 0x21c   : > { %v1624_v40 = vadd.f32 %v1622_v16, %v1606_v7  ;;  %1958 = vrot.lane.b32.xlu0 %v8533_v24, %s8276_s30  ;;  %v1732_v59 = vmul.f32 %v1728_v37, %v1718_v62 }
 0x21d   : > { %v1641_v48 = vadd.f32 %v1639_v6, %v1623_v36  ;;  %1960 = vrot.lane.b32.xlu1 %v9237_v63, %s8276_s30 }
 0x21e   : > { %v1642_v31 = vadd.f32 %v1640_v55, %v1624_v40  ;;  %v1646_v27 = vpop.permute.xlu0 %1645  ;;  %1981 = vrot.lane.b32.xlu2 %v8529_v18, %s8276_s30 }
 0x21f   : > { %v1649_v54 = vrot.slane %v1646_v27, 1  ;;  %v1651_v29 = vrot.slane %v1646_v27, 2  ;;  %v1648_v22 = vpop.permute.xlu1 %1647 }
 0x220   : > { %v1650_v10 = vrot.slane %v1648_v22, 1  ;;  %v1652_v58 = vrot.slane %v1648_v22, 2  ;;  %v9397_v5 = vpop.permute.xlu2 %1740 }
 0x221   : > { %v1654_v46 = vsel %vm1653_vm3, %v1649_v54, %v1651_v29  ;;  %v1743_v40 = vrot.slane %v9397_v5, 1 }
 0x222   : > { %v1658_v2 = vmul.f32 %v1654_v46, %v1644_v19  ;;  %v1655_v12 = vsel %vm1653_vm3, %v1650_v10, %v1652_v58 }
 0x223   : > { %v1659_v57 = vmul.f32 %v1655_v12, %v1644_v19 }
 0x224   : > { %v1660_v53 = vadd.f32 %v1658_v2, %v1641_v48  ;;  %1983 = vrot.lane.b32.xlu0 %v9263_v30, %s8276_s30  ;;  %v1745_v48 = vrot.slane %v9397_v5, 2 }
 0x225   : > { %v1661_v47 = vadd.f32 %v1659_v57, %v1642_v31  ;;  %1985 = vrot.lane.b32.xlu1 %v8535_v25, %s8276_s30 }
 0x226   : > { %v1678_v1 = vadd.f32 %v1676_v26, %v1660_v53  ;;  %v1667_v20 = vpop.permute.xlu0 %1666  ;;  %1987 = vrot.lane.b32.xlu2 %v9276_v11, %s8276_s30  ;;  %v1747_v58 = vsel %vm1727_vm5, %v1743_v40, %v1745_v48  ;;  %s5950_s30 = sld [smem:[#allocation4 + $0x25]] }
 0x227   : > { %v1669_v51 = vrot.slane %v1667_v20, 1  ;;  %v1671_v0 = vrot.slane %v1667_v20, 2  ;;  %v1683_v3 = vpop.permute.xlu1 %1682  ;;  %v1751_v28 = vmul.f32 %v1747_v58, %v1737_v60 }
 0x228   : > { %v1686_v42 = vrot.slane %v1683_v3, 1  ;;  %v1688_v38 = vrot.slane %v1683_v3, 2  ;;  %v9415_v7 = vpop.permute.xlu2 %1775 }
 0x229   : > { %v1673_v4 = vsel %vm1653_vm3, %v1669_v51, %v1671_v0  ;;  %v1779_v5 = vrot.slane %v9415_v7, 1  ;;  %v1781_v53 = vrot.slane %v9415_v7, 2  ;;  %v1755_v0 = vstv %s9438_s19  ;;  %s5959_s19 = sld [smem:[#allocation4 + $0x5a]] }
 0x22a   : > { %v1677_v35 = vmul.f32 %v1673_v4, %v1663_v32  ;;  %v1691_v8 = vsel %vm1690_vm4, %v1686_v42, %v1688_v38  ;;  %v1774_v38 = vstv %s9442_s23  ;;  %s8282_s23 = smov 53  }
 0x22b   : > { %v1695_v17 = vmul.f32 %v1691_v8, %v1681_v34  ;;  %v1783_v4 = vsel %vm1764_vm7, %v1779_v5, %v1781_v53  ;;  %v1821_v5 = vstv %s5947_s12  ;;  %s8283_s12 = smov 52  }
 0x22c   : > { %v1679_v36 = vadd.f32 %v1677_v35, %v1661_v47  ;;  %2007 = vrot.lane.b32.xlu0 %v8527_v15, %s8277_s18  ;;  %v1787_v41 = vmul.f32 %v1783_v4, %v1774_v38 }
 0x22d   : > { %v1697_v13 = vadd.f32 %v1695_v17, %v1678_v1  ;;  %2009 = vrot.lane.b32.xlu1 %v9223_v50, %s8277_s18 }
 0x22e   : > { %v1698_v21 = vadd.f32 %v1696_v44, %v1679_v36  ;;  %v1702_v39 = vpop.permute.xlu0 %1701  ;;  %2011 = vrot.lane.b32.xlu2 %v8533_v24, %s8277_s18 }
 0x22f   : > { %v1705_v33 = vrot.slane %v1702_v39, 1  ;;  %v1707_v45 = vrot.slane %v1702_v39, 2  ;;  %v1704_v61 = vpop.permute.xlu1 %1703 }
 0x230   : > { %v1706_v16 = vrot.slane %v1704_v61, 1  ;;  %v1708_v52 = vrot.slane %v1704_v61, 2  ;;  %v9432_v31 = vpop.permute.xlu2 %1797 }
 0x231   : > { %v1709_v55 = vsel %vm1690_vm4, %v1705_v33, %v1707_v45  ;;  %v1806_v33 = vrot.slane %v9432_v31, 2 }
 0x232   : > { %v1713_v6 = vmul.f32 %v1709_v55, %v1700_v49  ;;  %v1710_v23 = vsel %vm1690_vm4, %v1706_v16, %v1708_v52  ;;  %v1792_v55 = vstv %s9460_s16  ;;  %s9693_s16 = sld [smem:[#allocation4 + $0x2a]] }
 0x233   : > { %v1714_v14 = vmul.f32 %v1710_v23, %v1700_v49 }
 0x234   : > { %v1715_v19 = vadd.f32 %v1713_v6, %v1697_v13  ;;  %2013 = vrot.lane.b32.xlu0 %v9237_v63, %s8277_s18 }
 0x235   : > { %v1716_v27 = vadd.f32 %v1714_v14, %v1698_v21  ;;  %2034 = vrot.lane.b32.xlu1 %v8529_v18, %s8277_s18 }
 0x236   : > { %v1734_v54 = vadd.f32 %v1732_v59, %v1715_v19  ;;  %v1722_v29 = vpop.permute.xlu0 %1721  ;;  %2036 = vrot.lane.b32.xlu2 %v9263_v30, %s8277_s18 }
 0x237   : > { %v1724_v22 = vrot.slane %v1722_v29, 1  ;;  %v1726_v32 = vrot.slane %v1722_v29, 2  ;;  %v1739_v10 = vpop.permute.xlu1 %1738 }
 0x238   : > { %v1742_v46 = vrot.slane %v1739_v10, 1  ;;  %v1744_v2 = vrot.slane %v1739_v10, 2  ;;  %v9450_v47 = vpop.permute.xlu2 %1824 }
 0x239   : > { %v1729_v12 = vsel %vm1727_vm5, %v1724_v22, %v1726_v32 }
 0x23a   : > { %v1733_v26 = vmul.f32 %v1729_v12, %v1718_v62  ;;  %v1746_v57 = vsel %vm1727_vm5, %v1742_v46, %v1744_v2  ;;  %v1834_v46 = vrot.slane %v9450_v47, 2  ;;  %v1832_v12 = vrot.slane %v9450_v47, 1 }
 0x23b   : > { %v1750_v43 = vmul.f32 %v1746_v57, %v1737_v60 }
 0x23c   : > { %v1735_v1 = vadd.f32 %v1733_v26, %v1716_v27  ;;  %2038 = vrot.lane.b32.xlu0 %v8535_v25, %s8277_s18 }
 0x23d   : > { %v1752_v20 = vadd.f32 %v1750_v43, %v1734_v54  ;;  %2040 = vrot.lane.b32.xlu1 %v9276_v11, %s8277_s18  ;;  %s9657_s18 = sld [smem:[#allocation4 + $0x29]] }
 0x23e   : > { %v1753_v51 = vadd.f32 %v1751_v28, %v1735_v1  ;;  %v1757_v34 = vpop.permute.xlu0 %1756  ;;  %2060 = vrot.lane.b32.xlu2 %v8527_v15, %s8278_s22 }
 0x23f   : > { %v1760_v3 = vrot.slane %v1757_v34, 1  ;;  %v1762_v56 = vrot.slane %v1757_v34, 2  ;;  %v1759_v42 = vpop.permute.xlu1 %1758 }
 0x240   : > { %v1761_v35 = vrot.slane %v1759_v42, 1  ;;  %v1763_v8 = vrot.slane %v1759_v42, 2  ;;  %v1831_v36 = vpop.permute.xlu2 %1830 }
 0x241   : > { %v1765_v44 = vsel %vm1764_vm7, %v1760_v3, %v1762_v56  ;;  %v1837_v57 = vrot.slane %v1831_v36, 2 }
 0x242   : > { %v1769_v17 = vmul.f32 %v1765_v44, %v1755_v0  ;;  %v1766_v9 = vsel %vm1764_vm7, %v1761_v35, %v1763_v8 }
 0x243   : > { %v1770_v7 = vmul.f32 %v1766_v9, %v1755_v0  ;;  %v1849_v9 = vstv %s9493_s13  ;;  %s9743_s13 = sld [smem:[#allocation4 + $0x5c]] }
 0x244   : > { %v1771_v13 = vadd.f32 %v1769_v17, %v1752_v20  ;;  %2062 = vrot.lane.b32.xlu0 %v9223_v50, %s8278_s22 }
 0x245   : > { %v1772_v21 = vadd.f32 %v1770_v7, %v1753_v51  ;;  %2064 = vrot.lane.b32.xlu1 %v8533_v24, %s8278_s22 }
 0x246   : > { %v1789_v49 = vadd.f32 %v1787_v41, %v1771_v13  ;;  %v1778_v39 = vpop.permute.xlu0 %1777  ;;  %2066 = vrot.lane.b32.xlu2 %v9237_v63, %s8278_s22 }
 0x247   : > { %v1780_v45 = vrot.slane %v1778_v39, 1  ;;  %v1782_v61 = vrot.slane %v1778_v39, 2  ;;  %v1796_v62 = vpop.permute.xlu1 %1795 }
 0x248   : > { %v1803_v37 = vrot.slane %v1796_v62, 1  ;;  %v1805_v16 = vrot.slane %v1796_v62, 2  ;;  %v9476_v14 = vpop.permute.xlu2 %1854 }
 0x249   : > { %v1784_v52 = vsel %vm1764_vm7, %v1780_v45, %v1782_v61  ;;  %v1859_v39 = vrot.slane %v9476_v14, 1 }
 0x24a   : > { %v1788_v6 = vmul.f32 %v1784_v52, %v1774_v38  ;;  %v1810_v23 = vsel %vm1809_vm8, %v1805_v16, %v1806_v33 }
 0x24b   : > { %v1811_v59 = vsel %vm914_vm10, %v1803_v37, %v1810_v23 }
 0x24c   : > { %v1790_v40 = vadd.f32 %v1788_v6, %v1772_v21  ;;  %v1816_v48 = vmul.f32 %v1811_v59, %v1792_v55  ;;  %2087 = vrot.lane.b32.xlu0 %v8529_v18, %s8278_s22  ;;  %v1862_v21 = vrot.slane %v9476_v14, 2 }
 0x24d   : > { %2089 = vrot.lane.b32.xlu1 %v9263_v30, %s8278_s22 }
 0x24e   : > { %v1818_v31 = vadd.f32 %v1816_v48, %v1789_v49  ;;  %v1800_v19 = vpop.permute.xlu0 %1799  ;;  %2091 = vrot.lane.b32.xlu2 %v8535_v25, %s8278_s22 }
 0x24f   : > { %v1804_v27 = vrot.slane %v1800_v19, 1  ;;  %v1807_v54 = vrot.slane %v1800_v19, 2  ;;  %v1802_v29 = vpop.permute.xlu1 %1801 }
 0x250   : > { %v1808_v22 = vrot.slane %v1802_v29, 2  ;;  %v1879_v10 = vpop.permute.xlu2 %1878 }
 0x251   : > { %v1887_v45 = vrot.slane %v1879_v10, 2 }
 0x252   : > { %v1812_v32 = vsel %vm1809_vm8, %v1807_v54, %v1808_v22 }
 0x253   : > { %v1813_v60 = vsel %vm914_vm10, %v1804_v27, %v1812_v32 }
 0x254   : > { %v1817_v58 = vmul.f32 %v1813_v60, %v1792_v55  ;;  %2093 = vrot.lane.b32.xlu0 %v9276_v11, %s8278_s22  ;;  %v1875_v55 = vstv %s9507_s25  ;;  %s9707_s22 = sld [smem:[#allocation4 + $0x5b]] }
 0x255   : > { %2113 = vrot.lane.b32.xlu1 %v8527_v15, %s8279_s20  ;;  %s9755_s25 = sld [smem:[#allocation4 + $0x2c]] }
 0x256   : > { %v1819_v2 = vadd.f32 %v1817_v58, %v1790_v40  ;;  %v1827_v26 = vpop.permute.xlu0 %1826  ;;  %2115 = vrot.lane.b32.xlu2 %v9223_v50, %s8279_s20 }
 0x257   : > { %v1835_v28 = vrot.slane %v1827_v26, 2  ;;  %v1829_v43 = vpop.permute.xlu1 %1828 }
 0x258   : > { %v1833_v53 = vrot.slane %v1829_v43, 1  ;;  %v1836_v1 = vrot.slane %v1829_v43, 2  ;;  %v9500_v3 = vpop.permute.xlu2 %1902 }
 0x259   : > { %v1838_v20 = vsel %vm1809_vm8, %v1834_v46, %v1835_v28  ;;  %v1910_v26 = vrot.slane %v9500_v3, 1 }
 0x25a   : > { %v1839_v51 = vsel %vm914_vm10, %v1832_v12, %v1838_v20  ;;  %v1840_v0 = vsel %vm1809_vm8, %v1836_v1, %v1837_v57 }
 0x25b   : > { %v1844_v47 = vmul.f32 %v1839_v51, %v1821_v5  ;;  %v1841_v34 = vsel %vm914_vm10, %v1833_v53, %v1840_v0  ;;  %v1901_v53 = vstv %s5950_s30  ;;  %vm1969_vm10 = vcmask 719872   ;;  %s5965_s30 = sld [smem:[#allocation4 + $0x5d]] }
 0x25c   : > { %v1845_v56 = vmul.f32 %v1841_v34, %v1821_v5  ;;  %2117 = vrot.lane.b32.xlu0 %v8533_v24, %s8279_s20 }
 0x25d   : > { %v1846_v42 = vadd.f32 %v1844_v47, %v1818_v31  ;;  %2119 = vrot.lane.b32.xlu1 %v9237_v63, %s8279_s20 }
 0x25e   : > { %v1847_v38 = vadd.f32 %v1845_v56, %v1819_v2  ;;  %v1851_v4 = vpop.permute.xlu0 %1850  ;;  %2140 = vrot.lane.b32.xlu2 %v8529_v18, %s8279_s20  ;;  %v1912_v2 = vrot.slane %v9500_v3, 2 }
 0x25f   : > { %v1858_v35 = vrot.slane %v1851_v4, 1  ;;  %v1860_v8 = vrot.slane %v1851_v4, 2  ;;  %v1853_v44 = vpop.permute.xlu1 %1852 }
 0x260   : > { %v1861_v17 = vrot.slane %v1853_v44, 2  ;;  %v1909_v36 = vpop.permute.xlu2 %1908 }
 0x261   : > { %v1915_v28 = vrot.slane %v1909_v36, 2 }
 0x262   : > { %v1864_v41 = vsel %vm1809_vm8, %v1860_v8, %v1861_v17 }
 0x263   : > { %v1865_v7 = vsel %vm951_vm11, %v1858_v35, %v1864_v41  ;;  %v1927_v41 = vstv %s9543_s28  ;;  %s9778_s28 = sld [smem:[#allocation4 + $0x2d]] }
 0x264   : > { %v1870_v13 = vmul.f32 %v1865_v7, %v1849_v9  ;;  %2142 = vrot.lane.b32.xlu0 %v9263_v30, %s8279_s20 }
 0x265   : > { %2144 = vrot.lane.b32.xlu1 %v8535_v25, %s8279_s20 }
 0x266   : > { %v1872_v49 = vadd.f32 %v1870_v13, %v1846_v42  ;;  %v1857_v33 = vpop.permute.xlu0 %1856  ;;  %2146 = vrot.lane.b32.xlu2 %v9276_v11, %s8279_s20  ;;  %s5962_s20 = sld [smem:[#allocation4 + $0x2b]] }
 0x267   : > { %v1863_v61 = vrot.slane %v1857_v33, 2  ;;  %v1877_v62 = vpop.permute.xlu1 %1876 }
 0x268   : > { %v1884_v37 = vrot.slane %v1877_v62, 1  ;;  %v1886_v16 = vrot.slane %v1877_v62, 2  ;;  %v9526_v14 = vpop.permute.xlu2 %1932 }
 0x269   : > { %v1866_v52 = vsel %vm1809_vm8, %v1862_v21, %v1863_v61  ;;  %v1937_v33 = vrot.slane %v9526_v14, 1 }
 0x26a   : > { %v1867_v6 = vsel %vm951_vm11, %v1859_v39, %v1866_v52  ;;  %v1890_v23 = vsel %vm1809_vm8, %v1886_v16, %v1887_v45 }
 0x26b   : > { %v1871_v59 = vmul.f32 %v1867_v6, %v1849_v9  ;;  %v1891_v40 = vsel %vm951_vm11, %v1884_v37, %v1890_v23  ;;  %v1953_v6 = vstv %s9557_s10  ;;  %s9803_s10 = sld [smem:[#allocation4 + $0x5e]] }
 0x26c   : > { %v1896_v48 = vmul.f32 %v1891_v40, %v1875_v55  ;;  %2166 = vrot.lane.b32.xlu0 %v8527_v15, %s8262_s26 }
 0x26d   : > { %v1873_v31 = vadd.f32 %v1871_v59, %v1847_v38  ;;  %2168 = vrot.lane.b32.xlu1 %v9223_v50, %s8262_s26 }
 0x26e   : > { %v1898_v19 = vadd.f32 %v1896_v48, %v1872_v49  ;;  %v1881_v27 = vpop.permute.xlu0 %1880  ;;  %2170 = vrot.lane.b32.xlu2 %v8533_v24, %s8262_s26  ;;  %v1940_v49 = vrot.slane %v9526_v14, 2 }
 0x26f   : > { %v1885_v54 = vrot.slane %v1881_v27, 1  ;;  %v1888_v29 = vrot.slane %v1881_v27, 2  ;;  %v1883_v22 = vpop.permute.xlu1 %1882 }
 0x270   : > { %v1889_v32 = vrot.slane %v1883_v22, 2  ;;  %v1957_v58 = vpop.permute.xlu2 %1956 }
 0x271   : > { %v1965_v61 = vrot.slane %v1957_v58, 2 }
 0x272   : > { %v1892_v60 = vsel %vm1809_vm8, %v1888_v29, %v1889_v32 }
 0x273   : > { %v1893_v10 = vsel %vm951_vm11, %v1885_v54, %v1892_v60  ;;  %vm2022_vm11 = vcmask 711680  }
 0x274   : > { %v1897_v46 = vmul.f32 %v1893_v10, %v1875_v55  ;;  %2172 = vrot.lane.b32.xlu0 %v9237_v63, %s8262_s26 }
 0x275   : > { %2192 = vrot.lane.b32.xlu1 %v8529_v18, %s8262_s26 }
 0x276   : > { %v1899_v12 = vadd.f32 %v1897_v46, %v1873_v31  ;;  %v1905_v57 = vpop.permute.xlu0 %1904  ;;  %2194 = vrot.lane.b32.xlu2 %v9263_v30, %s8262_s26 }
 0x277   : > { %v1913_v43 = vrot.slane %v1905_v57, 2  ;;  %v1907_v5 = vpop.permute.xlu1 %1906 }
 0x278   : > { %v1911_v1 = vrot.slane %v1907_v5, 1  ;;  %v1914_v20 = vrot.slane %v1907_v5, 2  ;;  %v9550_v56 = vpop.permute.xlu2 %1981 }
 0x279   : > { %v1916_v51 = vsel %vm1809_vm8, %v1912_v2, %v1913_v43  ;;  %v1989_v57 = vrot.slane %v9550_v56, 1 }
 0x27a   : > { %v1917_v0 = vsel %vm988_vm12, %v1910_v26, %v1916_v51  ;;  %v1918_v47 = vsel %vm1809_vm8, %v1914_v20, %v1915_v28 }
 0x27b   : > { %v1922_v34 = vmul.f32 %v1917_v0, %v1901_v53  ;;  %v1919_v3 = vsel %vm988_vm12, %v1911_v1, %v1918_v47 }
 0x27c   : > { %v1923_v42 = vmul.f32 %v1919_v3, %v1901_v53  ;;  %2196 = vrot.lane.b32.xlu0 %v8535_v25, %s8262_s26 }
 0x27d   : > { %v1924_v38 = vadd.f32 %v1922_v34, %v1898_v19  ;;  %2198 = vrot.lane.b32.xlu1 %v9276_v11, %s8262_s26  ;;  %s5953_s26 = sld [smem:[#allocation4 + $0x57]] }
 0x27e   : > { %v1925_v4 = vadd.f32 %v1923_v42, %v1899_v12  ;;  %v1929_v35 = vpop.permute.xlu0 %1928  ;;  %2218 = vrot.lane.b32.xlu2 %v8527_v15, %s8263_s27  ;;  %v1991_v12 = vrot.slane %v9550_v56, 2 }
 0x27f   : > { %v1936_v8 = vrot.slane %v1929_v35, 1  ;;  %v1938_v44 = vrot.slane %v1929_v35, 2  ;;  %v1931_v17 = vpop.permute.xlu1 %1930 }
 0x280   : > { %v1939_v9 = vrot.slane %v1931_v17, 2  ;;  %v1988_v13 = vpop.permute.xlu2 %1987 }
 0x281   : > { %v1994_v43 = vrot.slane %v1988_v13, 2 }
 0x282   : > { %v1942_v7 = vsel %vm1809_vm8, %v1938_v44, %v1939_v9 }
 0x283   : > { %v1943_v36 = vsel %vm988_vm12, %v1936_v8, %v1942_v7  ;;  %v1980_v1 = vstv %s5953_s26  ;;  %v2006_v7 = vstv %s9593_s29  ;;  %s9805_s26 = sld [smem:[#allocation4 + $0x2e]] }
 0x284   : > { %v1948_v21 = vmul.f32 %v1943_v36, %v1927_v41  ;;  %2220 = vrot.lane.b32.xlu0 %v9223_v50, %s8263_s27  ;;  %s9814_s29 = sld [smem:[#allocation4 + $0x5f]] }
 0x285   : > { %2222 = vrot.lane.b32.xlu1 %v8533_v24, %s8263_s27 }
 0x286   : > { %v1950_v39 = vadd.f32 %v1948_v21, %v1924_v38  ;;  %v1935_v45 = vpop.permute.xlu0 %1934  ;;  %2224 = vrot.lane.b32.xlu2 %v9237_v63, %s8263_s27 }
 0x287   : > { %v1941_v62 = vrot.slane %v1935_v45, 2  ;;  %v1955_v37 = vpop.permute.xlu1 %1954 }
 0x288   : > { %v1962_v16 = vrot.slane %v1955_v37, 1  ;;  %v1964_v52 = vrot.slane %v1955_v37, 2  ;;  %v9576_v48 = vpop.permute.xlu2 %2011 }
 0x289   : > { %v1944_v55 = vsel %vm1809_vm8, %v1940_v49, %v1941_v62  ;;  %v2016_v45 = vrot.slane %v9576_v48, 1 }
 0x28a   : > { %v1945_v23 = vsel %vm988_vm12, %v1937_v33, %v1944_v55  ;;  %v1968_v59 = vsel %vm1809_vm8, %v1964_v52, %v1965_v61  ;;  %vm2075_vm12 = vcmask 703488  }
 0x28b   : > { %v1949_v40 = vmul.f32 %v1945_v23, %v1927_v41  ;;  %v1970_v14 = vsel %vm1969_vm10, %v1962_v16, %v1968_v59 }
 0x28c   : > { %v1975_v31 = vmul.f32 %v1970_v14, %v1953_v6  ;;  %2244 = vrot.lane.b32.xlu0 %v8529_v18, %s8263_s27 }
 0x28d   : > { %v1951_v19 = vadd.f32 %v1949_v40, %v1925_v4  ;;  %2246 = vrot.lane.b32.xlu1 %v9263_v30, %s8263_s27 }
 0x28e   : > { %v1977_v27 = vadd.f32 %v1975_v31, %v1950_v39  ;;  %v1959_v54 = vpop.permute.xlu0 %1958  ;;  %2248 = vrot.lane.b32.xlu2 %v8535_v25, %s8263_s27  ;;  %v2019_v39 = vrot.slane %v9576_v48, 2 }
 0x28f   : > { %v1963_v29 = vrot.slane %v1959_v54, 1  ;;  %v1966_v22 = vrot.slane %v1959_v54, 2  ;;  %v1961_v32 = vpop.permute.xlu1 %1960 }
 0x290   : > { %v1967_v60 = vrot.slane %v1961_v32, 2  ;;  %v2037_v46 = vpop.permute.xlu2 %2036 }
 0x291   : > { %v2045_v62 = vrot.slane %v2037_v46, 2 }
 0x292   : > { %v1971_v10 = vsel %vm1809_vm8, %v1966_v22, %v1967_v60 }
 0x293   : > { %v1972_v58 = vsel %vm1969_vm10, %v1963_v29, %v1971_v10 }
 0x294   : > { %v1976_v2 = vmul.f32 %v1972_v58, %v1953_v6  ;;  %2250 = vrot.lane.b32.xlu0 %v9276_v11, %s8263_s27  ;;  %s9607_s27 = sld [smem:[#allocation4 + $0x58]] }
 0x295   : > { %2270 = vrot.lane.b32.xlu1 %v8527_v15, %s8264_s4 }
 0x296   : > { %v1978_v26 = vadd.f32 %v1976_v2, %v1951_v19  ;;  %v1984_v28 = vpop.permute.xlu0 %1983  ;;  %2272 = vrot.lane.b32.xlu2 %v9223_v50, %s8264_s4 }
 0x297   : > { %v1992_v5 = vrot.slane %v1984_v28, 2  ;;  %v1986_v53 = vpop.permute.xlu1 %1985 }
 0x298   : > { %v1990_v20 = vrot.slane %v1986_v53, 1  ;;  %v1993_v51 = vrot.slane %v1986_v53, 2  ;;  %v9600_v42 = vpop.permute.xlu2 %2060 }
 0x299   : > { %v1995_v0 = vsel %vm1809_vm8, %v1991_v12, %v1992_v5  ;;  %v2068_v28 = vrot.slane %v9600_v42, 1 }
 0x29a   : > { %v1996_v47 = vsel %vm1969_vm10, %v1989_v57, %v1995_v0  ;;  %v1997_v34 = vsel %vm1809_vm8, %v1993_v51, %v1994_v43  ;;  %v2033_v23 = vstv %s9607_s27  ;;  %s9824_s27 = sld [smem:[#allocation4 + $0x2f]] }
 0x29b   : > { %v2001_v3 = vmul.f32 %v1996_v47, %v1980_v1  ;;  %v1998_v56 = vsel %vm1969_vm10, %v1990_v20, %v1997_v34 }
 0x29c   : > { %v2002_v38 = vmul.f32 %v1998_v56, %v1980_v1  ;;  %2274 = vrot.lane.b32.xlu0 %v8533_v24, %s8264_s4 }
 0x29d   : > { %v2003_v4 = vadd.f32 %v2001_v3, %v1977_v27  ;;  %2276 = vrot.lane.b32.xlu1 %v9237_v63, %s8264_s4 }
 0x29e   : > { %v2004_v35 = vadd.f32 %v2002_v38, %v1978_v26  ;;  %v2008_v8 = vpop.permute.xlu0 %2007  ;;  %2296 = vrot.lane.b32.xlu2 %v8529_v18, %s8264_s4  ;;  %v2070_v26 = vrot.slane %v9600_v42, 2 }
 0x29f   : > { %v2015_v44 = vrot.slane %v2008_v8, 1  ;;  %v2017_v17 = vrot.slane %v2008_v8, 2  ;;  %v2010_v9 = vpop.permute.xlu1 %2009 }
 0x2a0   : > { %v2018_v41 = vrot.slane %v2010_v9, 2  ;;  %v2067_v21 = vpop.permute.xlu2 %2066 }
 0x2a1   : > { %v2073_v5 = vrot.slane %v2067_v21, 2 }
 0x2a2   : > { %v2021_v36 = vsel %vm1809_vm8, %v2017_v17, %v2018_v41 }
 0x2a3   : > { %v2023_v13 = vsel %vm2022_vm11, %v2015_v44, %v2021_v36  ;;  %v2086_v36 = vstv %s9643_s24  ;;  %s9869_s24 = sld [smem:[#allocation4 + $0x61]] }
 0x2a4   : > { %v2028_v49 = vmul.f32 %v2023_v13, %v2006_v7  ;;  %2298 = vrot.lane.b32.xlu0 %v9263_v30, %s8264_s4 }
 0x2a5   : > { %2300 = vrot.lane.b32.xlu1 %v8535_v25, %s8264_s4 }
 0x2a6   : > { %v2030_v33 = vadd.f32 %v2028_v49, %v2003_v4  ;;  %v2014_v61 = vpop.permute.xlu0 %2013  ;;  %2302 = vrot.lane.b32.xlu2 %v9276_v11, %s8264_s4  ;;  %s5956_s4 = sld [smem:[#allocation4 + $0x28]] }
 0x2a7   : > { %v2020_v37 = vrot.slane %v2014_v61, 2  ;;  %v2035_v16 = vpop.permute.xlu1 %2034 }
 0x2a8   : > { %v2042_v52 = vrot.slane %v2035_v16, 1  ;;  %v2044_v55 = vrot.slane %v2035_v16, 2  ;;  %v9626_v48 = vpop.permute.xlu2 %2091 }
 0x2a9   : > { %v2024_v6 = vsel %vm1809_vm8, %v2019_v39, %v2020_v37  ;;  %v2096_v61 = vrot.slane %v9626_v48, 1 }
 0x2aa   : > { %v2025_v59 = vsel %vm2022_vm11, %v2016_v45, %v2024_v6  ;;  %v2048_v40 = vsel %vm1809_vm8, %v2044_v55, %v2045_v62 }
 0x2ab   : > { %v2029_v14 = vmul.f32 %v2025_v59, %v2006_v7  ;;  %v2049_v31 = vsel %vm2022_vm11, %v2042_v52, %v2048_v40  ;;  %v2112_v59 = vstv %s9657_s18  ;;  %s9884_s18 = sld [smem:[#allocation4 + $0x62]] }
 0x2ac   : > { %v2054_v19 = vmul.f32 %v2049_v31, %v2033_v23  ;;  %2322 = vrot.lane.b32.xlu0 %v8527_v15, %s8280_s8  ;;  %v2059_v20 = vstv %s5956_s4  ;;  %s9854_s4 = sld [smem:[#allocation4 + $0x30]] }
 0x2ad   : > { %v2031_v27 = vadd.f32 %v2029_v14, %v2004_v35  ;;  %2324 = vrot.lane.b32.xlu1 %v9223_v50, %s8280_s8 }
 0x2ae   : > { %v2056_v54 = vadd.f32 %v2054_v19, %v2030_v33  ;;  %v2039_v29 = vpop.permute.xlu0 %2038  ;;  %2326 = vrot.lane.b32.xlu2 %v8533_v24, %s8280_s8  ;;  %v2099_v33 = vrot.slane %v9626_v48, 2 }
 0x2af   : > { %v2043_v22 = vrot.slane %v2039_v29, 1  ;;  %v2046_v32 = vrot.slane %v2039_v29, 2  ;;  %v2041_v60 = vpop.permute.xlu1 %2040 }
 0x2b0   : > { %v2047_v10 = vrot.slane %v2041_v60, 2  ;;  %v2116_v2 = vpop.permute.xlu2 %2115 }
 0x2b1   : > { %v2124_v37 = vrot.slane %v2116_v2, 2 }
 0x2b2   : > { %v2050_v58 = vsel %vm1809_vm8, %v2046_v32, %v2047_v10 }
 0x2b3   : > { %v2051_v46 = vsel %vm2022_vm11, %v2043_v22, %v2050_v58 }
 0x2b4   : > { %v2055_v12 = vmul.f32 %v2051_v46, %v2033_v23  ;;  %2328 = vrot.lane.b32.xlu0 %v9237_v63, %s8280_s8 }
 0x2b5   : > { %2349 = vrot.lane.b32.xlu1 %v8529_v18, %s8280_s8 }
 0x2b6   : > { %v2057_v57 = vadd.f32 %v2055_v12, %v2031_v27  ;;  %v2063_v43 = vpop.permute.xlu0 %2062  ;;  %2351 = vrot.lane.b32.xlu2 %v9263_v30, %s8280_s8 }
 0x2b7   : > { %v2071_v53 = vrot.slane %v2063_v43, 2  ;;  %v2065_v1 = vpop.permute.xlu1 %2064 }
 0x2b8   : > { %v2069_v51 = vrot.slane %v2065_v1, 1  ;;  %v2072_v0 = vrot.slane %v2065_v1, 2  ;;  %v9650_v38 = vpop.permute.xlu2 %2140 }
 0x2b9   : > { %v2074_v47 = vsel %vm1809_vm8, %v2070_v26, %v2071_v53  ;;  %v2148_v43 = vrot.slane %v9650_v38, 1 }
 0x2ba   : > { %v2076_v34 = vsel %vm2075_vm12, %v2068_v28, %v2074_v47  ;;  %v2077_v3 = vsel %vm1809_vm8, %v2072_v0, %v2073_v5 }
 0x2bb   : > { %v2081_v56 = vmul.f32 %v2076_v34, %v2059_v20  ;;  %v2078_v42 = vsel %vm2075_vm12, %v2069_v51, %v2077_v3  ;;  %v2139_v51 = vstv %s5959_s19 }
 0x2bc   : > { %v2082_v4 = vmul.f32 %v2078_v42, %v2059_v20  ;;  %2353 = vrot.lane.b32.xlu0 %v8535_v25, %s8280_s8 }
 0x2bd   : > { %v2083_v35 = vadd.f32 %v2081_v56, %v2056_v54  ;;  %2355 = vrot.lane.b32.xlu1 %v9276_v11, %s8280_s8  ;;  %s9845_s8 = sld [smem:[#allocation4 + $0x60]] }
 0x2be   : > { %v2084_v8 = vadd.f32 %v2082_v4, %v2057_v57  ;;  %v2088_v44 = vpop.permute.xlu0 %2087  ;;  %2375 = vrot.lane.b32.xlu2 %v8527_v15, %s8281_s21  ;;  %v2150_v57 = vrot.slane %v9650_v38, 2 }
 0x2bf   : > { %v2095_v17 = vrot.slane %v2088_v44, 1  ;;  %v2097_v9 = vrot.slane %v2088_v44, 2  ;;  %v2090_v41 = vpop.permute.xlu1 %2089 }
 0x2c0   : > { %v2098_v7 = vrot.slane %v2090_v41, 2  ;;  %v2147_v49 = vpop.permute.xlu2 %2146 }
 0x2c1   : > { %v2153_v53 = vrot.slane %v2147_v49, 2 }
 0x2c2   : > { %v2101_v13 = vsel %vm1809_vm8, %v2097_v9, %v2098_v7 }
 0x2c3   : > { %v2102_v21 = vsel %vm2075_vm12, %v2095_v17, %v2101_v13  ;;  %v2165_v13 = vstv %s9693_s16 }
 0x2c4   : > { %v2107_v39 = vmul.f32 %v2102_v21, %v2086_v36  ;;  %2377 = vrot.lane.b32.xlu0 %v9223_v50, %s8281_s21 }
 0x2c5   : > { %2379 = vrot.lane.b32.xlu1 %v8533_v24, %s8281_s21 }
 0x2c6   : > { %v2109_v45 = vadd.f32 %v2107_v39, %v2083_v35  ;;  %v2094_v62 = vpop.permute.xlu0 %2093  ;;  %2381 = vrot.lane.b32.xlu2 %v9237_v63, %s8281_s21 }
 0x2c7   : > { %v2100_v16 = vrot.slane %v2094_v62, 2  ;;  %v2114_v52 = vpop.permute.xlu1 %2113 }
 0x2c8   : > { %v2121_v55 = vrot.slane %v2114_v52, 1  ;;  %v2123_v6 = vrot.slane %v2114_v52, 2  ;;  %v9676_v19 = vpop.permute.xlu2 %2170 }
 0x2c9   : > { %v2103_v23 = vsel %vm1809_vm8, %v2099_v33, %v2100_v16  ;;  %v2175_v62 = vrot.slane %v9676_v19, 1 }
 0x2ca   : > { %v2104_v40 = vsel %vm2075_vm12, %v2096_v61, %v2103_v23  ;;  %v2127_v14 = vsel %vm1809_vm8, %v2123_v6, %v2124_v37  ;;  %vm2595_vm12 = vcmask 1041408  }
 0x2cb   : > { %v2108_v31 = vmul.f32 %v2104_v40, %v2086_v36  ;;  %v2129_v48 = vsel %vm2128_vm9, %v2121_v55, %v2127_v14  ;;  %v2191_v40 = vstv %s9707_s22 }
 0x2cc   : > { %v2134_v27 = vmul.f32 %v2129_v48, %v2112_v59  ;;  %2402 = vrot.lane.b32.xlu0 %v8529_v18, %s8281_s21 }
 0x2cd   : > { %v2110_v54 = vadd.f32 %v2108_v31, %v2084_v8  ;;  %2404 = vrot.lane.b32.xlu1 %v9263_v30, %s8281_s21 }
 0x2ce   : > { %v2136_v29 = vadd.f32 %v2134_v27, %v2109_v45  ;;  %v2118_v22 = vpop.permute.xlu0 %2117  ;;  %2406 = vrot.lane.b32.xlu2 %v8535_v25, %s8281_s21  ;;  %v2178_v45 = vrot.slane %v9676_v19, 2 }
 0x2cf   : > { %v2122_v32 = vrot.slane %v2118_v22, 1  ;;  %v2125_v60 = vrot.slane %v2118_v22, 2  ;;  %v2120_v10 = vpop.permute.xlu1 %2119 }
 0x2d0   : > { %v2126_v58 = vrot.slane %v2120_v10, 2  ;;  %v2195_v12 = vpop.permute.xlu2 %2194 }
 0x2d1   : > { %v2203_v16 = vrot.slane %v2195_v12, 2 }
 0x2d2   : > { %v2130_v46 = vsel %vm1809_vm8, %v2125_v60, %v2126_v58 }
 0x2d3   : > { %v2131_v2 = vsel %vm2128_vm9, %v2122_v32, %v2130_v46 }
 0x2d4   : > { %v2135_v26 = vmul.f32 %v2131_v2, %v2112_v59  ;;  %2408 = vrot.lane.b32.xlu0 %v9276_v11, %s8281_s21 }
 0x2d5   : > { %2428 = vrot.lane.b32.xlu1 %v8527_v15, %s8282_s23 }
 0x2d6   : > { %v2137_v28 = vadd.f32 %v2135_v26, %v2110_v54  ;;  %v2143_v5 = vpop.permute.xlu0 %2142  ;;  %2430 = vrot.lane.b32.xlu2 %v9223_v50, %s8282_s23 }
 0x2d7   : > { %v2151_v1 = vrot.slane %v2143_v5, 2  ;;  %v2145_v20 = vpop.permute.xlu1 %2144 }
 0x2d8   : > { %v2149_v0 = vrot.slane %v2145_v20, 1  ;;  %v2152_v47 = vrot.slane %v2145_v20, 2  ;;  %v9700_v4 = vpop.permute.xlu2 %2218 }
 0x2d9   : > { %v2154_v34 = vsel %vm1809_vm8, %v2150_v57, %v2151_v1  ;;  %v2217_v1 = vstv %s5962_s20 }
 0x2da   : > { %v2155_v3 = vsel %vm2128_vm9, %v2148_v43, %v2154_v34  ;;  %v2156_v56 = vsel %vm1809_vm8, %v2152_v47, %v2153_v53 }
 0x2db   : > { %v2160_v42 = vmul.f32 %v2155_v3, %v2139_v51  ;;  %v2157_v38 = vsel %vm2128_vm9, %v2149_v0, %v2156_v56  ;;  %vm2638_vm9 = vcmask 951296  }
 0x2dc   : > { %v2161_v35 = vmul.f32 %v2157_v38, %v2139_v51  ;;  %2432 = vrot.lane.b32.xlu0 %v8533_v24, %s8282_s23 }
 0x2dd   : > { %v2162_v8 = vadd.f32 %v2160_v42, %v2136_v29  ;;  %2434 = vrot.lane.b32.xlu1 %v9237_v63, %s8282_s23 }
 0x2de   : > { %v2163_v44 = vadd.f32 %v2161_v35, %v2137_v28  ;;  %v2167_v17 = vpop.permute.xlu0 %2166  ;;  %2455 = vrot.lane.b32.xlu2 %v8529_v18, %s8282_s23  ;;  %v2226_v28 = vrot.slane %v9700_v4, 1 }
 0x2df   : > { %v2174_v9 = vrot.slane %v2167_v17, 1  ;;  %v2176_v41 = vrot.slane %v2167_v17, 2  ;;  %v2169_v7 = vpop.permute.xlu1 %2168  ;;  %v2243_v17 = vstv %s9743_s13 }
 0x2e0   : > { %v2177_v36 = vrot.slane %v2169_v7, 2  ;;  %v2225_v39 = vpop.permute.xlu2 %2224 }
 0x2e1   : > { %v2231_v5 = vrot.slane %v2225_v39, 2 }
 0x2e2   : > { %v2180_v21 = vsel %vm1809_vm8, %v2176_v41, %v2177_v36 }
 0x2e3   : > { %v2181_v49 = vsel %vm1173_vm1, %v2174_v9, %v2180_v21 }
 0x2e4   : > { %v2186_v33 = vmul.f32 %v2181_v49, %v2165_v13  ;;  %2457 = vrot.lane.b32.xlu0 %v9263_v30, %s8282_s23 }
 0x2e5   : > { %2459 = vrot.lane.b32.xlu1 %v8535_v25, %s8282_s23 }
 0x2e6   : > { %v2188_v61 = vadd.f32 %v2186_v33, %v2162_v8  ;;  %v2173_v37 = vpop.permute.xlu0 %2172  ;;  %2461 = vrot.lane.b32.xlu2 %v9276_v11, %s8282_s23 }
 0x2e7   : > { %v2179_v52 = vrot.slane %v2173_v37, 2  ;;  %v2193_v55 = vpop.permute.xlu1 %2192  ;;  %v2269_v37 = vstv %s9755_s25 }
 0x2e8   : > { %v2200_v6 = vrot.slane %v2193_v55, 1  ;;  %v2202_v23 = vrot.slane %v2193_v55, 2  ;;  %v9726_v19 = vpop.permute.xlu2 %2248 }
 0x2e9   : > { %v2182_v59 = vsel %vm1809_vm8, %v2178_v45, %v2179_v52  ;;  %v2256_v36 = vrot.slane %v9726_v19, 2 }
 0x2ea   : > { %v2183_v14 = vsel %vm1173_vm1, %v2175_v62, %v2182_v59  ;;  %v2206_v31 = vsel %vm1809_vm8, %v2202_v23, %v2203_v16 }
 0x2eb   : > { %v2187_v48 = vmul.f32 %v2183_v14, %v2165_v13  ;;  %v2207_v27 = vsel %vm1173_vm1, %v2200_v6, %v2206_v31 }
 0x2ec   : > { %v2212_v54 = vmul.f32 %v2207_v27, %v2191_v40  ;;  %2481 = vrot.lane.b32.xlu0 %v8527_v15, %s8283_s12 }
 0x2ed   : > { %v2189_v29 = vadd.f32 %v2187_v48, %v2163_v44  ;;  %2483 = vrot.lane.b32.xlu1 %v9223_v50, %s8283_s12  ;;  %v2228_v50 = vrot.slane %v9700_v4, 2 }
 0x2ee   : > { %v2214_v22 = vadd.f32 %v2212_v54, %v2188_v61  ;;  %v2197_v32 = vpop.permute.xlu0 %2196  ;;  %2485 = vrot.lane.b32.xlu2 %v8533_v24, %s8283_s12 }
 0x2ef   : > { %v2201_v60 = vrot.slane %v2197_v32, 1  ;;  %v2204_v10 = vrot.slane %v2197_v32, 2  ;;  %v2199_v58 = vpop.permute.xlu1 %2198 }
 0x2f0   : > { %v2205_v46 = vrot.slane %v2199_v58, 2  ;;  %v2273_v26 = vpop.permute.xlu2 %2272 }
 0x2f1   : > { %v2281_v49 = vrot.slane %v2273_v26, 2 }
 0x2f2   : > { %v2208_v2 = vsel %vm1809_vm8, %v2204_v10, %v2205_v46 }
 0x2f3   : > { %v2209_v12 = vsel %vm1173_vm1, %v2201_v60, %v2208_v2  ;;  %vm2337_vm1 = vcmask 449536  }
 0x2f4   : > { %v2213_v15 = vmul.f32 %v2209_v12, %v2191_v40  ;;  %2487 = vrot.lane.b32.xlu0 %v9237_v63, %s8283_s12 }
 0x2f5   : > { %2508 = vrot.lane.b32.xlu1 %v8529_v18, %s8283_s12 }
 0x2f6   : > { %v2215_v57 = vadd.f32 %v2213_v15, %v2189_v29  ;;  %v2221_v43 = vpop.permute.xlu0 %2220  ;;  %2510 = vrot.lane.b32.xlu2 %v9263_v30, %s8283_s12 }
 0x2f7   : > { %v2229_v24 = vrot.slane %v2221_v43, 2  ;;  %v2223_v53 = vpop.permute.xlu1 %2222 }
 0x2f8   : > { %v2227_v20 = vrot.slane %v2223_v53, 1  ;;  %v2230_v51 = vrot.slane %v2223_v53, 2  ;;  %v2297_v3 = vpop.permute.xlu2 %2296 }
 0x2f9   : > { %v2232_v0 = vsel %vm1809_vm8, %v2228_v50, %v2229_v24  ;;  %v2306_v10 = vrot.slane %v2297_v3, 2  ;;  %v2304_v46 = vrot.slane %v2297_v3, 1  ;;  %v2295_v50 = vstv %s5965_s30 }
 0x2fa   : > { %v2233_v18 = vsel %vm1210_vm2, %v2226_v28, %v2232_v0  ;;  %v2234_v63 = vsel %vm1809_vm8, %v2230_v51, %v2231_v5 }
 0x2fb   : > { %v2238_v47 = vmul.f32 %v2233_v18, %v2217_v1  ;;  %v2235_v34 = vsel %vm1210_vm2, %v2227_v20, %v2234_v63 }
 0x2fc   : > { %v2239_v56 = vmul.f32 %v2235_v34, %v2217_v1  ;;  %2512 = vrot.lane.b32.xlu0 %v8535_v25, %s8283_s12 }
 0x2fd   : > { %v2240_v42 = vadd.f32 %v2238_v47, %v2214_v22  ;;  %2514 = vrot.lane.b32.xlu1 %v9276_v11, %s8283_s12  ;;  %v2253_v11 = vrot.slane %v9726_v19, 1 }
 0x2fe   : > { %v2241_v38 = vadd.f32 %v2239_v56, %v2215_v57  ;;  %v2245_v4 = vpop.permute.xlu0 %2244 }
 0x2ff   : > { %v2252_v30 = vrot.slane %v2245_v4, 1  ;;  %v2254_v35 = vrot.slane %v2245_v4, 2  ;;  %v2247_v8 = vpop.permute.xlu1 %2246 }
 0x300   : > { %v2255_v44 = vrot.slane %v2247_v8, 2  ;;  %v2303_v7 = vpop.permute.xlu2 %2302 }
 0x301   : > { %v2309_v12 = vrot.slane %v2303_v7, 2 }
 0x302   : > { %v2258_v9 = vsel %vm1809_vm8, %v2254_v35, %v2255_v44  ;;  %v2321_v35 = vstv %s9778_s28 }
 0x303   : > { %v2259_v41 = vsel %vm1210_vm2, %v2252_v30, %v2258_v9 }
 0x304   : > { %v2264_v25 = vmul.f32 %v2259_v41, %v2243_v17 }
 0x306   : > { %v2266_v13 = vadd.f32 %v2264_v25, %v2240_v42  ;;  %v2251_v21 = vpop.permute.xlu0 %2250 }
 0x307   : > { %v2257_v39 = vrot.slane %v2251_v21, 2  ;;  %v2271_v33 = vpop.permute.xlu1 %2270 }
 0x308   : > { %v2278_v45 = vrot.slane %v2271_v33, 1  ;;  %v2280_v61 = vrot.slane %v2271_v33, 2  ;;  %v2327_v23 = vpop.permute.xlu2 %2326 }
 0x309   : > { %v2260_v62 = vsel %vm1809_vm8, %v2256_v36, %v2257_v39  ;;  %v2334_v34 = vrot.slane %v2327_v23, 2  ;;  %v2331_v3 = vrot.slane %v2327_v23, 1 }
 0x30a   : > { %v2261_v16 = vsel %vm1210_vm2, %v2253_v11, %v2260_v62  ;;  %v2284_v52 = vsel %vm1809_vm8, %v2280_v61, %v2281_v49 }
 0x30b   : > { %v2265_v55 = vmul.f32 %v2261_v16, %v2243_v17  ;;  %v2285_v6 = vsel %vm1247_vm6, %v2278_v45, %v2284_v52 }
 0x30c   : > { %v2290_v59 = vmul.f32 %v2285_v6, %v2269_v37 }
 0x30d   : > { %v2267_v40 = vadd.f32 %v2265_v55, %v2241_v38 }
 0x30e   : > { %v2292_v14 = vadd.f32 %v2290_v59, %v2266_v13  ;;  %v2275_v31 = vpop.permute.xlu0 %2274  ;;  %v2647_v59 = vlaneseq }
 0x30f   : > { %v2279_v48 = vrot.slane %v2275_v31, 1  ;;  %v2282_v27 = vrot.slane %v2275_v31, 2  ;;  %v2277_v19 = vpop.permute.xlu1 %2276 }
 0x310   : > { %v2283_v54 = vrot.slane %v2277_v19, 2  ;;  %v9768_v32 = vpop.permute.xlu2 %2351  ;;  %vm2649_vm2 = vcmp.lt.s32.totalorder %v2647_v59, 384 }
 0x311   : > { %v2360_v23 = vrot.slane %v9768_v32, 2  ;;  %v2374_v32 = vstv %s9805_s26 }
 0x312   : > { %v2286_v29 = vsel %vm1809_vm8, %v2282_v27, %v2283_v54 }
 0x313   : > { %v2287_v22 = vsel %vm1247_vm6, %v2279_v48, %v2286_v29 }
 0x314   : > { %v2291_v60 = vmul.f32 %v2287_v22, %v2269_v37  ;;  %v2348_v22 = vstv %s9803_s10 }
 0x316   : > { %v2293_v58 = vadd.f32 %v2291_v60, %v2267_v40  ;;  %v2299_v2 = vpop.permute.xlu0 %2298  ;;  %v8284_v40 = vmov 0.0  }
 0x317   : > { %v2307_v26 = vrot.slane %v2299_v2, 2  ;;  %v2301_v15 = vpop.permute.xlu1 %2300  ;;  %2646 = vst [vmem:[#allocation2] sm:$0xff] %v8284_v40 }
 0x318   : > { %v2305_v57 = vrot.slane %v2301_v15, 1  ;;  %v2308_v28 = vrot.slane %v2301_v15, 2  ;;  %v9776_v0 = vpop.permute.xlu2 %2375  ;;  %2651 = vst.msk [vmem:[#allocation2 + $0x8] sm:$0x7] %vm2649_vm2, %v8284_v40  ;;  %vm2667_vm2 = vcmask 1042434  }
 0x319   : > { %v2310_v43 = vsel %vm1809_vm8, %v2306_v10, %v2307_v26  ;;  %v2385_v19 = vrot.slane %v9776_v0, 2  ;;  %v2383_v15 = vrot.slane %v9776_v0, 1 }
 0x31a   : > { %v2311_v5 = vsel %vm1247_vm6, %v2304_v46, %v2310_v43  ;;  %v2312_v24 = vsel %vm1809_vm8, %v2308_v28, %v2309_v12 }
 0x31b   : > { %v2316_v53 = vmul.f32 %v2311_v5, %v2295_v50  ;;  %v2313_v1 = vsel %vm1247_vm6, %v2305_v57, %v2312_v24  ;;  %vm2681_vm6 = vcmp.lt.s32.totalorder %v2647_v59, 512 }
 0x31c   : > { %v2317_v20 = vmul.f32 %v2313_v1, %v2295_v50  ;;  %v2401_v50 = vstv %s9814_s29 }
 0x31d   : > { %v9774_v51 = vadd.f32 %v2316_v53, %v2292_v14  ;;  %v2680_v14 = vld [vmem:[#allocation8] sm:$0xf] }
 0x31e   : > { %v2319_v18 = vadd.f32 %v2317_v20, %v2293_v58  ;;  %v2323_v63 = vpop.permute.xlu0 %2322  ;;  %2683 = vst.msk [vmem:[#allocation2 + $0x7] sm:$0xf] %vm2681_vm6, %v2680_v14  ;;  %vm2670_vm6 = vcmask 1044484  }
 0x31f   : > { %v2325_v47 = vpop.permute.xlu1 %2324  ;;  %v2332_v45 = vrot.slane %v2323_v63, 2  ;;  %v2330_v37 = vrot.slane %v2323_v63, 1 }
 0x320   : > { %v9780_v4 = vpop.permute.xlu2 %2381  ;;  %v2333_v61 = vrot.slane %v2325_v47, 2 }
 0x321   : > { %v2388_v28 = vrot.slane %v9780_v4, 2 }
 0x322   : > { %v2336_v55 = vsel %vm1809_vm8, %v2332_v45, %v2333_v61 }
 0x323   : > { %v2338_v31 = vsel %vm2337_vm1, %v2330_v37, %v2336_v55 }
 0x324   : > { %v2343_v29 = vmul.f32 %v2338_v31, %v2321_v35 }
 0x326   : > { %v2329_v56 = vpop.permute.xlu0 %2328  ;;  %v2345_v53 = vadd.f32 %v2343_v29, %v9774_v51 }
 0x327   : > { %v2335_v42 = vrot.slane %v2329_v56, 2  ;;  %v2350_v38 = vpop.permute.xlu1 %2349 }
 0x328   : > { %v9789_v7 = vpop.permute.xlu2 %2406  ;;  %v2359_v6 = vrot.slane %v2350_v38, 2  ;;  %v2357_v48 = vrot.slane %v2350_v38, 1 }
 0x329   : > { %v2339_v30 = vsel %vm1809_vm8, %v2334_v34, %v2335_v42  ;;  %v2411_v38 = vrot.slane %v9789_v7, 1  ;;  %v2414_v4 = vrot.slane %v9789_v7, 2 }
 0x32a   : > { %v2340_v8 = vsel %vm2337_vm1, %v2331_v3, %v2339_v30  ;;  %v2363_v27 = vsel %vm1809_vm8, %v2359_v6, %v2360_v23 }
 0x32b   : > { %v2344_v44 = vmul.f32 %v2340_v8, %v2321_v35  ;;  %v2364_v26 = vsel %vm2337_vm1, %v2357_v48, %v2363_v27  ;;  %v2454_v48 = vstv %s9845_s8 }
 0x32d   : > { %v9785_v17 = vadd.f32 %v2344_v44, %v2319_v18  ;;  %v2369_v18 = vmul.f32 %v2364_v26, %v2348_v22 }
 0x32e   : > { %v9787_v9 = vpop.permute.xlu0 %2353 }
 0x32f   : > { %v2356_v41 = vpop.permute.xlu1 %2355  ;;  %v2361_v10 = vrot.slane %v9787_v9, 2  ;;  %v2358_v1 = vrot.slane %v9787_v9, 1  ;;  %v2427_v9 = vstv %s9824_s27 }
 0x330   : > { %v9793_v13 = vpop.permute.xlu2 %2430  ;;  %v2362_v58 = vrot.slane %v2356_v41, 2 }
 0x331   : > { %v2439_v5 = vrot.slane %v9793_v13, 2 }
 0x332   : > { %v2365_v63 = vsel %vm1809_vm8, %v2361_v10, %v2362_v58  ;;  %v2480_v58 = vstv %s9854_s4 }
 0x333   : > { %v2366_v35 = vsel %vm2337_vm1, %v2358_v1, %v2365_v63  ;;  %vm2665_vm1 = vcmask 1040384  }
 0x334   : > { %v2370_v37 = vmul.f32 %v2366_v35, %v2348_v22 }
 0x336   : > { %v2378_v25 = vpop.permute.xlu0 %2377 }
 0x337   : > { %v9791_v36 = vpop.permute.xlu1 %2379  ;;  %v2386_v54 = vrot.slane %v2378_v25, 2  ;;  %v2371_v25 = vadd.f32 %v2369_v18, %v2345_v53  ;;  %v2372_v18 = vadd.f32 %v2370_v37, %v9785_v17 }
 0x338   : > { %v9797_v49 = vpop.permute.xlu2 %2455  ;;  %v2387_v20 = vrot.slane %v9791_v36, 2  ;;  %v2384_v42 = vrot.slane %v9791_v36, 1 }
 0x339   : > { %v2389_v57 = vsel %vm1809_vm8, %v2385_v19, %v2386_v54  ;;  %v2465_v3 = vrot.slane %v9797_v49, 2  ;;  %v2463_v13 = vrot.slane %v9797_v49, 1 }
 0x33a   : > { %v2391_v34 = vsel %vm2390_vm13, %v2383_v15, %v2389_v57  ;;  %v2392_v8 = vsel %vm1809_vm8, %v2387_v20, %v2388_v28 }
 0x33b   : > { %v2396_v36 = vmul.f32 %v2391_v34, %v2374_v32  ;;  %v2393_v55 = vsel %vm2390_vm13, %v2384_v42, %v2392_v8  ;;  %v2507_v34 = vstv %s9869_s24 }
 0x33c   : > { %v2397_v54 = vmul.f32 %v2393_v55, %v2374_v32 }
 0x33d   : > { %v2398_v14 = vadd.f32 %v2396_v36, %v2371_v25 }
 0x33e   : > { %v9795_v11 = vpop.permute.xlu0 %2402 }
 0x33f   : > { %v2405_v21 = vpop.permute.xlu1 %2404  ;;  %v2412_v46 = vrot.slane %v9795_v11, 2  ;;  %v2410_v0 = vrot.slane %v9795_v11, 1 }
 0x340   : > { %v9811_v52 = vpop.permute.xlu2 %2461  ;;  %v2413_v2 = vrot.slane %v2405_v21, 2 }
 0x342   : > { %v2416_v47 = vsel %vm1809_vm8, %v2412_v46, %v2413_v2 }
 0x343   : > { %v2417_v44 = vsel %vm2390_vm13, %v2410_v0, %v2416_v47 }
 0x344   : > { %v2422_v6 = vmul.f32 %v2417_v44, %v2401_v50  ;;  %v2533_v44 = vstv %s9884_s18 }
 0x346   : > { %v9799_v39 = vpop.permute.xlu0 %2408  ;;  %v2424_v10 = vadd.f32 %v2422_v6, %v2398_v14 }
 0x347   : > { %v9801_v33 = vpop.permute.xlu1 %2428  ;;  %v2415_v21 = vrot.slane %v9799_v39, 2 }
 0x348   : > { %v2438_v43 = vrot.slane %v9801_v33, 2  ;;  %v9837_v24 = vpop.permute.xlu2 %2485  ;;  %v2436_v51 = vrot.slane %v9801_v33, 1 }
 0x349   : > { %v2418_v29 = vsel %vm1809_vm8, %v2414_v4, %v2415_v21  ;;  %v2493_v32 = vrot.slane %v9837_v24, 2  ;;  %v2490_v47 = vrot.slane %v9837_v24, 1  ;;  %v2399_v4 = vadd.f32 %v2397_v54, %v2372_v18 }
 0x34a   : > { %v2442_v30 = vsel %vm1809_vm8, %v2438_v43, %v2439_v5  ;;  %v2419_v28 = vsel %vm2390_vm13, %v2411_v38, %v2418_v29  ;;  %vm2672_vm13 = vcmask 1045508  }
 0x34b   : > { %v2444_v33 = vsel %vm2443_vm14, %v2436_v51, %v2442_v30  ;;  %v2423_v51 = vmul.f32 %v2419_v28, %v2401_v50 }
 0x34c   : > { %v2449_v31 = vmul.f32 %v2444_v33, %v2427_v9 }
 0x34d   : > { %v2425_v24 = vadd.f32 %v2423_v51, %v2399_v4 }
 0x34e   : > { %v9807_v62 = vpop.permute.xlu0 %2432 }
 0x34f   : > { %v9809_v16 = vpop.permute.xlu1 %2434  ;;  %v2440_v49 = vrot.slane %v9807_v62, 2 }
 0x350   : > { %v2441_v40 = vrot.slane %v9809_v16, 2  ;;  %v2511_v19 = vpop.permute.xlu2 %2510  ;;  %v2437_v16 = vrot.slane %v9807_v62, 1 }
 0x351   : > { %v2519_v57 = vrot.slane %v2511_v19, 2 }
 0x352   : > { %v2445_v2 = vsel %vm1809_vm8, %v2440_v49, %v2441_v40 }
 0x353   : > { %v2446_v63 = vsel %vm2443_vm14, %v2437_v16, %v2445_v2 }
 0x354   : > { %v2450_v30 = vmul.f32 %v2446_v63, %v2427_v9 }
 0x356   : > { %v2458_v60 = vpop.permute.xlu0 %2457 }
 0x357   : > { %v9828_v12 = vpop.permute.xlu1 %2459  ;;  %v2466_v56 = vrot.slane %v2458_v60, 2  ;;  %v2468_v60 = vrot.slane %v9811_v52, 2  ;;  %v2451_v52 = vadd.f32 %v2449_v31, %v2424_v10 }
 0x358   : > { %v2467_v22 = vrot.slane %v9828_v12, 2  ;;  %v2464_v43 = vrot.slane %v9828_v12, 1 }
 0x359   : > { %v2469_v45 = vsel %vm1809_vm8, %v2465_v3, %v2466_v56 }
 0x35a   : > { %v2470_v27 = vsel %vm2443_vm14, %v2463_v13, %v2469_v45  ;;  %v2471_v53 = vsel %vm1809_vm8, %v2467_v22, %v2468_v60 }
 0x35b   : > { %v2475_v26 = vmul.f32 %v2470_v27, %v2454_v48  ;;  %v2472_v42 = vsel %vm2443_vm14, %v2464_v43, %v2471_v53  ;;  %vm2674_vm14 = vcmask 1043456  }
 0x35d   : > { %v2477_v3 = vadd.f32 %v2475_v26, %v2451_v52 }
 0x35e   : > { %v2482_v41 = vpop.permute.xlu0 %2481 }
 0x35f   : > { %v2491_v11 = vrot.slane %v2482_v41, 2  ;;  %v2484_v7 = vpop.permute.xlu1 %2483  ;;  %v2489_v23 = vrot.slane %v2482_v41, 1  ;;  %v2476_v41 = vmul.f32 %v2472_v42, %v2454_v48 }
 0x360   : > { %v2492_v61 = vrot.slane %v2484_v7, 2  ;;  %v2452_v7 = vadd.f32 %v2450_v30, %v2425_v24 }
 0x362   : > { %v2495_v39 = vsel %vm1809_vm8, %v2491_v11, %v2492_v61  ;;  %v2478_v61 = vadd.f32 %v2476_v41, %v2452_v7 }
 0x363   : > { %v2497_v46 = vsel %vm2496_vm15, %v2489_v23, %v2495_v39 }
 0x364   : > { %v2502_v1 = vmul.f32 %v2497_v46, %v2480_v58 }
 0x366   : > { %v2488_v15 = vpop.permute.xlu0 %2487  ;;  %v2504_v35 = vadd.f32 %v2502_v1, %v2477_v3 }
 0x367   : > { %v2494_v62 = vrot.slane %v2488_v15, 2  ;;  %v2509_v5 = vpop.permute.xlu1 %2508 }
 0x368   : > { %v2516_v20 = vrot.slane %v2509_v5, 1  ;;  %v2518_v0 = vrot.slane %v2509_v5, 2 }
 0x369   : > { %v2498_v12 = vsel %vm1809_vm8, %v2493_v32, %v2494_v62 }
 0x36a   : > { %v2522_v56 = vsel %vm1809_vm8, %v2518_v0, %v2519_v57  ;;  %v2499_v8 = vsel %vm2496_vm15, %v2490_v47, %v2498_v12 }
 0x36b   : > { %v2523_v38 = vsel %vm2496_vm15, %v2516_v20, %v2522_v56  ;;  %v2503_v21 = vmul.f32 %v2499_v8, %v2480_v58 }
 0x36c   : > { %v2528_v17 = vmul.f32 %v2523_v38, %v2507_v34 }
 0x36d   : > { %v2505_v6 = vadd.f32 %v2503_v21, %v2478_v61 }
 0x36e   : > { %v2513_v25 = vpop.permute.xlu0 %2512  ;;  %v2530_v50 = vadd.f32 %v2528_v17, %v2504_v35 }
 0x36f   : > { %v2515_v36 = vpop.permute.xlu1 %2514  ;;  %v2517_v13 = vrot.slane %v2513_v25, 1  ;;  %v2520_v11 = vrot.slane %v2513_v25, 2 }
 0x370   : > { %v2521_v33 = vrot.slane %v2515_v36, 2  ;;  %v2534_v45 = vadd.f32 %v2533_v44, %v2530_v50 }
 0x372   : > { %v2524_v37 = vsel %vm1809_vm8, %v2520_v11, %v2521_v33  ;;  %v5975_v9 = vmul.f32 -1.442695, %v2534_v45 }
 0x373   : > { %v2525_v55 = vsel %vm2496_vm15, %v2517_v13, %v2524_v37  ;;  %vm2677_vm15 = vcmp.lt.s32.totalorder %v2647_v59, 885 }
 0x374   : > { %v2529_v23 = vmul.f32 %v2525_v55, %v2507_v34  ;;  %7904 = vpow2.f32 %v5975_v9 }
 0x376   : > { %v2531_v49 = vadd.f32 %v2529_v23, %v2505_v6 }
 0x378   : > { %v2535_v40 = vadd.f32 %v2533_v44, %v2531_v49 }
 0x37a   : > { %v7905_v39 = vpop.eup %7904  ;;  %v5976_v14 = vmul.f32 -1.442695, %v2535_v40 }
 0x37b   : > { %v2542_v31 = vadd.f32 1.0, %v7905_v39 }
 0x37c   : > { %7906 = vpow2.f32 %v5976_v14 }
 0x37d   : > { %7908 = vrcp.f32 %v2542_v31  ;;  %v2555_v22 = vand.u32 2147483648, %v2542_v31  ;;  %v2553_v10 = vand.u32 2147483647, %v2542_v31  ;;  %vm2549_vm3 = vweird.f32 %v2542_v31 }
 0x37f   : > { %v2556_v46 = vor.u32 1.1754944e-38, %v2555_v22  ;;  %vm2554_vm5 = vcmp.eq.f32.partialorder %v2553_v10, 8.507059e+37 }
 0x382   : > { %v7907_v48 = vpop.eup %7906 }
 0x383   : > { %v7909_v27 = vpop.eup %7908  ;;  %v2543_v19 = vadd.f32 1.0, %v7907_v48 }
 0x384   : > { %v2545_v54 = vmul.f32 %v7909_v27, %v2542_v31  ;;  %vm2550_vm0 = vweird.f32 %v7909_v27 }
 0x385   : > { %7910 = vrcp.f32 %v2543_v19  ;;  %vm2551_vm4 = vmor %vm2549_vm3, %vm2550_vm0  ;;  %v2570_v28 = vand.u32 2147483648, %v2543_v19  ;;  %v2568_v43 = vand.u32 2147483647, %v2543_v19  ;;  %vm2564_vm8 = vweird.f32 %v2543_v19 }
 0x386   : > { %v2546_v29 = vsub.f32 1.0, %v2545_v54 }
 0x387   : > { %v2571_v5 = vor.u32 1.1754944e-38, %v2570_v28  ;;  %vm2569_vm11 = vcmp.eq.f32.partialorder %v2568_v43, 8.507059e+37 }
 0x388   : > { %v2547_v60 = vmul.f32 %v7909_v27, %v2546_v29 }
 0x38a   : > { %v2548_v16 = vadd.f32 %v7909_v27, %v2547_v60 }
 0x38b   : > { %v7911_v58 = vpop.eup %7910 }
 0x38c   : > { %v2552_v2 = vsel %vm2551_vm4, %v7909_v27, %v2548_v16  ;;  %v2560_v26 = vmul.f32 %v7911_v58, %v2543_v19  ;;  %vm2565_vm7 = vweird.f32 %v7911_v58 }
 0x38d   : > { %v2557_v32 = vsel %vm2554_vm5, %v2556_v46, %v2552_v2  ;;  %vm2566_vm10 = vmor %vm2564_vm8, %vm2565_vm7 }
 0x38e   : > { %v2561_v15 = vsub.f32 1.0, %v2560_v26  ;;  %v2574_v57 = vmul.f32 %v2557_v32, %v2534_v45 }
 0x390   : > { %v2562_v52 = vmul.f32 %v7911_v58, %v2561_v15  ;;  %2578 = vst [vmem:[#allocation1] ss:$9 sm:$0xff] %v2574_v57 }
 0x392   : > { %v2563_v62 = vadd.f32 %v7911_v58, %v2562_v52 }
 0x394   : > { %v2567_v53 = vsel %vm2566_vm10, %v7911_v58, %v2563_v62 }
 0x395   : > { %v2572_v1 = vsel %vm2569_vm11, %v2571_v5, %v2567_v53 }
 0x396   : > { %v2575_v20 = vmul.f32 %v2572_v1, %v2535_v40 }
 0x398   : > { %2580 = vst [vmem:[#allocation1 + $0x1] ss:$9 sm:$0xff] %v2575_v20 }
 0x39f   : > { %v2581_v0 = vld [vmem:[#allocation1] sm:$0xff]  ;;  %v2582_v18 = vld [vmem:[#allocation1 + $0x9] sm:$0xff]  ;;  %v2583_v63 = vld [vmem:[#allocation1 + $0x12] sm:$0xff] }
 0x3a0   : > { %v2584_v47 = vld [vmem:[#allocation1 + $0x1b] sm:$0xff]  ;;  %v2585_v34 = vld [vmem:[#allocation1 + $0x24] sm:$0xff]  ;;  %v2586_v51 = vld [vmem:[#allocation1 + $0x2d] sm:$0xff]  ;;  %v2596_v3 = vsel %vm2595_vm12, %v2581_v0, 0.0  ;;  %v2603_v12 = vsel %vm2595_vm12, %v2582_v18, 0.0  ;;  %v2610_v56 = vsel %vm2595_vm12, %v2583_v63, 0.0 }
 0x3a1   : > { %v2587_v42 = vld [vmem:[#allocation1 + $0x36] sm:$0xff]  ;;  %v2597_v38 = vrot.slane %v2596_v3, 4  ;;  %v2604_v4 = vrot.slane %v2603_v12, 4  ;;  %v2611_v30 = vrot.slane %v2610_v56, 4  ;;  %v2617_v35 = vsel %vm2595_vm12, %v2584_v47, 0.0 }
 0x3a2   : > { %v2618_v17 = vrot.slane %v2617_v35, 4  ;;  %v2624_v8 = vsel %vm2595_vm12, %v2585_v34, 0.0  ;;  %v2631_v44 = vsel %vm2595_vm12, %v2586_v51, 0.0  ;;  %v2639_v24 = vsel %vm2638_vm9, %v2587_v42, 0.0 }
 0x3a3   : > { %v2598_v41 = vadd.f32 %v2597_v38, %v2596_v3  ;;  %v2605_v25 = vadd.f32 %v2604_v4, %v2603_v12  ;;  %v2612_v50 = vadd.f32 %v2611_v30, %v2610_v56  ;;  %v2625_v36 = vrot.slane %v2624_v8, 4 }
 0x3a4   : > { %v2619_v13 = vadd.f32 %v2618_v17, %v2617_v35  ;;  %v2632_v11 = vrot.slane %v2631_v44, 4  ;;  %v2640_v7 = vrot.slane %v2639_v24, 4 }
 0x3a5   : > { %v2599_v21 = vrot.slane %v2598_v41, 2  ;;  %v2606_v33 = vrot.slane %v2605_v25, 2  ;;  %v2613_v45 = vrot.slane %v2612_v50, 2  ;;  %v2626_v61 = vadd.f32 %v2625_v36, %v2624_v8 }
 0x3a6   : > { %v2620_v37 = vrot.slane %v2619_v13, 2  ;;  %v2633_v9 = vadd.f32 %v2632_v11, %v2631_v44  ;;  %v2641_v55 = vadd.f32 %v2640_v7, %v2639_v24 }
 0x3a7   : > { %v2600_v6 = vadd.f32 %v2599_v21, %v2598_v41  ;;  %v2607_v23 = vadd.f32 %v2606_v33, %v2605_v25  ;;  %v2614_v49 = vadd.f32 %v2613_v45, %v2612_v50  ;;  %v2627_v40 = vrot.slane %v2626_v61, 2 }
 0x3a8   : > { %v2621_v39 = vadd.f32 %v2620_v37, %v2619_v13  ;;  %v2634_v14 = vrot.slane %v2633_v9, 2  ;;  %v2642_v31 = vrot.slane %v2641_v55, 2 }
 0x3a9   : > { %v2601_v48 = vrot.slane %v2600_v6, 1  ;;  %v2608_v27 = vrot.slane %v2607_v23, 1  ;;  %v2615_v19 = vrot.slane %v2614_v49, 1  ;;  %v2628_v54 = vadd.f32 %v2627_v40, %v2626_v61 }
 0x3aa   : > { %v2622_v29 = vrot.slane %v2621_v39, 1  ;;  %v2635_v22 = vadd.f32 %v2634_v14, %v2633_v9  ;;  %v2643_v60 = vadd.f32 %v2642_v31, %v2641_v55 }
 0x3ab   : > { %v2609_v10 = vadd.f32 %v2608_v27, %v2607_v23  ;;  %v2616_v16 = vadd.f32 %v2615_v19, %v2614_v49  ;;  %v2629_v58 = vrot.slane %v2628_v54, 1  ;;  %v2602_v32 = vadd.f32 %v2601_v48, %v2600_v6 }
 0x3ac   : > { %v2623_v46 = vadd.f32 %v2622_v29, %v2621_v39  ;;  %v2636_v2 = vrot.slane %v2635_v22, 1  ;;  %v2644_v26 = vrot.slane %v2643_v60, 1 }
 0x3ad   : > { %v2630_v15 = vadd.f32 %v2629_v58, %v2628_v54  ;;  %v2659_v57 = vrot.slane %v2609_v10, 7  ;;  %v2660_v28 = vrot.slane %v2616_v16, 6 }
 0x3ae   : > { %v2637_v52 = vadd.f32 %v2636_v2, %v2635_v22  ;;  %v2645_v43 = vadd.f32 %v2644_v26, %v2643_v60  ;;  %v2661_v62 = vrot.slane %v2623_v46, 5 }
 0x3af   : > { %v2662_v5 = vrot.slane %v2630_v15, 4  ;;  %v2666_v53 = vsel %vm2665_vm1, %v2602_v32, %v2659_v57 }
 0x3b0   : > { %v2663_v1 = vrot.slane %v2637_v52, 3  ;;  %v2664_v20 = vrot.slane %v2645_v43, 2  ;;  %v2668_v0 = vsel %vm2667_vm2, %v2660_v28, %v2661_v62 }
 0x3b1   : > { %v2669_v18 = vsel %vm2595_vm12, %v2666_v53, %v2668_v0 }
 0x3b2   : > { %v2671_v63 = vsel %vm2670_vm6, %v2662_v5, %v2663_v1 }
 0x3b3   : > { %v2673_v47 = vsel %vm2672_vm13, %v2671_v63, %v2664_v20 }
 0x3b4   : > { %v2675_v34 = vsel %vm2674_vm14, %v2669_v18, %v2673_v47 }
 0x3b5   : > { %2679 = vst.msk [vmem:[#allocation2] sm:$0x7f] %vm2677_vm15, %v2675_v34 }
 0x3b6 PF: > { %v6091_v51 = vld [vmem:[%s8488_s2 + $0xe0] sm:$0xf]  ;;  %v7430_v3 = vld [vmem:[%s8488_s2 + $0xec] sm:$0xf0]  ;;  %vm5422_vm0 = vcmask 1040384   ;;  %s5436_s3 = sand.u32 3, %s8362_s17 }
 0x3b7   : > { %v6219_v59 = vld [vmem:[%s8488_s2 + $0x1e0] sm:$0xf]  ;;  %v6092_v12 = vor.u32 %v7430_v3, %v6091_v51  ;;  %v7462_v56 = vld [vmem:[%s8488_s2 + $0x1ec] sm:$0xf0]  ;;  %vm5424_vm3 = vcmask 1042434   ;;  %vm5426_vm4 = vcmask 1041408  }
 0x3b8   : > { %v6347_v42 = vld [vmem:[%s8488_s2 + $0x2e0] sm:$0xf]  ;;  %v7494_v38 = vld [vmem:[%s8488_s2 + $0x2ec] sm:$0xf0]  ;;  %v6220_v4 = vor.u32 %v7462_v56, %v6219_v59  ;;  %p7387_p5 = scmp.ne.s32.totalorder %s8362_s17, 3 }
 0x3b9   : > { %v6348_v30 = vor.u32 %v7494_v38, %v6347_v42  ;;  %v6475_v35 = vld [vmem:[%s8488_s2 + $0x3e0] sm:$0xf]  ;;  %v7526_v17 = vld [vmem:[%s8488_s2 + $0x3ec] sm:$0xf0]  ;;  %4843 = vmatpush.bf16.msra.mxu0 %v6092_v12 }
 0x3ba   : > { %v6075_v8 = vld [vmem:[%s8488_s2 + $0xc0] sm:$0xf]  ;;  %v6476_v44 = vor.u32 %v7526_v17, %v6475_v35  ;;  %v7426_v24 = vld [vmem:[%s8488_s2 + $0xcc] sm:$0xf0]  ;;  %4856 = vmatpush.bf16.msra.mxu1 %v6220_v4 }
 0x3bb   : > { %v6203_v41 = vld [vmem:[%s8488_s2 + $0x1c0] sm:$0xf]  ;;  %v7458_v25 = vld [vmem:[%s8488_s2 + $0x1cc] sm:$0xf0]  ;;  %4869 = vmatpush.bf16.msra.mxu2 %v6348_v30  ;;  %v6076_v50 = vor.u32 %v7426_v24, %v6075_v8 }
 0x3bc   : > { %v6204_v36 = vor.u32 %v7458_v25, %v6203_v41  ;;  %v6331_v13 = vld [vmem:[%s8488_s2 + $0x2c0] sm:$0xf]  ;;  %v7490_v11 = vld [vmem:[%s8488_s2 + $0x2cc] sm:$0xf0]  ;;  %4882 = vmatpush.bf16.msra.mxu3 %v6476_v44 }
 0x3bd   : > { %v6459_v7 = vld [vmem:[%s8488_s2 + $0x3c0] sm:$0xf]  ;;  %v6332_v21 = vor.u32 %v7490_v11, %v6331_v13  ;;  %v7522_v33 = vld [vmem:[%s8488_s2 + $0x3cc] sm:$0xf0]  ;;  %4844 = vmatpush.bf16.msra.mxu0 %v6076_v50 }
 0x3be   : > { %v6059_v45 = vld [vmem:[%s8488_s2 + $0xa0] sm:$0xf]  ;;  %v7422_v61 = vld [vmem:[%s8488_s2 + $0xac] sm:$0xf0]  ;;  %v6460_v37 = vor.u32 %v7522_v33, %v6459_v7  ;;  %4857 = vmatpush.bf16.msra.mxu1 %v6204_v36 }
 0x3bf   : > { %v6187_v9 = vld [vmem:[%s8488_s2 + $0x1a0] sm:$0xf]  ;;  %v7454_v55 = vld [vmem:[%s8488_s2 + $0x1ac] sm:$0xf0]  ;;  %v6060_v23 = vor.u32 %v7422_v61, %v6059_v45  ;;  %4870 = vmatpush.bf16.msra.mxu2 %v6332_v21 }
 0x3c0   : > { %v6315_v6 = vld [vmem:[%s8488_s2 + $0x2a0] sm:$0xf]  ;;  %v7486_v49 = vld [vmem:[%s8488_s2 + $0x2ac] sm:$0xf0]  ;;  %v6188_v14 = vor.u32 %v7454_v55, %v6187_v9  ;;  %4883 = vmatpush.bf16.msra.mxu3 %v6460_v37 }
 0x3c1   : > { %v6443_v40 = vld [vmem:[%s8488_s2 + $0x3a0] sm:$0xf]  ;;  %v7518_v39 = vld [vmem:[%s8488_s2 + $0x3ac] sm:$0xf0]  ;;  %v6316_v31 = vor.u32 %v7486_v49, %v6315_v6  ;;  %4845 = vmatpush.bf16.msra.mxu0 %v6060_v23 }
 0x3c2   : > { %v6043_v48 = vld [vmem:[%s8488_s2 + $0x80] sm:$0xf]  ;;  %v7418_v27 = vld [vmem:[%s8488_s2 + $0x8c] sm:$0xf0]  ;;  %v6444_v54 = vor.u32 %v7518_v39, %v6443_v40  ;;  %4858 = vmatpush.bf16.msra.mxu1 %v6188_v14 }
 0x3c3   : > { %v6171_v19 = vld [vmem:[%s8488_s2 + $0x180] sm:$0xf]  ;;  %v7450_v29 = vld [vmem:[%s8488_s2 + $0x18c] sm:$0xf0]  ;;  %v6044_v58 = vor.u32 %v7418_v27, %v6043_v48  ;;  %4871 = vmatpush.bf16.msra.mxu2 %v6316_v31 }
 0x3c4   : > { %v6299_v22 = vld [vmem:[%s8488_s2 + $0x280] sm:$0xf]  ;;  %v7482_v60 = vld [vmem:[%s8488_s2 + $0x28c] sm:$0xf0]  ;;  %v6172_v46 = vor.u32 %v7450_v29, %v6171_v19  ;;  %4884 = vmatpush.bf16.msra.mxu3 %v6444_v54 }
 0x3c5   : > { %v6427_v10 = vld [vmem:[%s8488_s2 + $0x380] sm:$0xf]  ;;  %v7514_v16 = vld [vmem:[%s8488_s2 + $0x38c] sm:$0xf0]  ;;  %v6300_v2 = vor.u32 %v7482_v60, %v6299_v22  ;;  %4846 = vmatpush.bf16.msra.mxu0 %v6044_v58 }
 0x3c6   : > { %v6027_v26 = vld [vmem:[%s8488_s2 + $0x60] sm:$0xf]  ;;  %v7414_v32 = vld [vmem:[%s8488_s2 + $0x6c] sm:$0xf0]  ;;  %v6428_v57 = vor.u32 %v7514_v16, %v6427_v10  ;;  %4859 = vmatpush.bf16.msra.mxu1 %v6172_v46 }
 0x3c7   : > { %v6155_v15 = vld [vmem:[%s8488_s2 + $0x160] sm:$0xf]  ;;  %v7446_v28 = vld [vmem:[%s8488_s2 + $0x16c] sm:$0xf0]  ;;  %v6028_v53 = vor.u32 %v7414_v32, %v6027_v26  ;;  %4872 = vmatpush.bf16.msra.mxu2 %v6300_v2 }
 0x3c8   : > { %v6283_v52 = vld [vmem:[%s8488_s2 + $0x260] sm:$0xf]  ;;  %v7478_v43 = vld [vmem:[%s8488_s2 + $0x26c] sm:$0xf0]  ;;  %v6156_v1 = vor.u32 %v7446_v28, %v6155_v15  ;;  %4885 = vmatpush.bf16.msra.mxu3 %v6428_v57 }
 0x3c9   : > { %v6411_v62 = vld [vmem:[%s8488_s2 + $0x360] sm:$0xf]  ;;  %v7510_v5 = vld [vmem:[%s8488_s2 + $0x36c] sm:$0xf0]  ;;  %v6284_v20 = vor.u32 %v7478_v43, %v6283_v52  ;;  %4847 = vmatpush.bf16.msra.mxu0 %v6028_v53 }
 0x3ca   : > { %v6011_v0 = vld [vmem:[%s8488_s2 + $0x40] sm:$0xf]  ;;  %v7410_v18 = vld [vmem:[%s8488_s2 + $0x4c] sm:$0xf0]  ;;  %v6412_v47 = vor.u32 %v7510_v5, %v6411_v62  ;;  %4860 = vmatpush.bf16.msra.mxu1 %v6156_v1 }
 0x3cb   : > { %v6139_v63 = vld [vmem:[%s8488_s2 + $0x140] sm:$0xf]  ;;  %v7442_v34 = vld [vmem:[%s8488_s2 + $0x14c] sm:$0xf0]  ;;  %v6012_v56 = vor.u32 %v7410_v18, %v6011_v0  ;;  %4873 = vmatpush.bf16.msra.mxu2 %v6284_v20 }
 0x3cc   : > { %v6267_v51 = vld [vmem:[%s8488_s2 + $0x240] sm:$0xf]  ;;  %v7474_v3 = vld [vmem:[%s8488_s2 + $0x24c] sm:$0xf0]  ;;  %v6140_v42 = vor.u32 %v7442_v34, %v6139_v63  ;;  %4886 = vmatpush.bf16.msra.mxu3 %v6412_v47 }
 0x3cd   : > { %v6395_v59 = vld [vmem:[%s8488_s2 + $0x340] sm:$0xf]  ;;  %v7506_v12 = vld [vmem:[%s8488_s2 + $0x34c] sm:$0xf0]  ;;  %v6268_v38 = vor.u32 %v7474_v3, %v6267_v51  ;;  %4848 = vmatpush.bf16.msra.mxu0 %v6012_v56 }
 0x3ce   : > { %v5995_v4 = vld [vmem:[%s8488_s2 + $0x20] sm:$0xf]  ;;  %v7406_v30 = vld [vmem:[%s8488_s2 + $0x2c] sm:$0xf0]  ;;  %v6396_v17 = vor.u32 %v7506_v12, %v6395_v59  ;;  %4861 = vmatpush.bf16.msra.mxu1 %v6140_v42 }
 0x3cf   : > { %v6123_v35 = vld [vmem:[%s8488_s2 + $0x120] sm:$0xf]  ;;  %v7438_v8 = vld [vmem:[%s8488_s2 + $0x12c] sm:$0xf0]  ;;  %v5996_v50 = vor.u32 %v7406_v30, %v5995_v4  ;;  %4874 = vmatpush.bf16.msra.mxu2 %v6268_v38 }
 0x3d0   : > { %v6251_v44 = vld [vmem:[%s8488_s2 + $0x220] sm:$0xf]  ;;  %v7470_v24 = vld [vmem:[%s8488_s2 + $0x22c] sm:$0xf0]  ;;  %v6124_v11 = vor.u32 %v7438_v8, %v6123_v35  ;;  %4887 = vmatpush.bf16.msra.mxu3 %v6396_v17 }
 0x3d1   : > { %v6379_v41 = vld [vmem:[%s8488_s2 + $0x320] sm:$0xf]  ;;  %v7502_v25 = vld [vmem:[%s8488_s2 + $0x32c] sm:$0xf0]  ;;  %v6252_v7 = vor.u32 %v7470_v24, %v6251_v44  ;;  %4849 = vmatpush.bf16.msra.mxu0 %v5996_v50 }
 0x3d2   : > { %v5979_v36 = vld [vmem:[%s8488_s2] sm:$0xf]  ;;  %v7402_v13 = vld [vmem:[%s8488_s2 + $0xc] sm:$0xf0]  ;;  %v6380_v61 = vor.u32 %v7502_v25, %v6379_v41  ;;  %4862 = vmatpush.bf16.msra.mxu1 %v6124_v11 }
 0x3d3   : > { %v6107_v21 = vld [vmem:[%s8488_s2 + $0x100] sm:$0xf]  ;;  %v7434_v33 = vld [vmem:[%s8488_s2 + $0x10c] sm:$0xf0]  ;;  %v5980_v40 = vor.u32 %v7402_v13, %v5979_v36  ;;  %4875 = vmatpush.bf16.msra.mxu2 %v6252_v7 }
 0x3d4   : > { %v6235_v45 = vld [vmem:[%s8488_s2 + $0x200] sm:$0xf]  ;;  %v7466_v37 = vld [vmem:[%s8488_s2 + $0x20c] sm:$0xf0]  ;;  %v6108_v48 = vor.u32 %v7434_v33, %v6107_v21  ;;  %4888 = vmatpush.bf16.msra.mxu3 %v6380_v61 }
 0x3d5   : > { %v6363_v9 = vld [vmem:[%s8488_s2 + $0x300] sm:$0xf]  ;;  %v7498_v55 = vld [vmem:[%s8488_s2 + $0x30c] sm:$0xf0]  ;;  %v6236_v27 = vor.u32 %v7466_v37, %v6235_v45  ;;  %4850 = vmatpush.bf16.msra.mxu0 %v5980_v40 }
 0x3d6   : > { %v6603_v6 = vld [vmem:[%s8488_s2 + $0x4e0] sm:$0xf]  ;;  %v7558_v23 = vld [vmem:[%s8488_s2 + $0x4ec] sm:$0xf0]  ;;  %v6364_v29 = vor.u32 %v7498_v55, %v6363_v9  ;;  %4863 = vmatpush.bf16.msra.mxu1 %v6108_v48 }
 0x3d7   : > { %v6731_v49 = vld [vmem:[%s8488_s2 + $0x5e0] sm:$0xf]  ;;  %v7590_v39 = vld [vmem:[%s8488_s2 + $0x5ec] sm:$0xf0]  ;;  %v6604_v22 = vor.u32 %v7558_v23, %v6603_v6  ;;  %4876 = vmatpush.bf16.msra.mxu2 %v6236_v27 }
 0x3d8   : > { %v6859_v14 = vld [vmem:[%s8488_s2 + $0x6e0] sm:$0xf]  ;;  %v7622_v31 = vld [vmem:[%s8488_s2 + $0x6ec] sm:$0xf0]  ;;  %v6732_v60 = vor.u32 %v7590_v39, %v6731_v49  ;;  %4889 = vmatpush.bf16.msra.mxu3 %v6364_v29 }
 0x3d9   : > { %v6987_v19 = vld [vmem:[%s8488_s2 + $0x7e0] sm:$0xf]  ;;  %v7654_v54 = vld [vmem:[%s8488_s2 + $0x7ec] sm:$0xf0]  ;;  %v6860_v10 = vor.u32 %v7622_v31, %v6859_v14  ;;  %4895 = vmatpush.bf16.msrb.mxu0 %v6604_v22 }
 0x3da   : > { %v6587_v16 = vld [vmem:[%s8488_s2 + $0x4c0] sm:$0xf]  ;;  %v7554_v58 = vld [vmem:[%s8488_s2 + $0x4cc] sm:$0xf0]  ;;  %v6988_v2 = vor.u32 %v7654_v54, %v6987_v19  ;;  %4908 = vmatpush.bf16.msrb.mxu1 %v6732_v60 }
 0x3db   : > { %v6715_v46 = vld [vmem:[%s8488_s2 + $0x5c0] sm:$0xf]  ;;  %v7586_v26 = vld [vmem:[%s8488_s2 + $0x5cc] sm:$0xf0]  ;;  %v6588_v52 = vor.u32 %v7554_v58, %v6587_v16  ;;  %4921 = vmatpush.bf16.msrb.mxu2 %v6860_v10 }
 0x3dc   : > { %v6843_v32 = vld [vmem:[%s8488_s2 + $0x6c0] sm:$0xf]  ;;  %v7618_v15 = vld [vmem:[%s8488_s2 + $0x6cc] sm:$0xf0]  ;;  %v6716_v5 = vor.u32 %v7586_v26, %v6715_v46  ;;  %4934 = vmatpush.bf16.msrb.mxu3 %v6988_v2 }
 0x3dd   : > { %v6971_v57 = vld [vmem:[%s8488_s2 + $0x7c0] sm:$0xf]  ;;  %v7650_v28 = vld [vmem:[%s8488_s2 + $0x7cc] sm:$0xf0]  ;;  %v6844_v53 = vor.u32 %v7618_v15, %v6843_v32  ;;  %4896 = vmatpush.bf16.msrb.mxu0 %v6588_v52 }
 0x3de   : > { %v6571_v43 = vld [vmem:[%s8488_s2 + $0x4a0] sm:$0xf]  ;;  %v7550_v62 = vld [vmem:[%s8488_s2 + $0x4ac] sm:$0xf0]  ;;  %v6972_v18 = vor.u32 %v7650_v28, %v6971_v57  ;;  %4909 = vmatpush.bf16.msrb.mxu1 %v6716_v5 }
 0x3df   : > { %v6699_v1 = vld [vmem:[%s8488_s2 + $0x5a0] sm:$0xf]  ;;  %v7582_v20 = vld [vmem:[%s8488_s2 + $0x5ac] sm:$0xf0]  ;;  %v6572_v12 = vor.u32 %v7550_v62, %v6571_v43  ;;  %4922 = vmatpush.bf16.msrb.mxu2 %v6844_v53 }
 0x3e0   : > { %v10000_v0 = vld [vmem:[#allocation2] sm:$0xff]  ;;  %v7614_v47 = vld [vmem:[%s8488_s2 + $0x6ac] sm:$0xf0]  ;;  %v6700_v4 = vor.u32 %v7582_v20, %v6699_v1  ;;  %4935 = vmatpush.bf16.msrb.mxu3 %v6972_v18 }
 0x3e1   : > { %v6827_v63 = vld [vmem:[%s8488_s2 + $0x6a0] sm:$0xf]  ;;  %v2690_v34 = vperm.slane %v10000_v0, 2  ;;  %v2688_v51 = vperm.slane %v10000_v0, 0  ;;  %v7646_v59 = vld [vmem:[%s8488_s2 + $0x7ac] sm:$0xf0]  ;;  %4897 = vmatpush.bf16.msrb.mxu0 %v6572_v12 }
 0x3e2   : > { %v6955_v3 = vld [vmem:[%s8488_s2 + $0x7a0] sm:$0xf]  ;;  %v6828_v30 = vor.u32 %v7614_v47, %v6827_v63  ;;  %v7546_v35 = vld [vmem:[%s8488_s2 + $0x48c] sm:$0xf0]  ;;  %v2691_v8 = vperm.slane %v10000_v0, 3  ;;  %v2689_v44 = vperm.slane %v10000_v0, 1  ;;  %4910 = vmatpush.bf16.msrb.mxu1 %v6700_v4 }
 0x3e3   : > { %v6555_v56 = vld [vmem:[%s8488_s2 + $0x480] sm:$0xf]  ;;  %v10009_v42 = vpack.c.bf16 %v2690_v34, %v2690_v34  ;;  %v10011_v38 = vpack.c.bf16 %v2688_v51, %v2688_v51  ;;  %v6956_v24 = vor.u32 %v7646_v59, %v6955_v3  ;;  %v7578_v41 = vld [vmem:[%s8488_s2 + $0x58c] sm:$0xf0] }
 0x3e4   : > { %v6683_v17 = vld [vmem:[%s8488_s2 + $0x580] sm:$0xf]  ;;  %v7610_v50 = vld [vmem:[%s8488_s2 + $0x68c] sm:$0xf0]  ;;  %v10024_v11 = vpack.c.bf16 %v2691_v8, %v2691_v8  ;;  %v10026_v7 = vpack.c.bf16 %v2689_v44, %v2689_v44  ;;  %v6556_v21 = vor.u32 %v7546_v35, %v6555_v56  ;;  %4923 = vmatpush.bf16.msrb.mxu2 %v6828_v30 }
 0x3e5   : > { %v6811_v25 = vld [vmem:[%s8488_s2 + $0x680] sm:$0xf]  ;;  %4877 = vmatmul.bf16.vlgmr.msra.gmra.mxu2 %v10009_v42  ;;  %v7642_v13 = vld [vmem:[%s8488_s2 + $0x78c] sm:$0xf0]  ;;  %4851 = vmatmul.bf16.vlgmr.msra.gmra.mxu0 %v10011_v38  ;;  %v6684_v33 = vor.u32 %v7578_v41, %v6683_v17 }
 0x3e6   : > { %v6939_v36 = vld [vmem:[%s8488_s2 + $0x780] sm:$0xf]  ;;  %v6812_v45 = vor.u32 %v7610_v50, %v6811_v25  ;;  %v7542_v37 = vld [vmem:[%s8488_s2 + $0x46c] sm:$0xf0]  ;;  %4936 = vmatpush.bf16.msrb.mxu3 %v6956_v24  ;;  %4864 = vmatmul.bf16.vlgmr.msra.gmra.mxu1 %v10026_v7  ;;  %v2694_v25 = vperm.slane %v10000_v0, 6 }
 0x3e7   : > { %v6539_v61 = vld [vmem:[%s8488_s2 + $0x460] sm:$0xf]  ;;  %v6940_v55 = vor.u32 %v7642_v13, %v6939_v36  ;;  %v7574_v6 = vld [vmem:[%s8488_s2 + $0x56c] sm:$0xf0]  ;;  %4890 = vmatmul.bf16.vlgmr.msra.gmra.mxu3 %v10024_v11  ;;  %4898 = vmatpush.bf16.msrb.mxu0 %v6556_v21  ;;  %v7428_v13 = vld [vmem:[%s8488_s2 + $0xe4] sm:$0xf] }
 0x3e8   : > { %v6667_v9 = vld [vmem:[%s8488_s2 + $0x560] sm:$0xf]  ;;  %v7606_v49 = vld [vmem:[%s8488_s2 + $0x66c] sm:$0xf0]  ;;  %v6540_v14 = vor.u32 %v7542_v37, %v6539_v61  ;;  %4911 = vmatpush.bf16.msrb.mxu1 %v6684_v33  ;;  %4924 = vmatpush.bf16.msrb.mxu2 %v6812_v45  ;;  %v6093_v21 = vld [vmem:[%s8488_s2 + $0xf0] sm:$0xf0] }
 0x3e9   : > { %v6795_v23 = vld [vmem:[%s8488_s2 + $0x660] sm:$0xf]  ;;  %v7638_v39 = vld [vmem:[%s8488_s2 + $0x76c] sm:$0xf0]  ;;  %v6668_v31 = vor.u32 %v7574_v6, %v6667_v9  ;;  %v2692_v33 = vperm.slane %v10000_v0, 4  ;;  %v2695_v45 = vperm.slane %v10000_v0, 7 }
 0x3ea   : > { %v6923_v40 = vld [vmem:[%s8488_s2 + $0x760] sm:$0xf]  ;;  %v6796_v48 = vor.u32 %v7606_v49, %v6795_v23  ;;  %v7538_v19 = vld [vmem:[%s8488_s2 + $0x44c] sm:$0xf0]  ;;  %4937 = vmatpush.bf16.msrb.mxu3 %v6940_v55  ;;  %v2693_v9 = vperm.slane %v10000_v0, 5 }
 0x3eb   : > { %v6523_v27 = vld [vmem:[%s8488_s2 + $0x440] sm:$0xf]  ;;  %v6924_v29 = vor.u32 %v7638_v39, %v6923_v40  ;;  %v7570_v22 = vld [vmem:[%s8488_s2 + $0x54c] sm:$0xf0]  ;;  %4899 = vmatpush.bf16.msrb.mxu0 %v6540_v14  ;;  %v6096_v39 = vor.u32 %v7428_v13, %v6093_v21  ;;  %v10084_v0 = vpack.c.bf16 %v2692_v33, %v2692_v33 }
 0x3ec   : > { %v6651_v54 = vld [vmem:[%s8488_s2 + $0x540] sm:$0xf]  ;;  %v7602_v10 = vld [vmem:[%s8488_s2 + $0x64c] sm:$0xf0]  ;;  %v6524_v46 = vor.u32 %v7538_v19, %v6523_v27  ;;  %4912 = vmatpush.bf16.msrb.mxu1 %v6668_v31  ;;  %4925 = vmatpush.bf16.msrb.mxu2 %v6796_v48  ;;  %v10080_v27 = vpack.c.bf16 %v2694_v25, %v2694_v25  ;;  %v7424_v19 = vld [vmem:[%s8488_s2 + $0xc4] sm:$0xf] }
 0x3ed   : > { %v6779_v60 = vld [vmem:[%s8488_s2 + $0x640] sm:$0xf]  ;;  %v7634_v58 = vld [vmem:[%s8488_s2 + $0x74c] sm:$0xf0]  ;;  %v6652_v2 = vor.u32 %v7570_v22, %v6651_v54  ;;  %v6077_v54 = vld [vmem:[%s8488_s2 + $0xd0] sm:$0xf0] }
 0x3ee   : > { %v6907_v16 = vld [vmem:[%s8488_s2 + $0x740] sm:$0xf]  ;;  %v6780_v26 = vor.u32 %v7602_v10, %v6779_v60  ;;  %v7534_v15 = vld [vmem:[%s8488_s2 + $0x42c] sm:$0xf0]  ;;  %4938 = vmatpush.bf16.msrb.mxu3 %v6924_v29  ;;  %v10086_v29 = vpack.c.bf16 %v2695_v45, %v2695_v45  ;;  %v10088_v60 = vpack.c.bf16 %v2693_v9, %v2693_v9  ;;  %v6029_v25 = vld [vmem:[%s8488_s2 + $0x70] sm:$0xf0] }
 0x3ef   : > { %v6507_v32 = vld [vmem:[%s8488_s2 + $0x420] sm:$0xf]  ;;  %v6908_v28 = vor.u32 %v7634_v58, %v6907_v16  ;;  %v7566_v52 = vld [vmem:[%s8488_s2 + $0x52c] sm:$0xf0]  ;;  %4900 = vmatpush.bf16.msrb.mxu0 %v6524_v46 }
 0x3f0   : > { %v6635_v57 = vld [vmem:[%s8488_s2 + $0x520] sm:$0xf]  ;;  %v7598_v62 = vld [vmem:[%s8488_s2 + $0x62c] sm:$0xf0]  ;;  %v6508_v1 = vor.u32 %v7534_v15, %v6507_v32  ;;  %4913 = vmatpush.bf16.msrb.mxu1 %v6652_v2  ;;  %4926 = vmatpush.bf16.msrb.mxu2 %v6780_v26  ;;  %v6080_v26 = vor.u32 %v7424_v19, %v6077_v54 }
 0x3f1   : > { %v6763_v43 = vld [vmem:[%s8488_s2 + $0x620] sm:$0xf]  ;;  %v7630_v53 = vld [vmem:[%s8488_s2 + $0x72c] sm:$0xf0]  ;;  %v6636_v47 = vor.u32 %v7566_v52, %v6635_v57  ;;  %v6061_v52 = vld [vmem:[%s8488_s2 + $0xb0] sm:$0xf0] }
 0x3f2   : > { %v6891_v5 = vld [vmem:[%s8488_s2 + $0x720] sm:$0xf]  ;;  %v7530_v18 = vld [vmem:[%s8488_s2 + $0x40c] sm:$0xf0]  ;;  %v6764_v34 = vor.u32 %v7598_v62, %v6763_v43  ;;  %4939 = vmatpush.bf16.msrb.mxu3 %v6908_v28  ;;  %v7420_v28 = vld [vmem:[%s8488_s2 + $0xa4] sm:$0xf] }
 0x3f3   : > { %v6491_v20 = vld [vmem:[%s8488_s2 + $0x400] sm:$0xf]  ;;  %v7562_v51 = vld [vmem:[%s8488_s2 + $0x50c] sm:$0xf0]  ;;  %v6892_v12 = vor.u32 %v7630_v53, %v6891_v5  ;;  %4901 = vmatpush.bf16.msrb.mxu0 %v6508_v1 }
 0x3f4   : > { %v6619_v63 = vld [vmem:[%s8488_s2 + $0x500] sm:$0xf]  ;;  %v7594_v59 = vld [vmem:[%s8488_s2 + $0x60c] sm:$0xf0]  ;;  %v6492_v44 = vor.u32 %v7530_v18, %v6491_v20  ;;  %4914 = vmatpush.bf16.msrb.mxu1 %v6636_v47  ;;  %4927 = vmatpush.bf16.msrb.mxu2 %v6764_v34  ;;  %v6064_v18 = vor.u32 %v7420_v28, %v6061_v52 }
 0x3f5   : > { %v6747_v3 = vld [vmem:[%s8488_s2 + $0x600] sm:$0xf]  ;;  %v7626_v4 = vld [vmem:[%s8488_s2 + $0x70c] sm:$0xf0]  ;;  %v6620_v50 = vor.u32 %v7562_v51, %v6619_v63  ;;  %v7416_v51 = vld [vmem:[%s8488_s2 + $0x84] sm:$0xf] }
 0x3f6   : > { %v6875_v56 = vld [vmem:[%s8488_s2 + $0x700] sm:$0xf]  ;;  %v7686_v35 = vld [vmem:[%s8488_s2 + $0x8ec] sm:$0xf0]  ;;  %v6748_v36 = vor.u32 %v7594_v59, %v6747_v3  ;;  %4940 = vmatpush.bf16.msrb.mxu3 %v6892_v12  ;;  %v6045_v3 = vld [vmem:[%s8488_s2 + $0x90] sm:$0xf0] }
 0x3f7   : > { %v7115_v30 = vld [vmem:[%s8488_s2 + $0x8e0] sm:$0xf]  ;;  %v7718_v8 = vld [vmem:[%s8488_s2 + $0x9ec] sm:$0xf0]  ;;  %v6876_v61 = vor.u32 %v7626_v4, %v6875_v56  ;;  %4902 = vmatpush.bf16.msrb.mxu0 %v6492_v44 }
 0x3f8   : > { %v7243_v17 = vld [vmem:[%s8488_s2 + $0x9e0] sm:$0xf]  ;;  %v7750_v41 = vld [vmem:[%s8488_s2 + $0xaec] sm:$0xf0]  ;;  %v7116_v37 = vor.u32 %v7686_v35, %v7115_v30  ;;  %4915 = vmatpush.bf16.msrb.mxu1 %v6620_v50  ;;  %4928 = vmatpush.bf16.msrb.mxu2 %v6748_v36 }
 0x3f9   : > { %v7371_v24 = vld [vmem:[%s8488_s2 + $0xae0] sm:$0xf]  ;;  %v7244_v55 = vor.u32 %v7718_v8, %v7243_v17  ;;  %v7682_v49 = vld [vmem:[%s8488_s2 + $0x8cc] sm:$0xf0]  ;;  %v6048_v17 = vor.u32 %v7416_v51, %v6045_v3  ;;  %v7524_v51 = vld [vmem:[%s8488_s2 + $0x3e4] sm:$0xf] }
 0x3fa   : > { %v7372_v6 = vor.u32 %v7750_v41, %v7371_v24  ;;  %v7099_v23 = vld [vmem:[%s8488_s2 + $0x8c0] sm:$0xf]  ;;  %v7714_v14 = vld [vmem:[%s8488_s2 + $0x9cc] sm:$0xf0]  ;;  %4941 = vmatpush.bf16.msrb.mxu3 %v6876_v61  ;;  %4903 = vmatmul.bf16.vlgmr.msrb.gmra.mxu0 %v10084_v0  ;;  %v7412_v41 = vld [vmem:[%s8488_s2 + $0x64] sm:$0xf] }
 0x3fb   : > { %v7227_v40 = vld [vmem:[%s8488_s2 + $0x9c0] sm:$0xf]  ;;  %v7746_v48 = vld [vmem:[%s8488_s2 + $0xacc] sm:$0xf0]  ;;  %4947 = vmatpush.bf16.msra.mxu0 %v7116_v37  ;;  %v7100_v22 = vor.u32 %v7682_v49, %v7099_v23  ;;  %4929 = vmatmul.bf16.vlgmr.msrb.gmra.mxu2 %v10080_v27  ;;  %v6032_v61 = vor.u32 %v7412_v41, %v6029_v25  ;;  %v6013_v23 = vld [vmem:[%s8488_s2 + $0x50] sm:$0xf0] }
 0x3fc   : > { %v7355_v31 = vld [vmem:[%s8488_s2 + $0xac0] sm:$0xf]  ;;  %4960 = vmatpush.bf16.msra.mxu1 %v7244_v55  ;;  %4973 = vmatpush.bf16.msra.mxu2 %v7372_v6  ;;  %v7228_v10 = vor.u32 %v7714_v14, %v7227_v40  ;;  %v7678_v46 = vld [vmem:[%s8488_s2 + $0x8ac] sm:$0xf0]  ;;  %v7408_v6 = vld [vmem:[%s8488_s2 + $0x44] sm:$0xf] }
 0x3fd   : > { %v7356_v16 = vor.u32 %v7746_v48, %v7355_v31  ;;  %v7083_v58 = vld [vmem:[%s8488_s2 + $0x8a0] sm:$0xf]  ;;  %v7710_v32 = vld [vmem:[%s8488_s2 + $0x9ac] sm:$0xf0]  ;;  %4942 = vmatmul.bf16.vlgmr.msrb.gmra.mxu3 %v10086_v29  ;;  %4916 = vmatmul.bf16.vlgmr.msrb.gmra.mxu1 %v10088_v60  ;;  %v6016_v19 = vor.u32 %v7408_v6, %v6013_v23  ;;  %v6477_v3 = vld [vmem:[%s8488_s2 + $0x3f0] sm:$0xf0] }
 0x3fe   : > { %v7211_v2 = vld [vmem:[%s8488_s2 + $0x9a0] sm:$0xf]  ;;  %4986 = vmatpush.bf16.msra.mxu3 %v6096_v39  ;;  %v7742_v57 = vld [vmem:[%s8488_s2 + $0xaac] sm:$0xf0]  ;;  %v7084_v43 = vor.u32 %v7678_v46, %v7083_v58  ;;  %v5997_v58 = vld [vmem:[%s8488_s2 + $0x30] sm:$0xf0]  ;;  %v6480_v41 = vor.u32 %v7524_v51, %v6477_v3 }
 0x3ff   : > { %v7339_v15 = vld [vmem:[%s8488_s2 + $0xaa0] sm:$0xf]  ;;  %4948 = vmatpush.bf16.msra.mxu0 %v7100_v22  ;;  %v7212_v62 = vor.u32 %v7710_v32, %v7211_v2  ;;  %v7674_v1 = vld [vmem:[%s8488_s2 + $0x88c] sm:$0xf0]  ;;  %v7456_v25 = vld [vmem:[%s8488_s2 + $0x1c4] sm:$0xf] }
 0x400   : > { %4961 = vmatpush.bf16.msra.mxu1 %v7228_v10  ;;  %4974 = vmatpush.bf16.msra.mxu2 %v7356_v16  ;;  %v7340_v5 = vor.u32 %v7742_v57, %v7339_v15  ;;  %v7067_v53 = vld [vmem:[%s8488_s2 + $0x880] sm:$0xf]  ;;  %v7706_v63 = vld [vmem:[%s8488_s2 + $0x98c] sm:$0xf0]  ;;  %v7404_v16 = vld [vmem:[%s8488_s2 + $0x24] sm:$0xf] }
 0x401   : > { %v7195_v20 = vld [vmem:[%s8488_s2 + $0x980] sm:$0xf]  ;;  %v7738_v34 = vld [vmem:[%s8488_s2 + $0xa8c] sm:$0xf0]  ;;  %v7068_v59 = vor.u32 %v7674_v1, %v7067_v53  ;;  %v7400_v53 = vld [vmem:[%s8488_s2 + $0x4] sm:$0xf] }
 0x402   : > { %4987 = vmatpush.bf16.msra.mxu3 %v6080_v26  ;;  %v7323_v47 = vld [vmem:[%s8488_s2 + $0xa80] sm:$0xf]  ;;  %v7196_v12 = vor.u32 %v7706_v63, %v7195_v20  ;;  %v7670_v30 = vld [vmem:[%s8488_s2 + $0x86c] sm:$0xf0]  ;;  %v5981_v1 = vld [vmem:[%s8488_s2 + $0x10] sm:$0xf0] }
 0x403   : > { %4949 = vmatpush.bf16.msra.mxu0 %v7084_v43  ;;  %v7324_v56 = vor.u32 %v7738_v34, %v7323_v47  ;;  %v7051_v4 = vld [vmem:[%s8488_s2 + $0x860] sm:$0xf]  ;;  %v7702_v8 = vld [vmem:[%s8488_s2 + $0x96c] sm:$0xf0]  ;;  %v7460_v20 = vld [vmem:[%s8488_s2 + $0x1e4] sm:$0xf] }
 0x404   : > { %4962 = vmatpush.bf16.msra.mxu1 %v7212_v62  ;;  %4975 = vmatpush.bf16.msra.mxu2 %v7340_v5  ;;  %v7179_v35 = vld [vmem:[%s8488_s2 + $0x960] sm:$0xf]  ;;  %v7734_v24 = vld [vmem:[%s8488_s2 + $0xa6c] sm:$0xf0]  ;;  %v7052_v50 = vor.u32 %v7670_v30, %v7051_v4  ;;  %v2685_v62 = vld [vmem:[#allocation2 + $0x8] sm:$0x7]  ;;  %v6000_v5 = vor.u32 %v7404_v16, %v5997_v58 }
 0x405   : > { %v7307_v44 = vld [vmem:[%s8488_s2 + $0xa60] sm:$0xf]  ;;  %v7180_v36 = vor.u32 %v7702_v8, %v7179_v35  ;;  %v7666_v33 = vld [vmem:[%s8488_s2 + $0x84c] sm:$0xf0]  ;;  %v7492_v63 = vld [vmem:[%s8488_s2 + $0x2e4] sm:$0xf]  ;;  %v5984_v8 = vor.u32 %v7400_v53, %v5981_v1 }
 0x406   : > { %4988 = vmatpush.bf16.msra.mxu3 %v6064_v18  ;;  %v7308_v13 = vor.u32 %v7734_v24, %v7307_v44  ;;  %v7035_v21 = vld [vmem:[%s8488_s2 + $0x840] sm:$0xf]  ;;  %v7698_v37 = vld [vmem:[%s8488_s2 + $0x94c] sm:$0xf0]  ;;  %v6221_v18 = vld [vmem:[%s8488_s2 + $0x1f0] sm:$0xf0] }
 0x407   : > { %4950 = vmatpush.bf16.msra.mxu0 %v7068_v59  ;;  %v7163_v45 = vld [vmem:[%s8488_s2 + $0x940] sm:$0xf]  ;;  %v7730_v55 = vld [vmem:[%s8488_s2 + $0xa4c] sm:$0xf0]  ;;  %v7036_v49 = vor.u32 %v7666_v33, %v7035_v21  ;;  %v6349_v47 = vld [vmem:[%s8488_s2 + $0x2f0] sm:$0xf0]  ;;  %v6224_v44 = vor.u32 %v7460_v20, %v6221_v18 }
 0x408   : > { %4963 = vmatpush.bf16.msra.mxu1 %v7196_v12  ;;  %4976 = vmatpush.bf16.msra.mxu2 %v7324_v56  ;;  %v7291_v9 = vld [vmem:[%s8488_s2 + $0xa40] sm:$0xf]  ;;  %v7164_v40 = vor.u32 %v7698_v37, %v7163_v45  ;;  %v7662_v31 = vld [vmem:[%s8488_s2 + $0x82c] sm:$0xf0]  ;;  %v2696_v59 = vperm.slane %v2685_v62, 0  ;;  %v2698_v35 = vperm.slane %v2685_v62, 2  ;;  %v6352_v24 = vor.u32 %v7492_v63, %v6349_v47 }
 0x409   : > { %v7292_v39 = vor.u32 %v7730_v55, %v7291_v9  ;;  %v7019_v14 = vld [vmem:[%s8488_s2 + $0x820] sm:$0xf]  ;;  %v7694_v54 = vld [vmem:[%s8488_s2 + $0x92c] sm:$0xf0]  ;;  %v7556_v4 = vld [vmem:[%s8488_s2 + $0x4e4] sm:$0xf] }
 0x40a   : > { %4989 = vmatpush.bf16.msra.mxu3 %v6048_v17  ;;  %v7147_v48 = vld [vmem:[%s8488_s2 + $0x920] sm:$0xf]  ;;  %v7726_v10 = vld [vmem:[%s8488_s2 + $0xa2c] sm:$0xf0]  ;;  %v7020_v2 = vor.u32 %v7662_v31, %v7019_v14  ;;  %v6605_v30 = vld [vmem:[%s8488_s2 + $0x4f0] sm:$0xf0]  ;;  %v10153_v21 = vpack.c.bf16 %v2696_v59, %v2696_v59  ;;  %v10158_v37 = vpack.c.bf16 %v2698_v35, %v2698_v35 }
 0x40b   : > { %4951 = vmatpush.bf16.msra.mxu0 %v7052_v50  ;;  %v7275_v22 = vld [vmem:[%s8488_s2 + $0xa20] sm:$0xf]  ;;  %v7658_v26 = vld [vmem:[%s8488_s2 + $0x80c] sm:$0xf0]  ;;  %v7148_v57 = vor.u32 %v7694_v54, %v7147_v48  ;;  %v2697_v17 = vperm.slane %v2685_v62, 1 }
 0x40c   : > { %4964 = vmatpush.bf16.msra.mxu1 %v7180_v36  ;;  %4977 = vmatpush.bf16.msra.mxu2 %v7308_v13  ;;  %v7003_v46 = vld [vmem:[%s8488_s2 + $0x800] sm:$0xf]  ;;  %v7690_v15 = vld [vmem:[%s8488_s2 + $0x90c] sm:$0xf0]  ;;  %v7276_v28 = vor.u32 %v7726_v10, %v7275_v22  ;;  %v6205_v50 = vld [vmem:[%s8488_s2 + $0x1d0] sm:$0xf0]  ;;  %v6608_v13 = vor.u32 %v7556_v4, %v6605_v30 }
 0x40d   : > { %v7131_v32 = vld [vmem:[%s8488_s2 + $0x900] sm:$0xf]  ;;  %v7722_v43 = vld [vmem:[%s8488_s2 + $0xa0c] sm:$0xf0]  ;;  %v7004_v34 = vor.u32 %v7658_v26, %v7003_v46  ;;  %v7488_v36 = vld [vmem:[%s8488_s2 + $0x2c4] sm:$0xf]  ;;  %v10160_v9 = vpack.c.bf16 %v2697_v17, %v2697_v17  ;;  %v6208_v23 = vor.u32 %v7456_v25, %v6205_v50 }
 0x40e   : > { %4990 = vmatpush.bf16.msra.mxu3 %v6032_v61  ;;  %v7259_v52 = vld [vmem:[%s8488_s2 + $0xa00] sm:$0xf]  ;;  %v7132_v12 = vor.u32 %v7690_v15, %v7131_v32  ;;  %v6333_v33 = vld [vmem:[%s8488_s2 + $0x2d0] sm:$0xf0]  ;;  %v7520_v45 = vld [vmem:[%s8488_s2 + $0x3c4] sm:$0xf] }
 0x40f   : > { %4952 = vmatpush.bf16.msra.mxu0 %v7036_v49  ;;  %v7260_v56 = vor.u32 %v7722_v43, %v7259_v52  ;;  %v6461_v61 = vld [vmem:[%s8488_s2 + $0x3d0] sm:$0xf0]  ;;  %v7552_v55 = vld [vmem:[%s8488_s2 + $0x4c4] sm:$0xf]  ;;  %v6336_v49 = vor.u32 %v7488_v36, %v6333_v33 }
 0x410   : > { %4965 = vmatpush.bf16.msra.mxu1 %v7164_v40  ;;  %4978 = vmatpush.bf16.msra.mxu2 %v7292_v39  ;;  %v6589_v6 = vld [vmem:[%s8488_s2 + $0x4d0] sm:$0xf0]  ;;  %v6464_v40 = vor.u32 %v7520_v45, %v6461_v61  ;;  %v7452_v39 = vld [vmem:[%s8488_s2 + $0x1a4] sm:$0xf] }
 0x411   : > { %v6189_v14 = vld [vmem:[%s8488_s2 + $0x1b0] sm:$0xf0]  ;;  %v7484_v31 = vld [vmem:[%s8488_s2 + $0x2a4] sm:$0xf]  ;;  %v6592_v48 = vor.u32 %v7552_v55, %v6589_v6 }
 0x412   : > { %4991 = vmatpush.bf16.msra.mxu3 %v6016_v19  ;;  %v6317_v19 = vld [vmem:[%s8488_s2 + $0x2b0] sm:$0xf0]  ;;  %v7516_v54 = vld [vmem:[%s8488_s2 + $0x3a4] sm:$0xf]  ;;  %v6192_v58 = vor.u32 %v7452_v39, %v6189_v14 }
 0x413   : > { %4953 = vmatpush.bf16.msra.mxu0 %v7020_v2  ;;  %v6445_v22 = vld [vmem:[%s8488_s2 + $0x3b0] sm:$0xf0]  ;;  %v7548_v10 = vld [vmem:[%s8488_s2 + $0x4a4] sm:$0xf]  ;;  %v6320_v46 = vor.u32 %v7484_v31, %v6317_v19 }
 0x414   : > { %4966 = vmatpush.bf16.msra.mxu1 %v7148_v57  ;;  %4979 = vmatpush.bf16.msra.mxu2 %v7276_v28  ;;  %v6573_v16 = vld [vmem:[%s8488_s2 + $0x4b0] sm:$0xf0]  ;;  %v6448_v2 = vor.u32 %v7516_v54, %v6445_v22  ;;  %v7448_v26 = vld [vmem:[%s8488_s2 + $0x184] sm:$0xf] }
 0x415   : > { %v6173_v32 = vld [vmem:[%s8488_s2 + $0x190] sm:$0xf0]  ;;  %v7480_v15 = vld [vmem:[%s8488_s2 + $0x284] sm:$0xf]  ;;  %v6576_v57 = vor.u32 %v7548_v10, %v6573_v16 }
 0x416   : > { %4992 = vmatpush.bf16.msra.mxu3 %v6000_v5  ;;  %v6301_v28 = vld [vmem:[%s8488_s2 + $0x290] sm:$0xf0]  ;;  %v7512_v52 = vld [vmem:[%s8488_s2 + $0x384] sm:$0xf]  ;;  %v6176_v53 = vor.u32 %v7448_v26, %v6173_v32 }
 0x417   : > { %4954 = vmatpush.bf16.msra.mxu0 %v7004_v34  ;;  %v6429_v43 = vld [vmem:[%s8488_s2 + $0x390] sm:$0xf0]  ;;  %v7544_v62 = vld [vmem:[%s8488_s2 + $0x484] sm:$0xf]  ;;  %v6304_v1 = vor.u32 %v7480_v15, %v6301_v28 }
 0x418   : > { %4967 = vmatpush.bf16.msra.mxu1 %v7132_v12  ;;  %4980 = vmatpush.bf16.msra.mxu2 %v7260_v56  ;;  %v6557_v5 = vld [vmem:[%s8488_s2 + $0x490] sm:$0xf0]  ;;  %v6432_v20 = vor.u32 %v7512_v52, %v6429_v43  ;;  %v7444_v18 = vld [vmem:[%s8488_s2 + $0x164] sm:$0xf] }
 0x419   : > { %v6157_v63 = vld [vmem:[%s8488_s2 + $0x170] sm:$0xf0]  ;;  %v7476_v47 = vld [vmem:[%s8488_s2 + $0x264] sm:$0xf]  ;;  %v6560_v34 = vor.u32 %v7544_v62, %v6557_v5 }
 0x41a   : > { %4993 = vmatpush.bf16.msra.mxu3 %v5984_v8  ;;  %4955 = vmatmul.bf16.vlgmr.msra.gmra.mxu0 %v10153_v21  ;;  %v6285_v51 = vld [vmem:[%s8488_s2 + $0x270] sm:$0xf0]  ;;  %v7508_v3 = vld [vmem:[%s8488_s2 + $0x364] sm:$0xf]  ;;  %v6160_v4 = vor.u32 %v7444_v18, %v6157_v63 }
 0x41b   : > { %4999 = vmatpush.bf16.msrb.mxu0 %v6224_v44  ;;  %4981 = vmatmul.bf16.vlgmr.msra.gmra.mxu2 %v10158_v37  ;;  %v6413_v59 = vld [vmem:[%s8488_s2 + $0x370] sm:$0xf0]  ;;  %v7540_v12 = vld [vmem:[%s8488_s2 + $0x464] sm:$0xf]  ;;  %v6288_v30 = vor.u32 %v7476_v47, %v6285_v51 }
 0x41c   : > { %5012 = vmatpush.bf16.msrb.mxu1 %v6352_v24  ;;  %5025 = vmatpush.bf16.msrb.mxu2 %v6480_v41  ;;  %v6541_v56 = vld [vmem:[%s8488_s2 + $0x470] sm:$0xf0]  ;;  %v6416_v35 = vor.u32 %v7508_v3, %v6413_v59  ;;  %v7440_v17 = vld [vmem:[%s8488_s2 + $0x144] sm:$0xf] }
 0x41d   : > { %4968 = vmatmul.bf16.vlgmr.msra.gmra.mxu1 %v10160_v9  ;;  %4994 = vmatmul.bf16.vlgmr.msra.gmra.mxu3 %v10011_v38  ;;  %v6141_v8 = vld [vmem:[%s8488_s2 + $0x150] sm:$0xf0]  ;;  %v7472_v44 = vld [vmem:[%s8488_s2 + $0x244] sm:$0xf]  ;;  %v6544_v24 = vor.u32 %v7540_v12, %v6541_v56 }
 0x41e   : > { %5038 = vmatpush.bf16.msrb.mxu3 %v6608_v13  ;;  %v6269_v41 = vld [vmem:[%s8488_s2 + $0x250] sm:$0xf0]  ;;  %v7504_v25 = vld [vmem:[%s8488_s2 + $0x344] sm:$0xf]  ;;  %v6144_v33 = vor.u32 %v7440_v17, %v6141_v8 }
 0x41f   : > { %5000 = vmatpush.bf16.msrb.mxu0 %v6208_v23  ;;  %v6397_v50 = vld [vmem:[%s8488_s2 + $0x350] sm:$0xf0]  ;;  %v7536_v36 = vld [vmem:[%s8488_s2 + $0x444] sm:$0xf]  ;;  %v6272_v45 = vor.u32 %v7472_v44, %v6269_v41 }
 0x420   : > { %5013 = vmatpush.bf16.msrb.mxu1 %v6336_v49  ;;  %5026 = vmatpush.bf16.msrb.mxu2 %v6464_v40  ;;  %v6525_v13 = vld [vmem:[%s8488_s2 + $0x450] sm:$0xf0]  ;;  %v6400_v61 = vor.u32 %v7504_v25, %v6397_v50  ;;  %v7436_v55 = vld [vmem:[%s8488_s2 + $0x124] sm:$0xf] }
 0x421   : > { %v6125_v6 = vld [vmem:[%s8488_s2 + $0x130] sm:$0xf0]  ;;  %v7468_v23 = vld [vmem:[%s8488_s2 + $0x224] sm:$0xf]  ;;  %v6528_v49 = vor.u32 %v7536_v36, %v6525_v13 }
 0x422   : > { %5039 = vmatpush.bf16.msrb.mxu3 %v6592_v48  ;;  %v6253_v40 = vld [vmem:[%s8488_s2 + $0x230] sm:$0xf0]  ;;  %v7500_v39 = vld [vmem:[%s8488_s2 + $0x324] sm:$0xf]  ;;  %v6128_v19 = vor.u32 %v7436_v55, %v6125_v6 }
 0x423   : > { %5001 = vmatpush.bf16.msrb.mxu0 %v6192_v58  ;;  %v6381_v14 = vld [vmem:[%s8488_s2 + $0x330] sm:$0xf0]  ;;  %v7532_v31 = vld [vmem:[%s8488_s2 + $0x424] sm:$0xf]  ;;  %v6256_v10 = vor.u32 %v7468_v23, %v6253_v40 }
 0x424   : > { %5014 = vmatpush.bf16.msrb.mxu1 %v6320_v46  ;;  %5027 = vmatpush.bf16.msrb.mxu2 %v6448_v2  ;;  %v6509_v48 = vld [vmem:[%s8488_s2 + $0x430] sm:$0xf0]  ;;  %v7432_v54 = vld [vmem:[%s8488_s2 + $0x104] sm:$0xf]  ;;  %v6384_v16 = vor.u32 %v7500_v39, %v6381_v14 }
 0x425   : > { %v6109_v22 = vld [vmem:[%s8488_s2 + $0x110] sm:$0xf0]  ;;  %v7464_v58 = vld [vmem:[%s8488_s2 + $0x204] sm:$0xf]  ;;  %v6512_v26 = vor.u32 %v7532_v31, %v6509_v48 }
 0x426   : > { %5040 = vmatpush.bf16.msrb.mxu3 %v6576_v57  ;;  %v6237_v46 = vld [vmem:[%s8488_s2 + $0x210] sm:$0xf0]  ;;  %v7496_v2 = vld [vmem:[%s8488_s2 + $0x304] sm:$0xf]  ;;  %v6112_v62 = vor.u32 %v7432_v54, %v6109_v22 }
 0x427   : > { %5002 = vmatpush.bf16.msrb.mxu0 %v6176_v53  ;;  %v6365_v32 = vld [vmem:[%s8488_s2 + $0x310] sm:$0xf0]  ;;  %v7528_v15 = vld [vmem:[%s8488_s2 + $0x404] sm:$0xf] }
 0x428   : > { %5015 = vmatpush.bf16.msrb.mxu1 %v6304_v1  ;;  %5028 = vmatpush.bf16.msrb.mxu2 %v6432_v20  ;;  %v6493_v57 = vld [vmem:[%s8488_s2 + $0x410] sm:$0xf0]  ;;  %v7588_v28 = vld [vmem:[%s8488_s2 + $0x5e4] sm:$0xf]  ;;  %v6240_v20 = vor.u32 %v7464_v58, %v6237_v46  ;;  %v6368_v18 = vor.u32 %v7496_v2, %v6365_v32 }
 0x429   : > { %v6733_v52 = vld [vmem:[%s8488_s2 + $0x5f0] sm:$0xf0]  ;;  %v7620_v43 = vld [vmem:[%s8488_s2 + $0x6e4] sm:$0xf] }
 0x42a   : > { %5041 = vmatpush.bf16.msrb.mxu3 %v6560_v34  ;;  %v6861_v5 = vld [vmem:[%s8488_s2 + $0x6f0] sm:$0xf0]  ;;  %v7652_v53 = vld [vmem:[%s8488_s2 + $0x7e4] sm:$0xf]  ;;  %v6496_v34 = vor.u32 %v7528_v15, %v6493_v57  ;;  %v6736_v51 = vor.u32 %v7588_v28, %v6733_v52 }
 0x42b   : > { %5003 = vmatpush.bf16.msrb.mxu0 %v6160_v4  ;;  %v6989_v1 = vld [vmem:[%s8488_s2 + $0x7f0] sm:$0xf0]  ;;  %v7684_v63 = vld [vmem:[%s8488_s2 + $0x8e4] sm:$0xf]  ;;  %v6864_v3 = vor.u32 %v7620_v43, %v6861_v5 }
 0x42c   : > { %5016 = vmatpush.bf16.msrb.mxu1 %v6288_v30  ;;  %5029 = vmatpush.bf16.msrb.mxu2 %v6416_v35  ;;  %v7117_v47 = vld [vmem:[%s8488_s2 + $0x8f0] sm:$0xf0]  ;;  %v6992_v59 = vor.u32 %v7652_v53, %v6989_v1  ;;  %v7584_v12 = vld [vmem:[%s8488_s2 + $0x5c4] sm:$0xf] }
 0x42d   : > { %v6717_v56 = vld [vmem:[%s8488_s2 + $0x5d0] sm:$0xf0]  ;;  %v7616_v4 = vld [vmem:[%s8488_s2 + $0x6c4] sm:$0xf]  ;;  %v7120_v30 = vor.u32 %v7684_v63, %v7117_v47 }
 0x42e   : > { %5042 = vmatpush.bf16.msrb.mxu3 %v6544_v24  ;;  %v6845_v35 = vld [vmem:[%s8488_s2 + $0x6d0] sm:$0xf0]  ;;  %v7648_v17 = vld [vmem:[%s8488_s2 + $0x7c4] sm:$0xf]  ;;  %v6720_v41 = vor.u32 %v7584_v12, %v6717_v56 }
 0x42f   : > { %5004 = vmatpush.bf16.msrb.mxu0 %v6144_v33  ;;  %v6973_v8 = vld [vmem:[%s8488_s2 + $0x7d0] sm:$0xf0]  ;;  %v7680_v44 = vld [vmem:[%s8488_s2 + $0x8c4] sm:$0xf]  ;;  %v6848_v25 = vor.u32 %v7616_v4, %v6845_v35 }
 0x430   : > { %5017 = vmatpush.bf16.msrb.mxu1 %v6272_v45  ;;  %5030 = vmatpush.bf16.msrb.mxu2 %v6400_v61  ;;  %v7101_v24 = vld [vmem:[%s8488_s2 + $0x8d0] sm:$0xf0]  ;;  %v6976_v50 = vor.u32 %v7648_v17, %v6973_v8  ;;  %v7580_v36 = vld [vmem:[%s8488_s2 + $0x5a4] sm:$0xf] }
 0x431   : > { %v6701_v13 = vld [vmem:[%s8488_s2 + $0x5b0] sm:$0xf0]  ;;  %v7612_v33 = vld [vmem:[%s8488_s2 + $0x6a4] sm:$0xf]  ;;  %v7104_v45 = vor.u32 %v7680_v44, %v7101_v24 }
 0x432   : > { %5043 = vmatpush.bf16.msrb.mxu3 %v6528_v49  ;;  %v6829_v61 = vld [vmem:[%s8488_s2 + $0x6b0] sm:$0xf0]  ;;  %v7644_v55 = vld [vmem:[%s8488_s2 + $0x7a4] sm:$0xf]  ;;  %v6704_v40 = vor.u32 %v7580_v36, %v6701_v13 }
 0x433   : > { %5005 = vmatpush.bf16.msrb.mxu0 %v6128_v19  ;;  %v6957_v6 = vld [vmem:[%s8488_s2 + $0x7b0] sm:$0xf0]  ;;  %v7676_v23 = vld [vmem:[%s8488_s2 + $0x8a4] sm:$0xf]  ;;  %v6832_v39 = vor.u32 %v7612_v33, %v6829_v61 }
 0x434   : > { %5018 = vmatpush.bf16.msrb.mxu1 %v6256_v10  ;;  %5031 = vmatpush.bf16.msrb.mxu2 %v6384_v16  ;;  %v7085_v49 = vld [vmem:[%s8488_s2 + $0x8b0] sm:$0xf0]  ;;  %v6960_v14 = vor.u32 %v7644_v55, %v6957_v6  ;;  %v7576_v31 = vld [vmem:[%s8488_s2 + $0x584] sm:$0xf] }
 0x435   : > { %v6685_v48 = vld [vmem:[%s8488_s2 + $0x590] sm:$0xf0]  ;;  %v7608_v19 = vld [vmem:[%s8488_s2 + $0x684] sm:$0xf]  ;;  %v7088_v54 = vor.u32 %v7676_v23, %v7085_v49 }
 0x436   : > { %5044 = vmatpush.bf16.msrb.mxu3 %v6512_v26  ;;  %v6813_v22 = vld [vmem:[%s8488_s2 + $0x690] sm:$0xf0]  ;;  %v7640_v10 = vld [vmem:[%s8488_s2 + $0x784] sm:$0xf]  ;;  %v6688_v2 = vor.u32 %v7576_v31, %v6685_v48 }
 0x437   : > { %5006 = vmatpush.bf16.msrb.mxu0 %v6112_v62  ;;  %v6941_v16 = vld [vmem:[%s8488_s2 + $0x790] sm:$0xf0]  ;;  %v7672_v58 = vld [vmem:[%s8488_s2 + $0x884] sm:$0xf]  ;;  %v6816_v26 = vor.u32 %v7608_v19, %v6813_v22 }
 0x438   : > { %5019 = vmatpush.bf16.msrb.mxu1 %v6240_v20  ;;  %5032 = vmatpush.bf16.msrb.mxu2 %v6368_v18  ;;  %v7069_v46 = vld [vmem:[%s8488_s2 + $0x890] sm:$0xf0]  ;;  %v6944_v32 = vor.u32 %v7640_v10, %v6941_v16  ;;  %v7572_v15 = vld [vmem:[%s8488_s2 + $0x564] sm:$0xf] }
 0x439   : > { %v6669_v57 = vld [vmem:[%s8488_s2 + $0x570] sm:$0xf0]  ;;  %v7604_v28 = vld [vmem:[%s8488_s2 + $0x664] sm:$0xf]  ;;  %v7072_v52 = vor.u32 %v7672_v58, %v7069_v46 }
 0x43a   : > { %5045 = vmatpush.bf16.msrb.mxu3 %v6496_v34  ;;  %5007 = vmatmul.bf16.vlgmr.msrb.gmra.mxu0 %v10026_v7  ;;  %v6797_v43 = vld [vmem:[%s8488_s2 + $0x670] sm:$0xf0]  ;;  %v7636_v62 = vld [vmem:[%s8488_s2 + $0x764] sm:$0xf]  ;;  %v6672_v20 = vor.u32 %v7572_v15, %v6669_v57  ;;  %v6227_v57 = vld [vmem:[%s8488_s2 + $0x1e8] sm:$0xf] }
 0x43b   : > { %5051 = vmatpush.bf16.msra.mxu0 %v6736_v51  ;;  %5033 = vmatmul.bf16.vlgmr.msrb.gmra.mxu2 %v10024_v11  ;;  %v6925_v5 = vld [vmem:[%s8488_s2 + $0x770] sm:$0xf0]  ;;  %v7668_v53 = vld [vmem:[%s8488_s2 + $0x864] sm:$0xf]  ;;  %v6800_v18 = vor.u32 %v7604_v28, %v6797_v43  ;;  %v7463_v28 = vld [vmem:[%s8488_s2 + $0x1f4] sm:$0xf0] }
 0x43c   : > { %5064 = vmatpush.bf16.msra.mxu1 %v6864_v3  ;;  %5077 = vmatpush.bf16.msra.mxu2 %v6992_v59  ;;  %v7053_v1 = vld [vmem:[%s8488_s2 + $0x870] sm:$0xf0]  ;;  %v6928_v63 = vor.u32 %v7636_v62, %v6925_v5  ;;  %v7568_v47 = vld [vmem:[%s8488_s2 + $0x544] sm:$0xf] }
 0x43d   : > { %5046 = vmatmul.bf16.vlgmr.msrb.gmra.mxu3 %v10084_v0  ;;  %5020 = vmatmul.bf16.vlgmr.msrb.gmra.mxu1 %v10009_v42  ;;  %v6653_v34 = vld [vmem:[%s8488_s2 + $0x550] sm:$0xf0]  ;;  %v7600_v51 = vld [vmem:[%s8488_s2 + $0x644] sm:$0xf]  ;;  %v7056_v3 = vor.u32 %v7668_v53, %v7053_v1 }
 0x43e   : > { %5090 = vmatpush.bf16.msra.mxu3 %v7120_v30  ;;  %v6781_v59 = vld [vmem:[%s8488_s2 + $0x650] sm:$0xf0]  ;;  %v7632_v12 = vld [vmem:[%s8488_s2 + $0x744] sm:$0xf]  ;;  %v6656_v35 = vor.u32 %v7568_v47, %v6653_v34  ;;  %v6083_v47 = vld [vmem:[%s8488_s2 + $0xc8] sm:$0xf] }
 0x43f   : > { %5052 = vmatpush.bf16.msra.mxu0 %v6720_v41  ;;  %v6909_v56 = vld [vmem:[%s8488_s2 + $0x750] sm:$0xf0]  ;;  %v7664_v4 = vld [vmem:[%s8488_s2 + $0x844] sm:$0xf]  ;;  %v6784_v17 = vor.u32 %v7600_v51, %v6781_v59  ;;  %v7427_v34 = vld [vmem:[%s8488_s2 + $0xd4] sm:$0xf0] }
 0x440   : > { %5065 = vmatpush.bf16.msra.mxu1 %v6848_v25  ;;  %5078 = vmatpush.bf16.msra.mxu2 %v6976_v50  ;;  %v7037_v30 = vld [vmem:[%s8488_s2 + $0x850] sm:$0xf0]  ;;  %v6912_v8 = vor.u32 %v7632_v12, %v6909_v56  ;;  %v7564_v44 = vld [vmem:[%s8488_s2 + $0x524] sm:$0xf]  ;;  %v6211_v51 = vld [vmem:[%s8488_s2 + $0x1c8] sm:$0xf]  ;;  %v6084_v56 = vor.u32 %v7427_v34, %v6083_v47 }
 0x441   : > { %v6637_v24 = vld [vmem:[%s8488_s2 + $0x530] sm:$0xf0]  ;;  %v7596_v41 = vld [vmem:[%s8488_s2 + $0x624] sm:$0xf]  ;;  %v7040_v25 = vor.u32 %v7664_v4, %v7037_v30  ;;  %v7411_v47 = vld [vmem:[%s8488_s2 + $0x54] sm:$0xf0] }
 0x442   : > { %5091 = vmatpush.bf16.msra.mxu3 %v7104_v45  ;;  %v6765_v50 = vld [vmem:[%s8488_s2 + $0x630] sm:$0xf0]  ;;  %v7628_v36 = vld [vmem:[%s8488_s2 + $0x724] sm:$0xf]  ;;  %v6640_v61 = vor.u32 %v7564_v44, %v6637_v24  ;;  %v6067_v44 = vld [vmem:[%s8488_s2 + $0xa8] sm:$0xf] }
 0x443   : > { %5053 = vmatpush.bf16.msra.mxu0 %v6704_v40  ;;  %v6893_v13 = vld [vmem:[%s8488_s2 + $0x730] sm:$0xf0]  ;;  %v7660_v33 = vld [vmem:[%s8488_s2 + $0x824] sm:$0xf]  ;;  %v6768_v23 = vor.u32 %v7596_v41, %v6765_v50  ;;  %v7423_v24 = vld [vmem:[%s8488_s2 + $0xb4] sm:$0xf0] }
 0x444   : > { %5066 = vmatpush.bf16.msra.mxu1 %v6832_v39  ;;  %5079 = vmatpush.bf16.msra.mxu2 %v6960_v14  ;;  %v7021_v45 = vld [vmem:[%s8488_s2 + $0x830] sm:$0xf0]  ;;  %v7560_v55 = vld [vmem:[%s8488_s2 + $0x504] sm:$0xf]  ;;  %v6896_v49 = vor.u32 %v7628_v36, %v6893_v13  ;;  %v6195_v41 = vld [vmem:[%s8488_s2 + $0x1a8] sm:$0xf] }
 0x445   : > { %v6621_v6 = vld [vmem:[%s8488_s2 + $0x510] sm:$0xf0]  ;;  %v7592_v40 = vld [vmem:[%s8488_s2 + $0x604] sm:$0xf]  ;;  %v7024_v31 = vor.u32 %v7660_v33, %v7021_v45  ;;  %v6068_v33 = vor.u32 %v7423_v24, %v6067_v44  ;;  %v6147_v34 = vld [vmem:[%s8488_s2 + $0x148] sm:$0xf] }
 0x446   : > { %5092 = vmatpush.bf16.msra.mxu3 %v7088_v54  ;;  %v6749_v39 = vld [vmem:[%s8488_s2 + $0x610] sm:$0xf0]  ;;  %v7624_v14 = vld [vmem:[%s8488_s2 + $0x704] sm:$0xf]  ;;  %v6624_v58 = vor.u32 %v7560_v55, %v6621_v6 }
 0x447   : > { %5054 = vmatpush.bf16.msra.mxu0 %v6688_v2  ;;  %v6877_v48 = vld [vmem:[%s8488_s2 + $0x710] sm:$0xf0]  ;;  %v7656_v19 = vld [vmem:[%s8488_s2 + $0x804] sm:$0xf]  ;;  %v6099_v2 = vld [vmem:[%s8488_s2 + $0xe8] sm:$0xf] }
 0x448   : > { %5067 = vmatpush.bf16.msra.mxu1 %v6816_v26  ;;  %5080 = vmatpush.bf16.msra.mxu2 %v6944_v32  ;;  %v7005_v54 = vld [vmem:[%s8488_s2 + $0x810] sm:$0xf0]  ;;  %v7716_v22 = vld [vmem:[%s8488_s2 + $0x9e4] sm:$0xf]  ;;  %v7431_v26 = vld [vmem:[%s8488_s2 + $0xf4] sm:$0xf0]  ;;  %v6752_v32 = vor.u32 %v7592_v40, %v6749_v39  ;;  %v6880_v15 = vor.u32 %v7624_v14, %v6877_v48 }
 0x449   : > { %v7245_v10 = vld [vmem:[%s8488_s2 + $0x9f0] sm:$0xf0]  ;;  %v7748_v16 = vld [vmem:[%s8488_s2 + $0xae4] sm:$0xf]  ;;  %v6100_v5 = vor.u32 %v7431_v26, %v6099_v2  ;;  %v6179_v39 = vld [vmem:[%s8488_s2 + $0x188] sm:$0xf] }
 0x44a   : > { %5093 = vmatpush.bf16.msra.mxu3 %v7072_v52  ;;  %v7373_v46 = vld [vmem:[%s8488_s2 + $0xaf0] sm:$0xf0]  ;;  %v7008_v52 = vor.u32 %v7656_v19, %v7005_v54  ;;  %v7248_v43 = vor.u32 %v7716_v22, %v7245_v10  ;;  %v7712_v53 = vld [vmem:[%s8488_s2 + $0x9c4] sm:$0xf]  ;;  %v7451_v14 = vld [vmem:[%s8488_s2 + $0x194] sm:$0xf0] }
 0x44b   : > { %5055 = vmatpush.bf16.msra.mxu0 %v6672_v20  ;;  %v7376_v62 = vor.u32 %v7748_v16, %v7373_v46  ;;  %v7229_v1 = vld [vmem:[%s8488_s2 + $0x9d0] sm:$0xf0]  ;;  %v7744_v20 = vld [vmem:[%s8488_s2 + $0xac4] sm:$0xf]  ;;  %v6035_v2 = vld [vmem:[%s8488_s2 + $0x68] sm:$0xf] }
 0x44c   : > { %5068 = vmatpush.bf16.msra.mxu1 %v6800_v18  ;;  %5081 = vmatpush.bf16.msra.mxu2 %v6928_v63  ;;  %v6228_v18 = vor.u32 %v7463_v28, %v6227_v57  ;;  %v7357_v63 = vld [vmem:[%s8488_s2 + $0xad0] sm:$0xf0]  ;;  %v7232_v59 = vor.u32 %v7712_v53, %v7229_v1  ;;  %v7708_v4 = vld [vmem:[%s8488_s2 + $0x9a4] sm:$0xf]  ;;  %v7415_v26 = vld [vmem:[%s8488_s2 + $0x74] sm:$0xf0] }
 0x44d   : > { %v7360_v12 = vor.u32 %v7744_v20, %v7357_v63  ;;  %v7213_v30 = vld [vmem:[%s8488_s2 + $0x9b0] sm:$0xf0]  ;;  %v7704_v36 = vld [vmem:[%s8488_s2 + $0x984] sm:$0xf]  ;;  %v6019_v63 = vld [vmem:[%s8488_s2 + $0x48] sm:$0xf] }
 0x44e   : > { %5094 = vmatpush.bf16.msra.mxu3 %v7056_v3  ;;  %v7459_v3 = vld [vmem:[%s8488_s2 + $0x1d4] sm:$0xf0]  ;;  %v7216_v50 = vor.u32 %v7708_v4, %v7213_v30  ;;  %v7197_v45 = vld [vmem:[%s8488_s2 + $0x990] sm:$0xf0]  ;;  %v10320_v40 = vld [vmem:[%s411_s11] sm:$0xf]  ;;  %v6020_v4 = vor.u32 %v7411_v47, %v6019_v63 }
 0x44f   : > { %5056 = vmatpush.bf16.msra.mxu0 %v6656_v35  ;;  %v7740_v35 = vld [vmem:[%s8488_s2 + $0xaa4] sm:$0xf]  ;;  %v7325_v55 = vld [vmem:[%s8488_s2 + $0xa90] sm:$0xf0]  ;;  %v4835_v16 = vperm.slane %v10320_v40, 0 }
 0x450   : > { %5069 = vmatpush.bf16.msra.mxu1 %v6784_v17  ;;  %5082 = vmatpush.bf16.msra.mxu2 %v6912_v8  ;;  %v6212_v17 = vor.u32 %v7459_v3, %v6211_v51  ;;  %v7341_v8 = vld [vmem:[%s8488_s2 + $0xab0] sm:$0xf0]  ;;  %v7700_v48 = vld [vmem:[%s8488_s2 + $0x964] sm:$0xf]  ;;  %v7443_v51 = vld [vmem:[%s8488_s2 + $0x154] sm:$0xf0] }
 0x451   : > { %v7344_v13 = vor.u32 %v7740_v35, %v7341_v8  ;;  %v7181_v22 = vld [vmem:[%s8488_s2 + $0x970] sm:$0xf0]  ;;  %v7732_v10 = vld [vmem:[%s8488_s2 + $0xa64] sm:$0xf]  ;;  %v6148_v44 = vor.u32 %v7443_v51, %v6147_v34  ;;  %v6339_v63 = vld [vmem:[%s8488_s2 + $0x2c8] sm:$0xf] }
 0x452   : > { %5095 = vmatpush.bf16.msra.mxu3 %v7040_v25  ;;  %v7455_v25 = vld [vmem:[%s8488_s2 + $0x1b4] sm:$0xf0]  ;;  %v7309_v46 = vld [vmem:[%s8488_s2 + $0xa70] sm:$0xf0]  ;;  %v7184_v57 = vor.u32 %v7700_v48, %v7181_v22  ;;  %v7728_v53 = vld [vmem:[%s8488_s2 + $0xa44] sm:$0xf] }
 0x453   : > { %5057 = vmatpush.bf16.msra.mxu0 %v6640_v61  ;;  %v7736_v61 = vld [vmem:[%s8488_s2 + $0xa84] sm:$0xf]  ;;  %v6196_v6 = vor.u32 %v7455_v25, %v6195_v41  ;;  %v7149_v35 = vld [vmem:[%s8488_s2 + $0x930] sm:$0xf0]  ;;  %v6003_v41 = vld [vmem:[%s8488_s2 + $0x28] sm:$0xf] }
 0x454   : > { %5070 = vmatpush.bf16.msra.mxu1 %v6768_v23  ;;  %5083 = vmatpush.bf16.msra.mxu2 %v6896_v49  ;;  %v6051_v23 = vld [vmem:[%s8488_s2 + $0x88] sm:$0xf]  ;;  %v7419_v49 = vld [vmem:[%s8488_s2 + $0x94] sm:$0xf0]  ;;  %v7328_v19 = vor.u32 %v7736_v61, %v7325_v55  ;;  %v7692_v30 = vld [vmem:[%s8488_s2 + $0x924] sm:$0xf] }
 0x455   : > { %v6052_v54 = vor.u32 %v7419_v49, %v6051_v23  ;;  %v7277_v24 = vld [vmem:[%s8488_s2 + $0xa30] sm:$0xf0]  ;;  %v7407_v25 = vld [vmem:[%s8488_s2 + $0x34] sm:$0xf0]  ;;  %v7720_v49 = vld [vmem:[%s8488_s2 + $0xa04] sm:$0xf] }
 0x456   : > { %5096 = vmatpush.bf16.msra.mxu3 %v7024_v31  ;;  %v7200_v31 = vor.u32 %v7704_v36, %v7197_v45  ;;  %v6131_v36 = vld [vmem:[%s8488_s2 + $0x128] sm:$0xf]  ;;  %v7688_v45 = vld [vmem:[%s8488_s2 + $0x904] sm:$0xf]  ;;  %v7133_v61 = vld [vmem:[%s8488_s2 + $0x910] sm:$0xf0]  ;;  %v6004_v23 = vor.u32 %v7407_v25, %v6003_v41 }
 0x457   : > { %5058 = vmatpush.bf16.msra.mxu0 %v6624_v58  ;;  %v6180_v58 = vor.u32 %v7451_v14, %v6179_v39  ;;  %v7261_v39 = vld [vmem:[%s8488_s2 + $0xa10] sm:$0xf0]  ;;  %v5987_v14 = vld [vmem:[%s8488_s2 + $0x8] sm:$0xf]  ;;  %v7403_v48 = vld [vmem:[%s8488_s2 + $0x14] sm:$0xf0] }
 0x458   : > { %5071 = vmatpush.bf16.msra.mxu1 %v6752_v32  ;;  %5084 = vmatpush.bf16.msra.mxu2 %v6880_v15  ;;  %v6163_v32 = vld [vmem:[%s8488_s2 + $0x168] sm:$0xf]  ;;  %v7447_v15 = vld [vmem:[%s8488_s2 + $0x174] sm:$0xf0] }
 0x459   : > { %v6164_v20 = vor.u32 %v7447_v15, %v6163_v32  ;;  %v7527_v32 = vld [vmem:[%s8488_s2 + $0x3f4] sm:$0xf0]  ;;  %v6611_v15 = vld [vmem:[%s8488_s2 + $0x4e8] sm:$0xf] }
 0x45a   : > { %5097 = vmatpush.bf16.msra.mxu3 %v7008_v52  ;;  %5059 = vmatmul.bf16.vlgmr.msra.gmra.mxu0 %v10088_v60  ;;  %v7312_v52 = vor.u32 %v7732_v10, %v7309_v46  ;;  %v6355_v10 = vld [vmem:[%s8488_s2 + $0x2e8] sm:$0xf]  ;;  %v7491_v47 = vld [vmem:[%s8488_s2 + $0x2d4] sm:$0xf0] }
 0x45b   : > { %5103 = vmatpush.bf16.msrb.mxu0 %v7248_v43  ;;  %5085 = vmatmul.bf16.vlgmr.msra.gmra.mxu2 %v10086_v29  ;;  %v6036_v43 = vor.u32 %v7415_v26, %v6035_v2  ;;  %v7136_v26 = vor.u32 %v7688_v45, %v7133_v61  ;;  %v6467_v34 = vld [vmem:[%s8488_s2 + $0x3c8] sm:$0xf]  ;;  %v7583_v45 = vld [vmem:[%s8488_s2 + $0x5b4] sm:$0xf0] }
 0x45c   : > { %5116 = vmatpush.bf16.msrb.mxu1 %v7376_v62  ;;  %5129 = vmatpush.bf16.msrb.mxu2 %v6100_v5  ;;  %v7696_v62 = vld [vmem:[%s8488_s2 + $0x944] sm:$0xf]  ;;  %v7165_v5 = vld [vmem:[%s8488_s2 + $0x950] sm:$0xf0]  ;;  %v6451_v41 = vld [vmem:[%s8488_s2 + $0x3a8] sm:$0xf] }
 0x45d   : > { %5072 = vmatmul.bf16.vlgmr.msra.gmra.mxu1 %v10080_v27  ;;  %5098 = vmatmul.bf16.vlgmr.msra.gmra.mxu3 %v10153_v21 }
 0x45e   : > { %5142 = vmatpush.bf16.msrb.mxu3 %v6228_v18  ;;  %v7293_v18 = vld [vmem:[%s8488_s2 + $0xa50] sm:$0xf0] }
 0x45f   : > { %5104 = vmatpush.bf16.msrb.mxu0 %v7232_v59  ;;  %v7168_v59 = vor.u32 %v7696_v62, %v7165_v5  ;;  %v7591_v62 = vld [vmem:[%s8488_s2 + $0x5f4] sm:$0xf0] }
 0x460   : > { %5117 = vmatpush.bf16.msrb.mxu1 %v7360_v12  ;;  %5130 = vmatpush.bf16.msrb.mxu2 %v6084_v56  ;;  %v7296_v56 = vor.u32 %v7728_v53, %v7293_v18 }
 0x462   : > { %5143 = vmatpush.bf16.msrb.mxu3 %v6212_v17  ;;  %v4852_v28 = vpop.f32.mrf.mxu0  ;;  %v7724_v17 = vld [vmem:[%s8488_s2 + $0xa24] sm:$0xf] }
 0x463   : > { %5105 = vmatpush.bf16.msrb.mxu0 %v7216_v50  ;;  %v4853_v1 = vadd.f32 %v4852_v28, %v4835_v16  ;;  %v4865_v3 = vpop.f32.mrf.mxu1  ;;  %v7495_v16 = vld [vmem:[%s8488_s2 + $0x2f4] sm:$0xf0]  ;;  %v7264_v28 = vor.u32 %v7720_v49, %v7261_v39  ;;  %v6435_v39 = vld [vmem:[%s8488_s2 + $0x388] sm:$0xf] }
 0x464   : > { %5118 = vmatpush.bf16.msrb.mxu1 %v7344_v13  ;;  %5131 = vmatpush.bf16.msrb.mxu2 %v6068_v33  ;;  %v7439_v13 = vld [vmem:[%s8488_s2 + $0x134] sm:$0xf0]  ;;  %v7152_v33 = vor.u32 %v7692_v30, %v7149_v35  ;;  %v6340_v30 = vor.u32 %v7491_v47, %v6339_v63  ;;  %v6275_v47 = vld [vmem:[%s8488_s2 + $0x248] sm:$0xf] }
 0x465   : > { %v4866_v12 = vadd.f32 %v4865_v3, %v4853_v1  ;;  %v6356_v1 = vor.u32 %v7495_v16, %v6355_v10  ;;  %v7523_v3 = vld [vmem:[%s8488_s2 + $0x3d4] sm:$0xf0] }
 0x466   : > { %5144 = vmatpush.bf16.msrb.mxu3 %v6196_v6  ;;  %v7280_v6 = vor.u32 %v7724_v17, %v7277_v24  ;;  %v6468_v17 = vor.u32 %v7523_v3, %v6467_v34  ;;  %v7487_v24 = vld [vmem:[%s8488_s2 + $0x2b4] sm:$0xf0] }
 0x467   : > { %5106 = vmatpush.bf16.msrb.mxu0 %v7200_v31  ;;  %v6132_v31 = vor.u32 %v7439_v13, %v6131_v36  ;;  %v6579_v36 = vld [vmem:[%s8488_s2 + $0x4a8] sm:$0xf]  ;;  %v7551_v13 = vld [vmem:[%s8488_s2 + $0x4b4] sm:$0xf0] }
 0x468   : > { %5119 = vmatpush.bf16.msrb.mxu1 %v7328_v19  ;;  %5132 = vmatpush.bf16.msrb.mxu2 %v6052_v54  ;;  %v4878_v8 = vpop.f32.mrf.mxu2  ;;  %v6115_v19 = vld [vmem:[%s8488_s2 + $0x108] sm:$0xf]  ;;  %v7435_v54 = vld [vmem:[%s8488_s2 + $0x114] sm:$0xf0] }
 0x469   : > { %v4879_v50 = vadd.f32 %v4878_v8, %v4866_v12  ;;  %v6116_v53 = vor.u32 %v7435_v54, %v6115_v19  ;;  %v7555_v12 = vld [vmem:[%s8488_s2 + $0x4d4] sm:$0xf0]  ;;  %v6691_v54 = vld [vmem:[%s8488_s2 + $0x588] sm:$0xf] }
 0x46a   : > { %5145 = vmatpush.bf16.msrb.mxu3 %v6180_v58  ;;  %v4854_v55 = vpop.f32.mrf.mxu0  ;;  %v4891_v22 = vpop.f32.mrf.mxu3  ;;  %v6483_v58 = vld [vmem:[%s8488_s2 + $0x3e8] sm:$0xf]  ;;  %v7483_v49 = vld [vmem:[%s8488_s2 + $0x294] sm:$0xf0] }
 0x46b   : > { %5107 = vmatpush.bf16.msrb.mxu0 %v7184_v57  ;;  %v10360_v46 = vadd.f32 %v4891_v22, %v4879_v50  ;;  %v4867_v2 = vpop.f32.mrf.mxu1  ;;  %v7559_v57 = vld [vmem:[%s8488_s2 + $0x4f4] sm:$0xf0] }
 0x46c   : > { %5120 = vmatpush.bf16.msrb.mxu1 %v7312_v52  ;;  %5133 = vmatpush.bf16.msrb.mxu2 %v6036_v43  ;;  %v5988_v52 = vor.u32 %v7403_v48, %v5987_v14  ;;  %v6739_v43 = vld [vmem:[%s8488_s2 + $0x5e8] sm:$0xf]  ;;  %v6612_v18 = vor.u32 %v7559_v57, %v6611_v15  ;;  %v7519_v50 = vld [vmem:[%s8488_s2 + $0x3b4] sm:$0xf0] }
 0x46d   : > { %v6740_v51 = vor.u32 %v7591_v62, %v6739_v43  ;;  %v6452_v55 = vor.u32 %v7519_v50, %v6451_v41  ;;  %v6563_v48 = vld [vmem:[%s8488_s2 + $0x488] sm:$0xf]  ;;  %v7547_v19 = vld [vmem:[%s8488_s2 + $0x494] sm:$0xf0] }
 0x46e   : > { %5146 = vmatpush.bf16.msrb.mxu3 %v6164_v20  ;;  %v6484_v20 = vor.u32 %v7527_v32, %v6483_v58  ;;  %v7579_v22 = vld [vmem:[%s8488_s2 + $0x594] sm:$0xf0]  ;;  %v6564_v2 = vor.u32 %v7547_v19, %v6563_v48  ;;  %v6419_v15 = vld [vmem:[%s8488_s2 + $0x368] sm:$0xf] }
 0x46f   : > { %5108 = vmatpush.bf16.msrb.mxu0 %v7168_v59  ;;  %v6595_v59 = vld [vmem:[%s8488_s2 + $0x4c8] sm:$0xf]  ;;  %v7479_v32 = vld [vmem:[%s8488_s2 + $0x274] sm:$0xf0] }
 0x470   : > { %5121 = vmatpush.bf16.msrb.mxu1 %v7296_v56  ;;  %5134 = vmatpush.bf16.msrb.mxu2 %v6020_v4  ;;  %v4880_v5 = vpop.f32.mrf.mxu2  ;;  %v6723_v56 = vld [vmem:[%s8488_s2 + $0x5c8] sm:$0xf]  ;;  %v7587_v4 = vld [vmem:[%s8488_s2 + $0x5d4] sm:$0xf0]  ;;  %v6596_v8 = vor.u32 %v7555_v12, %v6595_v59 }
 0x471   : > { %v6724_v25 = vor.u32 %v7587_v4, %v6723_v56  ;;  %v7511_v43 = vld [vmem:[%s8488_s2 + $0x374] sm:$0xf0]  ;;  %v6547_v62 = vld [vmem:[%s8488_s2 + $0x468] sm:$0xf] }
 0x472   : > { %5147 = vmatpush.bf16.msrb.mxu3 %v6148_v44  ;;  %v4893_v35 = vpop.f32.mrf.mxu3  ;;  %v6323_v44 = vld [vmem:[%s8488_s2 + $0x2a8] sm:$0xf]  ;;  %v7543_v5 = vld [vmem:[%s8488_s2 + $0x474] sm:$0xf0] }
 0x473   : > { %5109 = vmatpush.bf16.msrb.mxu0 %v7152_v33  ;;  %v6707_v33 = vld [vmem:[%s8488_s2 + $0x5a8] sm:$0xf]  ;;  %v6324_v61 = vor.u32 %v7487_v24, %v6323_v44  ;;  %v6548_v63 = vor.u32 %v7543_v5, %v6547_v62  ;;  %v7475_v34 = vld [vmem:[%s8488_s2 + $0x254] sm:$0xf0] }
 0x474   : > { %5122 = vmatpush.bf16.msrb.mxu1 %v7280_v6  ;;  %5135 = vmatpush.bf16.msrb.mxu2 %v6004_v23  ;;  %v6580_v6 = vor.u32 %v7551_v13, %v6579_v36  ;;  %v6307_v23 = vld [vmem:[%s8488_s2 + $0x288] sm:$0xf]  ;;  %v6708_v14 = vor.u32 %v7583_v45, %v6707_v33  ;;  %v7507_v12 = vld [vmem:[%s8488_s2 + $0x354] sm:$0xf0]  ;;  %v6276_v44 = vor.u32 %v7475_v34, %v6275_v47 }
 0x475   : > { %v6308_v10 = vor.u32 %v7483_v49, %v6307_v23  ;;  %v6531_v56 = vld [vmem:[%s8488_s2 + $0x448] sm:$0xf]  ;;  %v7539_v4 = vld [vmem:[%s8488_s2 + $0x454] sm:$0xf0] }
 0x476   : > { %5148 = vmatpush.bf16.msrb.mxu3 %v6132_v31  ;;  %v7515_v31 = vld [vmem:[%s8488_s2 + $0x394] sm:$0xf0]  ;;  %v6532_v50 = vor.u32 %v7539_v4, %v6531_v56  ;;  %v6259_v36 = vld [vmem:[%s8488_s2 + $0x228] sm:$0xf] }
 0x477   : > { %5110 = vmatpush.bf16.msrb.mxu0 %v7136_v26  ;;  %v4904_v16 = vpop.f32.mrf.mxu0  ;;  %v6436_v58 = vor.u32 %v7515_v31, %v6435_v39  ;;  %v6291_v26 = vld [vmem:[%s8488_s2 + $0x268] sm:$0xf]  ;;  %v7471_v13 = vld [vmem:[%s8488_s2 + $0x234] sm:$0xf0] }
 0x478   : > { %5123 = vmatpush.bf16.msrb.mxu1 %v7264_v28  ;;  %5136 = vmatpush.bf16.msrb.mxu2 %v5988_v52  ;;  %v4905_v57 = vadd.f32 %v4904_v16, %v10360_v46  ;;  %v6692_v52 = vor.u32 %v7579_v22, %v6691_v54  ;;  %v6420_v46 = vor.u32 %v7511_v43, %v6419_v15  ;;  %v6387_v33 = vld [vmem:[%s8488_s2 + $0x328] sm:$0xf]  ;;  %v7535_v23 = vld [vmem:[%s8488_s2 + $0x434] sm:$0xf0] }
 0x479   : > { %v6643_v49 = vld [vmem:[%s8488_s2 + $0x528] sm:$0xf]  ;;  %v7567_v39 = vld [vmem:[%s8488_s2 + $0x534] sm:$0xf0] }
 0x47a   : > { %5149 = vmatpush.bf16.msrb.mxu3 %v6116_v53  ;;  %5111 = vmatmul.bf16.vlgmr.msrb.gmra.mxu0 %v10160_v9  ;;  %v4917_v28 = vpop.f32.mrf.mxu1  ;;  %v6675_v53 = vld [vmem:[%s8488_s2 + $0x568] sm:$0xf]  ;;  %v7467_v48 = vld [vmem:[%s8488_s2 + $0x214] sm:$0xf0] }
 0x47b   : > { %5155 = vmatpush.bf16.msra.mxu0 %v6356_v1  ;;  %5124 = vmatmul.bf16.vlgmr.msrb.gmra.mxu1 %v10158_v37  ;;  %v7575_v1 = vld [vmem:[%s8488_s2 + $0x574] sm:$0xf0]  ;;  %v6243_v31 = vld [vmem:[%s8488_s2 + $0x208] sm:$0xf] }
 0x47c   : > { %5168 = vmatpush.bf16.msra.mxu1 %v6484_v20  ;;  %5181 = vmatpush.bf16.msra.mxu2 %v6612_v18  ;;  %v4918_v20 = vadd.f32 %v4917_v28, %v4905_v57  ;;  %v6292_v18 = vor.u32 %v7479_v32, %v6291_v26  ;;  %v6676_v59 = vor.u32 %v7575_v1, %v6675_v53  ;;  %v6371_v22 = vld [vmem:[%s8488_s2 + $0x308] sm:$0xf]  ;;  %v7531_v26 = vld [vmem:[%s8488_s2 + $0x414] sm:$0xf0] }
 0x47d   : > { %5137 = vmatmul.bf16.vlgmr.msrb.gmra.mxu2 %v10011_v38  ;;  %5150 = vmatmul.bf16.vlgmr.msrb.gmra.mxu3 %v10026_v7  ;;  %v6499_v16 = vld [vmem:[%s8488_s2 + $0x408] sm:$0xf]  ;;  %v7563_v15 = vld [vmem:[%s8488_s2 + $0x514] sm:$0xf0]  ;;  %v6244_v62 = vor.u32 %v7467_v48, %v6243_v31 }
 0x47e   : > { %5194 = vmatpush.bf16.msra.mxu3 %v6740_v51  ;;  %v6403_v51 = vld [vmem:[%s8488_s2 + $0x348] sm:$0xf]  ;;  %v4930_v3 = vpop.f32.mrf.mxu2  ;;  %v7655_v5 = vld [vmem:[%s8488_s2 + $0x7f4] sm:$0xf0] }
 0x47f   : > { %5156 = vmatpush.bf16.msra.mxu0 %v6340_v30  ;;  %v4931_v30 = vadd.f32 %v4930_v3, %v4918_v20  ;;  %v4906_v41 = vpop.f32.mrf.mxu0  ;;  %v6627_v32 = vld [vmem:[%s8488_s2 + $0x508] sm:$0xf]  ;;  %v7687_v1 = vld [vmem:[%s8488_s2 + $0x8f4] sm:$0xf0] }
 0x480   : > { %5169 = vmatpush.bf16.msra.mxu1 %v6468_v17  ;;  %5182 = vmatpush.bf16.msra.mxu2 %v6596_v8  ;;  %v4943_v35 = vpop.f32.mrf.mxu3  ;;  %v6659_v17 = vld [vmem:[%s8488_s2 + $0x548] sm:$0xf]  ;;  %v7571_v8 = vld [vmem:[%s8488_s2 + $0x554] sm:$0xf0]  ;;  %v6628_v47 = vor.u32 %v7563_v15, %v6627_v32 }
 0x481   : > { %v10412_v24 = vadd.f32 %v4943_v35, %v4931_v30  ;;  %v6867_v28 = vld [vmem:[%s8488_s2 + $0x6e8] sm:$0xf]  ;;  %v7651_v30 = vld [vmem:[%s8488_s2 + $0x7d4] sm:$0xf0] }
 0x482   : > { %5195 = vmatpush.bf16.msra.mxu3 %v6724_v25  ;;  %v6404_v25 = vor.u32 %v7507_v12, %v6403_v51  ;;  %v4919_v45 = vpop.f32.mrf.mxu1  ;;  %v6995_v43 = vld [vmem:[%s8488_s2 + $0x7e8] sm:$0xf]  ;;  %v7619_v12 = vld [vmem:[%s8488_s2 + $0x6d4] sm:$0xf0] }
 0x483   : > { %5157 = vmatpush.bf16.msra.mxu0 %v6324_v61  ;;  %v6660_v61 = vor.u32 %v7571_v8, %v6659_v17  ;;  %v7123_v53 = vld [vmem:[%s8488_s2 + $0x8e8] sm:$0xf]  ;;  %v6996_v51 = vor.u32 %v7655_v5, %v6995_v43  ;;  %v7683_v17 = vld [vmem:[%s8488_s2 + $0x8d4] sm:$0xf0] }
 0x484   : > { %5170 = vmatpush.bf16.msra.mxu1 %v6452_v55  ;;  %5183 = vmatpush.bf16.msra.mxu2 %v6580_v6  ;;  %v7503_v55 = vld [vmem:[%s8488_s2 + $0x334] sm:$0xf0]  ;;  %v6515_v6 = vld [vmem:[%s8488_s2 + $0x428] sm:$0xf]  ;;  %v7124_v3 = vor.u32 %v7687_v1, %v7123_v53 }
 0x485   : > { %v6388_v19 = vor.u32 %v7503_v55, %v6387_v33  ;;  %v6516_v54 = vor.u32 %v7535_v23, %v6515_v6  ;;  %v6979_v56 = vld [vmem:[%s8488_s2 + $0x7c8] sm:$0xf]  ;;  %v7679_v6 = vld [vmem:[%s8488_s2 + $0x8b4] sm:$0xf0] }
 0x486   : > { %5196 = vmatpush.bf16.msra.mxu3 %v6708_v14  ;;  %v6260_v14 = vor.u32 %v7471_v13, %v6259_v36  ;;  %v7107_v35 = vld [vmem:[%s8488_s2 + $0x8c8] sm:$0xf]  ;;  %v7615_v13 = vld [vmem:[%s8488_s2 + $0x6b4] sm:$0xf0] }
 0x487   : > { %5158 = vmatpush.bf16.msra.mxu0 %v6308_v10  ;;  %v7499_v10 = vld [vmem:[%s8488_s2 + $0x314] sm:$0xf0]  ;;  %v7235_v8 = vld [vmem:[%s8488_s2 + $0x9c8] sm:$0xf] }
 0x488   : > { %5171 = vmatpush.bf16.msra.mxu1 %v6436_v58  ;;  %5184 = vmatpush.bf16.msra.mxu2 %v6564_v2  ;;  %v4932_v58 = vpop.f32.mrf.mxu2  ;;  %v6644_v2 = vor.u32 %v7567_v39, %v6643_v49  ;;  %v4945_v57 = vpop.f32.mrf.mxu3  ;;  %v6372_v20 = vor.u32 %v7499_v10, %v6371_v22  ;;  %v6835_v36 = vld [vmem:[%s8488_s2 + $0x6a8] sm:$0xf]  ;;  %v7711_v49 = vld [vmem:[%s8488_s2 + $0x9b4] sm:$0xf0] }
 0x489   : > { %v6963_v33 = vld [vmem:[%s8488_s2 + $0x7a8] sm:$0xf]  ;;  %v6836_v39 = vor.u32 %v7615_v13, %v6835_v36  ;;  %v7643_v10 = vld [vmem:[%s8488_s2 + $0x794] sm:$0xf0] }
 0x48a   : > { %5197 = vmatpush.bf16.msra.mxu3 %v6692_v52  ;;  %v7623_v52 = vld [vmem:[%s8488_s2 + $0x6f4] sm:$0xf0]  ;;  %v7091_v55 = vld [vmem:[%s8488_s2 + $0x8a8] sm:$0xf] }
 0x48b   : > { %5159 = vmatpush.bf16.msra.mxu0 %v6292_v18  ;;  %v6500_v18 = vor.u32 %v7531_v26, %v6499_v16  ;;  %v6868_v34 = vor.u32 %v7623_v52, %v6867_v28  ;;  %v7219_v23 = vld [vmem:[%s8488_s2 + $0x9a8] sm:$0xf]  ;;  %v7092_v31 = vor.u32 %v7679_v6, %v7091_v55  ;;  %v7675_v58 = vld [vmem:[%s8488_s2 + $0x894] sm:$0xf0] }
 0x48c   : > { %5172 = vmatpush.bf16.msra.mxu1 %v6420_v46  ;;  %5185 = vmatpush.bf16.msra.mxu2 %v6548_v63  ;;  %v7251_v46 = vld [vmem:[%s8488_s2 + $0x9e8] sm:$0xf]  ;;  %v7719_v63 = vld [vmem:[%s8488_s2 + $0x9f4] sm:$0xf0]  ;;  %v7220_v22 = vor.u32 %v7711_v49, %v7219_v23 }
 0x48d   : > { %v7252_v4 = vor.u32 %v7719_v63, %v7251_v46  ;;  %v6819_v48 = vld [vmem:[%s8488_s2 + $0x688] sm:$0xf]  ;;  %v7707_v32 = vld [vmem:[%s8488_s2 + $0x994] sm:$0xf0] }
 0x48e   : > { %5198 = vmatpush.bf16.msra.mxu3 %v6676_v59  ;;  %v6851_v59 = vld [vmem:[%s8488_s2 + $0x6c8] sm:$0xf]  ;;  %v7607_v5 = vld [vmem:[%s8488_s2 + $0x674] sm:$0xf0] }
 0x48f   : > { %5160 = vmatpush.bf16.msra.mxu0 %v6276_v44  ;;  %v7715_v44 = vld [vmem:[%s8488_s2 + $0x9d4] sm:$0xf0]  ;;  %v6852_v41 = vor.u32 %v7619_v12, %v6851_v59  ;;  %v7075_v16 = vld [vmem:[%s8488_s2 + $0x888] sm:$0xf] }
 0x490   : > { %5173 = vmatpush.bf16.msra.mxu1 %v6404_v25  ;;  %5186 = vmatpush.bf16.msra.mxu2 %v6532_v50  ;;  %v6980_v25 = vor.u32 %v7651_v30, %v6979_v56  ;;  %v7108_v50 = vor.u32 %v7683_v17, %v7107_v35  ;;  %v7236_v45 = vor.u32 %v7715_v44, %v7235_v8  ;;  %v7203_v26 = vld [vmem:[%s8488_s2 + $0x988] sm:$0xf]  ;;  %v7603_v12 = vld [vmem:[%s8488_s2 + $0x654] sm:$0xf0] }
 0x491   : > { %v7076_v43 = vor.u32 %v7675_v58, %v7075_v16  ;;  %v6931_v53 = vld [vmem:[%s8488_s2 + $0x768] sm:$0xf]  ;;  %v7204_v1 = vor.u32 %v7707_v32, %v7203_v26  ;;  %v7635_v35 = vld [vmem:[%s8488_s2 + $0x754] sm:$0xf0] }
 0x492   : > { %5199 = vmatpush.bf16.msra.mxu3 %v6660_v61  ;;  %v7647_v61 = vld [vmem:[%s8488_s2 + $0x7b4] sm:$0xf0]  ;;  %v7059_v46 = vld [vmem:[%s8488_s2 + $0x868] sm:$0xf] }
 0x493   : > { %5161 = vmatpush.bf16.msra.mxu0 %v6260_v14  ;;  %v6964_v14 = vor.u32 %v7647_v61, %v6963_v33  ;;  %v7187_v63 = vld [vmem:[%s8488_s2 + $0x968] sm:$0xf]  ;;  %v7667_v8 = vld [vmem:[%s8488_s2 + $0x854] sm:$0xf0] }
 0x494   : > { %5174 = vmatpush.bf16.msra.mxu1 %v6388_v19  ;;  %5187 = vmatpush.bf16.msra.mxu2 %v6516_v54  ;;  %v7611_v19 = vld [vmem:[%s8488_s2 + $0x694] sm:$0xf0]  ;;  %v6947_v54 = vld [vmem:[%s8488_s2 + $0x788] sm:$0xf] }
 0x495   : > { %v6820_v57 = vor.u32 %v7611_v19, %v6819_v48  ;;  %v6948_v52 = vor.u32 %v7643_v10, %v6947_v54  ;;  %v6787_v59 = vld [vmem:[%s8488_s2 + $0x648] sm:$0xf]  ;;  %v7599_v6 = vld [vmem:[%s8488_s2 + $0x634] sm:$0xf0] }
 0x496   : > { %5200 = vmatpush.bf16.msra.mxu3 %v6644_v2  ;;  %v6915_v56 = vld [vmem:[%s8488_s2 + $0x748] sm:$0xf]  ;;  %v6788_v13 = vor.u32 %v7603_v12, %v6787_v59  ;;  %v7695_v19 = vld [vmem:[%s8488_s2 + $0x934] sm:$0xf0] }
 0x497   : > { %5162 = vmatpush.bf16.msra.mxu0 %v6244_v62  ;;  %v4956_v2 = vpop.f32.mrf.mxu0  ;;  %v6803_v62 = vld [vmem:[%s8488_s2 + $0x668] sm:$0xf]  ;;  %v7595_v10 = vld [vmem:[%s8488_s2 + $0x614] sm:$0xf0] }
 0x498   : > { %5175 = vmatpush.bf16.msra.mxu1 %v6372_v20  ;;  %5188 = vmatpush.bf16.msra.mxu2 %v6500_v18  ;;  %v4957_v15 = vadd.f32 %v4956_v2, %v10412_v24  ;;  %v7639_v18 = vld [vmem:[%s8488_s2 + $0x774] sm:$0xf0]  ;;  %v7043_v17 = vld [vmem:[%s8488_s2 + $0x848] sm:$0xf] }
 0x499   : > { %v7671_v24 = vld [vmem:[%s8488_s2 + $0x874] sm:$0xf0]  ;;  %v7044_v61 = vor.u32 %v7667_v8, %v7043_v17  ;;  %v6771_v55 = vld [vmem:[%s8488_s2 + $0x628] sm:$0xf]  ;;  %v6085_v8 = vld [vmem:[%s8488_s2 + $0xd8] sm:$0xf0] }
 0x49a   : > { %5201 = vmatpush.bf16.msra.mxu3 %v6628_v47  ;;  %5163 = vmatmul.bf16.vlgmr.msra.gmra.mxu0 %v10009_v42  ;;  %v4969_v28 = vpop.f32.mrf.mxu1  ;;  %v7703_v47 = vld [vmem:[%s8488_s2 + $0x974] sm:$0xf0]  ;;  %v6899_v23 = vld [vmem:[%s8488_s2 + $0x728] sm:$0xf]  ;;  %v6772_v54 = vor.u32 %v7599_v6, %v6771_v55 }
 0x49b   : > { %5207 = vmatpush.bf16.msrb.mxu0 %v6868_v34  ;;  %5189 = vmatmul.bf16.vlgmr.msra.gmra.mxu2 %v10084_v0  ;;  %v4970_v20 = vadd.f32 %v4969_v28, %v4957_v15  ;;  %v6804_v34 = vor.u32 %v7607_v5, %v6803_v62  ;;  %v7155_v48 = vld [vmem:[%s8488_s2 + $0x928] sm:$0xf]  ;;  %v7627_v26 = vld [vmem:[%s8488_s2 + $0x714] sm:$0xf0] }
 0x49c   : > { %5220 = vmatpush.bf16.msrb.mxu1 %v6996_v51  ;;  %5233 = vmatpush.bf16.msrb.mxu2 %v7124_v3  ;;  %v6932_v51 = vor.u32 %v7639_v18, %v6931_v53  ;;  %v7060_v3 = vor.u32 %v7671_v24, %v7059_v46  ;;  %v6883_v2 = vld [vmem:[%s8488_s2 + $0x708] sm:$0xf]  ;;  %v7156_v15 = vor.u32 %v7695_v19, %v7155_v48  ;;  %v7751_v5 = vld [vmem:[%s8488_s2 + $0xaf4] sm:$0xf0]  ;;  %v7429_v53 = vld [vmem:[%s8488_s2 + $0xec] sm:$0xf] }
 0x49d   : > { %5202 = vmatmul.bf16.vlgmr.msra.gmra.mxu3 %v10088_v60  ;;  %5176 = vmatmul.bf16.vlgmr.msra.gmra.mxu1 %v10024_v11  ;;  %v7011_v32 = vld [vmem:[%s8488_s2 + $0x808] sm:$0xf]  ;;  %v6101_v18 = vld [vmem:[%s8488_s2 + $0xf8] sm:$0xf0]  ;;  %v7461_v46 = vld [vmem:[%s8488_s2 + $0x1ec] sm:$0xf] }
 0x49e   : > { %5246 = vmatpush.bf16.msrb.mxu3 %v7252_v4  ;;  %v7188_v4 = vor.u32 %v7703_v47, %v7187_v63  ;;  %v4982_v30 = vpop.f32.mrf.mxu2  ;;  %v7139_v28 = vld [vmem:[%s8488_s2 + $0x908] sm:$0xf]  ;;  %v6229_v24 = vld [vmem:[%s8488_s2 + $0x1f8] sm:$0xf0]  ;;  %v6884_v63 = vor.u32 %v7627_v26, %v6883_v2  ;;  %v6104_v12 = vor.u32 %v7429_v53, %v6101_v18  ;;  %v7739_v2 = vld [vmem:[%s8488_s2 + $0xa94] sm:$0xf0] }
 0x49f   : > { %5208 = vmatpush.bf16.msrb.mxu0 %v6852_v41  ;;  %v10481_v44 = vadd.f32 %v4982_v30, %v4970_v20  ;;  %v7171_v41 = vld [vmem:[%s8488_s2 + $0x948] sm:$0xf]  ;;  %v4958_v36 = vpop.f32.mrf.mxu0  ;;  %v7747_v30 = vld [vmem:[%s8488_s2 + $0xad4] sm:$0xf0]  ;;  %v6197_v48 = vld [vmem:[%s8488_s2 + $0x1b8] sm:$0xf0] }
 0x4a0   : > { %5221 = vmatpush.bf16.msrb.mxu1 %v6980_v25  ;;  %5234 = vmatpush.bf16.msrb.mxu2 %v7108_v50  ;;  %v7699_v25 = vld [vmem:[%s8488_s2 + $0x954] sm:$0xf0]  ;;  %v10485_v50 = vpop.f32.mrf.mxu3  ;;  %v7379_v62 = vld [vmem:[%s8488_s2 + $0xae8] sm:$0xf]  ;;  %v7489_v36 = vld [vmem:[%s8488_s2 + $0x2cc] sm:$0xf] }
 0x4a1   : > { %v7172_v49 = vor.u32 %v7699_v25, %v7171_v41  ;;  %v7380_v59 = vor.u32 %v7751_v5, %v7379_v62  ;;  %v7457_v41 = vld [vmem:[%s8488_s2 + $0x1cc] sm:$0xf]  ;;  %v6213_v25 = vld [vmem:[%s8488_s2 + $0x1d8] sm:$0xf0]  ;;  %v7347_v6 = vld [vmem:[%s8488_s2 + $0xaa8] sm:$0xf] }
 0x4a2   : > { %5247 = vmatpush.bf16.msrb.mxu3 %v7236_v45  ;;  %v4971_v33 = vpop.f32.mrf.mxu1  ;;  %v6916_v45 = vor.u32 %v7635_v35, %v6915_v56  ;;  %v6232_v56 = vor.u32 %v7461_v46, %v6229_v24  ;;  %v7425_v35 = vld [vmem:[%s8488_s2 + $0xcc] sm:$0xf]  ;;  %v6216_v55 = vor.u32 %v7457_v41, %v6213_v25  ;;  %v6325_v19 = vld [vmem:[%s8488_s2 + $0x2b8] sm:$0xf0] }
 0x4a3   : > { %5209 = vmatpush.bf16.msrb.mxu0 %v6836_v39  ;;  %v7631_v39 = vld [vmem:[%s8488_s2 + $0x734] sm:$0xf0]  ;;  %v7417_v26 = vld [vmem:[%s8488_s2 + $0x8c] sm:$0xf] }
 0x4a4   : > { %5222 = vmatpush.bf16.msrb.mxu1 %v6964_v14  ;;  %5235 = vmatpush.bf16.msrb.mxu2 %v7092_v31  ;;  %v7027_v14 = vld [vmem:[%s8488_s2 + $0x828] sm:$0xf]  ;;  %v7663_v31 = vld [vmem:[%s8488_s2 + $0x834] sm:$0xf0]  ;;  %v6900_v16 = vor.u32 %v7631_v39, %v6899_v23  ;;  %v7413_v18 = vld [vmem:[%s8488_s2 + $0x6c] sm:$0xf] }
 0x4a5   : > { %v7028_v58 = vor.u32 %v7663_v31, %v7027_v14  ;;  %v7743_v23 = vld [vmem:[%s8488_s2 + $0xab4] sm:$0xf0]  ;;  %v6069_v14 = vld [vmem:[%s8488_s2 + $0xb8] sm:$0xf0]  ;;  %v7453_v31 = vld [vmem:[%s8488_s2 + $0x1ac] sm:$0xf] }
 0x4a6   : > { %5248 = vmatpush.bf16.msrb.mxu3 %v7220_v22  ;;  %v6755_v22 = vld [vmem:[%s8488_s2 + $0x608] sm:$0xf] }
 0x4a7   : > { %5210 = vmatpush.bf16.msrb.mxu0 %v6820_v57  ;;  %v7659_v57 = vld [vmem:[%s8488_s2 + $0x814] sm:$0xf0]  ;;  %v6756_v20 = vor.u32 %v7595_v10, %v6755_v22 }
 0x4a8   : > { %5223 = vmatpush.bf16.msrb.mxu1 %v6948_v52  ;;  %5236 = vmatpush.bf16.msrb.mxu2 %v7076_v43  ;;  %v7691_v52 = vld [vmem:[%s8488_s2 + $0x914] sm:$0xf0]  ;;  %v4984_v43 = vpop.f32.mrf.mxu2  ;;  %v7012_v47 = vor.u32 %v7659_v57, %v7011_v32  ;;  %v7449_v57 = vld [vmem:[%s8488_s2 + $0x18c] sm:$0xf] }
 0x4a9   : > { %v6309_v43 = vld [vmem:[%s8488_s2 + $0x298] sm:$0xf0] }
 0x4aa   : > { %5249 = vmatpush.bf16.msrb.mxu3 %v7204_v1  ;;  %v4997_v1 = vpop.f32.mrf.mxu3 }
 0x4ab   : > { %5211 = vmatpush.bf16.msrb.mxu0 %v6804_v34  ;;  %v7493_v34 = vld [vmem:[%s8488_s2 + $0x2ec] sm:$0xf]  ;;  %v7315_v1 = vld [vmem:[%s8488_s2 + $0xa68] sm:$0xf] }
 0x4ac   : > { %5224 = vmatpush.bf16.msrb.mxu1 %v6932_v51  ;;  %5237 = vmatpush.bf16.msrb.mxu2 %v7060_v3  ;;  %v6357_v51 = vld [vmem:[%s8488_s2 + $0x2f8] sm:$0xf0]  ;;  %v7140_v3 = vor.u32 %v7691_v52, %v7139_v28  ;;  %v7481_v52 = vld [vmem:[%s8488_s2 + $0x28c] sm:$0xf] }
 0x4ad   : > { %v6360_v17 = vor.u32 %v7493_v34, %v6357_v51  ;;  %v6181_v28 = vld [vmem:[%s8488_s2 + $0x198] sm:$0xf0]  ;;  %v7445_v34 = vld [vmem:[%s8488_s2 + $0x16c] sm:$0xf] }
 0x4ae   : > { %5250 = vmatpush.bf16.msrb.mxu3 %v7188_v4  ;;  %v7363_v4 = vld [vmem:[%s8488_s2 + $0xac8] sm:$0xf]  ;;  %v6184_v53 = vor.u32 %v7449_v57, %v6181_v28  ;;  %v6165_v51 = vld [vmem:[%s8488_s2 + $0x178] sm:$0xf0]  ;;  %v7723_v57 = vld [vmem:[%s8488_s2 + $0xa14] sm:$0xf0] }
 0x4af   : > { %5212 = vmatpush.bf16.msrb.mxu0 %v6788_v13  ;;  %v6341_v13 = vld [vmem:[%s8488_s2 + $0x2d8] sm:$0xf0]  ;;  %v7364_v33 = vor.u32 %v7747_v30, %v7363_v4  ;;  %v6168_v30 = vor.u32 %v7445_v34, %v6165_v51 }
 0x4b0   : > { %5225 = vmatpush.bf16.msrb.mxu1 %v6916_v45  ;;  %5238 = vmatpush.bf16.msrb.mxu2 %v7044_v61  ;;  %v4836_v45 = vperm.slane %v10320_v40, 1  ;;  %v6088_v61 = vor.u32 %v7425_v35, %v6085_v8  ;;  %v6344_v39 = vor.u32 %v7489_v36, %v6341_v13  ;;  %v7485_v40 = vld [vmem:[%s8488_s2 + $0x2ac] sm:$0xf]  ;;  %v7299_v35 = vld [vmem:[%s8488_s2 + $0xa48] sm:$0xf] }
 0x4b1   : > { %v6328_v32 = vor.u32 %v7485_v40, %v6325_v19  ;;  %v7409_v8 = vld [vmem:[%s8488_s2 + $0x4c] sm:$0xf]  ;;  %v6021_v36 = vld [vmem:[%s8488_s2 + $0x58] sm:$0xf0]  ;;  %v7727_v40 = vld [vmem:[%s8488_s2 + $0xa34] sm:$0xf0] }
 0x4b2   : > { %5251 = vmatpush.bf16.msrb.mxu3 %v7172_v49  ;;  %v7421_v49 = vld [vmem:[%s8488_s2 + $0xac] sm:$0xf]  ;;  %v4996_v22 = vadd.f32 %v10485_v50, %v4836_v45  ;;  %v6613_v51 = vld [vmem:[%s8488_s2 + $0x4f8] sm:$0xf0] }
 0x4b3   : > { %5213 = vmatpush.bf16.msrb.mxu0 %v6772_v54  ;;  %v7348_v54 = vor.u32 %v7743_v23, %v7347_v6  ;;  %v6072_v10 = vor.u32 %v7421_v49, %v6069_v14  ;;  %v7441_v13 = vld [vmem:[%s8488_s2 + $0x14c] sm:$0xf]  ;;  %v6277_v6 = vld [vmem:[%s8488_s2 + $0x258] sm:$0xf0]  ;;  %v6024_v14 = vor.u32 %v7409_v8, %v6021_v36 }
 0x4b4   : > { %5226 = vmatpush.bf16.msrb.mxu1 %v6900_v16  ;;  %5239 = vmatpush.bf16.msrb.mxu2 %v7028_v58  ;;  %v6200_v16 = vor.u32 %v7453_v31, %v6197_v48  ;;  %v7331_v58 = vld [vmem:[%s8488_s2 + $0xa88] sm:$0xf]  ;;  %v7405_v19 = vld [vmem:[%s8488_s2 + $0x2c] sm:$0xf]  ;;  %v6469_v36 = vld [vmem:[%s8488_s2 + $0x3d8] sm:$0xf0] }
 0x4b5   : > { %v7332_v50 = vor.u32 %v7739_v2, %v7331_v58  ;;  %v7283_v48 = vld [vmem:[%s8488_s2 + $0xa28] sm:$0xf]  ;;  %v6133_v58 = vld [vmem:[%s8488_s2 + $0x138] sm:$0xf0]  ;;  %v7469_v2 = vld [vmem:[%s8488_s2 + $0x22c] sm:$0xf] }
 0x4b6   : > { %5252 = vmatpush.bf16.msrb.mxu3 %v7156_v15  ;;  %v6053_v15 = vld [vmem:[%s8488_s2 + $0x98] sm:$0xf0] }
 0x4b7   : > { %5214 = vmatpush.bf16.msrb.mxu0 %v6756_v20  ;;  %v5008_v62 = vpop.f32.mrf.mxu0  ;;  %v6056_v5 = vor.u32 %v7417_v26, %v6053_v15  ;;  %v7735_v20 = vld [vmem:[%s8488_s2 + $0xa74] sm:$0xf0]  ;;  %v6261_v26 = vld [vmem:[%s8488_s2 + $0x238] sm:$0xf0]  ;;  %v7267_v15 = vld [vmem:[%s8488_s2 + $0xa08] sm:$0xf] }
 0x4b8   : > { %5227 = vmatpush.bf16.msrb.mxu1 %v6884_v63  ;;  %5240 = vmatpush.bf16.msrb.mxu2 %v7012_v47  ;;  %v5009_v46 = vadd.f32 %v5008_v62, %v4996_v22  ;;  %v6312_v63 = vor.u32 %v7481_v52, %v6309_v43  ;;  %v6037_v47 = vld [vmem:[%s8488_s2 + $0x78] sm:$0xf0]  ;;  %v7401_v43 = vld [vmem:[%s8488_s2 + $0xc] sm:$0xf]  ;;  %v7268_v34 = vor.u32 %v7723_v57, %v7267_v15 }
 0x4b9   : > { %v6040_v4 = vor.u32 %v7413_v18, %v6037_v47  ;;  %v7433_v62 = vld [vmem:[%s8488_s2 + $0x10c] sm:$0xf]  ;;  %v6245_v18 = vld [vmem:[%s8488_s2 + $0x218] sm:$0xf0] }
 0x4ba   : > { %5253 = vmatpush.bf16.msrb.mxu3 %v7140_v3  ;;  %5215 = vmatmul.bf16.vlgmr.msrb.gmra.mxu0 %v10080_v27  ;;  %v5021_v24 = vpop.f32.mrf.mxu1  ;;  %v7477_v3 = vld [vmem:[%s8488_s2 + $0x26c] sm:$0xf] }
 0x4bb   : > { %5259 = vmatpush.bf16.msra.mxu0 %v7380_v59  ;;  %5241 = vmatmul.bf16.vlgmr.msrb.gmra.mxu2 %v10153_v21  ;;  %v6293_v59 = vld [vmem:[%s8488_s2 + $0x278] sm:$0xf0]  ;;  %v7557_v47 = vld [vmem:[%s8488_s2 + $0x4ec] sm:$0xf] }
 0x4bc   : > { %5272 = vmatpush.bf16.msra.mxu1 %v6104_v12  ;;  %5285 = vmatpush.bf16.msra.mxu2 %v6232_v56  ;;  %v5022_v12 = vadd.f32 %v5021_v24, %v5009_v46  ;;  %v7316_v56 = vor.u32 %v7735_v20, %v7315_v1  ;;  %v6296_v25 = vor.u32 %v7477_v3, %v6293_v59  ;;  %v6117_v1 = vld [vmem:[%s8488_s2 + $0x118] sm:$0xf0]  ;;  %v7465_v20 = vld [vmem:[%s8488_s2 + $0x20c] sm:$0xf] }
 0x4bd   : > { %5228 = vmatmul.bf16.vlgmr.msrb.gmra.mxu1 %v10086_v29  ;;  %5254 = vmatmul.bf16.vlgmr.msrb.gmra.mxu3 %v10160_v9  ;;  %v7525_v24 = vld [vmem:[%s8488_s2 + $0x3ec] sm:$0xf]  ;;  %v6741_v59 = vld [vmem:[%s8488_s2 + $0x5f8] sm:$0xf0]  ;;  %v6616_v8 = vor.u32 %v7557_v47, %v6613_v51 }
 0x4be   : > { %5298 = vmatpush.bf16.msra.mxu3 %v6360_v17  ;;  %v7731_v17 = vld [vmem:[%s8488_s2 + $0xa54] sm:$0xf0]  ;;  %v5034_v41 = vpop.f32.mrf.mxu2  ;;  %v7589_v3 = vld [vmem:[%s8488_s2 + $0x5ec] sm:$0xf] }
 0x4bf   : > { %5260 = vmatpush.bf16.msra.mxu0 %v7364_v33  ;;  %v6149_v33 = vld [vmem:[%s8488_s2 + $0x158] sm:$0xf0]  ;;  %v5035_v45 = vadd.f32 %v5034_v41, %v5022_v12  ;;  %v7300_v23 = vor.u32 %v7731_v17, %v7299_v35  ;;  %v6248_v35 = vor.u32 %v7465_v20, %v6245_v18  ;;  %v6744_v41 = vor.u32 %v7589_v3, %v6741_v59  ;;  %v7513_v57 = vld [vmem:[%s8488_s2 + $0x38c] sm:$0xf] }
 0x4c0   : > { %5273 = vmatpush.bf16.msra.mxu1 %v6088_v61  ;;  %5286 = vmatpush.bf16.msra.mxu2 %v6216_v55  ;;  %v5047_v61 = vpop.f32.mrf.mxu3  ;;  %v7473_v55 = vld [vmem:[%s8488_s2 + $0x24c] sm:$0xf]  ;;  %v6152_v31 = vor.u32 %v7441_v13, %v6149_v33  ;;  %v6549_v3 = vld [vmem:[%s8488_s2 + $0x478] sm:$0xf0] }
 0x4c1   : > { %v10557_v49 = vadd.f32 %v5047_v61, %v5035_v45  ;;  %v6280_v22 = vor.u32 %v7473_v55, %v6277_v6  ;;  %v7553_v13 = vld [vmem:[%s8488_s2 + $0x4cc] sm:$0xf]  ;;  %v6597_v45 = vld [vmem:[%s8488_s2 + $0x4d8] sm:$0xf0] }
 0x4c2   : > { %5299 = vmatpush.bf16.msra.mxu3 %v6344_v39  ;;  %v5010_v39 = vpop.f32.mrf.mxu0  ;;  %v7585_v61 = vld [vmem:[%s8488_s2 + $0x5cc] sm:$0xf]  ;;  %v6725_v55 = vld [vmem:[%s8488_s2 + $0x5d8] sm:$0xf0] }
 0x4c3   : > { %5261 = vmatpush.bf16.msra.mxu0 %v7348_v54  ;;  %v5023_v54 = vpop.f32.mrf.mxu1  ;;  %v7617_v6 = vld [vmem:[%s8488_s2 + $0x6cc] sm:$0xf] }
 0x4c4   : > { %5274 = vmatpush.bf16.msra.mxu1 %v6072_v10  ;;  %5287 = vmatpush.bf16.msra.mxu2 %v6200_v16  ;;  %v6005_v10 = vld [vmem:[%s8488_s2 + $0x38] sm:$0xf0]  ;;  %v7437_v16 = vld [vmem:[%s8488_s2 + $0x12c] sm:$0xf] }
 0x4c5   : > { %v6008_v28 = vor.u32 %v7405_v19, %v6005_v10  ;;  %v6136_v52 = vor.u32 %v7437_v16, %v6133_v58  ;;  %v7549_v19 = vld [vmem:[%s8488_s2 + $0x4ac] sm:$0xf]  ;;  %v6709_v16 = vld [vmem:[%s8488_s2 + $0x5b8] sm:$0xf0] }
 0x4c6   : > { %5300 = vmatpush.bf16.msra.mxu3 %v6328_v32  ;;  %v7284_v32 = vor.u32 %v7727_v40, %v7283_v48  ;;  %v7517_v48 = vld [vmem:[%s8488_s2 + $0x3ac] sm:$0xf]  ;;  %v6453_v40 = vld [vmem:[%s8488_s2 + $0x3b8] sm:$0xf0] }
 0x4c7   : > { %5262 = vmatpush.bf16.msra.mxu0 %v7332_v50  ;;  %v5989_v50 = vld [vmem:[%s8488_s2 + $0x18] sm:$0xf0]  ;;  %v7581_v10 = vld [vmem:[%s8488_s2 + $0x5ac] sm:$0xf] }
 0x4c8   : > { %5275 = vmatpush.bf16.msra.mxu1 %v6056_v5  ;;  %5288 = vmatpush.bf16.msra.mxu2 %v6184_v53  ;;  %v5036_v5 = vpop.f32.mrf.mxu2  ;;  %v6264_v53 = vor.u32 %v7469_v2, %v6261_v26  ;;  %v5049_v46 = vpop.f32.mrf.mxu3  ;;  %v5992_v12 = vor.u32 %v7401_v43, %v5989_v50  ;;  %v7613_v58 = vld [vmem:[%s8488_s2 + $0x6ac] sm:$0xf]  ;;  %v6837_v2 = vld [vmem:[%s8488_s2 + $0x6b8] sm:$0xf0]  ;;  %v6456_v26 = vor.u32 %v7517_v48, %v6453_v40 }
 0x4c9   : > { %v6712_v15 = vor.u32 %v7581_v10, %v6709_v16  ;;  %v6840_v43 = vor.u32 %v7613_v58, %v6837_v2  ;;  %v6693_v50 = vld [vmem:[%s8488_s2 + $0x598] sm:$0xf0]  ;;  %v7609_v5 = vld [vmem:[%s8488_s2 + $0x68c] sm:$0xf] }
 0x4ca   : > { %5301 = vmatpush.bf16.msra.mxu3 %v6312_v63  ;;  %v6485_v63 = vld [vmem:[%s8488_s2 + $0x3f8] sm:$0xf0]  ;;  %v7541_v47 = vld [vmem:[%s8488_s2 + $0x46c] sm:$0xf] }
 0x4cb   : > { %5263 = vmatpush.bf16.msra.mxu0 %v7316_v56  ;;  %v6120_v56 = vor.u32 %v7433_v62, %v6117_v1  ;;  %v6488_v17 = vor.u32 %v7525_v24, %v6485_v63  ;;  %v7509_v24 = vld [vmem:[%s8488_s2 + $0x36c] sm:$0xf]  ;;  %v6421_v63 = vld [vmem:[%s8488_s2 + $0x378] sm:$0xf0] }
 0x4cc   : > { %5276 = vmatpush.bf16.msra.mxu1 %v6040_v4  ;;  %5289 = vmatpush.bf16.msra.mxu2 %v6168_v30  ;;  %v7621_v4 = vld [vmem:[%s8488_s2 + $0x6ec] sm:$0xf]  ;;  %v6869_v30 = vld [vmem:[%s8488_s2 + $0x6f8] sm:$0xf0] }
 0x4cd   : > { %v6872_v33 = vor.u32 %v7621_v4, %v6869_v30  ;;  %v7573_v59 = vld [vmem:[%s8488_s2 + $0x56c] sm:$0xf]  ;;  %v6424_v4 = vor.u32 %v7509_v24, %v6421_v63  ;;  %v6552_v30 = vor.u32 %v7541_v47, %v6549_v3  ;;  %v6517_v58 = vld [vmem:[%s8488_s2 + $0x438] sm:$0xf0] }
 0x4ce   : > { %5302 = vmatpush.bf16.msra.mxu3 %v6296_v25  ;;  %v7521_v25 = vld [vmem:[%s8488_s2 + $0x3cc] sm:$0xf]  ;;  %v7253_v3 = vld [vmem:[%s8488_s2 + $0x9f8] sm:$0xf0] }
 0x4cf   : > { %5264 = vmatpush.bf16.msra.mxu0 %v7300_v23  ;;  %v6853_v23 = vld [vmem:[%s8488_s2 + $0x6d8] sm:$0xf0]  ;;  %v6472_v39 = vor.u32 %v7521_v25, %v6469_v36  ;;  %v7533_v10 = vld [vmem:[%s8488_s2 + $0x42c] sm:$0xf] }
 0x4d0   : > { %5277 = vmatpush.bf16.msra.mxu1 %v6024_v14  ;;  %5290 = vmatpush.bf16.msra.mxu2 %v6152_v31  ;;  %v6600_v14 = vor.u32 %v7553_v13, %v6597_v45  ;;  %v6728_v31 = vor.u32 %v7585_v61, %v6725_v55  ;;  %v6856_v54 = vor.u32 %v7617_v6, %v6853_v23  ;;  %v6533_v13 = vld [vmem:[%s8488_s2 + $0x458] sm:$0xf0]  ;;  %v7601_v6 = vld [vmem:[%s8488_s2 + $0x64c] sm:$0xf] }
 0x4d1   : > { %v6661_v45 = vld [vmem:[%s8488_s2 + $0x558] sm:$0xf0]  ;;  %v7565_v2 = vld [vmem:[%s8488_s2 + $0x52c] sm:$0xf] }
 0x4d2   : > { %5303 = vmatpush.bf16.msra.mxu3 %v6280_v22  ;;  %v6581_v22 = vld [vmem:[%s8488_s2 + $0x4b8] sm:$0xf0]  ;;  %v7685_v24 = vld [vmem:[%s8488_s2 + $0x8ec] sm:$0xf] }
 0x4d3   : > { %5265 = vmatpush.bf16.msra.mxu0 %v7284_v32  ;;  %v6584_v32 = vor.u32 %v7549_v19, %v6581_v22  ;;  %v6789_v23 = vld [vmem:[%s8488_s2 + $0x658] sm:$0xf0] }
 0x4d4   : > { %5278 = vmatpush.bf16.msra.mxu1 %v6008_v28  ;;  %5291 = vmatpush.bf16.msra.mxu2 %v6136_v52  ;;  %v6437_v28 = vld [vmem:[%s8488_s2 + $0x398] sm:$0xf0]  ;;  %v7545_v52 = vld [vmem:[%s8488_s2 + $0x48c] sm:$0xf]  ;;  %v6792_v16 = vor.u32 %v7601_v6, %v6789_v23 }
 0x4d5   : > { %v6440_v1 = vor.u32 %v7513_v57, %v6437_v28  ;;  %v6389_v22 = vld [vmem:[%s8488_s2 + $0x338] sm:$0xf0]  ;;  %v7497_v28 = vld [vmem:[%s8488_s2 + $0x30c] sm:$0xf] }
 0x4d6   : > { %5304 = vmatpush.bf16.msra.mxu3 %v6264_v53  ;;  %v6821_v53 = vld [vmem:[%s8488_s2 + $0x698] sm:$0xf0] }
 0x4d7   : > { %5266 = vmatpush.bf16.msra.mxu0 %v7268_v34  ;;  %v5060_v62 = vpop.f32.mrf.mxu0  ;;  %v6824_v34 = vor.u32 %v7609_v5, %v6821_v53  ;;  %v6629_v53 = vld [vmem:[%s8488_s2 + $0x518] sm:$0xf0] }
 0x4d8   : > { %5279 = vmatpush.bf16.msra.mxu1 %v5992_v12  ;;  %5292 = vmatpush.bf16.msra.mxu2 %v6120_v56  ;;  %v7605_v12 = vld [vmem:[%s8488_s2 + $0x66c] sm:$0xf]  ;;  %v6805_v56 = vld [vmem:[%s8488_s2 + $0x678] sm:$0xf0] }
 0x4d9   : > { %v6808_v25 = vor.u32 %v7605_v12, %v6805_v56  ;;  %v7749_v12 = vld [vmem:[%s8488_s2 + $0xaec] sm:$0xf]  ;;  %v7381_v56 = vld [vmem:[%s8488_s2 + $0xaf8] sm:$0xf0] }
 0x4da   : > { %5305 = vmatpush.bf16.msra.mxu3 %v6248_v35  ;;  %5267 = vmatmul.bf16.vlgmr.msra.gmra.mxu0 %v10158_v37  ;;  %v5073_v20 = vpop.f32.mrf.mxu1 }
 0x4db   : > { %5311 = vmatpush.bf16.msrb.mxu0 %v6488_v17  ;;  %5293 = vmatmul.bf16.vlgmr.msra.gmra.mxu2 %v10026_v7  ;;  %v6565_v7 = vld [vmem:[%s8488_s2 + $0x498] sm:$0xf0]  ;;  %v7505_v17 = vld [vmem:[%s8488_s2 + $0x34c] sm:$0xf] }
 0x4dc   : > { %5324 = vmatpush.bf16.msrb.mxu1 %v6616_v8  ;;  %5337 = vmatpush.bf16.msrb.mxu2 %v6744_v41  ;;  %v6568_v18 = vor.u32 %v7545_v52, %v6565_v7  ;;  %v6405_v8 = vld [vmem:[%s8488_s2 + $0x358] sm:$0xf0]  ;;  %v7537_v41 = vld [vmem:[%s8488_s2 + $0x44c] sm:$0xf] }
 0x4dd   : > { %5306 = vmatmul.bf16.vlgmr.msra.gmra.mxu3 %v10009_v42  ;;  %5280 = vmatmul.bf16.vlgmr.msra.gmra.mxu1 %v10011_v38  ;;  %v7577_v42 = vld [vmem:[%s8488_s2 + $0x58c] sm:$0xf]  ;;  %v5061_v38 = vadd.f32 %v5060_v62, %v10557_v49  ;;  %v6677_v49 = vld [vmem:[%s8488_s2 + $0x578] sm:$0xf0]  ;;  %v6536_v40 = vor.u32 %v7537_v41, %v6533_v13 }
 0x4de   : > { %5350 = vmatpush.bf16.msrb.mxu3 %v6872_v33  ;;  %v6696_v46 = vor.u32 %v7577_v42, %v6693_v50  ;;  %v6680_v35 = vor.u32 %v7573_v59, %v6677_v49  ;;  %v5086_v36 = vpop.f32.mrf.mxu2  ;;  %v7569_v33 = vld [vmem:[%s8488_s2 + $0x54c] sm:$0xf]  ;;  %v6373_v52 = vld [vmem:[%s8488_s2 + $0x318] sm:$0xf0] }
 0x4df   : > { %5312 = vmatpush.bf16.msrb.mxu0 %v6472_v39  ;;  %v5074_v51 = vadd.f32 %v5073_v20, %v5061_v38  ;;  %v5062_v39 = vpop.f32.mrf.mxu0  ;;  %v6664_v19 = vor.u32 %v7569_v33, %v6661_v45  ;;  %v7529_v42 = vld [vmem:[%s8488_s2 + $0x40c] sm:$0xf]  ;;  %v6501_v50 = vld [vmem:[%s8488_s2 + $0x418] sm:$0xf0]  ;;  %v6376_v47 = vor.u32 %v7497_v28, %v6373_v52 }
 0x4e0   : > { %5325 = vmatpush.bf16.msrb.mxu1 %v6600_v14  ;;  %5338 = vmatpush.bf16.msrb.mxu2 %v6728_v31  ;;  %v5099_v55 = vpop.f32.mrf.mxu3  ;;  %v6408_v14 = vor.u32 %v7505_v17, %v6405_v8  ;;  %v7561_v62 = vld [vmem:[%s8488_s2 + $0x50c] sm:$0xf]  ;;  %v6504_v59 = vor.u32 %v7529_v42, %v6501_v50  ;;  %v6981_v41 = vld [vmem:[%s8488_s2 + $0x7d8] sm:$0xf0] }
 0x4e1   : > { %v5087_v61 = vadd.f32 %v5086_v36, %v5074_v51  ;;  %v7593_v38 = vld [vmem:[%s8488_s2 + $0x60c] sm:$0xf]  ;;  %v6632_v49 = vor.u32 %v7561_v62, %v6629_v53  ;;  %v7384_v36 = vor.u32 %v7749_v12, %v7381_v56  ;;  %v7109_v13 = vld [vmem:[%s8488_s2 + $0x8d8] sm:$0xf0] }
 0x4e2   : > { %5351 = vmatpush.bf16.msrb.mxu3 %v6856_v54  ;;  %v5075_v31 = vpop.f32.mrf.mxu1  ;;  %v7501_v54 = vld [vmem:[%s8488_s2 + $0x32c] sm:$0xf]  ;;  %v7237_v45 = vld [vmem:[%s8488_s2 + $0x9d8] sm:$0xf0] }
 0x4e3   : > { %5313 = vmatpush.bf16.msrb.mxu0 %v6456_v26  ;;  %v10628_v48 = vadd.f32 %v5099_v55, %v5087_v61  ;;  %v6645_v26 = vld [vmem:[%s8488_s2 + $0x538] sm:$0xf0]  ;;  %v6392_v57 = vor.u32 %v7501_v54, %v6389_v22  ;;  %v7717_v51 = vld [vmem:[%s8488_s2 + $0x9ec] sm:$0xf] }
 0x4e4   : > { %5326 = vmatpush.bf16.msrb.mxu1 %v6584_v32  ;;  %5339 = vmatpush.bf16.msrb.mxu2 %v6712_v15  ;;  %v7597_v32 = vld [vmem:[%s8488_s2 + $0x62c] sm:$0xf]  ;;  %v6773_v15 = vld [vmem:[%s8488_s2 + $0x638] sm:$0xf0]  ;;  %v6648_v7 = vor.u32 %v7565_v2, %v6645_v26  ;;  %v7256_v17 = vor.u32 %v7717_v51, %v7253_v3  ;;  %v10693_v51 = vld [vmem:[%s411_s11] sm:$0xf] }
 0x4e5   : > { %v6776_v5 = vor.u32 %v7597_v32, %v6773_v15  ;;  %v7649_v8 = vld [vmem:[%s8488_s2 + $0x7cc] sm:$0xf]  ;;  %v7365_v55 = vld [vmem:[%s8488_s2 + $0xad8] sm:$0xf0]  ;;  %v4837_v3 = vperm.slane %v10693_v51, 2 }
 0x4e6   : > { %5352 = vmatpush.bf16.msrb.mxu3 %v6840_v43  ;;  %v6520_v43 = vor.u32 %v7533_v10, %v6517_v58  ;;  %v5088_v20 = vpop.f32.mrf.mxu2  ;;  %v7713_v33 = vld [vmem:[%s8488_s2 + $0x9cc] sm:$0xf]  ;;  %v6984_v6 = vor.u32 %v7649_v8, %v6981_v41  ;;  %v6965_v31 = vld [vmem:[%s8488_s2 + $0x7b8] sm:$0xf0] }
 0x4e7   : > { %5314 = vmatpush.bf16.msrb.mxu0 %v6440_v1  ;;  %v6757_v1 = vld [vmem:[%s8488_s2 + $0x618] sm:$0xf0]  ;;  %v7745_v61 = vld [vmem:[%s8488_s2 + $0xacc] sm:$0xf]  ;;  %v7240_v39 = vor.u32 %v7713_v33, %v7237_v45 }
 0x4e8   : > { %5327 = vmatpush.bf16.msrb.mxu1 %v6568_v18  ;;  %5340 = vmatpush.bf16.msrb.mxu2 %v6696_v46  ;;  %v7653_v18 = vld [vmem:[%s8488_s2 + $0x7ec] sm:$0xf]  ;;  %v6997_v46 = vld [vmem:[%s8488_s2 + $0x7f8] sm:$0xf0]  ;;  %v5101_v63 = vpop.f32.mrf.mxu3 }
 0x4e9   : > { %v7093_v54 = vld [vmem:[%s8488_s2 + $0x8b8] sm:$0xf0]  ;;  %v7709_v22 = vld [vmem:[%s8488_s2 + $0x9ac] sm:$0xf] }
 0x4ea   : > { %5353 = vmatpush.bf16.msrb.mxu3 %v6824_v34  ;;  %v7125_v34 = vld [vmem:[%s8488_s2 + $0x8f8] sm:$0xf0]  ;;  %v7641_v32 = vld [vmem:[%s8488_s2 + $0x78c] sm:$0xf] }
 0x4eb   : > { %5315 = vmatpush.bf16.msrb.mxu0 %v6424_v4  ;;  %v6760_v4 = vor.u32 %v7593_v38, %v6757_v1  ;;  %v7221_v10 = vld [vmem:[%s8488_s2 + $0x9b8] sm:$0xf0]  ;;  %v7705_v28 = vld [vmem:[%s8488_s2 + $0x98c] sm:$0xf] }
 0x4ec   : > { %5328 = vmatpush.bf16.msrb.mxu1 %v6552_v30  ;;  %5341 = vmatpush.bf16.msrb.mxu2 %v6680_v35  ;;  %v7000_v30 = vor.u32 %v7653_v18, %v6997_v46  ;;  %v7128_v35 = vor.u32 %v7685_v24, %v7125_v34  ;;  %v7349_v58 = vld [vmem:[%s8488_s2 + $0xab8] sm:$0xf0]  ;;  %v7224_v26 = vor.u32 %v7709_v22, %v7221_v10  ;;  %v7637_v38 = vld [vmem:[%s8488_s2 + $0x76c] sm:$0xf] }
 0x4ed   : > { %v6949_v15 = vld [vmem:[%s8488_s2 + $0x798] sm:$0xf0]  ;;  %v7669_v20 = vld [vmem:[%s8488_s2 + $0x86c] sm:$0xf] }
 0x4ee   : > { %5354 = vmatpush.bf16.msrb.mxu3 %v6808_v25  ;;  %v7681_v25 = vld [vmem:[%s8488_s2 + $0x8cc] sm:$0xf]  ;;  %v7205_v52 = vld [vmem:[%s8488_s2 + $0x998] sm:$0xf0]  ;;  %v6952_v50 = vor.u32 %v7641_v32, %v6949_v15 }
 0x4ef   : > { %5316 = vmatpush.bf16.msrb.mxu0 %v6408_v14  ;;  %v7112_v23 = vor.u32 %v7681_v25, %v7109_v13  ;;  %v7645_v14 = vld [vmem:[%s8488_s2 + $0x7ac] sm:$0xf]  ;;  %v7333_v42 = vld [vmem:[%s8488_s2 + $0xa98] sm:$0xf0]  ;;  %v7208_v53 = vor.u32 %v7705_v28, %v7205_v52 }
 0x4f0   : > { %5329 = vmatpush.bf16.msrb.mxu1 %v6536_v40  ;;  %5342 = vmatpush.bf16.msrb.mxu2 %v6664_v19  ;;  %v7677_v40 = vld [vmem:[%s8488_s2 + $0x8ac] sm:$0xf]  ;;  %v7368_v19 = vor.u32 %v7745_v61, %v7365_v55  ;;  %v6968_v2 = vor.u32 %v7645_v14, %v6965_v31  ;;  %v6933_v1 = vld [vmem:[%s8488_s2 + $0x778] sm:$0xf0] }
 0x4f1   : > { %v7061_v24 = vld [vmem:[%s8488_s2 + $0x878] sm:$0xf0]  ;;  %v7701_v63 = vld [vmem:[%s8488_s2 + $0x96c] sm:$0xf] }
 0x4f2   : > { %5355 = vmatpush.bf16.msrb.mxu3 %v6792_v16  ;;  %v7741_v16 = vld [vmem:[%s8488_s2 + $0xaac] sm:$0xf]  ;;  %v7317_v34 = vld [vmem:[%s8488_s2 + $0xa78] sm:$0xf0]  ;;  %v7064_v12 = vor.u32 %v7669_v20, %v7061_v24 }
 0x4f3   : > { %5317 = vmatpush.bf16.msrb.mxu0 %v6392_v57  ;;  %v7077_v57 = vld [vmem:[%s8488_s2 + $0x898] sm:$0xf0]  ;;  %v7697_v25 = vld [vmem:[%s8488_s2 + $0x94c] sm:$0xf] }
 0x4f4   : > { %5330 = vmatpush.bf16.msrb.mxu1 %v6520_v43  ;;  %5343 = vmatpush.bf16.msrb.mxu2 %v6648_v7  ;;  %v7737_v7 = vld [vmem:[%s8488_s2 + $0xa8c] sm:$0xf]  ;;  %v7045_v41 = vld [vmem:[%s8488_s2 + $0x858] sm:$0xf0] }
 0x4f5   : > { %v7336_v18 = vor.u32 %v7737_v7, %v7333_v42  ;;  %v7729_v33 = vld [vmem:[%s8488_s2 + $0xa4c] sm:$0xf]  ;;  %v7301_v45 = vld [vmem:[%s8488_s2 + $0xa58] sm:$0xf0] }
 0x4f6   : > { %5356 = vmatpush.bf16.msrb.mxu3 %v6776_v5  ;;  %v7629_v31 = vld [vmem:[%s8488_s2 + $0x72c] sm:$0xf]  ;;  %v7304_v22 = vor.u32 %v7729_v33, %v7301_v45  ;;  %v7029_v10 = vld [vmem:[%s8488_s2 + $0x838] sm:$0xf0] }
 0x4f7   : > { %5318 = vmatpush.bf16.msrb.mxu0 %v6376_v47  ;;  %v5112_v43 = vpop.f32.mrf.mxu0  ;;  %v7733_v47 = vld [vmem:[%s8488_s2 + $0xa6c] sm:$0xf]  ;;  %v7013_v52 = vld [vmem:[%s8488_s2 + $0x818] sm:$0xf0] }
 0x4f8   : > { %5331 = vmatpush.bf16.msrb.mxu1 %v6504_v59  ;;  %5344 = vmatpush.bf16.msrb.mxu2 %v6632_v49  ;;  %v5125_v62 = vpop.f32.mrf.mxu1  ;;  %v6936_v49 = vor.u32 %v7637_v38, %v6933_v1  ;;  %v7320_v8 = vor.u32 %v7733_v47, %v7317_v34  ;;  %v7141_v7 = vld [vmem:[%s8488_s2 + $0x918] sm:$0xf0] }
 0x4fa   : > { %5357 = vmatpush.bf16.msrb.mxu3 %v6760_v4  ;;  %5319 = vmatmul.bf16.vlgmr.msrb.gmra.mxu0 %v10024_v11  ;;  %v7673_v11 = vld [vmem:[%s8488_s2 + $0x88c] sm:$0xf] }
 0x4fb   : > { %5363 = vmatpush.bf16.msra.mxu0 %v7000_v30  ;;  %5345 = vmatmul.bf16.vlgmr.msrb.gmra.mxu2 %v10088_v60  ;;  %v7096_v60 = vor.u32 %v7677_v40, %v7093_v54  ;;  %v7080_v5 = vor.u32 %v7673_v11, %v7077_v57  ;;  %v7633_v4 = vld [vmem:[%s8488_s2 + $0x74c] sm:$0xf]  ;;  %v6917_v30 = vld [vmem:[%s8488_s2 + $0x758] sm:$0xf0] }
 0x4fc   : > { %5376 = vmatpush.bf16.msra.mxu1 %v7128_v35  ;;  %5389 = vmatpush.bf16.msra.mxu2 %v7256_v17  ;;  %v7665_v35 = vld [vmem:[%s8488_s2 + $0x84c] sm:$0xf]  ;;  %v6901_v40 = vld [vmem:[%s8488_s2 + $0x738] sm:$0xf0] }
 0x4fd   : > { %5358 = vmatmul.bf16.vlgmr.msrb.gmra.mxu3 %v10080_v27  ;;  %5332 = vmatmul.bf16.vlgmr.msrb.gmra.mxu1 %v10084_v0  ;;  %v7352_v27 = vor.u32 %v7741_v16, %v7349_v58  ;;  %v5113_v0 = vadd.f32 %v5112_v43, %v10628_v48  ;;  %v7189_v48 = vld [vmem:[%s8488_s2 + $0x978] sm:$0xf0]  ;;  %v7693_v16 = vld [vmem:[%s8488_s2 + $0x92c] sm:$0xf] }
 0x4fe   : > { %5402 = vmatpush.bf16.msra.mxu3 %v7384_v36  ;;  %v7192_v56 = vor.u32 %v7701_v63, %v7189_v48  ;;  %v7173_v36 = vld [vmem:[%s8488_s2 + $0x958] sm:$0xf0]  ;;  %v7625_v11 = vld [vmem:[%s8488_s2 + $0x70c] sm:$0xf] }
 0x4ff   : > { %5364 = vmatpush.bf16.msra.mxu0 %v6984_v6  ;;  %v5126_v46 = vadd.f32 %v5125_v62, %v5113_v0  ;;  %v5114_v6 = vpop.f32.mrf.mxu0  ;;  %v7176_v14 = vor.u32 %v7697_v25, %v7173_v36  ;;  %v7157_v58 = vld [vmem:[%s8488_s2 + $0x938] sm:$0xf0]  ;;  %v7657_v57 = vld [vmem:[%s8488_s2 + $0x80c] sm:$0xf] }
 0x500   : > { %5377 = vmatpush.bf16.msra.mxu1 %v7112_v23  ;;  %5390 = vmatpush.bf16.msra.mxu2 %v7240_v39  ;;  %v5138_v13 = vpop.f32.mrf.mxu2  ;;  %v5151_v55 = vpop.f32.mrf.mxu3  ;;  %v7048_v39 = vor.u32 %v7665_v35, %v7045_v41  ;;  %v7160_v15 = vor.u32 %v7693_v16, %v7157_v58  ;;  %v7689_v43 = vld [vmem:[%s8488_s2 + $0x90c] sm:$0xf] }
 0x501   : > { %v5419_v59 = vrot.slane %v5126_v46, 7  ;;  %v5139_v61 = vadd.f32 %v5138_v13, %v4837_v3  ;;  %v5127_v23 = vpop.f32.mrf.mxu1  ;;  %v7721_v0 = vld [vmem:[%s8488_s2 + $0xa0c] sm:$0xf]  ;;  %v7144_v38 = vor.u32 %v7689_v43, %v7141_v7 }
 0x502   : > { %5403 = vmatpush.bf16.msra.mxu3 %v7368_v19  ;;  %v7661_v19 = vld [vmem:[%s8488_s2 + $0x82c] sm:$0xf] }
 0x503   : > { %5365 = vmatpush.bf16.msra.mxu0 %v6968_v2  ;;  %v10701_v17 = vsel %vm5422_vm0, %v10481_v44, %v5419_v59  ;;  %v6920_v44 = vor.u32 %v7633_v4, %v6917_v30  ;;  %v5152_v54 = vadd.f32 %v5151_v55, %v5139_v61  ;;  %v7725_v2 = vld [vmem:[%s8488_s2 + $0xa2c] sm:$0xf]  ;;  %v7032_v32 = vor.u32 %v7661_v19, %v7029_v10 }
 0x504   : > { %5378 = vmatpush.bf16.msra.mxu1 %v7096_v60  ;;  %5391 = vmatpush.bf16.msra.mxu2 %v7224_v26  ;;  %v7285_v60 = vld [vmem:[%s8488_s2 + $0xa38] sm:$0xf0]  ;;  %v6904_v26 = vor.u32 %v7629_v31, %v6901_v40 }
 0x505   : > { %v7288_v28 = vor.u32 %v7725_v2, %v7285_v60 }
 0x506   : > { %5404 = vmatpush.bf16.msra.mxu3 %v7352_v27  ;;  %v6885_v27 = vld [vmem:[%s8488_s2 + $0x718] sm:$0xf0] }
 0x507   : > { %5366 = vmatpush.bf16.msra.mxu0 %v6952_v50  ;;  %v7269_v50 = vld [vmem:[%s8488_s2 + $0xa18] sm:$0xf0]  ;;  %s5433_s2 = sshra.s32 %s8362_s17, 2 }
 0x508   : > { %5379 = vmatpush.bf16.msra.mxu1 %v7080_v5  ;;  %5392 = vmatpush.bf16.msra.mxu2 %v7208_v53  ;;  %v5140_v42 = vpop.f32.mrf.mxu2  ;;  %v5153_v62 = vpop.f32.mrf.mxu3  ;;  %v6888_v5 = vor.u32 %v7625_v11, %v6885_v27  ;;  %v7016_v53 = vor.u32 %v7657_v57, %v7013_v52  ;;  %v7272_v1 = vor.u32 %v7721_v0, %v7269_v50  ;;  %s7752_s11 = sshll.u32 %s5433_s2, 4  ;;  %v5429_v50 = vlaneseq }
 0x509   : > { %s5439_s21 = sadd.s32 %s7752_s11, %s5436_s3 }
 0x50a   : > { %5405 = vmatpush.bf16.msra.mxu3 %v7336_v18  ;;  %vm10731_vm5 = vcmp.lt.s32.totalorder %v5429_v50, 512  ;;  %s5440_s19 = scalar_lea.vmem [#allocation3], %s5439_s21 }
 0x50b   : > { %5367 = vmatpush.bf16.msra.mxu0 %v6936_v49 }
 0x50c   : > { %5380 = vmatpush.bf16.msra.mxu1 %v7064_v12  ;;  %5393 = vmatpush.bf16.msra.mxu2 %v7192_v56 }
 0x50e   : > { %5406 = vmatpush.bf16.msra.mxu3 %v7320_v8 }
 0x50f   : > { %5368 = vmatpush.bf16.msra.mxu0 %v6920_v44 }
 0x510   : > { %5381 = vmatpush.bf16.msra.mxu1 %v7048_v39  ;;  %5394 = vmatpush.bf16.msra.mxu2 %v7176_v14  ;;  %v4838_v14 = vperm.slane %v10693_v51, 3 }
 0x512   : > { %5407 = vmatpush.bf16.msra.mxu3 %v7304_v22 }
 0x513   : > { %5369 = vmatpush.bf16.msra.mxu0 %v6904_v26 }
 0x514   : > { %5382 = vmatpush.bf16.msra.mxu1 %v7032_v32  ;;  %5395 = vmatpush.bf16.msra.mxu2 %v7160_v15 }
 0x516   : > { %5408 = vmatpush.bf16.msra.mxu3 %v7288_v28 }
 0x517   : > { %5370 = vmatpush.bf16.msra.mxu0 %v6888_v5  ;;  %v5164_v20 = vpop.f32.mrf.mxu0 }
 0x518   : > { %5383 = vmatpush.bf16.msra.mxu1 %v7016_v53  ;;  %5396 = vmatpush.bf16.msra.mxu2 %v7144_v38  ;;  %v5165_v18 = vadd.f32 %v5164_v20, %v5152_v54 }
 0x51a   : > { %5409 = vmatpush.bf16.msra.mxu3 %v7272_v1  ;;  %5371 = vmatmul.bf16.vlgmr.msra.gmra.mxu0 %v10086_v29  ;;  %v5177_v46 = vpop.f32.mrf.mxu1 }
 0x51b   : > { %5384 = vmatmul.bf16.vlgmr.msra.gmra.mxu1 %v10153_v21  ;;  %5397 = vmatmul.bf16.vlgmr.msra.gmra.mxu2 %v10160_v9  ;;  %v5178_v24 = vadd.f32 %v5177_v46, %v5165_v18 }
 0x51d   : > { %5410 = vmatmul.bf16.vlgmr.msra.gmra.mxu3 %v10158_v37 }
 0x51e   : > { %v5190_v63 = vpop.f32.mrf.mxu2 }
 0x51f   : > { %v5191_v48 = vadd.f32 %v5190_v63, %v5178_v24  ;;  %v5166_v3 = vpop.f32.mrf.mxu0 }
 0x520   : > { %v5203_v47 = vpop.f32.mrf.mxu3 }
 0x521   : > { %v5204_v34 = vadd.f32 %v5203_v47, %v5191_v48 }
 0x522   : > { %v5179_v59 = vpop.f32.mrf.mxu1 }
 0x526   : > { %v5192_v49 = vpop.f32.mrf.mxu2 }
 0x528   : > { %v5205_v12 = vpop.f32.mrf.mxu3 }
 0x537   : > { %v5216_v56 = vpop.f32.mrf.mxu0 }
 0x538   : > { %v5217_v29 = vadd.f32 %v5216_v56, %v5204_v34 }
 0x53a   : > { %v5229_v4 = vpop.f32.mrf.mxu1 }
 0x53b   : > { %v5230_v21 = vadd.f32 %v5229_v4, %v5217_v29 }
 0x53e   : > { %v5242_v30 = vpop.f32.mrf.mxu2 }
 0x53f   : > { %v5243_v9 = vadd.f32 %v5242_v30, %v5230_v21  ;;  %v5218_v37 = vpop.f32.mrf.mxu0 }
 0x540   : > { %v5255_v35 = vpop.f32.mrf.mxu3 }
 0x541   : > { %v5256_v41 = vadd.f32 %v5255_v35, %v5243_v9 }
 0x542   : > { %v5231_v8 = vpop.f32.mrf.mxu1 }
 0x546   : > { %v5244_v25 = vpop.f32.mrf.mxu2 }
 0x548   : > { %v5257_v36 = vpop.f32.mrf.mxu3 }
 0x557   : > { %v5268_v13 = vpop.f32.mrf.mxu0 }
 0x558   : > { %v5269_v33 = vadd.f32 %v5268_v13, %v5256_v41 }
 0x55a   : > { %v5281_v45 = vpop.f32.mrf.mxu1  ;;  %v5420_v53 = vrot.slane %v5269_v33, 6 }
 0x55b   : > { %v5282_v19 = vadd.f32 %v5281_v45, %v4838_v14 }
 0x55e   : > { %v5294_v61 = vpop.f32.mrf.mxu2 }
 0x55f   : > { %v5270_v6 = vpop.f32.mrf.mxu0  ;;  %v5295_v10 = vadd.f32 %v5294_v61, %v5282_v19 }
 0x560   : > { %v5307_v55 = vpop.f32.mrf.mxu3 }
 0x561   : > { %v5308_v2 = vadd.f32 %v5307_v55, %v5295_v10 }
 0x562   : > { %v5283_v44 = vpop.f32.mrf.mxu1 }
 0x566   : > { %v5296_v23 = vpop.f32.mrf.mxu2 }
 0x568   : > { %v5309_v39 = vpop.f32.mrf.mxu3 }
 0x577   : > { %v5320_v31 = vpop.f32.mrf.mxu0 }
 0x578   : > { %v5321_v32 = vadd.f32 %v5320_v31, %v5308_v2 }
 0x57a   : > { %v5333_v40 = vpop.f32.mrf.mxu1 }
 0x57b   : > { %v5334_v15 = vadd.f32 %v5333_v40, %v5321_v32 }
 0x57e   : > { %v5346_v54 = vpop.f32.mrf.mxu2 }
 0x57f   : > { %v5322_v16 = vpop.f32.mrf.mxu0  ;;  %v5347_v11 = vadd.f32 %v5346_v54, %v5334_v15 }
 0x580   : > { %v5359_v22 = vpop.f32.mrf.mxu3 }
 0x581   : > { %v5360_v27 = vadd.f32 %v5359_v22, %v5347_v11 }
 0x582   : > { %v5335_v58 = vpop.f32.mrf.mxu1 }
 0x586   : > { %v5348_v60 = vpop.f32.mrf.mxu2 }
 0x588   : > { %v5361_v26 = vpop.f32.mrf.mxu3 }
 0x597   : > { %v5372_v57 = vpop.f32.mrf.mxu0 }
 0x598   : > { %v5385_v28 = vpop.f32.mrf.mxu1  ;;  %v5373_v51 = vadd.f32 %v5372_v57, %v5360_v27 }
 0x59a   : > { %v5386_v52 = vadd.f32 %v5385_v28, %v5373_v51 }
 0x59e   : > { %v5398_v43 = vpop.f32.mrf.mxu2 }
 0x59f   : > { %v5399_v7 = vadd.f32 %v5398_v43, %v5386_v52  ;;  %v5374_v0 = vpop.f32.mrf.mxu0 }
 0x5a0   : > { %v5411_v42 = vpop.f32.mrf.mxu3  ;;  %v5387_v62 = vpop.f32.mrf.mxu1 }
 0x5a1   : > { %v5412_v5 = vadd.f32 %v5411_v42, %v5399_v7 }
 0x5a3   : > { %v5421_v38 = vrot.slane %v5412_v5, 5 }
 0x5a4   : > { %5445 = sbr.rel (%p7387_p5) target bundleno = 1646 (0x66e), region = 84 }
 0x5a5   : > { %v5425_v20 = vsel %vm5424_vm3, %v5420_v53, %v5421_v38 }
 0x5a6   : > { %v5427_v18 = vsel %vm5426_vm4, %v10701_v17, %v5425_v20  ;;  %v5400_v46 = vpop.f32.mrf.mxu2 }
 0x5a7   : > { %5441 = vst.msk [vmem:[%s5440_s19] ss:$4 sm:$0xf] %vm10731_vm5, %v5427_v18 }
 0x5a8   : > { %v5413_v24 = vpop.f32.mrf.mxu3 }
 0x5a9   : > { %v5566_v63 = vld [vmem:[%s10979_s6 + $0x178] sm:$0xff]  ;;  %v5565_v17 = vld [vmem:[%s10979_s6 + $0x170] sm:$0xff]  ;;  %v5564_v59 = vld [vmem:[%s10979_s6 + $0x168] sm:$0xff]  ;;  %vm5673_vm0 = vcmask 90112  }
 0x5aa   : > { %v5534_v48 = vld [vmem:[%s10979_s6 + $0x78] sm:$0xff]  ;;  %5633 = vmatpush.msra.mxu2 %v5566_v63  ;;  %v5533_v34 = vld [vmem:[%s10979_s6 + $0x70] sm:$0xff]  ;;  %v5532_v12 = vld [vmem:[%s10979_s6 + $0x68] sm:$0xff] }
 0x5ab   : > { %5593 = vmatpush.msra.mxu0 %v5534_v48  ;;  %v5582_v47 = vld [vmem:[%s10979_s6 + $0x1f8] sm:$0xff]  ;;  %v5581_v49 = vld [vmem:[%s10979_s6 + $0x1f0] sm:$0xff]  ;;  %v5580_v29 = vld [vmem:[%s10979_s6 + $0x1e8] sm:$0xff] }
 0x5ac   : > { %v5550_v3 = vld [vmem:[%s10979_s6 + $0xf8] sm:$0xff]  ;;  %5653 = vmatpush.msra.mxu3 %v5582_v47  ;;  %5634 = vmatpush.msra.mxu2 %v5565_v17  ;;  %v5549_v56 = vld [vmem:[%s10979_s6 + $0xf0] sm:$0xff]  ;;  %v5563_v4 = vld [vmem:[%s10979_s6 + $0x160] sm:$0xff] }
 0x5ad   : > { %5613 = vmatpush.msra.mxu1 %v5550_v3  ;;  %5594 = vmatpush.msra.mxu0 %v5533_v34  ;;  %v5531_v21 = vld [vmem:[%s10979_s6 + $0x60] sm:$0xff]  ;;  %v5548_v30 = vld [vmem:[%s10979_s6 + $0xe8] sm:$0xff]  ;;  %v5562_v37 = vld [vmem:[%s10979_s6 + $0x158] sm:$0xff] }
 0x5ae   : > { %5654 = vmatpush.msra.mxu3 %v5581_v49  ;;  %5635 = vmatpush.msra.mxu2 %v5564_v59  ;;  %v5579_v9 = vld [vmem:[%s10979_s6 + $0x1e0] sm:$0xff]  ;;  %v5530_v8 = vld [vmem:[%s10979_s6 + $0x58] sm:$0xff]  ;;  %v5561_v36 = vld [vmem:[%s10979_s6 + $0x150] sm:$0xff] }
 0x5af   : > { %5614 = vmatpush.msra.mxu1 %v5549_v56  ;;  %5595 = vmatpush.msra.mxu0 %v5532_v12  ;;  %v5547_v35 = vld [vmem:[%s10979_s6 + $0xe0] sm:$0xff]  ;;  %v5578_v41 = vld [vmem:[%s10979_s6 + $0x1d8] sm:$0xff]  ;;  %v5529_v13 = vld [vmem:[%s10979_s6 + $0x50] sm:$0xff] }
 0x5b0   : > { %5655 = vmatpush.msra.mxu3 %v5580_v29  ;;  %5636 = vmatpush.msra.mxu2 %v5563_v4  ;;  %v5546_v25 = vld [vmem:[%s10979_s6 + $0xd8] sm:$0xff]  ;;  %v5577_v33 = vld [vmem:[%s10979_s6 + $0x1d0] sm:$0xff]  ;;  %v5560_v61 = vld [vmem:[%s10979_s6 + $0x148] sm:$0xff] }
 0x5b1   : > { %5615 = vmatpush.msra.mxu1 %v5548_v30  ;;  %5596 = vmatpush.msra.mxu0 %v5531_v21  ;;  %v5545_v45 = vld [vmem:[%s10979_s6 + $0xd0] sm:$0xff]  ;;  %v5528_v55 = vld [vmem:[%s10979_s6 + $0x48] sm:$0xff]  ;;  %v5559_v23 = vld [vmem:[%s10979_s6 + $0x140] sm:$0xff] }
 0x5b2   : > { %5656 = vmatpush.msra.mxu3 %v5579_v9  ;;  %5637 = vmatpush.msra.mxu2 %v5562_v37  ;;  %v5576_v6 = vld [vmem:[%s10979_s6 + $0x1c8] sm:$0xff]  ;;  %v5527_v39 = vld [vmem:[%s10979_s6 + $0x40] sm:$0xff]  ;;  %v5558_v40 = vld [vmem:[%s10979_s6 + $0x138] sm:$0xff] }
 0x5b3   : > { %5616 = vmatpush.msra.mxu1 %v5547_v35  ;;  %5597 = vmatpush.msra.mxu0 %v5530_v8  ;;  %v5544_v44 = vld [vmem:[%s10979_s6 + $0xc8] sm:$0xff]  ;;  %v5575_v14 = vld [vmem:[%s10979_s6 + $0x1c0] sm:$0xff]  ;;  %v5526_v19 = vld [vmem:[%s10979_s6 + $0x38] sm:$0xff] }
 0x5b4   : > { %5657 = vmatpush.msra.mxu3 %v5578_v41  ;;  %5638 = vmatpush.msra.mxu2 %v5561_v36  ;;  %v5543_v31 = vld [vmem:[%s10979_s6 + $0xc0] sm:$0xff]  ;;  %v5574_v54 = vld [vmem:[%s10979_s6 + $0x1b8] sm:$0xff]  ;;  %v5557_v10 = vld [vmem:[%s10979_s6 + $0x130] sm:$0xff] }
 0x5b5   : > { %5617 = vmatpush.msra.mxu1 %v5546_v25  ;;  %5598 = vmatpush.msra.mxu0 %v5529_v13  ;;  %v5542_v22 = vld [vmem:[%s10979_s6 + $0xb8] sm:$0xff]  ;;  %v5525_v16 = vld [vmem:[%s10979_s6 + $0x30] sm:$0xff]  ;;  %v5556_v60 = vld [vmem:[%s10979_s6 + $0x128] sm:$0xff] }
 0x5b6   : > { %5658 = vmatpush.msra.mxu3 %v5577_v33  ;;  %5639 = vmatpush.msra.mxu2 %v5560_v61  ;;  %v5573_v58 = vld [vmem:[%s10979_s6 + $0x1b0] sm:$0xff]  ;;  %v5524_v26 = vld [vmem:[%s10979_s6 + $0x28] sm:$0xff]  ;;  %v5555_v32 = vld [vmem:[%s10979_s6 + $0x120] sm:$0xff] }
 0x5b7   : > { %5618 = vmatpush.msra.mxu1 %v5545_v45  ;;  %5599 = vmatpush.msra.mxu0 %v5528_v55  ;;  %v5541_v2 = vld [vmem:[%s10979_s6 + $0xb0] sm:$0xff]  ;;  %v5572_v15 = vld [vmem:[%s10979_s6 + $0x1a8] sm:$0xff]  ;;  %v5523_v11 = vld [vmem:[%s10979_s6 + $0x20] sm:$0xff] }
 0x5b8   : > { %5659 = vmatpush.msra.mxu3 %v5576_v6  ;;  %5640 = vmatpush.msra.mxu2 %v5559_v23  ;;  %v5540_v27 = vld [vmem:[%s10979_s6 + $0xa8] sm:$0xff]  ;;  %v5446_v57 = vld [vmem:[#allocation3] ss:$4 sm:$0xf]  ;;  %v5571_v51 = vld [vmem:[%s10979_s6 + $0x1a0] sm:$0xff] }
 0x5b9   : > { %5619 = vmatpush.msra.mxu1 %v5544_v44  ;;  %5600 = vmatpush.msra.mxu0 %v5527_v39  ;;  %v5467_v28 = vld [vmem:[#allocation3 + $0x1] ss:$4 sm:$0xf]  ;;  %v7388_v43 = vmul.f32 -1.442695, %v5446_v57  ;;  %v5552_v24 = vld [vmem:[%s10979_s6 + $0x108] sm:$0xff] }
 0x5ba   : > { %5660 = vmatpush.msra.mxu3 %v5575_v14  ;;  %5641 = vmatpush.msra.mxu2 %v5558_v40  ;;  %v5539_v52 = vld [vmem:[%s10979_s6 + $0xa0] sm:$0xff]  ;;  %v7389_v7 = vmul.f32 -1.442695, %v5467_v28  ;;  %v5554_v42 = vld [vmem:[%s10979_s6 + $0x118] sm:$0xff]  ;;  %v5553_v38 = vld [vmem:[%s10979_s6 + $0x110] sm:$0xff] }
 0x5bb   : > { %5620 = vmatpush.msra.mxu1 %v5543_v31  ;;  %5601 = vmatpush.msra.mxu0 %v5526_v19  ;;  %v5522_v0 = vld [vmem:[%s10979_s6 + $0x18] sm:$0xff]  ;;  %7913 = vpow2.f32 %v7388_v43  ;;  %v5521_v20 = vld [vmem:[%s10979_s6 + $0x10] sm:$0xff]  ;;  %v5520_v63 = vld [vmem:[%s10979_s6 + $0x8] sm:$0xff] }
 0x5bc   : > { %5661 = vmatpush.msra.mxu3 %v5574_v54  ;;  %5642 = vmatpush.msra.mxu2 %v5557_v10  ;;  %v5491_v50 = vld [vmem:[#allocation3 + $0x3] ss:$4 sm:$0xf]  ;;  %7915 = vpow2.f32 %v7389_v7  ;;  %v5568_v48 = vld [vmem:[%s10979_s6 + $0x188] sm:$0xff] }
 0x5bd   : > { %5621 = vmatpush.msra.mxu1 %v5542_v22  ;;  %5602 = vmatpush.msra.mxu0 %v5525_v16  ;;  %v5570_v62 = vld [vmem:[%s10979_s6 + $0x198] sm:$0xff]  ;;  %v7390_v53 = vmul.f32 -1.442695, %v5491_v50  ;;  %v5569_v18 = vld [vmem:[%s10979_s6 + $0x190] sm:$0xff]  ;;  %v5551_v17 = vld [vmem:[%s10979_s6 + $0x100] sm:$0xff] }
 0x5be   : > { %5662 = vmatpush.msra.mxu3 %v5573_v58  ;;  %5643 = vmatpush.msra.mxu2 %v5556_v60  ;;  %v5538_v5 = vld [vmem:[%s10979_s6 + $0x98] sm:$0xff]  ;;  %v5537_v46 = vld [vmem:[%s10979_s6 + $0x90] sm:$0xff]  ;;  %v5519_v12 = vld [vmem:[%s10979_s6] sm:$0xff] }
 0x5bf   : > { %5622 = vmatpush.msra.mxu1 %v5541_v2  ;;  %5603 = vmatpush.msra.mxu0 %v5524_v26  ;;  %7917 = vpow2.f32 %v7390_v53  ;;  %v5536_v56 = vld [vmem:[%s10979_s6 + $0x88] sm:$0xff]  ;;  %v5567_v29 = vld [vmem:[%s10979_s6 + $0x180] sm:$0xff] }
 0x5c0   : > { %5663 = vmatpush.msra.mxu3 %v5572_v15  ;;  %5644 = vmatpush.msra.mxu2 %v5555_v32  ;;  %v5535_v21 = vld [vmem:[%s10979_s6 + $0x80] sm:$0xff] }
 0x5c1   : > { %5623 = vmatpush.msra.mxu1 %v5540_v27  ;;  %5604 = vmatpush.msra.mxu0 %v5523_v11  ;;  %v7914_v47 = vpop.eup %7913  ;;  %v5488_v30 = vld [vmem:[#allocation3 + $0x2] ss:$4 sm:$0xf]  ;;  %v5511_v10 = vld [vmem:[#allocation9] sm:$0xf] }
 0x5c2   : > { %5664 = vmatpush.msra.mxu3 %v5571_v51  ;;  %5645 = vmatpush.msra.mxu2 %v5554_v42  ;;  %v7916_v34 = vpop.eup %7915  ;;  %v5450_v3 = vadd.f32 1.0, %v7914_v47 }
 0x5c3   : > { %5624 = vmatpush.msra.mxu1 %v5539_v52  ;;  %5605 = vmatpush.msra.mxu0 %v5522_v0  ;;  %v5471_v59 = vadd.f32 1.0, %v7916_v34 }
 0x5c4   : > { %5665 = vmatpush.msra.mxu3 %v5570_v62  ;;  %5646 = vmatpush.msra.mxu2 %v5553_v38  ;;  %7919 = vrcp.f32 %v5450_v3  ;;  %vm5456_vm7 = vweird.f32 %v5450_v3  ;;  %v5462_v8 = vand.u32 2147483648, %v5450_v3  ;;  %v5460_v36 = vand.u32 2147483647, %v5450_v3  ;;  %v5583_v62 = vld [vmem:[#allocation13] sm:$0x1] }
 0x5c5   : > { %5625 = vmatpush.msra.mxu1 %v5538_v5  ;;  %5606 = vmatpush.msra.mxu0 %v5521_v20  ;;  %v7918_v49 = vpop.eup %7917  ;;  %7921 = vrcp.f32 %v5471_v59  ;;  %v5483_v13 = vand.u32 2147483648, %v5471_v59  ;;  %vm5477_vm10 = vweird.f32 %v5471_v59  ;;  %v5481_v61 = vand.u32 2147483647, %v5471_v59 }
 0x5c6   : > { %5666 = vmatpush.msra.mxu3 %v5569_v18  ;;  %5647 = vmatpush.msra.mxu2 %v5552_v24  ;;  %v5495_v4 = vadd.f32 1.0, %v7918_v49  ;;  %v5463_v44 = vor.u32 1.1754944e-38, %v5462_v8  ;;  %vm5461_vm9 = vcmp.eq.f32.partialorder %v5460_v36, 8.507059e+37 }
 0x5c7   : > { %5626 = vmatpush.msra.mxu1 %v5537_v46  ;;  %5607 = vmatpush.msra.mxu0 %v5520_v63  ;;  %v5484_v14 = vor.u32 1.1754944e-38, %v5483_v13  ;;  %vm5482_vm2 = vcmp.eq.f32.partialorder %v5481_v61, 8.507059e+37 }
 0x5c8   : > { %5667 = vmatpush.msra.mxu3 %v5568_v48  ;;  %5648 = vmatpush.msra.mxu2 %v5551_v17  ;;  %7923 = vrcp.f32 %v5495_v4  ;;  %vm5501_vm6 = vweird.f32 %v5495_v4  ;;  %v5507_v26 = vand.u32 2147483648, %v5495_v4  ;;  %v5505_v11 = vand.u32 2147483647, %v5495_v4 }
 0x5c9   : > { %5608 = vmatpush.msra.mxu0 %v5519_v12  ;;  %5627 = vmatpush.msra.mxu1 %v5536_v56  ;;  %7925 = vtanh.f32 %v5488_v30 }
 0x5ca   : > { %5668 = vmatpush.msra.mxu3 %v5567_v29  ;;  %v7920_v9 = vpop.eup %7919  ;;  %v5508_v57 = vor.u32 1.1754944e-38, %v5507_v26  ;;  %vm5506_vm15 = vcmp.eq.f32.partialorder %v5505_v11, 8.507059e+37 }
 0x5cb   : > { %5628 = vmatpush.msra.mxu1 %v5535_v21  ;;  %v7922_v35 = vpop.eup %7921  ;;  %v5452_v37 = vmul.f32 %v7920_v9, %v5450_v3  ;;  %vm5457_vm8 = vweird.f32 %v7920_v9 }
 0x5cc   : > { %v5473_v41 = vmul.f32 %v7922_v35, %v5471_v59  ;;  %vm5478_vm11 = vweird.f32 %v7922_v35  ;;  %vm5458_vm12 = vmor %vm5456_vm7, %vm5457_vm8 }
 0x5cd   : > { %v5453_v25 = vsub.f32 1.0, %v5452_v37  ;;  %vm5479_vm1 = vmor %vm5477_vm10, %vm5478_vm11 }
 0x5ce   : > { %v7924_v33 = vpop.eup %7923  ;;  %v5474_v45 = vsub.f32 1.0, %v5473_v41 }
 0x5cf   : > { %v5454_v55 = vmul.f32 %v7920_v9, %v5453_v25  ;;  %v5497_v6 = vmul.f32 %v7924_v33, %v5495_v4  ;;  %v7926_v40 = vpop.eup %7925  ;;  %vm5502_vm13 = vweird.f32 %v7924_v33 }
 0x5d0   : > { %v5475_v23 = vmul.f32 %v7922_v35, %v5474_v45  ;;  %vm5503_vm14 = vmor %vm5501_vm6, %vm5502_vm13 }
 0x5d1   : > { %v5455_v39 = vadd.f32 %v7920_v9, %v5454_v55  ;;  %v5498_v31 = vsub.f32 1.0, %v5497_v6 }
 0x5d2   : > { %v5476_v19 = vadd.f32 %v7922_v35, %v5475_v23 }
 0x5d3   : > { %v5459_v54 = vsel %vm5458_vm12, %v7920_v9, %v5455_v39  ;;  %v5499_v22 = vmul.f32 %v7924_v33, %v5498_v31 }
 0x5d4   : > { %v5464_v16 = vsel %vm5461_vm9, %v5463_v44, %v5459_v54  ;;  %v5480_v58 = vsel %vm5479_vm1, %v7922_v35, %v5476_v19 }
 0x5d5   : > { %v5485_v2 = vsel %vm5482_vm2, %v5484_v14, %v5480_v58  ;;  %v5513_v60 = vmul.f32 %v7926_v40, %v5464_v16  ;;  %v5500_v15 = vadd.f32 %v7924_v33, %v5499_v22 }
 0x5d6   : > { %v5512_v32 = vmul.f32 %v5511_v10, %v5485_v2 }
 0x5d7   : > { %v5504_v28 = vsel %vm5503_vm14, %v7924_v33, %v5500_v15 }
 0x5d8   : > { %v5514_v27 = vadd.f32 %v5513_v60, %v5512_v32  ;;  %v5509_v51 = vsel %vm5506_vm15, %v5508_v57, %v5504_v28 }
 0x5da   : > { %7927 = vtanh.f32 %v5514_v27  ;;  %5517 = vst.msk [vmem:[#allocation17] sm:$0xf] %vm10731_vm5, %v5514_v27 }
 0x5e0   : > { %v7928_v52 = vpop.eup %7927 }
 0x5e1   : > { %v5516_v43 = vmul.f32 %v7928_v52, %v5509_v51 }
 0x5e3   : > { %5518 = vst.msk [vmem:[#allocation15] sm:$0xf] %vm10731_vm5, %v5516_v43  ;;  %v5587_v7 = vperm.slane %v5516_v43, 2  ;;  %v5585_v42 = vperm.slane %v5516_v43, 0  ;;  %v5588_v0 = vperm.slane %v5516_v43, 3  ;;  %v5586_v50 = vperm.slane %v5516_v43, 1 }
 0x5e5   : > { %5649 = vmatmul.f32.vlgmr.msra.gmra.mxu2 %v5587_v7  ;;  %5609 = vmatmul.f32.vlgmr.msra.gmra.mxu0 %v5585_v42 }
 0x5e6   : > { %5669 = vmatmul.f32.vlgmr.msra.gmra.mxu3 %v5588_v0  ;;  %5629 = vmatmul.f32.vlgmr.msra.gmra.mxu1 %v5586_v50 }
 0x662   : > { %v5610_v5 = vpop.f32.mrf.mxu0 }
 0x663   : > { %v5611_v53 = vadd.f32 %v5610_v5, %v5583_v62  ;;  %v5630_v38 = vpop.f32.mrf.mxu1 }
 0x665   : > { %v5631_v20 = vadd.f32 %v5630_v38, %v5611_v53 }
 0x668   : > { %v5650_v18 = vpop.f32.mrf.mxu2 }
 0x669   : > { %v5651_v46 = vadd.f32 %v5650_v18, %v5631_v20  ;;  %v5670_v24 = vpop.f32.mrf.mxu3 }
 0x66b   : > { %v5671_v63 = vadd.f32 %v5670_v24, %v5651_v46 }
 0x66d   : > { %5674 = vst.msk [vmem:[#allocation14] sm:$0x1] %vm5673_vm0, %v5671_v63 }
 0x66e PF: > { %p7816_p8 = scmp.eq.s32.totalorder %s8362_s17, 3  ;;  %s8285_s3 = smov [#allocation15]  }
 0x66f   : > { %s5693_s11 = sshll.u32 %s8285_s3, 4  ;;  %s5695_s23 = sshll.u32 %s10982_s9, 4  ;;  %s5694_s11 = int_to_ptr.vmem [resolvable:$true] %s5693_s11  ;;  %s5696_s23 = int_to_ptr.hbm [resolvable:$true] %s5695_s23 }
 0x670   : > { %7778 = dma.vmem_to_hbm [thread:$0]  (%p7816_p8), %s5694_s11, 64, %s5696_s23, [#allocation16]  }
 0x671   : > { %s11041_s12 = sld [smem:[#allocation42_spill]]  ;;  %s8286_s13 = smov [#allocation14]  }
 0x672   : > { %s5681_s25 = sshll.u32 %s8286_s13, 4  ;;  %s8287_s30 = smov [#allocation17]   ;;  %s5682_s25 = int_to_ptr.vmem [resolvable:$true] %s5681_s25 }
 0x673   : > { %s5705_s28 = sshll.u32 %s8287_s30, 4  ;;  %s11042_s29 = sld [smem:[#allocation43_spill]]  ;;  %s5706_s28 = int_to_ptr.vmem [resolvable:$true] %s5705_s28 }
 0x677   : > { %s5683_s20 = sshll.u32 %s11041_s12, 4  ;;  %s5684_s20 = int_to_ptr.hbm [resolvable:$true] %s5683_s20 }
 0x678   : > { %7776 = dma.vmem_to_hbm [thread:$0]  (%p7816_p8), %s5682_s25, 16, %s5684_s20, [#allocation6]  }
 0x679   : > { %s5707_s27 = sshll.u32 %s11042_s29, 4  ;;  %s5708_s27 = int_to_ptr.hbm [resolvable:$true] %s5707_s27 }
 0x67a   : > { %7780 = dma.vmem_to_hbm [thread:$0]  (%p7816_p8), %s5706_s28, 64, %s5708_s27, [#allocation16]  }
 0x67b   : > { %8215 = dma.done.wait (%p7816_p8), [#allocation6], 16  }
 0x67c   : > { %8217 = vsyncadd (%p7816_p8), [#allocation6], 4294967280 }
 0x67d   : > { %8219 = dma.done.wait (%p7816_p8), [#allocation16], 128  }
 0x67e   : > { %8221 = vsyncadd (%p7816_p8), [#allocation16], 4294967168 }
 0x67f PF: > { %s11043_s16 = sld [smem:[#allocation25_spill]]  ;;  %s11045_s13 = smov %s8228_s14 }
 0x680   : > { %s11044_s8 = sld [smem:[#allocation26_spill]]  ;;  %s11046_s14 = smov %s8232_s15 }
 0x685   : > { %p23_p9 = scmp.ge.s32.totalorder %s11043_s16, 6  }
 0x686   : > { %s11047_s15 = smov %s11044_s8 }
 0x687   :  { %25 = sbr.rel (!%p23_p9) target bundleno = 12 (0xc), region = 160 }
 0x68c   :  { %5731 = vsyncpa [#allocation5], 1 }
 0x68d   :  { %5733 = vsyncpa [#allocation5 + $0x1], 1 }
 0x68e   :  { %5734 = vsyncpa [#allocation10], 1 }
 0x68f   :  { %5735 = vsyncpa [#allocation6], 1 }
 0x690   :  { %5737 = vsyncpa [#allocation6 + $0x1], 1 }
 0x691   :  { %5738 = vsyncpa [#allocation16], 1 }
 0x692   :  { %5739 = vsyncpa [#allocation7], 1 }
 0x693   :  { %5741 = vsyncpa [#allocation7 + $0x1], 1 }

</bundles_post_ra>
